<compile_context>
chip_gen: v7x
topology: tpu7x:2x2x1
jax: 0.10.0
libtpu: 0.0.40
codegen_flags: <defaults>
</compile_context>

<pallas_src>
import functools

import numpy as np
import jax
import jax.numpy as jnp
from jax.experimental import pallas as pl
from jax.experimental.pallas import tpu as pltpu

VIS_EMB_DIM = 256
HIDDEN_DIM = 128
POSSIBLE_ACTIONS = 41


# --------------------------- conv patch matmul kernel -----------------------

def _matmul_bias_relu_kernel(x_ref, w_ref, b_ref, o_ref):
    y = jnp.dot(x_ref[...], w_ref[...], preferred_element_type=jnp.float32)
    o_ref[...] = jnp.maximum(y + b_ref[...], 0.0)


def _pick_tile_m(m, max_rows=4096):
    """Largest row tile that divides m, is a multiple of 8, and keeps >=2 grid
    blocks so the 'parallel' axis can be sharded across v7x's two TensorCores."""
    if m % 8 != 0:
        return m
    cap = min(max_rows, m)
    if m // cap < 2 and m > 8:
        cap = max(8, m // 2)
    for tm in range(cap - cap % 8, 7, -8):
        if m % tm == 0:
            return tm
    return m


def matmul_bias_relu(x, w, b):
    """relu(x @ w + b); x:(M,K), w:(K,N), b:(N,) -> (M,N) float32."""
    m, k = x.shape
    n = w.shape[1]
    tm = _pick_tile_m(m)
    return pl.pallas_call(
        _matmul_bias_relu_kernel,
        out_shape=jax.ShapeDtypeStruct((m, n), jnp.float32),
        grid_spec=pltpu.PrefetchScalarGridSpec(
            num_scalar_prefetch=0,
            grid=(m // tm,),
            in_specs=[
                pl.BlockSpec((tm, k), lambda i: (i, 0)),
                pl.BlockSpec((k, n), lambda i: (0, 0)),
                pl.BlockSpec((1, n), lambda i: (0, 0)),
            ],
            out_specs=pl.BlockSpec((tm, n), lambda i: (i, 0)),
        ),
        compiler_params=pltpu.CompilerParams(dimension_semantics=("parallel",)),
    )(x.astype(jnp.float32), w.astype(jnp.float32),
      b.reshape(1, n).astype(jnp.float32))


def conv_patch_nhwc(x_nhwc, w_oihw, b, k):
    """Conv2d with stride == kernel on an NHWC input via a non-overlapping patch
    matmul. Output stays in NHWC layout (no NCHW bounce between layers)."""
    n, h, w, c = x_nhwc.shape
    oh, ow = h // k, w // k
    oc = w_oihw.shape[0]
    patches = (x_nhwc.reshape(n, oh, k, ow, k, c)
               .transpose(0, 1, 3, 2, 4, 5)
               .reshape(n * oh * ow, k * k * c))            # cols: (kh, kw, c)
    w_mat = jnp.transpose(w_oihw, (0, 2, 3, 1)).reshape(oc, k * k * c).T
    y = matmul_bias_relu(patches, w_mat, b)
    return y.reshape(n, oh, ow, oc)


# ------------------------------ fused tail kernel ---------------------------
# fc+tanh, action-embedding gather+tanh, rtg Linear(1,E)+tanh, 3-way add,
# hoisted x@W_ih, LSTM recurrence (h@W_hh per step), lane-dense action head.

def _tail_kernel(feat_ref, fcw_ref, fcb_ref, act_ref, emb_ref, rtg_ref,
                 rtgw_ref, rtgb_ref, wih_ref, whh_ref, b_ref, head_ref,
                 logits_ref, hn_ref, cn_ref, *, batch, n_steps, hidden,
                 n_actions):
    tb = batch * n_steps
    hd = hidden

    # visual embedding: tanh(flattened conv features @ permuted fc weight + b)
    frame_emb = jnp.tanh(
        jnp.dot(feat_ref[...], fcw_ref[...], preferred_element_type=jnp.float32)
        + fcb_ref[...])

    # action embedding: exact gather via one-hot matmul against the VMEM table
    onehot = (jax.lax.broadcasted_iota(jnp.int32, (tb, n_actions), 1)
              == act_ref[...]).astype(jnp.float32)
    a_emb = jnp.tanh(jnp.dot(onehot, emb_ref[...],
                             preferred_element_type=jnp.float32))

    # reward-to-go embedding: Linear(1, E) == broadcast outer product
    r_emb = jnp.tanh(rtg_ref[...] * rtgw_ref[...] + rtgb_ref[...])

    lstm_in = frame_emb + a_emb + r_emb                      # (T*B, E), time-major

    # hoisted input projection: one (T*B, E) @ (E, 4H) matmul for all timesteps
    gates_x = (jnp.dot(lstm_in, wih_ref[...], preferred_element_type=jnp.float32)
               + b_ref[...])                                 # (T*B, 4H)

    whh = whh_ref[...]
    h = jnp.zeros((batch, hd), jnp.float32)
    c = jnp.zeros((batch, hd), jnp.float32)
    hs = []
    for t in range(n_steps):                                 # static unroll (T small)
        g = gates_x[t * batch:(t + 1) * batch, :] + jnp.dot(
            h, whh, preferred_element_type=jnp.float32)      # PyTorch order i,f,g,o
        i_g = jax.nn.sigmoid(g[:, 0:hd])
        f_g = jax.nn.sigmoid(g[:, hd:2 * hd])
        g_g = jnp.tanh(g[:, 2 * hd:3 * hd])
        o_g = jax.nn.sigmoid(g[:, 3 * hd:4 * hd])
        c = f_g * c + i_g * g_g
        h = o_g * jnp.tanh(c)
        hs.append(h)

    h_all = jnp.concatenate(hs, axis=0)                      # (T*B, H) time-major
    # lane-dense action head (weight pre-padded to a multiple of 128 columns)
    logits_ref[...] = jnp.dot(h_all, head_ref[...],
                              preferred_element_type=jnp.float32)
    hn_ref[...] = h
    cn_ref[...] = c


def fused_tail(feat_tm, fc_w_t, fc_b, acts_tm, emb_table, rtg_tm, rtg_w_row,
               rtg_b, w_ih_t, w_hh_t, b_sum, head_pad, *, batch, n_steps,
               hidden, n_actions):
    tb = batch * n_steps
    e = fc_w_t.shape[1]
    n_head = head_pad.shape[1]

    def full2(shape):
        return pl.BlockSpec(shape, lambda i: (0, 0))

    kernel = functools.partial(_tail_kernel, batch=batch, n_steps=n_steps,
                               hidden=hidden, n_actions=n_actions)
    return pl.pallas_call(
        kernel,
        out_shape=(
            jax.ShapeDtypeStruct((tb, n_head), jnp.float32),
            jax.ShapeDtypeStruct((batch, hidden), jnp.float32),
            jax.ShapeDtypeStruct((batch, hidden), jnp.float32),
        ),
        grid_spec=pltpu.PrefetchScalarGridSpec(
            num_scalar_prefetch=0,
            grid=(1,),
            in_specs=[
                full2(feat_tm.shape),          # (T*B, 1024) conv features
                full2(fc_w_t.shape),           # (1024, E)  (columns pre-permuted)
                full2((1, e)),                 # fc bias
                full2((tb, 1)),                # previous actions (int32)
                full2(emb_table.shape),        # (A, E)
                full2((tb, 1)),                # reward-to-go
                full2((1, e)),                 # rtg weight row
                full2((1, e)),                 # rtg bias
                full2(w_ih_t.shape),           # (E, 4H)
                full2(w_hh_t.shape),           # (H, 4H)
                full2((1, 4 * hidden)),        # b_ih + b_hh
                full2(head_pad.shape),         # (H, 128) lane-dense head
            ],
            out_specs=(
                full2((tb, n_head)),
                full2((batch, hidden)),
                full2((batch, hidden)),
            ),
        ),
        compiler_params=pltpu.CompilerParams(dimension_semantics=("arbitrary",)),
    )(feat_tm.astype(jnp.float32), fc_w_t.astype(jnp.float32),
      fc_b.reshape(1, e).astype(jnp.float32),
      acts_tm.reshape(tb, 1).astype(jnp.int32),
      emb_table.astype(jnp.float32),
      rtg_tm.reshape(tb, 1).astype(jnp.float32),
      rtg_w_row.reshape(1, e).astype(jnp.float32),
      rtg_b.reshape(1, e).astype(jnp.float32),
      w_ih_t.astype(jnp.float32), w_hh_t.astype(jnp.float32),
      b_sum.reshape(1, 4 * hidden).astype(jnp.float32),
      head_pad.astype(jnp.float32))


# ------------------------------- model glue ---------------------------------

def init_params(key, vis_emb_dim=VIS_EMB_DIM, hidden_dim=HIDDEN_DIM,
                possible_actions=POSSIBLE_ACTIONS):
    ks = jax.random.split(key, 16)

    def nrm(k, shape, scale):
        return jax.random.normal(k, shape, jnp.float32) * scale

    return {
        "conv1_w": nrm(ks[0], (16, 3, 3, 3), 0.10),
        "conv1_b": nrm(ks[1], (16,), 0.05),
        "conv2_w": nrm(ks[2], (32, 16, 3, 3), 0.05),
        "conv2_b": nrm(ks[3], (32,), 0.05),
        "conv3_w": nrm(ks[4], (64, 32, 4, 4), 0.05),
        "conv3_b": nrm(ks[5], (64,), 0.05),
        "fc_w": nrm(ks[6], (vis_emb_dim, 1024), 0.03),
        "fc_b": nrm(ks[7], (vis_emb_dim,), 0.03),
        "emb_table": nrm(ks[8], (possible_actions, vis_emb_dim), 0.10),
        "rtg_w": nrm(ks[9], (vis_emb_dim, 1), 0.10),
        "rtg_b": nrm(ks[10], (vis_emb_dim,), 0.05),
        "w_ih": nrm(ks[11], (4 * hidden_dim, vis_emb_dim), 0.05),
        "w_hh": nrm(ks[12], (4 * hidden_dim, hidden_dim), 0.05),
        "b_ih": nrm(ks[13], (4 * hidden_dim,), 0.05),
        "b_hh": nrm(ks[14], (4 * hidden_dim,), 0.05),
        "head_w": nrm(ks[15], (possible_actions, hidden_dim), 0.05),
    }


def forward(params, frames, reward_to_go, previous_actions):
    """Inference path of RNNModel.forward (target_actions=None, prev_hidden=None)."""
    # TODO(synk): cross-entropy loss / accuracy branch (target_actions != None)
    # and user-supplied prev_hidden are not implemented (zero initial state).
    b, f, h, w, c = frames.shape
    e, hd, a = VIS_EMB_DIM, HIDDEN_DIM, POSSIBLE_ACTIONS

    # CNN tower: frames are already '(b f) h w c' after one reshape -> stay NHWC.
    x = frames.reshape(b * f, h, w, c)
    x = conv_patch_nhwc(x, params["conv1_w"], params["conv1_b"], 3)
    x = conv_patch_nhwc(x, params["conv2_w"], params["conv2_b"], 3)
    x = conv_patch_nhwc(x, params["conv3_w"], params["conv3_b"], 4)
    _, oh3, ow3, oc3 = x.shape
    conv_feat = x.reshape(b * f, oh3 * ow3 * oc3)            # flatten in (h, w, c)

    # Fold PyTorch's NCHW Flatten ordering into a column permutation of fc_w
    # (constant index array, tiny gather; avoids an NCHW activation transpose).
    hh, ww, cc = np.meshgrid(np.arange(oh3), np.arange(ow3), np.arange(oc3),
                             indexing="ij")
    perm = jnp.asarray((cc * (oh3 * ow3) + hh * ow3 + ww).reshape(-1))
    fc_w_t = params["fc_w"][:, perm].T                       # (1024, E)

    def to_time_major(arr):                                  # (B, F, ...) -> (F*B, ...)
        return jnp.swapaxes(arr, 0, 1).reshape((f * b,) + arr.shape[2:])

    feat_tm = to_time_major(conv_feat.reshape(b, f, -1))
    acts_tm = to_time_major(previous_actions)
    rtg_tm = to_time_major(reward_to_go)

    n_head = -(-a // 128) * 128                              # lane-dense head width
    head_pad = jnp.pad(params["head_w"].T.astype(jnp.float32),
                       ((0, 0), (0, n_head - a)))            # (H, 128)

    logits_pad, hn, cn = fused_tail(
        feat_tm, fc_w_t, params["fc_b"], acts_tm, params["emb_table"],
        rtg_tm, params["rtg_w"].T, params["rtg_b"],
        params["w_ih"].T, params["w_hh"].T, params["b_ih"] + params["b_hh"],
        head_pad, batch=b, n_steps=f, hidden=hd, n_actions=a)

    logits = jnp.transpose(logits_pad.reshape(f, b, n_head)[:, :, :a], (1, 0, 2))
    return logits, (hn[None], cn[None])


# --------------------------- pure-JAX reference -----------------------------

def reference_forward(params, frames, rtg, prev_actions):
    B, F_, H, W, C = frames.shape
    Hd = HIDDEN_DIM
    x = jnp.transpose(frames.reshape(B * F_, H, W, C), (0, 3, 1, 2))

    def conv(x, w, b, s):
        y = jax.lax.conv_general_dilated(
            x, w, (s, s), "VALID", dimension_numbers=("NCHW", "OIHW", "NCHW"))
        return jax.nn.relu(y + b[None, :, None, None])

    x = conv(x, params["conv1_w"], params["conv1_b"], 3)
    x = conv(x, params["conv2_w"], params["conv2_b"], 3)
    x = conv(x, params["conv3_w"], params["conv3_b"], 4)
    x = x.reshape(B * F_, -1)
    fe = jnp.tanh(x @ params["fc_w"].T + params["fc_b"]).reshape(B, F_, -1)
    ae = jnp.tanh(params["emb_table"][prev_actions])
    re = jnp.tanh(rtg[..., None] @ params["rtg_w"].T + params["rtg_b"])
    z = fe + ae + re

    def step(carry, x_t):
        h, c = carry
        g = (x_t @ params["w_ih"].T + h @ params["w_hh"].T
             + params["b_ih"] + params["b_hh"])
        i = jax.nn.sigmoid(g[:, :Hd]); f = jax.nn.sigmoid(g[:, Hd:2 * Hd])
        gg = jnp.tanh(g[:, 2 * Hd:3 * Hd]); o = jax.nn.sigmoid(g[:, 3 * Hd:])
        c = f * c + i * gg
        h = o * jnp.tanh(c)
        return (h, c), h

    h0 = jnp.zeros((B, Hd), jnp.float32)
    (hn, cn), outs = jax.lax.scan(step, (h0, h0), jnp.transpose(z, (1, 0, 2)))
    lstm_out = jnp.transpose(outs, (1, 0, 2))
    logits = lstm_out @ params["head_w"].T
    return logits, (hn[None], cn[None])


# ----------------------------------- main -----------------------------------

if __name__ == "__main__":
    key = jax.random.PRNGKey(0)
    k1, k2, k3, kp = jax.random.split(key, 4)

    B, F_, IMG = 2, 4, 144          # 144x144 -> 48 -> 16 -> 4 => Flatten == 1024
    params = init_params(kp)
    frames = jax.random.uniform(k1, (B, F_, IMG, IMG, 3), jnp.float32)
    reward_to_go = jax.random.normal(k2, (B, F_), jnp.float32)
    previous_actions = jax.random.randint(k3, (B, F_), 0, POSSIBLE_ACTIONS)

    fwd = jax.jit(forward)
    logits, (hn, cn) = fwd(params, frames, reward_to_go, previous_actions)
    jax.block_until_ready((logits, hn, cn))

    ref_logits, (rhn, rcn) = reference_forward(params, frames, reward_to_go,
                                               previous_actions)
    np.testing.assert_allclose(np.asarray(logits), np.asarray(ref_logits),
                               atol=2e-3, rtol=2e-3)
    np.testing.assert_allclose(np.asarray(hn), np.asarray(rhn), atol=2e-3, rtol=2e-3)
    np.testing.assert_allclose(np.asarray(cn), np.asarray(rcn), atol=2e-3, rtol=2e-3)

    print("KERNEL_OK")
</pallas_src>

<mosaic_0001>
module attributes {stable_mosaic.version = 11 : i64} {
  func.func @_matmul_bias_relu_kernel(%arg0: i32, %arg1: memref<3072x27xf32, #tpu.memory_space<vmem>>, %arg2: memref<27x16xf32, #tpu.memory_space<vmem>>, %arg3: memref<1x16xf32, #tpu.memory_space<vmem>>, %arg4: memref<3072x16xf32, #tpu.memory_space<vmem>>) attributes {dimension_semantics = [#tpu.dimension_semantics<parallel>], iteration_bounds = array<i64: 6>, scalar_prefetch = 0 : i64, scratch_operands = 0 : i64, tpu.core_type = #tpu.core_type<tc>, window_params = [{transform_indices = @transform_0, window_bounds = array<i64: 3072, 27>}, {pipeline_mode = #tpu.pipeline_mode<synchronous>, transform_indices = @transform_1, window_bounds = array<i64: 27, 16>}, {pipeline_mode = #tpu.pipeline_mode<synchronous>, transform_indices = @transform_2, window_bounds = array<i64: 1, 16>}, {transform_indices = @transform_3, window_bounds = array<i64: 3072, 16>}]} {
    %c0 = arith.constant 0 : index
    %c0_0 = arith.constant 0 : index
    %0 = vector.load %arg1[%c0, %c0_0] : memref<3072x27xf32, #tpu.memory_space<vmem>>, vector<3072x27xf32>
    %c0_1 = arith.constant 0 : index
    %c0_2 = arith.constant 0 : index
    %1 = vector.load %arg2[%c0_1, %c0_2] : memref<27x16xf32, #tpu.memory_space<vmem>>, vector<27x16xf32>
    %cst = arith.constant dense<0.000000e+00> : vector<3072x16xf32>
    %2 = tpu.matmul %0, %1, %cst {dimension_numbers = #tpu.dot_dimension_numbers<[1], [0], [0], [1], [0, 0, 1, 1], [], []>} : vector<3072x27xf32>, vector<27x16xf32>, vector<3072x16xf32> -> vector<3072x16xf32>
    %c0_3 = arith.constant 0 : index
    %c0_4 = arith.constant 0 : index
    %3 = vector.load %arg3[%c0_3, %c0_4] : memref<1x16xf32, #tpu.memory_space<vmem>>, vector<1x16xf32>
    %4 = vector.broadcast %3 : vector<1x16xf32> to vector<3072x16xf32>
    %5 = arith.addf %2, %4 : vector<3072x16xf32>
    %cst_5 = arith.constant 0.000000e+00 : f32
    %6 = vector.broadcast %cst_5 : f32 to vector<3072x16xf32>
    %7 = arith.maximumf %5, %6 : vector<3072x16xf32>
    %c0_6 = arith.constant 0 : index
    %c0_7 = arith.constant 0 : index
    %8 = vector.load %arg4[%c0_6, %c0_7] : memref<3072x16xf32, #tpu.memory_space<vmem>>, vector<3072x16xf32>
    tpu.vector_store %arg4[%c0_6, %c0_7], %7 {strides = array<i32>} : memref<3072x16xf32, #tpu.memory_space<vmem>>, vector<3072x16xf32>,
    return
  }
  func.func @transform_0(%arg0: i32) -> (i32, i32) {
    %c0_i32 = arith.constant 0 : i32
    %c0_i32_0 = arith.constant 0 : i32
    return %arg0, %c0_i32 : i32, i32
  }
  func.func @transform_1(%arg0: i32) -> (i32, i32) {
    %c0_i32 = arith.constant 0 : i32
    %c0_i32_0 = arith.constant 0 : i32
    %c0_i32_1 = arith.constant 0 : i32
    return %c0_i32, %c0_i32_0 : i32, i32
  }
  func.func @transform_2(%arg0: i32) -> (i32, i32) {
    %c0_i32 = arith.constant 0 : i32
    %c0_i32_0 = arith.constant 0 : i32
    %c0_i32_1 = arith.constant 0 : i32
    return %c0_i32, %c0_i32_0 : i32, i32
  }
  func.func @transform_3(%arg0: i32) -> (i32, i32) {
    %c0_i32 = arith.constant 0 : i32
    %c0_i32_0 = arith.constant 0 : i32
    return %arg0, %c0_i32 : i32, i32
  }
}

module attributes {stable_mosaic.version = 11 : i64} {
  func.func @_matmul_bias_relu_kernel(%arg0: i32, %arg1: memref<1024x144xf32, #tpu.memory_space<vmem>>, %arg2: memref<144x32xf32, #tpu.memory_space<vmem>>, %arg3: memref<1x32xf32, #tpu.memory_space<vmem>>, %arg4: memref<1024x32xf32, #tpu.memory_space<vmem>>) attributes {dimension_semantics = [#tpu.dimension_semantics<parallel>], iteration_bounds = array<i64: 2>, scalar_prefetch = 0 : i64, scratch_operands = 0 : i64, tpu.core_type = #tpu.core_type<tc>, window_params = [{transform_indices = @transform_0, window_bounds = array<i64: 1024, 144>}, {pipeline_mode = #tpu.pipeline_mode<synchronous>, transform_indices = @transform_1, window_bounds = array<i64: 144, 32>}, {pipeline_mode = #tpu.pipeline_mode<synchronous>, transform_indices = @transform_2, window_bounds = array<i64: 1, 32>}, {transform_indices = @transform_3, window_bounds = array<i64: 1024, 32>}]} {
    %c0 = arith.constant 0 : index
    %c0_0 = arith.constant 0 : index
    %0 = vector.load %arg1[%c0, %c0_0] : memref<1024x144xf32, #tpu.memory_space<vmem>>, vector<1024x144xf32>
    %c0_1 = arith.constant 0 : index
    %c0_2 = arith.constant 0 : index
    %1 = vector.load %arg2[%c0_1, %c0_2] : memref<144x32xf32, #tpu.memory_space<vmem>>, vector<144x32xf32>
    %cst = arith.constant dense<0.000000e+00> : vector<1024x32xf32>
    %2 = tpu.matmul %0, %1, %cst {dimension_numbers = #tpu.dot_dimension_numbers<[1], [0], [0], [1], [0, 0, 1, 1], [], []>} : vector<1024x144xf32>, vector<144x32xf32>, vector<1024x32xf32> -> vector<1024x32xf32>
    %c0_3 = arith.constant 0 : index
    %c0_4 = arith.constant 0 : index
    %3 = vector.load %arg3[%c0_3, %c0_4] : memref<1x32xf32, #tpu.memory_space<vmem>>, vector<1x32xf32>
    %4 = vector.broadcast %3 : vector<1x32xf32> to vector<1024x32xf32>
    %5 = arith.addf %2, %4 : vector<1024x32xf32>
    %cst_5 = arith.constant 0.000000e+00 : f32
    %6 = vector.broadcast %cst_5 : f32 to vector<1024x32xf32>
    %7 = arith.maximumf %5, %6 : vector<1024x32xf32>
    %c0_6 = arith.constant 0 : index
    %c0_7 = arith.constant 0 : index
    %8 = vector.load %arg4[%c0_6, %c0_7] : memref<1024x32xf32, #tpu.memory_space<vmem>>, vector<1024x32xf32>
    tpu.vector_store %arg4[%c0_6, %c0_7], %7 {strides = array<i32>} : memref<1024x32xf32, #tpu.memory_space<vmem>>, vector<1024x32xf32>,
    return
  }
  func.func @transform_0(%arg0: i32) -> (i32, i32) {
    %c0_i32 = arith.constant 0 : i32
    %c0_i32_0 = arith.constant 0 : i32
    return %arg0, %c0_i32 : i32, i32
  }
  func.func @transform_1(%arg0: i32) -> (i32, i32) {
    %c0_i32 = arith.constant 0 : i32
    %c0_i32_0 = arith.constant 0 : i32
    %c0_i32_1 = arith.constant 0 : i32
    return %c0_i32, %c0_i32_0 : i32, i32
  }
  func.func @transform_2(%arg0: i32) -> (i32, i32) {
    %c0_i32 = arith.constant 0 : i32
    %c0_i32_0 = arith.constant 0 : i32
    %c0_i32_1 = arith.constant 0 : i32
    return %c0_i32, %c0_i32_0 : i32, i32
  }
  func.func @transform_3(%arg0: i32) -> (i32, i32) {
    %c0_i32 = arith.constant 0 : i32
    %c0_i32_0 = arith.constant 0 : i32
    return %arg0, %c0_i32 : i32, i32
  }
}

module attributes {stable_mosaic.version = 11 : i64} {
  func.func @_matmul_bias_relu_kernel(%arg0: i32, %arg1: memref<64x512xf32, #tpu.memory_space<vmem>>, %arg2: memref<512x64xf32, #tpu.memory_space<vmem>>, %arg3: memref<1x64xf32, #tpu.memory_space<vmem>>, %arg4: memref<64x64xf32, #tpu.memory_space<vmem>>) attributes {dimension_semantics = [#tpu.dimension_semantics<parallel>], iteration_bounds = array<i64: 2>, scalar_prefetch = 0 : i64, scratch_operands = 0 : i64, tpu.core_type = #tpu.core_type<tc>, window_params = [{transform_indices = @transform_0, window_bounds = array<i64: 64, 512>}, {pipeline_mode = #tpu.pipeline_mode<synchronous>, transform_indices = @transform_1, window_bounds = array<i64: 512, 64>}, {pipeline_mode = #tpu.pipeline_mode<synchronous>, transform_indices = @transform_2, window_bounds = array<i64: 1, 64>}, {transform_indices = @transform_3, window_bounds = array<i64: 64, 64>}]} {
    %c0 = arith.constant 0 : index
    %c0_0 = arith.constant 0 : index
    %0 = vector.load %arg1[%c0, %c0_0] : memref<64x512xf32, #tpu.memory_space<vmem>>, vector<64x512xf32>
    %c0_1 = arith.constant 0 : index
    %c0_2 = arith.constant 0 : index
    %1 = vector.load %arg2[%c0_1, %c0_2] : memref<512x64xf32, #tpu.memory_space<vmem>>, vector<512x64xf32>
    %cst = arith.constant dense<0.000000e+00> : vector<64x64xf32>
    %2 = tpu.matmul %0, %1, %cst {dimension_numbers = #tpu.dot_dimension_numbers<[1], [0], [0], [1], [0, 0, 1, 1], [], []>} : vector<64x512xf32>, vector<512x64xf32>, vector<64x64xf32> -> vector<64x64xf32>
    %c0_3 = arith.constant 0 : index
    %c0_4 = arith.constant 0 : index
    %3 = vector.load %arg3[%c0_3, %c0_4] : memref<1x64xf32, #tpu.memory_space<vmem>>, vector<1x64xf32>
    %4 = vector.broadcast %3 : vector<1x64xf32> to vector<64x64xf32>
    %5 = arith.addf %2, %4 : vector<64x64xf32>
    %cst_5 = arith.constant 0.000000e+00 : f32
    %6 = vector.broadcast %cst_5 : f32 to vector<64x64xf32>
    %7 = arith.maximumf %5, %6 : vector<64x64xf32>
    %c0_6 = arith.constant 0 : index
    %c0_7 = arith.constant 0 : index
    %8 = vector.load %arg4[%c0_6, %c0_7] : memref<64x64xf32, #tpu.memory_space<vmem>>, vector<64x64xf32>
    tpu.vector_store %arg4[%c0_6, %c0_7], %7 {strides = array<i32>} : memref<64x64xf32, #tpu.memory_space<vmem>>, vector<64x64xf32>,
    return
  }
  func.func @transform_0(%arg0: i32) -> (i32, i32) {
    %c0_i32 = arith.constant 0 : i32
    %c0_i32_0 = arith.constant 0 : i32
    return %arg0, %c0_i32 : i32, i32
  }
  func.func @transform_1(%arg0: i32) -> (i32, i32) {
    %c0_i32 = arith.constant 0 : i32
    %c0_i32_0 = arith.constant 0 : i32
    %c0_i32_1 = arith.constant 0 : i32
    return %c0_i32, %c0_i32_0 : i32, i32
  }
  func.func @transform_2(%arg0: i32) -> (i32, i32) {
    %c0_i32 = arith.constant 0 : i32
    %c0_i32_0 = arith.constant 0 : i32
    %c0_i32_1 = arith.constant 0 : i32
    return %c0_i32, %c0_i32_0 : i32, i32
  }
  func.func @transform_3(%arg0: i32) -> (i32, i32) {
    %c0_i32 = arith.constant 0 : i32
    %c0_i32_0 = arith.constant 0 : i32
    return %arg0, %c0_i32 : i32, i32
  }
}

module attributes {stable_mosaic.version = 11 : i64} {
  func.func @_tail_kernel(%arg0: i32, %arg1: memref<8x1024xf32, #tpu.memory_space<vmem>>, %arg2: memref<1024x256xf32, #tpu.memory_space<vmem>>, %arg3: memref<1x256xf32, #tpu.memory_space<vmem>>, %arg4: memref<8x1xi32, #tpu.memory_space<vmem>>, %arg5: memref<41x256xf32, #tpu.memory_space<vmem>>, %arg6: memref<8x1xf32, #tpu.memory_space<vmem>>, %arg7: memref<1x256xf32, #tpu.memory_space<vmem>>, %arg8: memref<1x256xf32, #tpu.memory_space<vmem>>, %arg9: memref<256x512xf32, #tpu.memory_space<vmem>>, %arg10: memref<128x512xf32, #tpu.memory_space<vmem>>, %arg11: memref<1x512xf32, #tpu.memory_space<vmem>>, %arg12: memref<128x128xf32, #tpu.memory_space<vmem>>, %arg13: memref<8x128xf32, #tpu.memory_space<vmem>>, %arg14: memref<2x128xf32, #tpu.memory_space<vmem>>, %arg15: memref<2x128xf32, #tpu.memory_space<vmem>>) attributes {dimension_semantics = [#tpu.dimension_semantics<arbitrary>], iteration_bounds = array<i64: 1>, scalar_prefetch = 0 : i64, scratch_operands = 0 : i64, tpu.core_type = #tpu.core_type<tc>, window_params = [{pipeline_mode = #tpu.pipeline_mode<synchronous>, transform_indices = @transform_0, window_bounds = array<i64: 8, 1024>}, {pipeline_mode = #tpu.pipeline_mode<synchronous>, transform_indices = @transform_1, window_bounds = array<i64: 1024, 256>}, {pipeline_mode = #tpu.pipeline_mode<synchronous>, transform_indices = @transform_2, window_bounds = array<i64: 1, 256>}, {pipeline_mode = #tpu.pipeline_mode<synchronous>, transform_indices = @transform_3, window_bounds = array<i64: 8, 1>}, {pipeline_mode = #tpu.pipeline_mode<synchronous>, transform_indices = @transform_4, window_bounds = array<i64: 41, 256>}, {pipeline_mode = #tpu.pipeline_mode<synchronous>, transform_indices = @transform_5, window_bounds = array<i64: 8, 1>}, {pipeline_mode = #tpu.pipeline_mode<synchronous>, transform_indices = @transform_6, window_bounds = array<i64: 1, 256>}, {pipeline_mode = #tpu.pipeline_mode<synchronous>, transform_indices = @transform_7, window_bounds = array<i64: 1, 256>}, {pipeline_mode = #tpu.pipeline_mode<synchronous>, transform_indices = @transform_8, window_bounds = array<i64: 256, 512>}, {pipeline_mode = #tpu.pipeline_mode<synchronous>, transform_indices = @transform_9, window_bounds = array<i64: 128, 512>}, {pipeline_mode = #tpu.pipeline_mode<synchronous>, transform_indices = @transform_10, window_bounds = array<i64: 1, 512>}, {pipeline_mode = #tpu.pipeline_mode<synchronous>, transform_indices = @transform_11, window_bounds = array<i64: 128, 128>}, {pipeline_mode = #tpu.pipeline_mode<synchronous>, transform_indices = @transform_12, window_bounds = array<i64: 8, 128>}, {pipeline_mode = #tpu.pipeline_mode<synchronous>, transform_indices = @transform_13, window_bounds = array<i64: 2, 128>}, {pipeline_mode = #tpu.pipeline_mode<synchronous>, transform_indices = @transform_14, window_bounds = array<i64: 2, 128>}]} {
    %c0 = arith.constant 0 : index
    %c0_0 = arith.constant 0 : index
    %0 = vector.load %arg1[%c0, %c0_0] : memref<8x1024xf32, #tpu.memory_space<vmem>>, vector<8x1024xf32>
    %c0_1 = arith.constant 0 : index
    %c0_2 = arith.constant 0 : index
    %1 = vector.load %arg2[%c0_1, %c0_2] : memref<1024x256xf32, #tpu.memory_space<vmem>>, vector<1024x256xf32>
    %cst = arith.constant dense<0.000000e+00> : vector<8x256xf32>
    %2 = tpu.matmul %0, %1, %cst {dimension_numbers = #tpu.dot_dimension_numbers<[1], [0], [0], [1], [0, 0, 1, 1], [], []>} : vector<8x1024xf32>, vector<1024x256xf32>, vector<8x256xf32> -> vector<8x256xf32>
    %c0_3 = arith.constant 0 : index
    %c0_4 = arith.constant 0 : index
    %3 = vector.load %arg3[%c0_3, %c0_4] : memref<1x256xf32, #tpu.memory_space<vmem>>, vector<1x256xf32>
    %4 = vector.broadcast %3 : vector<1x256xf32> to vector<8x256xf32>
    %5 = arith.addf %2, %4 : vector<8x256xf32>
    %6 = math.tanh %5 : vector<8x256xf32>
    %7 = tpu.iota {dimensions = array<i32: 1>} : vector<8x41xi32>
    %c0_5 = arith.constant 0 : index
    %c0_6 = arith.constant 0 : index
    %8 = vector.load %arg4[%c0_5, %c0_6] : memref<8x1xi32, #tpu.memory_space<vmem>>, vector<8x1xi32>
    %9 = vector.broadcast %8 : vector<8x1xi32> to vector<8x41xi32>
    %10 = arith.cmpi eq, %7, %9 : vector<8x41xi32>
    %11 = arith.extui %10 : vector<8x41xi1> to vector<8x41xi32>
    %12 = arith.sitofp %11 : vector<8x41xi32> to vector<8x41xf32>
    %c0_7 = arith.constant 0 : index
    %c0_8 = arith.constant 0 : index
    %13 = vector.load %arg5[%c0_7, %c0_8] : memref<41x256xf32, #tpu.memory_space<vmem>>, vector<41x256xf32>
    %cst_9 = arith.constant dense<0.000000e+00> : vector<8x256xf32>
    %14 = tpu.matmul %12, %13, %cst_9 {dimension_numbers = #tpu.dot_dimension_numbers<[1], [0], [0], [1], [0, 0, 1, 1], [], []>} : vector<8x41xf32>, vector<41x256xf32>, vector<8x256xf32> -> vector<8x256xf32>
    %15 = math.tanh %14 : vector<8x256xf32>
    %c0_10 = arith.constant 0 : index
    %c0_11 = arith.constant 0 : index
    %16 = vector.load %arg6[%c0_10, %c0_11] : memref<8x1xf32, #tpu.memory_space<vmem>>, vector<8x1xf32>
    %c0_12 = arith.constant 0 : index
    %c0_13 = arith.constant 0 : index
    %17 = vector.load %arg7[%c0_12, %c0_13] : memref<1x256xf32, #tpu.memory_space<vmem>>, vector<1x256xf32>
    %18 = vector.broadcast %16 : vector<8x1xf32> to vector<8x256xf32>
    %19 = vector.broadcast %17 : vector<1x256xf32> to vector<8x256xf32>
    %20 = arith.mulf %18, %19 : vector<8x256xf32>
    %c0_14 = arith.constant 0 : index
    %c0_15 = arith.constant 0 : index
    %21 = vector.load %arg8[%c0_14, %c0_15] : memref<1x256xf32, #tpu.memory_space<vmem>>, vector<1x256xf32>
    %22 = vector.broadcast %21 : vector<1x256xf32> to vector<8x256xf32>
    %23 = arith.addf %20, %22 : vector<8x256xf32>
    %24 = math.tanh %23 : vector<8x256xf32>
    %25 = arith.addf %6, %15 : vector<8x256xf32>
    %26 = arith.addf %25, %24 : vector<8x256xf32>
    %c0_16 = arith.constant 0 : index
    %c0_17 = arith.constant 0 : index
    %27 = vector.load %arg9[%c0_16, %c0_17] : memref<256x512xf32, #tpu.memory_space<vmem>>, vector<256x512xf32>
    %cst_18 = arith.constant dense<0.000000e+00> : vector<8x512xf32>
    %28 = tpu.matmul %26, %27, %cst_18 {dimension_numbers = #tpu.dot_dimension_numbers<[1], [0], [0], [1], [0, 0, 1, 1], [], []>} : vector<8x256xf32>, vector<256x512xf32>, vector<8x512xf32> -> vector<8x512xf32>
    %c0_19 = arith.constant 0 : index
    %c0_20 = arith.constant 0 : index
    %29 = vector.load %arg11[%c0_19, %c0_20] : memref<1x512xf32, #tpu.memory_space<vmem>>, vector<1x512xf32>
    %30 = vector.broadcast %29 : vector<1x512xf32> to vector<8x512xf32>
    %31 = arith.addf %28, %30 : vector<8x512xf32>
    %c0_21 = arith.constant 0 : index
    %c0_22 = arith.constant 0 : index
    %32 = vector.load %arg10[%c0_21, %c0_22] : memref<128x512xf32, #tpu.memory_space<vmem>>, vector<128x512xf32>
    %cst_23 = arith.constant 0.000000e+00 : f32
    %33 = vector.broadcast %cst_23 : f32 to vector<2x128xf32>
    %cst_24 = arith.constant 0.000000e+00 : f32
    %34 = vector.broadcast %cst_24 : f32 to vector<2x128xf32>
    %35 = vector.extract_strided_slice %31 {offsets = [0, 0], sizes = [2, 512], strides = [1, 1]} : vector<8x512xf32> to vector<2x512xf32>
    %cst_25 = arith.constant dense<0.000000e+00> : vector<2x512xf32>
    %36 = tpu.matmul %33, %32, %cst_25 {dimension_numbers = #tpu.dot_dimension_numbers<[1], [0], [0], [1], [0, 0, 1, 1], [], []>} : vector<2x128xf32>, vector<128x512xf32>, vector<2x512xf32> -> vector<2x512xf32>
    %37 = arith.addf %35, %36 : vector<2x512xf32>
    %38 = vector.extract_strided_slice %37 {offsets = [0, 0], sizes = [2, 128], strides = [1, 1]} : vector<2x512xf32> to vector<2x128xf32>
    %39 = arith.negf %38 : vector<2x128xf32>
    %40 = math.exp %39 : vector<2x128xf32>
    %cst_26 = arith.constant 1.000000e+00 : f32
    %41 = vector.broadcast %cst_26 : f32 to vector<2x128xf32>
    %42 = arith.addf %41, %40 : vector<2x128xf32>
    %43 = arith.divf %41, %42 : vector<2x128xf32>
    %44 = vector.extract_strided_slice %37 {offsets = [0, 128], sizes = [2, 128], strides = [1, 1]} : vector<2x512xf32> to vector<2x128xf32>
    %45 = arith.negf %44 : vector<2x128xf32>
    %46 = math.exp %45 : vector<2x128xf32>
    %cst_27 = arith.constant 1.000000e+00 : f32
    %47 = vector.broadcast %cst_27 : f32 to vector<2x128xf32>
    %48 = arith.addf %47, %46 : vector<2x128xf32>
    %49 = arith.divf %47, %48 : vector<2x128xf32>
    %50 = vector.extract_strided_slice %37 {offsets = [0, 256], sizes = [2, 128], strides = [1, 1]} : vector<2x512xf32> to vector<2x128xf32>
    %51 = math.tanh %50 : vector<2x128xf32>
    %52 = vector.extract_strided_slice %37 {offsets = [0, 384], sizes = [2, 128], strides = [1, 1]} : vector<2x512xf32> to vector<2x128xf32>
    %53 = arith.negf %52 : vector<2x128xf32>
    %54 = math.exp %53 : vector<2x128xf32>
    %cst_28 = arith.constant 1.000000e+00 : f32
    %55 = vector.broadcast %cst_28 : f32 to vector<2x128xf32>
    %56 = arith.addf %55, %54 : vector<2x128xf32>
    %57 = arith.divf %55, %56 : vector<2x128xf32>
    %58 = arith.mulf %49, %34 : vector<2x128xf32>
    %59 = arith.mulf %43, %51 : vector<2x128xf32>
    %60 = arith.addf %58, %59 : vector<2x128xf32>
    %61 = math.tanh %60 : vector<2x128xf32>
    %62 = arith.mulf %57, %61 : vector<2x128xf32>
    %63 = vector.extract_strided_slice %31 {offsets = [2, 0], sizes = [2, 512], strides = [1, 1]} : vector<8x512xf32> to vector<2x512xf32>
    %cst_29 = arith.constant dense<0.000000e+00> : vector<2x512xf32>
    %64 = tpu.matmul %62, %32, %cst_29 {dimension_numbers = #tpu.dot_dimension_numbers<[1], [0], [0], [1], [0, 0, 1, 1], [], []>} : vector<2x128xf32>, vector<128x512xf32>, vector<2x512xf32> -> vector<2x512xf32>
    %65 = arith.addf %63, %64 : vector<2x512xf32>
    %66 = vector.extract_strided_slice %65 {offsets = [0, 0], sizes = [2, 128], strides = [1, 1]} : vector<2x512xf32> to vector<2x128xf32>
    %67 = arith.negf %66 : vector<2x128xf32>
    %68 = math.exp %67 : vector<2x128xf32>
    %cst_30 = arith.constant 1.000000e+00 : f32
    %69 = vector.broadcast %cst_30 : f32 to vector<2x128xf32>
    %70 = arith.addf %69, %68 : vector<2x128xf32>
    %71 = arith.divf %69, %70 : vector<2x128xf32>
    %72 = vector.extract_strided_slice %65 {offsets = [0, 128], sizes = [2, 128], strides = [1, 1]} : vector<2x512xf32> to vector<2x128xf32>
    %73 = arith.negf %72 : vector<2x128xf32>
    %74 = math.exp %73 : vector<2x128xf32>
    %cst_31 = arith.constant 1.000000e+00 : f32
    %75 = vector.broadcast %cst_31 : f32 to vector<2x128xf32>
    %76 = arith.addf %75, %74 : vector<2x128xf32>
    %77 = arith.divf %75, %76 : vector<2x128xf32>
    %78 = vector.extract_strided_slice %65 {offsets = [0, 256], sizes = [2, 128], strides = [1, 1]} : vector<2x512xf32> to vector<2x128xf32>
    %79 = math.tanh %78 : vector<2x128xf32>
    %80 = vector.extract_strided_slice %65 {offsets = [0, 384], sizes = [2, 128], strides = [1, 1]} : vector<2x512xf32> to vector<2x128xf32>
    %81 = arith.negf %80 : vector<2x128xf32>
    %82 = math.exp %81 : vector<2x128xf32>
    %cst_32 = arith.constant 1.000000e+00 : f32
    %83 = vector.broadcast %cst_32 : f32 to vector<2x128xf32>
    %84 = arith.addf %83, %82 : vector<2x128xf32>
    %85 = arith.divf %83, %84 : vector<2x128xf32>
    %86 = arith.mulf %77, %60 : vector<2x128xf32>
    %87 = arith.mulf %71, %79 : vector<2x128xf32>
    %88 = arith.addf %86, %87 : vector<2x128xf32>
    %89 = math.tanh %88 : vector<2x128xf32>
    %90 = arith.mulf %85, %89 : vector<2x128xf32>
    %91 = vector.extract_strided_slice %31 {offsets = [4, 0], sizes = [2, 512], strides = [1, 1]} : vector<8x512xf32> to vector<2x512xf32>
    %cst_33 = arith.constant dense<0.000000e+00> : vector<2x512xf32>
    %92 = tpu.matmul %90, %32, %cst_33 {dimension_numbers = #tpu.dot_dimension_numbers<[1], [0], [0], [1], [0, 0, 1, 1], [], []>} : vector<2x128xf32>, vector<128x512xf32>, vector<2x512xf32> -> vector<2x512xf32>
    %93 = arith.addf %91, %92 : vector<2x512xf32>
    %94 = vector.extract_strided_slice %93 {offsets = [0, 0], sizes = [2, 128], strides = [1, 1]} : vector<2x512xf32> to vector<2x128xf32>
    %95 = arith.negf %94 : vector<2x128xf32>
    %96 = math.exp %95 : vector<2x128xf32>
    %cst_34 = arith.constant 1.000000e+00 : f32
    %97 = vector.broadcast %cst_34 : f32 to vector<2x128xf32>
    %98 = arith.addf %97, %96 : vector<2x128xf32>
    %99 = arith.divf %97, %98 : vector<2x128xf32>
    %100 = vector.extract_strided_slice %93 {offsets = [0, 128], sizes = [2, 128], strides = [1, 1]} : vector<2x512xf32> to vector<2x128xf32>
    %101 = arith.negf %100 : vector<2x128xf32>
    %102 = math.exp %101 : vector<2x128xf32>
    %cst_35 = arith.constant 1.000000e+00 : f32
    %103 = vector.broadcast %cst_35 : f32 to vector<2x128xf32>
    %104 = arith.addf %103, %102 : vector<2x128xf32>
    %105 = arith.divf %103, %104 : vector<2x128xf32>
    %106 = vector.extract_strided_slice %93 {offsets = [0, 256], sizes = [2, 128], strides = [1, 1]} : vector<2x512xf32> to vector<2x128xf32>
    %107 = math.tanh %106 : vector<2x128xf32>
    %108 = vector.extract_strided_slice %93 {offsets = [0, 384], sizes = [2, 128], strides = [1, 1]} : vector<2x512xf32> to vector<2x128xf32>
    %109 = arith.negf %108 : vector<2x128xf32>
    %110 = math.exp %109 : vector<2x128xf32>
    %cst_36 = arith.constant 1.000000e+00 : f32
    %111 = vector.broadcast %cst_36 : f32 to vector<2x128xf32>
    %112 = arith.addf %111, %110 : vector<2x128xf32>
    %113 = arith.divf %111, %112 : vector<2x128xf32>
    %114 = arith.mulf %105, %88 : vector<2x128xf32>
    %115 = arith.mulf %99, %107 : vector<2x128xf32>
    %116 = arith.addf %114, %115 : vector<2x128xf32>
    %117 = math.tanh %116 : vector<2x128xf32>
    %118 = arith.mulf %113, %117 : vector<2x128xf32>
    %119 = vector.extract_strided_slice %31 {offsets = [6, 0], sizes = [2, 512], strides = [1, 1]} : vector<8x512xf32> to vector<2x512xf32>
    %cst_37 = arith.constant dense<0.000000e+00> : vector<2x512xf32>
    %120 = tpu.matmul %118, %32, %cst_37 {dimension_numbers = #tpu.dot_dimension_numbers<[1], [0], [0], [1], [0, 0, 1, 1], [], []>} : vector<2x128xf32>, vector<128x512xf32>, vector<2x512xf32> -> vector<2x512xf32>
    %121 = arith.addf %119, %120 : vector<2x512xf32>
    %122 = vector.extract_strided_slice %121 {offsets = [0, 0], sizes = [2, 128], strides = [1, 1]} : vector<2x512xf32> to vector<2x128xf32>
    %123 = arith.negf %122 : vector<2x128xf32>
    %124 = math.exp %123 : vector<2x128xf32>
    %cst_38 = arith.constant 1.000000e+00 : f32
    %125 = vector.broadcast %cst_38 : f32 to vector<2x128xf32>
    %126 = arith.addf %125, %124 : vector<2x128xf32>
    %127 = arith.divf %125, %126 : vector<2x128xf32>
    %128 = vector.extract_strided_slice %121 {offsets = [0, 128], sizes = [2, 128], strides = [1, 1]} : vector<2x512xf32> to vector<2x128xf32>
    %129 = arith.negf %128 : vector<2x128xf32>
    %130 = math.exp %129 : vector<2x128xf32>
    %cst_39 = arith.constant 1.000000e+00 : f32
    %131 = vector.broadcast %cst_39 : f32 to vector<2x128xf32>
    %132 = arith.addf %131, %130 : vector<2x128xf32>
    %133 = arith.divf %131, %132 : vector<2x128xf32>
    %134 = vector.extract_strided_slice %121 {offsets = [0, 256], sizes = [2, 128], strides = [1, 1]} : vector<2x512xf32> to vector<2x128xf32>
    %135 = math.tanh %134 : vector<2x128xf32>
    %136 = vector.extract_strided_slice %121 {offsets = [0, 384], sizes = [2, 128], strides = [1, 1]} : vector<2x512xf32> to vector<2x128xf32>
    %137 = arith.negf %136 : vector<2x128xf32>
    %138 = math.exp %137 : vector<2x128xf32>
    %cst_40 = arith.constant 1.000000e+00 : f32
    %139 = vector.broadcast %cst_40 : f32 to vector<2x128xf32>
    %140 = arith.addf %139, %138 : vector<2x128xf32>
    %141 = arith.divf %139, %140 : vector<2x128xf32>
    %142 = arith.mulf %133, %116 : vector<2x128xf32>
    %143 = arith.mulf %127, %135 : vector<2x128xf32>
    %144 = arith.addf %142, %143 : vector<2x128xf32>
    %145 = math.tanh %144 : vector<2x128xf32>
    %146 = arith.mulf %141, %145 : vector<2x128xf32>
    %147 = tpu.concatenate %62, %90, %118, %146 in 0 : vector<2x128xf32>, vector<2x128xf32>, vector<2x128xf32>, vector<2x128xf32> -> vector<8x128xf32>
    %c0_41 = arith.constant 0 : index
    %c0_42 = arith.constant 0 : index
    %148 = vector.load %arg12[%c0_41, %c0_42] : memref<128x128xf32, #tpu.memory_space<vmem>>, vector<128x128xf32>
    %cst_43 = arith.constant dense<0.000000e+00> : vector<8x128xf32>
    %149 = tpu.matmul %147, %148, %cst_43 {dimension_numbers = #tpu.dot_dimension_numbers<[1], [0], [0], [1], [0, 0, 1, 1], [], []>} : vector<8x128xf32>, vector<128x128xf32>, vector<8x128xf32> -> vector<8x128xf32>
    %c0_44 = arith.constant 0 : index
    %c0_45 = arith.constant 0 : index
    %150 = vector.load %arg13[%c0_44, %c0_45] : memref<8x128xf32, #tpu.memory_space<vmem>>, vector<8x128xf32>
    tpu.vector_store %arg13[%c0_44, %c0_45], %149 {strides = array<i32>} : memref<8x128xf32, #tpu.memory_space<vmem>>, vector<8x128xf32>,
    %c0_46 = arith.constant 0 : index
    %c0_47 = arith.constant 0 : index
    %151 = vector.load %arg14[%c0_46, %c0_47] : memref<2x128xf32, #tpu.memory_space<vmem>>, vector<2x128xf32>
    tpu.vector_store %arg14[%c0_46, %c0_47], %146 {strides = array<i32>} : memref<2x128xf32, #tpu.memory_space<vmem>>, vector<2x128xf32>,
    %c0_48 = arith.constant 0 : index
    %c0_49 = arith.constant 0 : index
    %152 = vector.load %arg15[%c0_48, %c0_49] : memref<2x128xf32, #tpu.memory_space<vmem>>, vector<2x128xf32>
    tpu.vector_store %arg15[%c0_48, %c0_49], %144 {strides = array<i32>} : memref<2x128xf32, #tpu.memory_space<vmem>>, vector<2x128xf32>,
    return
  }
  func.func @transform_0(%arg0: i32) -> (i32, i32) {
    %c0_i32 = arith.constant 0 : i32
    %c0_i32_0 = arith.constant 0 : i32
    %c0_i32_1 = arith.constant 0 : i32
    return %c0_i32, %c0_i32_0 : i32, i32
  }
  func.func @transform_1(%arg0: i32) -> (i32, i32) {
    %c0_i32 = arith.constant 0 : i32
    %c0_i32_0 = arith.constant 0 : i32
    %c0_i32_1 = arith.constant 0 : i32
    return %c0_i32, %c0_i32_0 : i32, i32
  }
  func.func @transform_2(%arg0: i32) -> (i32, i32) {
    %c0_i32 = arith.constant 0 : i32
    %c0_i32_0 = arith.constant 0 : i32
    %c0_i32_1 = arith.constant 0 : i32
    return %c0_i32, %c0_i32_0 : i32, i32
  }
  func.func @transform_3(%arg0: i32) -> (i32, i32) {
    %c0_i32 = arith.constant 0 : i32
    %c0_i32_0 = arith.constant 0 : i32
    %c0_i32_1 = arith.constant 0 : i32
    return %c0_i32, %c0_i32_0 : i32, i32
  }
  func.func @transform_4(%arg0: i32) -> (i32, i32) {
    %c0_i32 = arith.constant 0 : i32
    %c0_i32_0 = arith.constant 0 : i32
    %c0_i32_1 = arith.constant 0 : i32
    return %c0_i32, %c0_i32_0 : i32, i32
  }
  func.func @transform_5(%arg0: i32) -> (i32, i32) {
    %c0_i32 = arith.constant 0 : i32
    %c0_i32_0 = arith.constant 0 : i32
    %c0_i32_1 = arith.constant 0 : i32
    return %c0_i32, %c0_i32_0 : i32, i32
  }
  func.func @transform_6(%arg0: i32) -> (i32, i32) {
    %c0_i32 = arith.constant 0 : i32
    %c0_i32_0 = arith.constant 0 : i32
    %c0_i32_1 = arith.constant 0 : i32
    return %c0_i32, %c0_i32_0 : i32, i32
  }
  func.func @transform_7(%arg0: i32) -> (i32, i32) {
    %c0_i32 = arith.constant 0 : i32
    %c0_i32_0 = arith.constant 0 : i32
    %c0_i32_1 = arith.constant 0 : i32
    return %c0_i32, %c0_i32_0 : i32, i32
  }
  func.func @transform_8(%arg0: i32) -> (i32, i32) {
    %c0_i32 = arith.constant 0 : i32
    %c0_i32_0 = arith.constant 0 : i32
    %c0_i32_1 = arith.constant 0 : i32
    return %c0_i32, %c0_i32_0 : i32, i32
  }
  func.func @transform_9(%arg0: i32) -> (i32, i32) {
    %c0_i32 = arith.constant 0 : i32
    %c0_i32_0 = arith.constant 0 : i32
    %c0_i32_1 = arith.constant 0 : i32
    return %c0_i32, %c0_i32_0 : i32, i32
  }
  func.func @transform_10(%arg0: i32) -> (i32, i32) {
    %c0_i32 = arith.constant 0 : i32
    %c0_i32_0 = arith.constant 0 : i32
    %c0_i32_1 = arith.constant 0 : i32
    return %c0_i32, %c0_i32_0 : i32, i32
  }
  func.func @transform_11(%arg0: i32) -> (i32, i32) {
    %c0_i32 = arith.constant 0 : i32
    %c0_i32_0 = arith.constant 0 : i32
    %c0_i32_1 = arith.constant 0 : i32
    return %c0_i32, %c0_i32_0 : i32, i32
  }
  func.func @transform_12(%arg0: i32) -> (i32, i32) {
    %c0_i32 = arith.constant 0 : i32
    %c0_i32_0 = arith.constant 0 : i32
    %c0_i32_1 = arith.constant 0 : i32
    return %c0_i32, %c0_i32_0 : i32, i32
  }
  func.func @transform_13(%arg0: i32) -> (i32, i32) {
    %c0_i32 = arith.constant 0 : i32
    %c0_i32_0 = arith.constant 0 : i32
    %c0_i32_1 = arith.constant 0 : i32
    return %c0_i32, %c0_i32_0 : i32, i32
  }
  func.func @transform_14(%arg0: i32) -> (i32, i32) {
    %c0_i32 = arith.constant 0 : i32
    %c0_i32_0 = arith.constant 0 : i32
    %c0_i32_1 = arith.constant 0 : i32
    return %c0_i32, %c0_i32_0 : i32, i32
  }
}

</mosaic_0001>

<bundles_post_ra>
// kernel: forward.4
= control target key start
LH: loop header
LB: loop body
LE: loop exit
PB: predicated region body
PF: predicated region fallthrough
CT: control target
= control target key end

     0   :  { %s5958_s12 = smov 0   ;;  %s7938_s0 = inlined_call_operand.vmem [shape: f32[18432,27], index: 0, kind: input, shape index: {}]   ;;  %s7939_s1 = inlined_call_operand.vmem [shape: f32[27,16], index: 1, kind: input, shape index: {}]   ;;  %s7940_s2 = inlined_call_operand.vmem [shape: f32[1,16], index: 2, kind: input, shape index: {}]   ;;  %s7941_s3 = inlined_call_operand.vmem [shape: f32[18432,16], index: 3, kind: output, shape index: {}]  }
   0x1 LB: > { %s4536_s13 = sadd.s32 4294967295, %s5935_s12   ;;  %p4540_p0 = scmp.ge.s32.totalorder %s5935_s12, 1  ;;  %s5935_s12 = sphi %s5958_s12, %s13_s12  }
   0x2   : > { %p138_p1 = scmp.lt.s32.totalorder %s5935_s12, 7 }
   0x4   : > { %p139_p2 = pnand %p4540_p0, %p138_p1 }
   0x5   : > { %v558_v0 = vld [vmem:[%s7939_s1] sm:$0xff] (!%p139_p2)  ;;  %v559_v1 = vld [vmem:[%s7939_s1 + $0x8] sm:$0xff] (!%p139_p2)  ;;  %v560_v2 = vld [vmem:[%s7939_s1 + $0x10] sm:$0xff] (!%p139_p2)  ;;  %vm1722_vm0 = vcmask (!%p139_p2), 1042432   ;;  %s162_s20 = smul.u32 (!%p139_p2), 384, %s4536_s13  ;;  %vm5937_vm1 = vmmov (!%p139_p2), 1  }
   0x6   : > { %142 = sbr.rel (%p139_p2) target bundleno = 617 (0x269), region = 32  ;;  %v5903_v3 = vpack.c.bf16 (!%p139_p2), %v559_v1, %v558_v0  ;;  %v561_v4 = vld [vmem:[%s7939_s1 + $0x18] sm:$0x7] (!%p139_p2)  ;;  %vm5908_vm2 = vmpackc.low (!%p139_p2), %vm1722_vm0, %vm5937_vm1  ;;  %vm569_vm3 = vcmask (!%p139_p2), 220160   ;;  %vm4095_vm4 = vcmask (!%p139_p2), 130048  }
   0x7   : > { %v5907_v5 = vpack.c.bf16 (!%p139_p2), %v561_v4, %v560_v2  ;;  %p163_p3 = scmp.lt.s32.totalorder (!%p139_p2), %s162_s20, 2303 }
   0x8   : > { %5904 = vmatprep.subr.bf16.mxu0 (!%p139_p2), %v5903_v3  ;;  %5913 = vmatprep.subr.bf16.mxu1 (!%p139_p2), %v5903_v3 }
   0x9   : > { %5906 = vmatpush3.bf16.msra.mxu0 (!%p139_p2), %v5903_v3  ;;  %5915 = vmatpush3.bf16.msra.mxu1 (!%p139_p2), %v5903_v3 }
   0xa   : > { %5909 = vmatprep.subr.msk.bf16.mxu0 (!%p139_p2), %vm5908_vm2, %v5907_v5  ;;  %5914 = vmatprep.subr.msk.bf16.mxu1 (!%p139_p2), %vm5908_vm2, %v5907_v5 }
   0xd   : > { %s7943_s20 = smov (!%p163_p3, %s162_s20), 2303  ;;  %5912 = vmatpush3.bf16.msk.msra.mxu0 %vm5908_vm2, %v5907_v5  ;;  %5916 = vmatpush3.bf16.msk.msra.mxu1 %vm5908_vm2, %v5907_v5 }
   0xe   : > { %s4541_s23 = sshll.u32 %s7943_s20, 3 }
   0xf   : > { %s5986_s26 = scalar_lea.vmem %s7938_s0, %s4541_s23  ;;  %s6434_s4 = scalar_lea.vmem %s7941_s3, %s4541_s23 }
  0x10   : > { %v174_v6 = vld [vmem:[%s5986_s26] sm:$0xff]  ;;  %v175_v8 = vld [vmem:[%s5986_s26 + $0x8] sm:$0xff]  ;;  %v176_v10 = vld [vmem:[%s5986_s26 + $0x10] sm:$0xff] }
  0x11   : > { %v366_v7 = vld [vmem:[%s5986_s26 + $0x600] sm:$0xff]  ;;  %5327 = vmatprep.mubr.msk.f32.mxu0 %vm569_vm3, %v174_v6  ;;  %v367_v9 = vld [vmem:[%s5986_s26 + $0x608] sm:$0xff]  ;;  %v368_v11 = vld [vmem:[%s5986_s26 + $0x610] sm:$0xff] }
  0x12   : > { %5615 = vmatprep.mubr.msk.f32.mxu1 %vm569_vm3, %v366_v7  ;;  %5328 = vmatmul.mubr.msk.f32.vlgmr.msra.gmra.mrb[0].mxu0 %vm569_vm3, %v175_v8  ;;  %v177_v12 = vld [vmem:[%s5986_s26 + $0x18] sm:$0xff]  ;;  %v178_v14 = vld [vmem:[%s5986_s26 + $0x20] sm:$0xff]  ;;  %v179_v16 = vld [vmem:[%s5986_s26 + $0x28] sm:$0xff] }
  0x13   : > { %5616 = vmatmul.mubr.msk.f32.vlgmr.msra.gmra.mrb[0].mxu1 %vm569_vm3, %v367_v9  ;;  %5330 = vmatprep.mubr.msk.f32.mxu0 %vm569_vm3, %v176_v10  ;;  %v369_v13 = vld [vmem:[%s5986_s26 + $0x618] sm:$0xff]  ;;  %v370_v15 = vld [vmem:[%s5986_s26 + $0x620] sm:$0xff]  ;;  %v371_v17 = vld [vmem:[%s5986_s26 + $0x628] sm:$0xff] }
  0x14   : > { %5618 = vmatprep.mubr.msk.f32.mxu1 %vm569_vm3, %v368_v11  ;;  %v180_v18 = vld [vmem:[%s5986_s26 + $0x30] sm:$0xff]  ;;  %v181_v20 = vld [vmem:[%s5986_s26 + $0x38] sm:$0xff]  ;;  %v182_v22 = vld [vmem:[%s5986_s26 + $0x40] sm:$0xff] }
  0x15   : > { %v372_v19 = vld [vmem:[%s5986_s26 + $0x630] sm:$0xff]  ;;  %v373_v21 = vld [vmem:[%s5986_s26 + $0x638] sm:$0xff]  ;;  %v374_v23 = vld [vmem:[%s5986_s26 + $0x640] sm:$0xff] }
  0x16   : > { %5331 = vmatmul.mubr.msk.f32.gmra.mrb[2].mxu0 %vm569_vm3, %v177_v12  ;;  %v183_v24 = vld [vmem:[%s5986_s26 + $0x48] sm:$0xff]  ;;  %v184_v26 = vld [vmem:[%s5986_s26 + $0x50] sm:$0xff]  ;;  %v185_v28 = vld [vmem:[%s5986_s26 + $0x58] sm:$0xff] }
  0x17   : > { %5619 = vmatmul.mubr.msk.f32.gmra.mrb[2].mxu1 %vm569_vm3, %v369_v13  ;;  %5333 = vmatprep.mubr.msk.f32.mxu0 %vm569_vm3, %v178_v14  ;;  %v375_v25 = vld [vmem:[%s5986_s26 + $0x648] sm:$0xff]  ;;  %v376_v27 = vld [vmem:[%s5986_s26 + $0x650] sm:$0xff]  ;;  %v377_v29 = vld [vmem:[%s5986_s26 + $0x658] sm:$0xff] }
  0x18   : > { %5621 = vmatprep.mubr.msk.f32.mxu1 %vm569_vm3, %v370_v15  ;;  %v186_v30 = vld [vmem:[%s5986_s26 + $0x60] sm:$0xff]  ;;  %v187_v32 = vld [vmem:[%s5986_s26 + $0x68] sm:$0xff]  ;;  %v188_v34 = vld [vmem:[%s5986_s26 + $0x70] sm:$0xff] }
  0x19   : > { %v378_v31 = vld [vmem:[%s5986_s26 + $0x660] sm:$0xff]  ;;  %v379_v33 = vld [vmem:[%s5986_s26 + $0x668] sm:$0xff]  ;;  %v380_v35 = vld [vmem:[%s5986_s26 + $0x670] sm:$0xff] }
  0x1a   : > { %5334 = vmatmul.mubr.msk.f32.gmra.mrb[4].mxu0 %vm569_vm3, %v179_v16  ;;  %v189_v36 = vld [vmem:[%s5986_s26 + $0x78] sm:$0xff]  ;;  %v190_v38 = vld [vmem:[%s5986_s26 + $0x80] sm:$0xff]  ;;  %v191_v40 = vld [vmem:[%s5986_s26 + $0x88] sm:$0xff] }
  0x1b   : > { %5622 = vmatmul.mubr.msk.f32.gmra.mrb[4].mxu1 %vm569_vm3, %v371_v17  ;;  %5336 = vmatprep.mubr.msk.f32.mxu0 %vm569_vm3, %v180_v18  ;;  %v381_v37 = vld [vmem:[%s5986_s26 + $0x678] sm:$0xff]  ;;  %v382_v39 = vld [vmem:[%s5986_s26 + $0x680] sm:$0xff]  ;;  %v383_v41 = vld [vmem:[%s5986_s26 + $0x688] sm:$0xff] }
  0x1c   : > { %5624 = vmatprep.mubr.msk.f32.mxu1 %vm569_vm3, %v372_v19  ;;  %v192_v42 = vld [vmem:[%s5986_s26 + $0x90] sm:$0xff]  ;;  %v193_v44 = vld [vmem:[%s5986_s26 + $0x98] sm:$0xff]  ;;  %v194_v46 = vld [vmem:[%s5986_s26 + $0xa0] sm:$0xff] }
  0x1d   : > { %v384_v43 = vld [vmem:[%s5986_s26 + $0x690] sm:$0xff]  ;;  %v385_v45 = vld [vmem:[%s5986_s26 + $0x698] sm:$0xff]  ;;  %v386_v47 = vld [vmem:[%s5986_s26 + $0x6a0] sm:$0xff] }
  0x1e   : > { %5337 = vmatmul.mubr.msk.f32.gmra.mrb[6].mxu0 %vm569_vm3, %v181_v20  ;;  %v195_v48 = vld [vmem:[%s5986_s26 + $0xa8] sm:$0xff]  ;;  %v196_v50 = vld [vmem:[%s5986_s26 + $0xb0] sm:$0xff]  ;;  %v197_v52 = vld [vmem:[%s5986_s26 + $0xb8] sm:$0xff] }
  0x1f   : > { %5625 = vmatmul.mubr.msk.f32.gmra.mrb[6].mxu1 %vm569_vm3, %v373_v21  ;;  %5339 = vmatprep.mubr.msk.f32.mxu0 %vm569_vm3, %v182_v22  ;;  %v387_v49 = vld [vmem:[%s5986_s26 + $0x6a8] sm:$0xff]  ;;  %v388_v51 = vld [vmem:[%s5986_s26 + $0x6b0] sm:$0xff]  ;;  %v389_v53 = vld [vmem:[%s5986_s26 + $0x6b8] sm:$0xff] }
  0x20   : > { %5627 = vmatprep.mubr.msk.f32.mxu1 %vm569_vm3, %v374_v23  ;;  %v198_v54 = vld [vmem:[%s5986_s26 + $0xc0] sm:$0xff]  ;;  %v199_v56 = vld [vmem:[%s5986_s26 + $0xc8] sm:$0xff]  ;;  %v200_v58 = vld [vmem:[%s5986_s26 + $0xd0] sm:$0xff] }
  0x21   : > { %v390_v55 = vld [vmem:[%s5986_s26 + $0x6c0] sm:$0xff]  ;;  %v391_v57 = vld [vmem:[%s5986_s26 + $0x6c8] sm:$0xff]  ;;  %v392_v59 = vld [vmem:[%s5986_s26 + $0x6d0] sm:$0xff] }
  0x22   : > { %5340 = vmatmul.mubr.msk.f32.gmra.mrb[8].mxu0 %vm569_vm3, %v183_v24  ;;  %v201_v60 = vld [vmem:[%s5986_s26 + $0xd8] sm:$0xff]  ;;  %v202_v62 = vld [vmem:[%s5986_s26 + $0xe0] sm:$0xff]  ;;  %v203_v0 = vld [vmem:[%s5986_s26 + $0xe8] sm:$0xff] }
  0x23   : > { %5628 = vmatmul.mubr.msk.f32.gmra.mrb[8].mxu1 %vm569_vm3, %v375_v25  ;;  %5342 = vmatprep.mubr.msk.f32.mxu0 %vm569_vm3, %v184_v26  ;;  %v393_v61 = vld [vmem:[%s5986_s26 + $0x6d8] sm:$0xff]  ;;  %v394_v63 = vld [vmem:[%s5986_s26 + $0x6e0] sm:$0xff]  ;;  %v395_v1 = vld [vmem:[%s5986_s26 + $0x6e8] sm:$0xff] }
  0x24   : > { %5630 = vmatprep.mubr.msk.f32.mxu1 %vm569_vm3, %v376_v27  ;;  %v204_v2 = vld [vmem:[%s5986_s26 + $0xf0] sm:$0xff]  ;;  %v205_v4 = vld [vmem:[%s5986_s26 + $0xf8] sm:$0xff]  ;;  %v206_v6 = vld [vmem:[%s5986_s26 + $0x100] sm:$0xff] }
  0x25   : > { %v396_v3 = vld [vmem:[%s5986_s26 + $0x6f0] sm:$0xff]  ;;  %v397_v5 = vld [vmem:[%s5986_s26 + $0x6f8] sm:$0xff]  ;;  %v398_v7 = vld [vmem:[%s5986_s26 + $0x700] sm:$0xff] }
  0x26   : > { %5343 = vmatmul.mubr.msk.f32.gmra.mrb[10].mxu0 %vm569_vm3, %v185_v28  ;;  %v207_v8 = vld [vmem:[%s5986_s26 + $0x108] sm:$0xff]  ;;  %v208_v10 = vld [vmem:[%s5986_s26 + $0x110] sm:$0xff]  ;;  %v209_v12 = vld [vmem:[%s5986_s26 + $0x118] sm:$0xff] }
  0x27   : > { %5631 = vmatmul.mubr.msk.f32.gmra.mrb[10].mxu1 %vm569_vm3, %v377_v29  ;;  %5345 = vmatprep.mubr.msk.f32.mxu0 %vm569_vm3, %v186_v30  ;;  %v399_v9 = vld [vmem:[%s5986_s26 + $0x708] sm:$0xff]  ;;  %v400_v11 = vld [vmem:[%s5986_s26 + $0x710] sm:$0xff]  ;;  %v401_v13 = vld [vmem:[%s5986_s26 + $0x718] sm:$0xff] }
  0x28   : > { %5633 = vmatprep.mubr.msk.f32.mxu1 %vm569_vm3, %v378_v31  ;;  %v210_v14 = vld [vmem:[%s5986_s26 + $0x120] sm:$0xff]  ;;  %v211_v16 = vld [vmem:[%s5986_s26 + $0x128] sm:$0xff]  ;;  %v212_v18 = vld [vmem:[%s5986_s26 + $0x130] sm:$0xff] }
  0x29   : > { %v402_v15 = vld [vmem:[%s5986_s26 + $0x720] sm:$0xff]  ;;  %v403_v17 = vld [vmem:[%s5986_s26 + $0x728] sm:$0xff]  ;;  %v404_v19 = vld [vmem:[%s5986_s26 + $0x730] sm:$0xff] }
  0x2a   : > { %5346 = vmatmul.mubr.msk.f32.gmra.mrb[12].mxu0 %vm569_vm3, %v187_v32  ;;  %v213_v20 = vld [vmem:[%s5986_s26 + $0x138] sm:$0xff]  ;;  %v214_v22 = vld [vmem:[%s5986_s26 + $0x140] sm:$0xff]  ;;  %v215_v24 = vld [vmem:[%s5986_s26 + $0x148] sm:$0xff] }
  0x2b   : > { %5634 = vmatmul.mubr.msk.f32.gmra.mrb[12].mxu1 %vm569_vm3, %v379_v33  ;;  %5348 = vmatprep.mubr.msk.f32.mxu0 %vm569_vm3, %v188_v34  ;;  %v405_v21 = vld [vmem:[%s5986_s26 + $0x738] sm:$0xff]  ;;  %v406_v23 = vld [vmem:[%s5986_s26 + $0x740] sm:$0xff]  ;;  %v407_v25 = vld [vmem:[%s5986_s26 + $0x748] sm:$0xff] }
  0x2c   : > { %5636 = vmatprep.mubr.msk.f32.mxu1 %vm569_vm3, %v380_v35  ;;  %v216_v26 = vld [vmem:[%s5986_s26 + $0x150] sm:$0xff]  ;;  %v217_v28 = vld [vmem:[%s5986_s26 + $0x158] sm:$0xff]  ;;  %v218_v30 = vld [vmem:[%s5986_s26 + $0x160] sm:$0xff] }
  0x2d   : > { %v408_v27 = vld [vmem:[%s5986_s26 + $0x750] sm:$0xff]  ;;  %v409_v29 = vld [vmem:[%s5986_s26 + $0x758] sm:$0xff]  ;;  %v410_v31 = vld [vmem:[%s5986_s26 + $0x760] sm:$0xff] }
  0x2e   : > { %5349 = vmatmul.mubr.msk.f32.gmra.mrb[14].mxu0 %vm569_vm3, %v189_v36  ;;  %v219_v32 = vld [vmem:[%s5986_s26 + $0x168] sm:$0xff]  ;;  %v220_v34 = vld [vmem:[%s5986_s26 + $0x170] sm:$0xff]  ;;  %v221_v36 = vld [vmem:[%s5986_s26 + $0x178] sm:$0xff] }
  0x2f   : > { %5637 = vmatmul.mubr.msk.f32.gmra.mrb[14].mxu1 %vm569_vm3, %v381_v37  ;;  %5351 = vmatprep.mubr.msk.f32.mxu0 %vm569_vm3, %v190_v38  ;;  %v411_v33 = vld [vmem:[%s5986_s26 + $0x768] sm:$0xff]  ;;  %v412_v35 = vld [vmem:[%s5986_s26 + $0x770] sm:$0xff]  ;;  %v413_v37 = vld [vmem:[%s5986_s26 + $0x778] sm:$0xff] }
  0x30   : > { %5639 = vmatprep.mubr.msk.f32.mxu1 %vm569_vm3, %v382_v39  ;;  %v222_v38 = vld [vmem:[%s5986_s26 + $0x180] sm:$0xff] }
  0x31   : > { %v414_v39 = vld [vmem:[%s5986_s26 + $0x780] sm:$0xff] }
  0x32   : > { %5352 = vmatmul.mubr.msk.f32.gmra.mrb[16].mxu0 %vm569_vm3, %v191_v40  ;;  %v223_v40 = vld [vmem:[%s5986_s26 + $0x188] sm:$0xff] }
  0x33   : > { %5640 = vmatmul.mubr.msk.f32.gmra.mrb[16].mxu1 %vm569_vm3, %v383_v41  ;;  %5354 = vmatprep.mubr.msk.f32.mxu0 %vm569_vm3, %v192_v42  ;;  %v415_v41 = vld [vmem:[%s5986_s26 + $0x788] sm:$0xff]  ;;  %v224_v42 = vld [vmem:[%s5986_s26 + $0x190] sm:$0xff] }
  0x34   : > { %5642 = vmatprep.mubr.msk.f32.mxu1 %vm569_vm3, %v384_v43  ;;  %v416_v43 = vld [vmem:[%s5986_s26 + $0x790] sm:$0xff] }
  0x36   : > { %5355 = vmatmul.mubr.msk.f32.gmra.mrb[18].mxu0 %vm569_vm3, %v193_v44  ;;  %v225_v44 = vld [vmem:[%s5986_s26 + $0x198] sm:$0xff] }
  0x37   : > { %5643 = vmatmul.mubr.msk.f32.gmra.mrb[18].mxu1 %vm569_vm3, %v385_v45  ;;  %5357 = vmatprep.mubr.msk.f32.mxu0 %vm569_vm3, %v194_v46  ;;  %v417_v45 = vld [vmem:[%s5986_s26 + $0x798] sm:$0xff]  ;;  %v226_v46 = vld [vmem:[%s5986_s26 + $0x1a0] sm:$0xff] }
  0x38   : > { %5645 = vmatprep.mubr.msk.f32.mxu1 %vm569_vm3, %v386_v47  ;;  %v418_v47 = vld [vmem:[%s5986_s26 + $0x7a0] sm:$0xff] }
  0x3a   : > { %5358 = vmatmul.mubr.msk.f32.gmra.mrb[20].mxu0 %vm569_vm3, %v195_v48  ;;  %v227_v48 = vld [vmem:[%s5986_s26 + $0x1a8] sm:$0xff] }
  0x3b   : > { %5646 = vmatmul.mubr.msk.f32.gmra.mrb[20].mxu1 %vm569_vm3, %v387_v49  ;;  %5360 = vmatprep.mubr.msk.f32.mxu0 %vm569_vm3, %v196_v50  ;;  %v419_v49 = vld [vmem:[%s5986_s26 + $0x7a8] sm:$0xff]  ;;  %v228_v50 = vld [vmem:[%s5986_s26 + $0x1b0] sm:$0xff] }
  0x3c   : > { %5648 = vmatprep.mubr.msk.f32.mxu1 %vm569_vm3, %v388_v51  ;;  %v420_v51 = vld [vmem:[%s5986_s26 + $0x7b0] sm:$0xff] }
  0x3e   : > { %5361 = vmatmul.mubr.msk.f32.gmra.mrb[22].mxu0 %vm569_vm3, %v197_v52  ;;  %v229_v52 = vld [vmem:[%s5986_s26 + $0x1b8] sm:$0xff] }
  0x3f   : > { %5649 = vmatmul.mubr.msk.f32.gmra.mrb[22].mxu1 %vm569_vm3, %v389_v53  ;;  %5363 = vmatprep.mubr.msk.f32.mxu0 %vm569_vm3, %v198_v54  ;;  %v421_v53 = vld [vmem:[%s5986_s26 + $0x7b8] sm:$0xff]  ;;  %v230_v54 = vld [vmem:[%s5986_s26 + $0x1c0] sm:$0xff] }
  0x40   : > { %5651 = vmatprep.mubr.msk.f32.mxu1 %vm569_vm3, %v390_v55  ;;  %v422_v55 = vld [vmem:[%s5986_s26 + $0x7c0] sm:$0xff] }
  0x42   : > { %5364 = vmatmul.mubr.msk.f32.gmra.mrb[24].mxu0 %vm569_vm3, %v199_v56  ;;  %v231_v56 = vld [vmem:[%s5986_s26 + $0x1c8] sm:$0xff] }
  0x43   : > { %5652 = vmatmul.mubr.msk.f32.gmra.mrb[24].mxu1 %vm569_vm3, %v391_v57  ;;  %5366 = vmatprep.mubr.msk.f32.mxu0 %vm569_vm3, %v200_v58  ;;  %v423_v57 = vld [vmem:[%s5986_s26 + $0x7c8] sm:$0xff]  ;;  %v232_v58 = vld [vmem:[%s5986_s26 + $0x1d0] sm:$0xff] }
  0x44   : > { %5654 = vmatprep.mubr.msk.f32.mxu1 %vm569_vm3, %v392_v59  ;;  %v424_v59 = vld [vmem:[%s5986_s26 + $0x7d0] sm:$0xff] }
  0x46   : > { %5367 = vmatmul.mubr.msk.f32.gmra.mrb[26].mxu0 %vm569_vm3, %v201_v60  ;;  %v233_v60 = vld [vmem:[%s5986_s26 + $0x1d8] sm:$0xff] }
  0x47   : > { %5655 = vmatmul.mubr.msk.f32.gmra.mrb[26].mxu1 %vm569_vm3, %v393_v61  ;;  %5369 = vmatprep.mubr.msk.f32.mxu0 %vm569_vm3, %v202_v62  ;;  %v425_v61 = vld [vmem:[%s5986_s26 + $0x7d8] sm:$0xff]  ;;  %v234_v62 = vld [vmem:[%s5986_s26 + $0x1e0] sm:$0xff] }
  0x48   : > { %5657 = vmatprep.mubr.msk.f32.mxu1 %vm569_vm3, %v394_v63  ;;  %v426_v63 = vld [vmem:[%s5986_s26 + $0x7e0] sm:$0xff] }
  0x4a   : > { %5370 = vmatmul.mubr.msk.f32.gmra.mrb[28].mxu0 %vm569_vm3, %v203_v0  ;;  %v235_v0 = vld [vmem:[%s5986_s26 + $0x1e8] sm:$0xff] }
  0x4b   : > { %5658 = vmatmul.mubr.msk.f32.gmra.mrb[28].mxu1 %vm569_vm3, %v395_v1  ;;  %5372 = vmatprep.mubr.msk.f32.mxu0 %vm569_vm3, %v204_v2  ;;  %v427_v1 = vld [vmem:[%s5986_s26 + $0x7e8] sm:$0xff]  ;;  %v236_v2 = vld [vmem:[%s5986_s26 + $0x1f0] sm:$0xff] }
  0x4c   : > { %5660 = vmatprep.mubr.msk.f32.mxu1 %vm569_vm3, %v396_v3  ;;  %v428_v3 = vld [vmem:[%s5986_s26 + $0x7f0] sm:$0xff] }
  0x4e   : > { %5373 = vmatmul.mubr.msk.f32.gmra.mrb[30].mxu0 %vm569_vm3, %v205_v4  ;;  %v237_v4 = vld [vmem:[%s5986_s26 + $0x1f8] sm:$0xff] }
  0x4f   : > { %5661 = vmatmul.mubr.msk.f32.gmra.mrb[30].mxu1 %vm569_vm3, %v397_v5  ;;  %5375 = vmatprep.mubr.msk.f32.mxu0 %vm569_vm3, %v206_v6  ;;  %v429_v5 = vld [vmem:[%s5986_s26 + $0x7f8] sm:$0xff]  ;;  %v238_v6 = vld [vmem:[%s5986_s26 + $0x200] sm:$0xff] }
  0x50   : > { %5663 = vmatprep.mubr.msk.f32.mxu1 %vm569_vm3, %v398_v7  ;;  %v430_v7 = vld [vmem:[%s5986_s26 + $0x800] sm:$0xff] }
  0x52   : > { %5376 = vmatmul.mubr.msk.f32.gmra.mrb[32].mxu0 %vm569_vm3, %v207_v8  ;;  %v239_v8 = vld [vmem:[%s5986_s26 + $0x208] sm:$0xff] }
  0x53   : > { %5664 = vmatmul.mubr.msk.f32.gmra.mrb[32].mxu1 %vm569_vm3, %v399_v9  ;;  %5378 = vmatprep.mubr.msk.f32.mxu0 %vm569_vm3, %v208_v10  ;;  %v431_v9 = vld [vmem:[%s5986_s26 + $0x808] sm:$0xff]  ;;  %v240_v10 = vld [vmem:[%s5986_s26 + $0x210] sm:$0xff] }
  0x54   : > { %5666 = vmatprep.mubr.msk.f32.mxu1 %vm569_vm3, %v400_v11  ;;  %v432_v11 = vld [vmem:[%s5986_s26 + $0x810] sm:$0xff] }
  0x56   : > { %5379 = vmatmul.mubr.msk.f32.gmra.mrb[34].mxu0 %vm569_vm3, %v209_v12  ;;  %v241_v12 = vld [vmem:[%s5986_s26 + $0x218] sm:$0xff] }
  0x57   : > { %5667 = vmatmul.mubr.msk.f32.gmra.mrb[34].mxu1 %vm569_vm3, %v401_v13  ;;  %5381 = vmatprep.mubr.msk.f32.mxu0 %vm569_vm3, %v210_v14  ;;  %v433_v13 = vld [vmem:[%s5986_s26 + $0x818] sm:$0xff]  ;;  %v242_v14 = vld [vmem:[%s5986_s26 + $0x220] sm:$0xff] }
  0x58   : > { %5669 = vmatprep.mubr.msk.f32.mxu1 %vm569_vm3, %v402_v15  ;;  %v434_v15 = vld [vmem:[%s5986_s26 + $0x820] sm:$0xff] }
  0x5a   : > { %5382 = vmatmul.mubr.msk.f32.gmra.mrb[36].mxu0 %vm569_vm3, %v211_v16  ;;  %v243_v16 = vld [vmem:[%s5986_s26 + $0x228] sm:$0xff] }
  0x5b   : > { %5670 = vmatmul.mubr.msk.f32.gmra.mrb[36].mxu1 %vm569_vm3, %v403_v17  ;;  %5384 = vmatprep.mubr.msk.f32.mxu0 %vm569_vm3, %v212_v18  ;;  %v435_v17 = vld [vmem:[%s5986_s26 + $0x828] sm:$0xff]  ;;  %v244_v18 = vld [vmem:[%s5986_s26 + $0x230] sm:$0xff] }
  0x5c   : > { %5672 = vmatprep.mubr.msk.f32.mxu1 %vm569_vm3, %v404_v19  ;;  %v436_v19 = vld [vmem:[%s5986_s26 + $0x830] sm:$0xff] }
  0x5e   : > { %5385 = vmatmul.mubr.msk.f32.gmra.mrb[38].mxu0 %vm569_vm3, %v213_v20  ;;  %v245_v20 = vld [vmem:[%s5986_s26 + $0x238] sm:$0xff] }
  0x5f   : > { %5673 = vmatmul.mubr.msk.f32.gmra.mrb[38].mxu1 %vm569_vm3, %v405_v21  ;;  %5387 = vmatprep.mubr.msk.f32.mxu0 %vm569_vm3, %v214_v22  ;;  %v437_v21 = vld [vmem:[%s5986_s26 + $0x838] sm:$0xff]  ;;  %v246_v22 = vld [vmem:[%s5986_s26 + $0x240] sm:$0xff] }
  0x60   : > { %5675 = vmatprep.mubr.msk.f32.mxu1 %vm569_vm3, %v406_v23  ;;  %v438_v23 = vld [vmem:[%s5986_s26 + $0x840] sm:$0xff] }
  0x62   : > { %5388 = vmatmul.mubr.msk.f32.gmra.mrb[40].mxu0 %vm569_vm3, %v215_v24  ;;  %v247_v24 = vld [vmem:[%s5986_s26 + $0x248] sm:$0xff] }
  0x63   : > { %5676 = vmatmul.mubr.msk.f32.gmra.mrb[40].mxu1 %vm569_vm3, %v407_v25  ;;  %5390 = vmatprep.mubr.msk.f32.mxu0 %vm569_vm3, %v216_v26  ;;  %v439_v25 = vld [vmem:[%s5986_s26 + $0x848] sm:$0xff]  ;;  %v248_v26 = vld [vmem:[%s5986_s26 + $0x250] sm:$0xff] }
  0x64   : > { %5678 = vmatprep.mubr.msk.f32.mxu1 %vm569_vm3, %v408_v27  ;;  %v440_v27 = vld [vmem:[%s5986_s26 + $0x850] sm:$0xff] }
  0x66   : > { %5391 = vmatmul.mubr.msk.f32.gmra.mrb[42].mxu0 %vm569_vm3, %v217_v28  ;;  %v249_v28 = vld [vmem:[%s5986_s26 + $0x258] sm:$0xff] }
  0x67   : > { %5679 = vmatmul.mubr.msk.f32.gmra.mrb[42].mxu1 %vm569_vm3, %v409_v29  ;;  %5393 = vmatprep.mubr.msk.f32.mxu0 %vm569_vm3, %v218_v30  ;;  %v441_v29 = vld [vmem:[%s5986_s26 + $0x858] sm:$0xff]  ;;  %v250_v30 = vld [vmem:[%s5986_s26 + $0x260] sm:$0xff] }
  0x68   : > { %5681 = vmatprep.mubr.msk.f32.mxu1 %vm569_vm3, %v410_v31  ;;  %v442_v31 = vld [vmem:[%s5986_s26 + $0x860] sm:$0xff] }
  0x6a   : > { %5394 = vmatmul.mubr.msk.f32.gmra.mrb[44].mxu0 %vm569_vm3, %v219_v32  ;;  %v251_v32 = vld [vmem:[%s5986_s26 + $0x268] sm:$0xff] }
  0x6b   : > { %5682 = vmatmul.mubr.msk.f32.gmra.mrb[44].mxu1 %vm569_vm3, %v411_v33  ;;  %5396 = vmatprep.mubr.msk.f32.mxu0 %vm569_vm3, %v220_v34  ;;  %v443_v33 = vld [vmem:[%s5986_s26 + $0x868] sm:$0xff]  ;;  %v252_v34 = vld [vmem:[%s5986_s26 + $0x270] sm:$0xff] }
  0x6c   : > { %5684 = vmatprep.mubr.msk.f32.mxu1 %vm569_vm3, %v412_v35  ;;  %v444_v35 = vld [vmem:[%s5986_s26 + $0x870] sm:$0xff] }
  0x6e   : > { %5397 = vmatmul.mubr.msk.f32.gmra.mrb[46].mxu0 %vm569_vm3, %v221_v36  ;;  %v253_v36 = vld [vmem:[%s5986_s26 + $0x278] sm:$0xff] }
  0x6f   : > { %5685 = vmatmul.mubr.msk.f32.gmra.mrb[46].mxu1 %vm569_vm3, %v413_v37  ;;  %5399 = vmatprep.mubr.msk.f32.mxu0 %vm569_vm3, %v222_v38  ;;  %v445_v37 = vld [vmem:[%s5986_s26 + $0x878] sm:$0xff]  ;;  %v254_v38 = vld [vmem:[%s5986_s26 + $0x280] sm:$0xff] }
  0x70   : > { %5687 = vmatprep.mubr.msk.f32.mxu1 %vm569_vm3, %v414_v39  ;;  %v446_v39 = vld [vmem:[%s5986_s26 + $0x880] sm:$0xff] }
  0x72   : > { %5400 = vmatmul.mubr.msk.f32.gmra.mrb[48].mxu0 %vm569_vm3, %v223_v40  ;;  %v255_v40 = vld [vmem:[%s5986_s26 + $0x288] sm:$0xff] }
  0x73   : > { %5688 = vmatmul.mubr.msk.f32.gmra.mrb[48].mxu1 %vm569_vm3, %v415_v41  ;;  %5402 = vmatprep.mubr.msk.f32.mxu0 %vm569_vm3, %v224_v42  ;;  %v447_v41 = vld [vmem:[%s5986_s26 + $0x888] sm:$0xff]  ;;  %v256_v42 = vld [vmem:[%s5986_s26 + $0x290] sm:$0xff] }
  0x74   : > { %5690 = vmatprep.mubr.msk.f32.mxu1 %vm569_vm3, %v416_v43  ;;  %v448_v43 = vld [vmem:[%s5986_s26 + $0x890] sm:$0xff] }
  0x76   : > { %5403 = vmatmul.mubr.msk.f32.gmra.mrb[50].mxu0 %vm569_vm3, %v225_v44  ;;  %v257_v44 = vld [vmem:[%s5986_s26 + $0x298] sm:$0xff] }
  0x77   : > { %5691 = vmatmul.mubr.msk.f32.gmra.mrb[50].mxu1 %vm569_vm3, %v417_v45  ;;  %5405 = vmatprep.mubr.msk.f32.mxu0 %vm569_vm3, %v226_v46  ;;  %v449_v45 = vld [vmem:[%s5986_s26 + $0x898] sm:$0xff]  ;;  %v258_v46 = vld [vmem:[%s5986_s26 + $0x2a0] sm:$0xff] }
  0x78   : > { %5693 = vmatprep.mubr.msk.f32.mxu1 %vm569_vm3, %v418_v47  ;;  %v450_v47 = vld [vmem:[%s5986_s26 + $0x8a0] sm:$0xff] }
  0x7a   : > { %5406 = vmatmul.mubr.msk.f32.gmra.mrb[52].mxu0 %vm569_vm3, %v227_v48  ;;  %v259_v48 = vld [vmem:[%s5986_s26 + $0x2a8] sm:$0xff] }
  0x7b   : > { %5694 = vmatmul.mubr.msk.f32.gmra.mrb[52].mxu1 %vm569_vm3, %v419_v49  ;;  %5408 = vmatprep.mubr.msk.f32.mxu0 %vm569_vm3, %v228_v50  ;;  %v451_v49 = vld [vmem:[%s5986_s26 + $0x8a8] sm:$0xff]  ;;  %v260_v50 = vld [vmem:[%s5986_s26 + $0x2b0] sm:$0xff] }
  0x7c   : > { %5696 = vmatprep.mubr.msk.f32.mxu1 %vm569_vm3, %v420_v51  ;;  %v452_v51 = vld [vmem:[%s5986_s26 + $0x8b0] sm:$0xff] }
  0x7e   : > { %5409 = vmatmul.mubr.msk.f32.gmra.mrb[54].mxu0 %vm569_vm3, %v229_v52  ;;  %v261_v52 = vld [vmem:[%s5986_s26 + $0x2b8] sm:$0xff] }
  0x7f   : > { %5697 = vmatmul.mubr.msk.f32.gmra.mrb[54].mxu1 %vm569_vm3, %v421_v53  ;;  %5411 = vmatprep.mubr.msk.f32.mxu0 %vm569_vm3, %v230_v54  ;;  %v453_v53 = vld [vmem:[%s5986_s26 + $0x8b8] sm:$0xff]  ;;  %v262_v54 = vld [vmem:[%s5986_s26 + $0x2c0] sm:$0xff] }
  0x80   : > { %5699 = vmatprep.mubr.msk.f32.mxu1 %vm569_vm3, %v422_v55  ;;  %v454_v55 = vld [vmem:[%s5986_s26 + $0x8c0] sm:$0xff] }
  0x82   : > { %5412 = vmatmul.mubr.msk.f32.gmra.mrb[56].mxu0 %vm569_vm3, %v231_v56  ;;  %v263_v56 = vld [vmem:[%s5986_s26 + $0x2c8] sm:$0xff] }
  0x83   : > { %5700 = vmatmul.mubr.msk.f32.gmra.mrb[56].mxu1 %vm569_vm3, %v423_v57  ;;  %5414 = vmatprep.mubr.msk.f32.mxu0 %vm569_vm3, %v232_v58  ;;  %v455_v57 = vld [vmem:[%s5986_s26 + $0x8c8] sm:$0xff]  ;;  %v264_v58 = vld [vmem:[%s5986_s26 + $0x2d0] sm:$0xff] }
  0x84   : > { %5702 = vmatprep.mubr.msk.f32.mxu1 %vm569_vm3, %v424_v59  ;;  %v456_v59 = vld [vmem:[%s5986_s26 + $0x8d0] sm:$0xff] }
  0x86   : > { %5415 = vmatmul.mubr.msk.f32.gmra.mrb[58].mxu0 %vm569_vm3, %v233_v60  ;;  %v265_v60 = vld [vmem:[%s5986_s26 + $0x2d8] sm:$0xff] }
  0x87   : > { %5703 = vmatmul.mubr.msk.f32.gmra.mrb[58].mxu1 %vm569_vm3, %v425_v61  ;;  %5417 = vmatprep.mubr.msk.f32.mxu0 %vm569_vm3, %v234_v62  ;;  %v457_v61 = vld [vmem:[%s5986_s26 + $0x8d8] sm:$0xff]  ;;  %v266_v62 = vld [vmem:[%s5986_s26 + $0x2e0] sm:$0xff] }
  0x88   : > { %5705 = vmatprep.mubr.msk.f32.mxu1 %vm569_vm3, %v426_v63  ;;  %v458_v63 = vld [vmem:[%s5986_s26 + $0x8e0] sm:$0xff] }
  0x8a   : > { %5418 = vmatmul.mubr.msk.f32.gmra.mrb[60].mxu0 %vm569_vm3, %v235_v0  ;;  %v267_v0 = vld [vmem:[%s5986_s26 + $0x2e8] sm:$0xff] }
  0x8b   : > { %5706 = vmatmul.mubr.msk.f32.gmra.mrb[60].mxu1 %vm569_vm3, %v427_v1  ;;  %5420 = vmatprep.mubr.msk.f32.mxu0 %vm569_vm3, %v236_v2  ;;  %v459_v1 = vld [vmem:[%s5986_s26 + $0x8e8] sm:$0xff]  ;;  %v268_v2 = vld [vmem:[%s5986_s26 + $0x2f0] sm:$0xff] }
  0x8c   : > { %5708 = vmatprep.mubr.msk.f32.mxu1 %vm569_vm3, %v428_v3  ;;  %v460_v3 = vld [vmem:[%s5986_s26 + $0x8f0] sm:$0xff] }
  0x8e   : > { %5421 = vmatmul.mubr.msk.f32.gmra.mrb[62].mxu0 %vm569_vm3, %v237_v4  ;;  %v269_v4 = vld [vmem:[%s5986_s26 + $0x2f8] sm:$0xff] }
  0x8f   : > { %5709 = vmatmul.mubr.msk.f32.gmra.mrb[62].mxu1 %vm569_vm3, %v429_v5  ;;  %5423 = vmatprep.mubr.msk.f32.mxu0 %vm569_vm3, %v238_v6  ;;  %v461_v5 = vld [vmem:[%s5986_s26 + $0x8f8] sm:$0xff]  ;;  %v270_v6 = vld [vmem:[%s5986_s26 + $0x300] sm:$0xff] }
  0x90   : > { %5711 = vmatprep.mubr.msk.f32.mxu1 %vm569_vm3, %v430_v7  ;;  %v462_v7 = vld [vmem:[%s5986_s26 + $0x900] sm:$0xff] }
  0x92   : > { %5424 = vmatmul.mubr.msk.f32.gmra.mrb[64].mxu0 %vm569_vm3, %v239_v8  ;;  %v271_v8 = vld [vmem:[%s5986_s26 + $0x308] sm:$0xff] }
  0x93   : > { %5712 = vmatmul.mubr.msk.f32.gmra.mrb[64].mxu1 %vm569_vm3, %v431_v9  ;;  %5426 = vmatprep.mubr.msk.f32.mxu0 %vm569_vm3, %v240_v10  ;;  %v463_v9 = vld [vmem:[%s5986_s26 + $0x908] sm:$0xff]  ;;  %v272_v10 = vld [vmem:[%s5986_s26 + $0x310] sm:$0xff] }
  0x94   : > { %5714 = vmatprep.mubr.msk.f32.mxu1 %vm569_vm3, %v432_v11  ;;  %v464_v11 = vld [vmem:[%s5986_s26 + $0x910] sm:$0xff] }
  0x96   : > { %5427 = vmatmul.mubr.msk.f32.gmra.mrb[66].mxu0 %vm569_vm3, %v241_v12  ;;  %v273_v12 = vld [vmem:[%s5986_s26 + $0x318] sm:$0xff] }
  0x97   : > { %5715 = vmatmul.mubr.msk.f32.gmra.mrb[66].mxu1 %vm569_vm3, %v433_v13  ;;  %5429 = vmatprep.mubr.msk.f32.mxu0 %vm569_vm3, %v242_v14  ;;  %v465_v13 = vld [vmem:[%s5986_s26 + $0x918] sm:$0xff]  ;;  %v274_v14 = vld [vmem:[%s5986_s26 + $0x320] sm:$0xff] }
  0x98   : > { %5717 = vmatprep.mubr.msk.f32.mxu1 %vm569_vm3, %v434_v15  ;;  %v466_v15 = vld [vmem:[%s5986_s26 + $0x920] sm:$0xff] }
  0x9a   : > { %5430 = vmatmul.mubr.msk.f32.gmra.mrb[68].mxu0 %vm569_vm3, %v243_v16  ;;  %v275_v16 = vld [vmem:[%s5986_s26 + $0x328] sm:$0xff] }
  0x9b   : > { %5718 = vmatmul.mubr.msk.f32.gmra.mrb[68].mxu1 %vm569_vm3, %v435_v17  ;;  %5432 = vmatprep.mubr.msk.f32.mxu0 %vm569_vm3, %v244_v18  ;;  %v467_v17 = vld [vmem:[%s5986_s26 + $0x928] sm:$0xff]  ;;  %v276_v18 = vld [vmem:[%s5986_s26 + $0x330] sm:$0xff] }
  0x9c   : > { %5720 = vmatprep.mubr.msk.f32.mxu1 %vm569_vm3, %v436_v19  ;;  %v468_v19 = vld [vmem:[%s5986_s26 + $0x930] sm:$0xff] }
  0x9e   : > { %5433 = vmatmul.mubr.msk.f32.gmra.mrb[70].mxu0 %vm569_vm3, %v245_v20  ;;  %v277_v20 = vld [vmem:[%s5986_s26 + $0x338] sm:$0xff] }
  0x9f   : > { %5721 = vmatmul.mubr.msk.f32.gmra.mrb[70].mxu1 %vm569_vm3, %v437_v21  ;;  %5435 = vmatprep.mubr.msk.f32.mxu0 %vm569_vm3, %v246_v22  ;;  %v469_v21 = vld [vmem:[%s5986_s26 + $0x938] sm:$0xff]  ;;  %v278_v22 = vld [vmem:[%s5986_s26 + $0x340] sm:$0xff] }
  0xa0   : > { %5723 = vmatprep.mubr.msk.f32.mxu1 %vm569_vm3, %v438_v23  ;;  %v470_v23 = vld [vmem:[%s5986_s26 + $0x940] sm:$0xff] }
  0xa2   : > { %5436 = vmatmul.mubr.msk.f32.gmra.mrb[72].mxu0 %vm569_vm3, %v247_v24  ;;  %v279_v24 = vld [vmem:[%s5986_s26 + $0x348] sm:$0xff] }
  0xa3   : > { %5724 = vmatmul.mubr.msk.f32.gmra.mrb[72].mxu1 %vm569_vm3, %v439_v25  ;;  %5438 = vmatprep.mubr.msk.f32.mxu0 %vm569_vm3, %v248_v26  ;;  %v471_v25 = vld [vmem:[%s5986_s26 + $0x948] sm:$0xff]  ;;  %v280_v26 = vld [vmem:[%s5986_s26 + $0x350] sm:$0xff] }
  0xa4   : > { %5726 = vmatprep.mubr.msk.f32.mxu1 %vm569_vm3, %v440_v27  ;;  %v472_v27 = vld [vmem:[%s5986_s26 + $0x950] sm:$0xff] }
  0xa6   : > { %5439 = vmatmul.mubr.msk.f32.gmra.mrb[74].mxu0 %vm569_vm3, %v249_v28  ;;  %v6417_v28 = vld [vmem:[%s7940_s2] ss:$0 sm:$0xff] }
  0xa7   : > { %5727 = vmatmul.mubr.msk.f32.gmra.mrb[74].mxu1 %vm569_vm3, %v441_v29  ;;  %5441 = vmatprep.mubr.msk.f32.mxu0 %vm569_vm3, %v250_v30  ;;  %v281_v29 = vld [vmem:[%s5986_s26 + $0x358] sm:$0xff] }
  0xa8   : > { %5729 = vmatprep.mubr.msk.f32.mxu1 %vm569_vm3, %v442_v31  ;;  %v473_v30 = vld [vmem:[%s5986_s26 + $0x958] sm:$0xff]  ;;  %v282_v31 = vld [vmem:[%s5986_s26 + $0x360] sm:$0xff] }
  0xaa   : > { %5442 = vmatmul.mubr.msk.f32.gmra.mrb[76].mxu0 %vm569_vm3, %v251_v32  ;;  %v474_v32 = vld [vmem:[%s5986_s26 + $0x960] sm:$0xff] }
  0xab   : > { %5730 = vmatmul.mubr.msk.f32.gmra.mrb[76].mxu1 %vm569_vm3, %v443_v33  ;;  %5444 = vmatprep.mubr.msk.f32.mxu0 %vm569_vm3, %v252_v34 }
  0xac   : > { %5732 = vmatprep.mubr.msk.f32.mxu1 %vm569_vm3, %v444_v35 }
  0xae   : > { %5445 = vmatmul.mubr.msk.f32.gmra.mrb[78].mxu0 %vm569_vm3, %v253_v36 }
  0xaf   : > { %5733 = vmatmul.mubr.msk.f32.gmra.mrb[78].mxu1 %vm569_vm3, %v445_v37  ;;  %5447 = vmatprep.mubr.msk.f32.mxu0 %vm569_vm3, %v254_v38 }
  0xb0   : > { %5735 = vmatprep.mubr.msk.f32.mxu1 %vm569_vm3, %v446_v39 }
  0xb2   : > { %5448 = vmatmul.mubr.msk.f32.gmra.mrb[80].mxu0 %vm569_vm3, %v255_v40 }
  0xb3   : > { %5736 = vmatmul.mubr.msk.f32.gmra.mrb[80].mxu1 %vm569_vm3, %v447_v41  ;;  %5450 = vmatprep.mubr.msk.f32.mxu0 %vm569_vm3, %v256_v42  ;;  %v283_v41 = vld [vmem:[%s5986_s26 + $0x368] sm:$0xff] }
  0xb4   : > { %5738 = vmatprep.mubr.msk.f32.mxu1 %vm569_vm3, %v448_v43  ;;  %v475_v42 = vld [vmem:[%s5986_s26 + $0x968] sm:$0xff] }
  0xb6   : > { %5451 = vmatmul.mubr.msk.f32.gmra.mrb[82].mxu0 %vm569_vm3, %v257_v44 }
  0xb7   : > { %5739 = vmatmul.mubr.msk.f32.gmra.mrb[82].mxu1 %vm569_vm3, %v449_v45  ;;  %5453 = vmatprep.mubr.msk.f32.mxu0 %vm569_vm3, %v258_v46  ;;  %v284_v45 = vld [vmem:[%s5986_s26 + $0x370] sm:$0xff] }
  0xb8   : > { %5741 = vmatprep.mubr.msk.f32.mxu1 %vm569_vm3, %v450_v47  ;;  %v476_v46 = vld [vmem:[%s5986_s26 + $0x970] sm:$0xff] }
  0xba   : > { %5454 = vmatmul.mubr.msk.f32.gmra.mrb[84].mxu0 %vm569_vm3, %v259_v48 }
  0xbb   : > { %5742 = vmatmul.mubr.msk.f32.gmra.mrb[84].mxu1 %vm569_vm3, %v451_v49  ;;  %5456 = vmatprep.mubr.msk.f32.mxu0 %vm569_vm3, %v260_v50 }
  0xbc   : > { %5744 = vmatprep.mubr.msk.f32.mxu1 %vm569_vm3, %v452_v51 }
  0xbe   : > { %5457 = vmatmul.mubr.msk.f32.gmra.mrb[86].mxu0 %vm569_vm3, %v261_v52 }
  0xbf   : > { %5745 = vmatmul.mubr.msk.f32.gmra.mrb[86].mxu1 %vm569_vm3, %v453_v53  ;;  %5459 = vmatprep.mubr.msk.f32.mxu0 %vm569_vm3, %v262_v54 }
  0xc0   : > { %5747 = vmatprep.mubr.msk.f32.mxu1 %vm569_vm3, %v454_v55 }
  0xc2   : > { %5460 = vmatmul.mubr.msk.f32.gmra.mrb[88].mxu0 %vm569_vm3, %v263_v56 }
  0xc3   : > { %5748 = vmatmul.mubr.msk.f32.gmra.mrb[88].mxu1 %vm569_vm3, %v455_v57  ;;  %5462 = vmatprep.mubr.msk.f32.mxu0 %vm569_vm3, %v264_v58  ;;  %v285_v57 = vld [vmem:[%s5986_s26 + $0x378] sm:$0xff] }
  0xc4   : > { %5750 = vmatprep.mubr.msk.f32.mxu1 %vm569_vm3, %v456_v59  ;;  %v477_v58 = vld [vmem:[%s5986_s26 + $0x978] sm:$0xff] }
  0xc6   : > { %5463 = vmatmul.mubr.msk.f32.gmra.mrb[90].mxu0 %vm569_vm3, %v265_v60 }
  0xc7   : > { %5751 = vmatmul.mubr.msk.f32.gmra.mrb[90].mxu1 %vm569_vm3, %v457_v61  ;;  %5465 = vmatprep.mubr.msk.f32.mxu0 %vm569_vm3, %v266_v62  ;;  %v286_v61 = vld [vmem:[%s5986_s26 + $0x380] sm:$0xff] }
  0xc8   : > { %5753 = vmatprep.mubr.msk.f32.mxu1 %vm569_vm3, %v458_v63  ;;  %v478_v62 = vld [vmem:[%s5986_s26 + $0x980] sm:$0xff] }
  0xca   : > { %5466 = vmatmul.mubr.msk.f32.gmra.mrb[92].mxu0 %vm569_vm3, %v267_v0 }
  0xcb   : > { %5754 = vmatmul.mubr.msk.f32.gmra.mrb[92].mxu1 %vm569_vm3, %v459_v1  ;;  %5468 = vmatprep.mubr.msk.f32.mxu0 %vm569_vm3, %v268_v2 }
  0xcc   : > { %5756 = vmatprep.mubr.msk.f32.mxu1 %vm569_vm3, %v460_v3 }
  0xce   : > { %5469 = vmatmul.mubr.msk.f32.gmra.mrb[94].mxu0 %vm569_vm3, %v269_v4 }
  0xcf   : > { %5757 = vmatmul.mubr.msk.f32.gmra.mrb[94].mxu1 %vm569_vm3, %v461_v5  ;;  %5471 = vmatprep.mubr.msk.f32.mxu0 %vm569_vm3, %v270_v6 }
  0xd0   : > { %5759 = vmatprep.mubr.msk.f32.mxu1 %vm569_vm3, %v462_v7 }
  0xd2   : > { %5472 = vmatmul.mubr.msk.f32.gmra.mrb[96].mxu0 %vm569_vm3, %v271_v8 }
  0xd3   : > { %5760 = vmatmul.mubr.msk.f32.gmra.mrb[96].mxu1 %vm569_vm3, %v463_v9  ;;  %5474 = vmatprep.mubr.msk.f32.mxu0 %vm569_vm3, %v272_v10  ;;  %v287_v9 = vld [vmem:[%s5986_s26 + $0x388] sm:$0xff] }
  0xd4   : > { %5762 = vmatprep.mubr.msk.f32.mxu1 %vm569_vm3, %v464_v11  ;;  %v479_v10 = vld [vmem:[%s5986_s26 + $0x988] sm:$0xff] }
  0xd6   : > { %5475 = vmatmul.mubr.msk.f32.gmra.mrb[98].mxu0 %vm569_vm3, %v273_v12 }
  0xd7   : > { %5763 = vmatmul.mubr.msk.f32.gmra.mrb[98].mxu1 %vm569_vm3, %v465_v13  ;;  %5477 = vmatprep.mubr.msk.f32.mxu0 %vm569_vm3, %v274_v14  ;;  %v288_v13 = vld [vmem:[%s5986_s26 + $0x390] sm:$0xff] }
  0xd8   : > { %5765 = vmatprep.mubr.msk.f32.mxu1 %vm569_vm3, %v466_v15  ;;  %v480_v14 = vld [vmem:[%s5986_s26 + $0x990] sm:$0xff] }
  0xda   : > { %5478 = vmatmul.mubr.msk.f32.gmra.mrb[100].mxu0 %vm569_vm3, %v275_v16 }
  0xdb   : > { %5766 = vmatmul.mubr.msk.f32.gmra.mrb[100].mxu1 %vm569_vm3, %v467_v17  ;;  %5480 = vmatprep.mubr.msk.f32.mxu0 %vm569_vm3, %v276_v18 }
  0xdc   : > { %5768 = vmatprep.mubr.msk.f32.mxu1 %vm569_vm3, %v468_v19 }
  0xde   : > { %5481 = vmatmul.mubr.msk.f32.gmra.mrb[102].mxu0 %vm569_vm3, %v277_v20 }
  0xdf   : > { %5769 = vmatmul.mubr.msk.f32.gmra.mrb[102].mxu1 %vm569_vm3, %v469_v21  ;;  %5483 = vmatprep.mubr.msk.f32.mxu0 %vm569_vm3, %v278_v22 }
  0xe0   : > { %5771 = vmatprep.mubr.msk.f32.mxu1 %vm569_vm3, %v470_v23 }
  0xe2   : > { %5484 = vmatmul.mubr.msk.f32.gmra.mrb[104].mxu0 %vm569_vm3, %v279_v24 }
  0xe3   : > { %5772 = vmatmul.mubr.msk.f32.gmra.mrb[104].mxu1 %vm569_vm3, %v471_v25  ;;  %5486 = vmatprep.mubr.msk.f32.mxu0 %vm569_vm3, %v280_v26  ;;  %v289_v25 = vld [vmem:[%s5986_s26 + $0x398] sm:$0xff] }
  0xe4   : > { %5774 = vmatprep.mubr.msk.f32.mxu1 %vm569_vm3, %v472_v27  ;;  %v481_v26 = vld [vmem:[%s5986_s26 + $0x998] sm:$0xff] }
  0xe5   : > { %v5329_v33 = vpop.f32.mrb[0].mxu0 }
  0xe6   : > { %v5617_v34 = vpop.f32.mrb[0].mxu1  ;;  %v1798_v35 = vadd.f32 %v5329_v33, %v6417_v28  ;;  %v1792_v37 = vpop.f32.mrb[1].mxu0  ;;  %5487 = vmatmul.mubr.msk.f32.gmra.mrb[106].mxu0 %vm569_vm3, %v281_v29 }
  0xe7   : > { %v2758_v36 = vadd.f32 %v5617_v34, %v6417_v28  ;;  %v2752_v38 = vpop.f32.mrb[1].mxu1  ;;  %5775 = vmatmul.mubr.msk.f32.gmra.mrb[106].mxu1 %vm569_vm3, %v473_v30  ;;  %v1793_v39 = vadd.f32 %v6417_v28, %v1792_v37  ;;  %5489 = vmatprep.mubr.msk.f32.mxu0 %vm569_vm3, %v282_v31  ;;  %v290_v30 = vld [vmem:[%s5986_s26 + $0x3a0] sm:$0xff] }
  0xe8   : > { %v2753_v40 = vadd.f32 %v6417_v28, %v2752_v38  ;;  %5777 = vmatprep.mubr.msk.f32.mxu1 %vm569_vm3, %v474_v32  ;;  %v3712_v43 = vmax.f32 %v1798_v35, 0.0  ;;  %v482_v31 = vld [vmem:[%s5986_s26 + $0x9a0] sm:$0xff] }
  0xe9   : > { %v3904_v44 = vmax.f32 %v2758_v36, 0.0  ;;  %v3711_v47 = vmax.f32 %v1793_v39, 0.0  ;;  %v5332_v49 = vpop.f32.mrb[2].mxu0 }
  0xea   : > { %v3903_v48 = vmax.f32 %v2753_v40, 0.0  ;;  %v5620_v50 = vpop.f32.mrb[2].mxu1  ;;  %4097 = vst.msk [vmem:[%s6434_s4 + $0x8] sm:$0xff] %vm4095_vm4, %v3712_v43  ;;  %v1808_v51 = vadd.f32 %v5332_v49, %v6417_v28  ;;  %v1802_v53 = vpop.f32.mrb[3].mxu0  ;;  %5490 = vmatmul.mubr.msk.f32.gmra.mrb[108].mxu0 %vm569_vm3, %v283_v41  ;;  %v483_v43 = vld [vmem:[%s5986_s26 + $0x9a8] sm:$0xff] }
  0xeb   : > { %4289 = vst.msk [vmem:[%s6434_s4 + $0x608] sm:$0xff] %vm4095_vm4, %v3904_v44  ;;  %v2768_v52 = vadd.f32 %v5620_v50, %v6417_v28  ;;  %v2762_v54 = vpop.f32.mrb[3].mxu1  ;;  %5778 = vmatmul.mubr.msk.f32.gmra.mrb[108].mxu1 %vm569_vm3, %v475_v42  ;;  %4096 = vst.msk [vmem:[%s6434_s4] sm:$0xff] %vm4095_vm4, %v3711_v47  ;;  %v1803_v55 = vadd.f32 %v6417_v28, %v1802_v53  ;;  %5492 = vmatprep.mubr.msk.f32.mxu0 %vm569_vm3, %v284_v45  ;;  %v291_v42 = vld [vmem:[%s5986_s26 + $0x3a8] sm:$0xff]  ;;  %v484_v47 = vld [vmem:[%s5986_s26 + $0x9b0] sm:$0xff] }
  0xec   : > { %4288 = vst.msk [vmem:[%s6434_s4 + $0x600] sm:$0xff] %vm4095_vm4, %v3903_v48  ;;  %v2763_v56 = vadd.f32 %v6417_v28, %v2762_v54  ;;  %5780 = vmatprep.mubr.msk.f32.mxu1 %vm569_vm3, %v476_v46  ;;  %v3714_v59 = vmax.f32 %v1808_v51, 0.0  ;;  %v292_v46 = vld [vmem:[%s5986_s26 + $0x3b0] sm:$0xff] }
  0xed   : > { %v3906_v60 = vmax.f32 %v2768_v52, 0.0  ;;  %v3713_v63 = vmax.f32 %v1803_v55, 0.0  ;;  %v5335_v1 = vpop.f32.mrb[4].mxu0 }
  0xee   : > { %v3905_v0 = vmax.f32 %v2763_v56, 0.0  ;;  %v5623_v2 = vpop.f32.mrb[4].mxu1  ;;  %4099 = vst.msk [vmem:[%s6434_s4 + $0x18] sm:$0xff] %vm4095_vm4, %v3714_v59  ;;  %v1818_v3 = vadd.f32 %v5335_v1, %v6417_v28  ;;  %v1812_v5 = vpop.f32.mrb[5].mxu0  ;;  %5493 = vmatmul.mubr.msk.f32.gmra.mrb[110].mxu0 %vm569_vm3, %v285_v57  ;;  %v485_v59 = vld [vmem:[%s5986_s26 + $0x9b8] sm:$0xff] }
  0xef   : > { %4291 = vst.msk [vmem:[%s6434_s4 + $0x618] sm:$0xff] %vm4095_vm4, %v3906_v60  ;;  %v2778_v4 = vadd.f32 %v5623_v2, %v6417_v28  ;;  %v2772_v6 = vpop.f32.mrb[5].mxu1  ;;  %5781 = vmatmul.mubr.msk.f32.gmra.mrb[110].mxu1 %vm569_vm3, %v477_v58  ;;  %4098 = vst.msk [vmem:[%s6434_s4 + $0x10] sm:$0xff] %vm4095_vm4, %v3713_v63  ;;  %v1813_v7 = vadd.f32 %v6417_v28, %v1812_v5  ;;  %5495 = vmatprep.mubr.msk.f32.mxu0 %vm569_vm3, %v286_v61  ;;  %v293_v58 = vld [vmem:[%s5986_s26 + $0x3b8] sm:$0xff]  ;;  %v486_v63 = vld [vmem:[%s5986_s26 + $0x9c0] sm:$0xff] }
  0xf0   : > { %4290 = vst.msk [vmem:[%s6434_s4 + $0x610] sm:$0xff] %vm4095_vm4, %v3905_v0  ;;  %v2773_v8 = vadd.f32 %v6417_v28, %v2772_v6  ;;  %5783 = vmatprep.mubr.msk.f32.mxu1 %vm569_vm3, %v478_v62  ;;  %v3716_v11 = vmax.f32 %v1818_v3, 0.0  ;;  %v294_v62 = vld [vmem:[%s5986_s26 + $0x3c0] sm:$0xff] }
  0xf1   : > { %v3908_v12 = vmax.f32 %v2778_v4, 0.0  ;;  %v3715_v15 = vmax.f32 %v1813_v7, 0.0  ;;  %v5338_v17 = vpop.f32.mrb[6].mxu0 }
  0xf2   : > { %v3907_v16 = vmax.f32 %v2773_v8, 0.0  ;;  %v5626_v18 = vpop.f32.mrb[6].mxu1  ;;  %4101 = vst.msk [vmem:[%s6434_s4 + $0x28] sm:$0xff] %vm4095_vm4, %v3716_v11  ;;  %v1828_v19 = vadd.f32 %v5338_v17, %v6417_v28  ;;  %v1822_v21 = vpop.f32.mrb[7].mxu0  ;;  %5496 = vmatmul.mubr.msk.f32.gmra.mrb[112].mxu0 %vm569_vm3, %v287_v9  ;;  %v487_v11 = vld [vmem:[%s5986_s26 + $0x9c8] sm:$0xff] }
  0xf3   : > { %4293 = vst.msk [vmem:[%s6434_s4 + $0x628] sm:$0xff] %vm4095_vm4, %v3908_v12  ;;  %v2788_v20 = vadd.f32 %v5626_v18, %v6417_v28  ;;  %v2782_v22 = vpop.f32.mrb[7].mxu1  ;;  %5784 = vmatmul.mubr.msk.f32.gmra.mrb[112].mxu1 %vm569_vm3, %v479_v10  ;;  %4100 = vst.msk [vmem:[%s6434_s4 + $0x20] sm:$0xff] %vm4095_vm4, %v3715_v15  ;;  %v1823_v23 = vadd.f32 %v6417_v28, %v1822_v21  ;;  %5498 = vmatprep.mubr.msk.f32.mxu0 %vm569_vm3, %v288_v13  ;;  %v295_v10 = vld [vmem:[%s5986_s26 + $0x3c8] sm:$0xff]  ;;  %v488_v15 = vld [vmem:[%s5986_s26 + $0x9d0] sm:$0xff] }
  0xf4   : > { %4292 = vst.msk [vmem:[%s6434_s4 + $0x620] sm:$0xff] %vm4095_vm4, %v3907_v16  ;;  %v2783_v24 = vadd.f32 %v6417_v28, %v2782_v22  ;;  %5786 = vmatprep.mubr.msk.f32.mxu1 %vm569_vm3, %v480_v14  ;;  %v3718_v27 = vmax.f32 %v1828_v19, 0.0  ;;  %v296_v14 = vld [vmem:[%s5986_s26 + $0x3d0] sm:$0xff] }
  0xf5   : > { %v3910_v29 = vmax.f32 %v2788_v20, 0.0  ;;  %v3717_v32 = vmax.f32 %v1823_v23, 0.0  ;;  %v5341_v34 = vpop.f32.mrb[8].mxu0 }
  0xf6   : > { %v3909_v33 = vmax.f32 %v2783_v24, 0.0  ;;  %v5629_v35 = vpop.f32.mrb[8].mxu1  ;;  %4103 = vst.msk [vmem:[%s6434_s4 + $0x38] sm:$0xff] %vm4095_vm4, %v3718_v27  ;;  %v1838_v36 = vadd.f32 %v5341_v34, %v6417_v28  ;;  %v1832_v38 = vpop.f32.mrb[9].mxu0  ;;  %5499 = vmatmul.mubr.msk.f32.gmra.mrb[114].mxu0 %vm569_vm3, %v289_v25  ;;  %v489_v27 = vld [vmem:[%s5986_s26 + $0x9d8] sm:$0xff] }
  0xf7   : > { %4295 = vst.msk [vmem:[%s6434_s4 + $0x638] sm:$0xff] %vm4095_vm4, %v3910_v29  ;;  %v2798_v37 = vadd.f32 %v5629_v35, %v6417_v28  ;;  %v2792_v39 = vpop.f32.mrb[9].mxu1  ;;  %5787 = vmatmul.mubr.msk.f32.gmra.mrb[114].mxu1 %vm569_vm3, %v481_v26  ;;  %4102 = vst.msk [vmem:[%s6434_s4 + $0x30] sm:$0xff] %vm4095_vm4, %v3717_v32  ;;  %v1833_v40 = vadd.f32 %v6417_v28, %v1832_v38  ;;  %5501 = vmatprep.mubr.msk.f32.mxu0 %vm569_vm3, %v290_v30  ;;  %v297_v26 = vld [vmem:[%s5986_s26 + $0x3d8] sm:$0xff]  ;;  %v490_v32 = vld [vmem:[%s5986_s26 + $0x9e0] sm:$0xff] }
  0xf8   : > { %4294 = vst.msk [vmem:[%s6434_s4 + $0x630] sm:$0xff] %vm4095_vm4, %v3909_v33  ;;  %v2793_v41 = vadd.f32 %v6417_v28, %v2792_v39  ;;  %5789 = vmatprep.mubr.msk.f32.mxu1 %vm569_vm3, %v482_v31  ;;  %v3720_v44 = vmax.f32 %v1838_v36, 0.0  ;;  %v298_v31 = vld [vmem:[%s5986_s26 + $0x3e0] sm:$0xff] }
  0xf9   : > { %v3912_v45 = vmax.f32 %v2798_v37, 0.0  ;;  %v3719_v48 = vmax.f32 %v1833_v40, 0.0  ;;  %v5344_v50 = vpop.f32.mrb[10].mxu0 }
  0xfa   : > { %v3911_v49 = vmax.f32 %v2793_v41, 0.0  ;;  %v5632_v51 = vpop.f32.mrb[10].mxu1  ;;  %4105 = vst.msk [vmem:[%s6434_s4 + $0x48] sm:$0xff] %vm4095_vm4, %v3720_v44  ;;  %v1848_v52 = vadd.f32 %v5344_v50, %v6417_v28  ;;  %v1842_v54 = vpop.f32.mrb[11].mxu0  ;;  %5502 = vmatmul.mubr.msk.f32.gmra.mrb[116].mxu0 %vm569_vm3, %v291_v42  ;;  %v491_v44 = vld [vmem:[%s5986_s26 + $0x9e8] sm:$0xff] }
  0xfb   : > { %4297 = vst.msk [vmem:[%s6434_s4 + $0x648] sm:$0xff] %vm4095_vm4, %v3912_v45  ;;  %v2808_v53 = vadd.f32 %v5632_v51, %v6417_v28  ;;  %v2802_v55 = vpop.f32.mrb[11].mxu1  ;;  %5790 = vmatmul.mubr.msk.f32.gmra.mrb[116].mxu1 %vm569_vm3, %v483_v43  ;;  %4104 = vst.msk [vmem:[%s6434_s4 + $0x40] sm:$0xff] %vm4095_vm4, %v3719_v48  ;;  %v1843_v56 = vadd.f32 %v6417_v28, %v1842_v54  ;;  %5504 = vmatprep.mubr.msk.f32.mxu0 %vm569_vm3, %v292_v46  ;;  %v299_v43 = vld [vmem:[%s5986_s26 + $0x3e8] sm:$0xff]  ;;  %v492_v48 = vld [vmem:[%s5986_s26 + $0x9f0] sm:$0xff] }
  0xfc   : > { %4296 = vst.msk [vmem:[%s6434_s4 + $0x640] sm:$0xff] %vm4095_vm4, %v3911_v49  ;;  %v2803_v57 = vadd.f32 %v6417_v28, %v2802_v55  ;;  %5792 = vmatprep.mubr.msk.f32.mxu1 %vm569_vm3, %v484_v47  ;;  %v3722_v60 = vmax.f32 %v1848_v52, 0.0  ;;  %v300_v47 = vld [vmem:[%s5986_s26 + $0x3f0] sm:$0xff] }
  0xfd   : > { %v3914_v61 = vmax.f32 %v2808_v53, 0.0  ;;  %v3721_v0 = vmax.f32 %v1843_v56, 0.0  ;;  %v5347_v2 = vpop.f32.mrb[12].mxu0 }
  0xfe   : > { %v3913_v1 = vmax.f32 %v2803_v57, 0.0  ;;  %v5635_v3 = vpop.f32.mrb[12].mxu1  ;;  %4107 = vst.msk [vmem:[%s6434_s4 + $0x58] sm:$0xff] %vm4095_vm4, %v3722_v60  ;;  %v1858_v4 = vadd.f32 %v5347_v2, %v6417_v28  ;;  %v1852_v6 = vpop.f32.mrb[13].mxu0  ;;  %5505 = vmatmul.mubr.msk.f32.gmra.mrb[118].mxu0 %vm569_vm3, %v293_v58  ;;  %v493_v60 = vld [vmem:[%s5986_s26 + $0x9f8] sm:$0xff] }
  0xff   : > { %4299 = vst.msk [vmem:[%s6434_s4 + $0x658] sm:$0xff] %vm4095_vm4, %v3914_v61  ;;  %v2818_v5 = vadd.f32 %v5635_v3, %v6417_v28  ;;  %v2812_v7 = vpop.f32.mrb[13].mxu1  ;;  %5793 = vmatmul.mubr.msk.f32.gmra.mrb[118].mxu1 %vm569_vm3, %v485_v59  ;;  %4106 = vst.msk [vmem:[%s6434_s4 + $0x50] sm:$0xff] %vm4095_vm4, %v3721_v0  ;;  %v1853_v8 = vadd.f32 %v6417_v28, %v1852_v6  ;;  %5507 = vmatprep.mubr.msk.f32.mxu0 %vm569_vm3, %v294_v62  ;;  %v301_v59 = vld [vmem:[%s5986_s26 + $0x3f8] sm:$0xff]  ;;  %v494_v0 = vld [vmem:[%s5986_s26 + $0xa00] sm:$0xff] }
 0x100   : > { %4298 = vst.msk [vmem:[%s6434_s4 + $0x650] sm:$0xff] %vm4095_vm4, %v3913_v1  ;;  %v2813_v9 = vadd.f32 %v6417_v28, %v2812_v7  ;;  %5795 = vmatprep.mubr.msk.f32.mxu1 %vm569_vm3, %v486_v63  ;;  %v3724_v12 = vmax.f32 %v1858_v4, 0.0  ;;  %v302_v63 = vld [vmem:[%s5986_s26 + $0x400] sm:$0xff] }
 0x101   : > { %v3916_v13 = vmax.f32 %v2818_v5, 0.0  ;;  %v3723_v16 = vmax.f32 %v1853_v8, 0.0  ;;  %v5350_v18 = vpop.f32.mrb[14].mxu0 }
 0x102   : > { %v3915_v17 = vmax.f32 %v2813_v9, 0.0  ;;  %v5638_v19 = vpop.f32.mrb[14].mxu1  ;;  %4109 = vst.msk [vmem:[%s6434_s4 + $0x68] sm:$0xff] %vm4095_vm4, %v3724_v12  ;;  %v1868_v20 = vadd.f32 %v5350_v18, %v6417_v28  ;;  %v1862_v22 = vpop.f32.mrb[15].mxu0  ;;  %5508 = vmatmul.mubr.msk.f32.gmra.mrb[120].mxu0 %vm569_vm3, %v295_v10  ;;  %v495_v12 = vld [vmem:[%s5986_s26 + $0xa08] sm:$0xff] }
 0x103   : > { %4301 = vst.msk [vmem:[%s6434_s4 + $0x668] sm:$0xff] %vm4095_vm4, %v3916_v13  ;;  %v2828_v21 = vadd.f32 %v5638_v19, %v6417_v28  ;;  %v2822_v23 = vpop.f32.mrb[15].mxu1  ;;  %5796 = vmatmul.mubr.msk.f32.gmra.mrb[120].mxu1 %vm569_vm3, %v487_v11  ;;  %4108 = vst.msk [vmem:[%s6434_s4 + $0x60] sm:$0xff] %vm4095_vm4, %v3723_v16  ;;  %v1863_v24 = vadd.f32 %v6417_v28, %v1862_v22  ;;  %5510 = vmatprep.mubr.msk.f32.mxu0 %vm569_vm3, %v296_v14  ;;  %v303_v11 = vld [vmem:[%s5986_s26 + $0x408] sm:$0xff]  ;;  %v496_v16 = vld [vmem:[%s5986_s26 + $0xa10] sm:$0xff] }
 0x104   : > { %4300 = vst.msk [vmem:[%s6434_s4 + $0x660] sm:$0xff] %vm4095_vm4, %v3915_v17  ;;  %v2823_v25 = vadd.f32 %v6417_v28, %v2822_v23  ;;  %5798 = vmatprep.mubr.msk.f32.mxu1 %vm569_vm3, %v488_v15  ;;  %v3726_v29 = vmax.f32 %v1868_v20, 0.0  ;;  %v304_v15 = vld [vmem:[%s5986_s26 + $0x410] sm:$0xff] }
 0x105   : > { %v3918_v30 = vmax.f32 %v2828_v21, 0.0  ;;  %v3725_v33 = vmax.f32 %v1863_v24, 0.0  ;;  %v5353_v35 = vpop.f32.mrb[16].mxu0 }
 0x106   : > { %v3917_v34 = vmax.f32 %v2823_v25, 0.0  ;;  %v5641_v36 = vpop.f32.mrb[16].mxu1  ;;  %4111 = vst.msk [vmem:[%s6434_s4 + $0x78] sm:$0xff] %vm4095_vm4, %v3726_v29  ;;  %v1878_v37 = vadd.f32 %v5353_v35, %v6417_v28  ;;  %v1872_v39 = vpop.f32.mrb[17].mxu0  ;;  %5511 = vmatmul.mubr.msk.f32.gmra.mrb[122].mxu0 %vm569_vm3, %v297_v26  ;;  %v497_v29 = vld [vmem:[%s5986_s26 + $0xa18] sm:$0xff] }
 0x107   : > { %4303 = vst.msk [vmem:[%s6434_s4 + $0x678] sm:$0xff] %vm4095_vm4, %v3918_v30  ;;  %v2838_v38 = vadd.f32 %v5641_v36, %v6417_v28  ;;  %v2832_v40 = vpop.f32.mrb[17].mxu1  ;;  %5799 = vmatmul.mubr.msk.f32.gmra.mrb[122].mxu1 %vm569_vm3, %v489_v27  ;;  %4110 = vst.msk [vmem:[%s6434_s4 + $0x70] sm:$0xff] %vm4095_vm4, %v3725_v33  ;;  %v1873_v41 = vadd.f32 %v6417_v28, %v1872_v39  ;;  %5513 = vmatprep.mubr.msk.f32.mxu0 %vm569_vm3, %v298_v31  ;;  %v305_v27 = vld [vmem:[%s5986_s26 + $0x418] sm:$0xff]  ;;  %v498_v33 = vld [vmem:[%s5986_s26 + $0xa20] sm:$0xff] }
 0x108   : > { %4302 = vst.msk [vmem:[%s6434_s4 + $0x670] sm:$0xff] %vm4095_vm4, %v3917_v34  ;;  %v2833_v42 = vadd.f32 %v6417_v28, %v2832_v40  ;;  %5801 = vmatprep.mubr.msk.f32.mxu1 %vm569_vm3, %v490_v32  ;;  %v3728_v45 = vmax.f32 %v1878_v37, 0.0  ;;  %v306_v32 = vld [vmem:[%s5986_s26 + $0x420] sm:$0xff] }
 0x109   : > { %v3920_v46 = vmax.f32 %v2838_v38, 0.0  ;;  %v3727_v49 = vmax.f32 %v1873_v41, 0.0  ;;  %v5356_v51 = vpop.f32.mrb[18].mxu0 }
 0x10a   : > { %v3919_v50 = vmax.f32 %v2833_v42, 0.0  ;;  %v5644_v52 = vpop.f32.mrb[18].mxu1  ;;  %4113 = vst.msk [vmem:[%s6434_s4 + $0x88] sm:$0xff] %vm4095_vm4, %v3728_v45  ;;  %v1888_v53 = vadd.f32 %v5356_v51, %v6417_v28  ;;  %v1882_v55 = vpop.f32.mrb[19].mxu0  ;;  %5514 = vmatmul.mubr.msk.f32.gmra.mrb[124].mxu0 %vm569_vm3, %v299_v43  ;;  %v499_v45 = vld [vmem:[%s5986_s26 + $0xa28] sm:$0xff] }
 0x10b   : > { %4305 = vst.msk [vmem:[%s6434_s4 + $0x688] sm:$0xff] %vm4095_vm4, %v3920_v46  ;;  %v2848_v54 = vadd.f32 %v5644_v52, %v6417_v28  ;;  %v2842_v56 = vpop.f32.mrb[19].mxu1  ;;  %5802 = vmatmul.mubr.msk.f32.gmra.mrb[124].mxu1 %vm569_vm3, %v491_v44  ;;  %4112 = vst.msk [vmem:[%s6434_s4 + $0x80] sm:$0xff] %vm4095_vm4, %v3727_v49  ;;  %v1883_v57 = vadd.f32 %v6417_v28, %v1882_v55  ;;  %5516 = vmatprep.mubr.msk.f32.mxu0 %vm569_vm3, %v300_v47  ;;  %v307_v44 = vld [vmem:[%s5986_s26 + $0x428] sm:$0xff]  ;;  %v500_v49 = vld [vmem:[%s5986_s26 + $0xa30] sm:$0xff] }
 0x10c   : > { %4304 = vst.msk [vmem:[%s6434_s4 + $0x680] sm:$0xff] %vm4095_vm4, %v3919_v50  ;;  %v2843_v58 = vadd.f32 %v6417_v28, %v2842_v56  ;;  %5804 = vmatprep.mubr.msk.f32.mxu1 %vm569_vm3, %v492_v48  ;;  %v3730_v61 = vmax.f32 %v1888_v53, 0.0  ;;  %v308_v48 = vld [vmem:[%s5986_s26 + $0x430] sm:$0xff] }
 0x10d   : > { %v3922_v62 = vmax.f32 %v2848_v54, 0.0  ;;  %v3729_v1 = vmax.f32 %v1883_v57, 0.0  ;;  %v5359_v3 = vpop.f32.mrb[20].mxu0 }
 0x10e   : > { %v3921_v2 = vmax.f32 %v2843_v58, 0.0  ;;  %v5647_v4 = vpop.f32.mrb[20].mxu1  ;;  %4115 = vst.msk [vmem:[%s6434_s4 + $0x98] sm:$0xff] %vm4095_vm4, %v3730_v61  ;;  %v1898_v5 = vadd.f32 %v5359_v3, %v6417_v28  ;;  %v1892_v7 = vpop.f32.mrb[21].mxu0  ;;  %5517 = vmatmul.mubr.msk.f32.gmra.mrb[126].mxu0 %vm569_vm3, %v301_v59  ;;  %v501_v61 = vld [vmem:[%s5986_s26 + $0xa38] sm:$0xff] }
 0x10f   : > { %4307 = vst.msk [vmem:[%s6434_s4 + $0x698] sm:$0xff] %vm4095_vm4, %v3922_v62  ;;  %v2858_v6 = vadd.f32 %v5647_v4, %v6417_v28  ;;  %v2852_v8 = vpop.f32.mrb[21].mxu1  ;;  %5805 = vmatmul.mubr.msk.f32.gmra.mrb[126].mxu1 %vm569_vm3, %v493_v60  ;;  %4114 = vst.msk [vmem:[%s6434_s4 + $0x90] sm:$0xff] %vm4095_vm4, %v3729_v1  ;;  %v1893_v9 = vadd.f32 %v6417_v28, %v1892_v7  ;;  %5519 = vmatprep.mubr.msk.f32.mxu0 %vm569_vm3, %v302_v63  ;;  %v309_v60 = vld [vmem:[%s5986_s26 + $0x438] sm:$0xff]  ;;  %v502_v1 = vld [vmem:[%s5986_s26 + $0xa40] sm:$0xff] }
 0x110   : > { %4306 = vst.msk [vmem:[%s6434_s4 + $0x690] sm:$0xff] %vm4095_vm4, %v3921_v2  ;;  %v2853_v10 = vadd.f32 %v6417_v28, %v2852_v8  ;;  %5807 = vmatprep.mubr.msk.f32.mxu1 %vm569_vm3, %v494_v0  ;;  %v3732_v13 = vmax.f32 %v1898_v5, 0.0  ;;  %v310_v0 = vld [vmem:[%s5986_s26 + $0x440] sm:$0xff] }
 0x111   : > { %v3924_v14 = vmax.f32 %v2858_v6, 0.0  ;;  %v3731_v17 = vmax.f32 %v1893_v9, 0.0  ;;  %v5362_v19 = vpop.f32.mrb[22].mxu0 }
 0x112   : > { %v3923_v18 = vmax.f32 %v2853_v10, 0.0  ;;  %v5650_v20 = vpop.f32.mrb[22].mxu1  ;;  %4117 = vst.msk [vmem:[%s6434_s4 + $0xa8] sm:$0xff] %vm4095_vm4, %v3732_v13  ;;  %v1908_v21 = vadd.f32 %v5362_v19, %v6417_v28  ;;  %v1902_v23 = vpop.f32.mrb[23].mxu0  ;;  %5520 = vmatmul.mubr.msk.f32.gmra.mrb[128].mxu0 %vm569_vm3, %v303_v11  ;;  %v503_v13 = vld [vmem:[%s5986_s26 + $0xa48] sm:$0xff] }
 0x113   : > { %4309 = vst.msk [vmem:[%s6434_s4 + $0x6a8] sm:$0xff] %vm4095_vm4, %v3924_v14  ;;  %v2868_v22 = vadd.f32 %v5650_v20, %v6417_v28  ;;  %v2862_v24 = vpop.f32.mrb[23].mxu1  ;;  %5808 = vmatmul.mubr.msk.f32.gmra.mrb[128].mxu1 %vm569_vm3, %v495_v12  ;;  %4116 = vst.msk [vmem:[%s6434_s4 + $0xa0] sm:$0xff] %vm4095_vm4, %v3731_v17  ;;  %v1903_v25 = vadd.f32 %v6417_v28, %v1902_v23  ;;  %5522 = vmatprep.mubr.msk.f32.mxu0 %vm569_vm3, %v304_v15  ;;  %v311_v12 = vld [vmem:[%s5986_s26 + $0x448] sm:$0xff]  ;;  %v504_v17 = vld [vmem:[%s5986_s26 + $0xa50] sm:$0xff] }
 0x114   : > { %4308 = vst.msk [vmem:[%s6434_s4 + $0x6a0] sm:$0xff] %vm4095_vm4, %v3923_v18  ;;  %v2863_v26 = vadd.f32 %v6417_v28, %v2862_v24  ;;  %5810 = vmatprep.mubr.msk.f32.mxu1 %vm569_vm3, %v496_v16  ;;  %v3734_v30 = vmax.f32 %v1908_v21, 0.0  ;;  %v312_v16 = vld [vmem:[%s5986_s26 + $0x450] sm:$0xff] }
 0x115   : > { %v3926_v31 = vmax.f32 %v2868_v22, 0.0  ;;  %v3733_v34 = vmax.f32 %v1903_v25, 0.0  ;;  %v5365_v36 = vpop.f32.mrb[24].mxu0 }
 0x116   : > { %v3925_v35 = vmax.f32 %v2863_v26, 0.0  ;;  %v5653_v37 = vpop.f32.mrb[24].mxu1  ;;  %4119 = vst.msk [vmem:[%s6434_s4 + $0xb8] sm:$0xff] %vm4095_vm4, %v3734_v30  ;;  %v1918_v38 = vadd.f32 %v5365_v36, %v6417_v28  ;;  %v1912_v40 = vpop.f32.mrb[25].mxu0  ;;  %5523 = vmatmul.mubr.msk.f32.gmra.mrb[130].mxu0 %vm569_vm3, %v305_v27  ;;  %v505_v30 = vld [vmem:[%s5986_s26 + $0xa58] sm:$0xff] }
 0x117   : > { %4311 = vst.msk [vmem:[%s6434_s4 + $0x6b8] sm:$0xff] %vm4095_vm4, %v3926_v31  ;;  %v2878_v39 = vadd.f32 %v5653_v37, %v6417_v28  ;;  %v2872_v41 = vpop.f32.mrb[25].mxu1  ;;  %5811 = vmatmul.mubr.msk.f32.gmra.mrb[130].mxu1 %vm569_vm3, %v497_v29  ;;  %4118 = vst.msk [vmem:[%s6434_s4 + $0xb0] sm:$0xff] %vm4095_vm4, %v3733_v34  ;;  %v1913_v42 = vadd.f32 %v6417_v28, %v1912_v40  ;;  %5525 = vmatprep.mubr.msk.f32.mxu0 %vm569_vm3, %v306_v32  ;;  %v313_v29 = vld [vmem:[%s5986_s26 + $0x458] sm:$0xff]  ;;  %v506_v34 = vld [vmem:[%s5986_s26 + $0xa60] sm:$0xff] }
 0x118   : > { %4310 = vst.msk [vmem:[%s6434_s4 + $0x6b0] sm:$0xff] %vm4095_vm4, %v3925_v35  ;;  %v2873_v43 = vadd.f32 %v6417_v28, %v2872_v41  ;;  %5813 = vmatprep.mubr.msk.f32.mxu1 %vm569_vm3, %v498_v33  ;;  %v3736_v46 = vmax.f32 %v1918_v38, 0.0  ;;  %v314_v33 = vld [vmem:[%s5986_s26 + $0x460] sm:$0xff] }
 0x119   : > { %v3928_v47 = vmax.f32 %v2878_v39, 0.0  ;;  %v3735_v50 = vmax.f32 %v1913_v42, 0.0  ;;  %v5368_v52 = vpop.f32.mrb[26].mxu0 }
 0x11a   : > { %v3927_v51 = vmax.f32 %v2873_v43, 0.0  ;;  %v5656_v53 = vpop.f32.mrb[26].mxu1  ;;  %4121 = vst.msk [vmem:[%s6434_s4 + $0xc8] sm:$0xff] %vm4095_vm4, %v3736_v46  ;;  %v1928_v54 = vadd.f32 %v5368_v52, %v6417_v28  ;;  %v1922_v56 = vpop.f32.mrb[27].mxu0  ;;  %5526 = vmatmul.mubr.msk.f32.gmra.mrb[132].mxu0 %vm569_vm3, %v307_v44  ;;  %v507_v46 = vld [vmem:[%s5986_s26 + $0xa68] sm:$0xff] }
 0x11b   : > { %4313 = vst.msk [vmem:[%s6434_s4 + $0x6c8] sm:$0xff] %vm4095_vm4, %v3928_v47  ;;  %v2888_v55 = vadd.f32 %v5656_v53, %v6417_v28  ;;  %v2882_v57 = vpop.f32.mrb[27].mxu1  ;;  %5814 = vmatmul.mubr.msk.f32.gmra.mrb[132].mxu1 %vm569_vm3, %v499_v45  ;;  %4120 = vst.msk [vmem:[%s6434_s4 + $0xc0] sm:$0xff] %vm4095_vm4, %v3735_v50  ;;  %v1923_v58 = vadd.f32 %v6417_v28, %v1922_v56  ;;  %5528 = vmatprep.mubr.msk.f32.mxu0 %vm569_vm3, %v308_v48  ;;  %v315_v45 = vld [vmem:[%s5986_s26 + $0x468] sm:$0xff]  ;;  %v508_v50 = vld [vmem:[%s5986_s26 + $0xa70] sm:$0xff] }
 0x11c   : > { %4312 = vst.msk [vmem:[%s6434_s4 + $0x6c0] sm:$0xff] %vm4095_vm4, %v3927_v51  ;;  %v2883_v59 = vadd.f32 %v6417_v28, %v2882_v57  ;;  %5816 = vmatprep.mubr.msk.f32.mxu1 %vm569_vm3, %v500_v49  ;;  %v3738_v62 = vmax.f32 %v1928_v54, 0.0  ;;  %v316_v49 = vld [vmem:[%s5986_s26 + $0x470] sm:$0xff] }
 0x11d   : > { %v3930_v63 = vmax.f32 %v2888_v55, 0.0  ;;  %v3737_v2 = vmax.f32 %v1923_v58, 0.0  ;;  %v5371_v4 = vpop.f32.mrb[28].mxu0 }
 0x11e   : > { %v3929_v3 = vmax.f32 %v2883_v59, 0.0  ;;  %v5659_v5 = vpop.f32.mrb[28].mxu1  ;;  %4123 = vst.msk [vmem:[%s6434_s4 + $0xd8] sm:$0xff] %vm4095_vm4, %v3738_v62  ;;  %v1938_v6 = vadd.f32 %v5371_v4, %v6417_v28  ;;  %v1932_v8 = vpop.f32.mrb[29].mxu0  ;;  %5529 = vmatmul.mubr.msk.f32.gmra.mrb[134].mxu0 %vm569_vm3, %v309_v60  ;;  %v509_v62 = vld [vmem:[%s5986_s26 + $0xa78] sm:$0xff] }
 0x11f   : > { %4315 = vst.msk [vmem:[%s6434_s4 + $0x6d8] sm:$0xff] %vm4095_vm4, %v3930_v63  ;;  %v2898_v7 = vadd.f32 %v5659_v5, %v6417_v28  ;;  %v2892_v9 = vpop.f32.mrb[29].mxu1  ;;  %5817 = vmatmul.mubr.msk.f32.gmra.mrb[134].mxu1 %vm569_vm3, %v501_v61  ;;  %4122 = vst.msk [vmem:[%s6434_s4 + $0xd0] sm:$0xff] %vm4095_vm4, %v3737_v2  ;;  %v1933_v10 = vadd.f32 %v6417_v28, %v1932_v8  ;;  %5531 = vmatprep.mubr.msk.f32.mxu0 %vm569_vm3, %v310_v0  ;;  %v317_v61 = vld [vmem:[%s5986_s26 + $0x478] sm:$0xff]  ;;  %v510_v2 = vld [vmem:[%s5986_s26 + $0xa80] sm:$0xff] }
 0x120   : > { %4314 = vst.msk [vmem:[%s6434_s4 + $0x6d0] sm:$0xff] %vm4095_vm4, %v3929_v3  ;;  %v2893_v11 = vadd.f32 %v6417_v28, %v2892_v9  ;;  %5819 = vmatprep.mubr.msk.f32.mxu1 %vm569_vm3, %v502_v1  ;;  %v3740_v14 = vmax.f32 %v1938_v6, 0.0  ;;  %v318_v1 = vld [vmem:[%s5986_s26 + $0x480] sm:$0xff] }
 0x121   : > { %v3932_v15 = vmax.f32 %v2898_v7, 0.0  ;;  %v3739_v18 = vmax.f32 %v1933_v10, 0.0  ;;  %v5374_v20 = vpop.f32.mrb[30].mxu0 }
 0x122   : > { %v3931_v19 = vmax.f32 %v2893_v11, 0.0  ;;  %v5662_v21 = vpop.f32.mrb[30].mxu1  ;;  %4125 = vst.msk [vmem:[%s6434_s4 + $0xe8] sm:$0xff] %vm4095_vm4, %v3740_v14  ;;  %v1948_v22 = vadd.f32 %v5374_v20, %v6417_v28  ;;  %v1942_v24 = vpop.f32.mrb[31].mxu0  ;;  %5532 = vmatmul.mubr.msk.f32.gmra.mrb[136].mxu0 %vm569_vm3, %v311_v12  ;;  %v511_v14 = vld [vmem:[%s5986_s26 + $0xa88] sm:$0xff] }
 0x123   : > { %4317 = vst.msk [vmem:[%s6434_s4 + $0x6e8] sm:$0xff] %vm4095_vm4, %v3932_v15  ;;  %v2908_v23 = vadd.f32 %v5662_v21, %v6417_v28  ;;  %v2902_v25 = vpop.f32.mrb[31].mxu1  ;;  %5820 = vmatmul.mubr.msk.f32.gmra.mrb[136].mxu1 %vm569_vm3, %v503_v13  ;;  %4124 = vst.msk [vmem:[%s6434_s4 + $0xe0] sm:$0xff] %vm4095_vm4, %v3739_v18  ;;  %v1943_v26 = vadd.f32 %v6417_v28, %v1942_v24  ;;  %5534 = vmatprep.mubr.msk.f32.mxu0 %vm569_vm3, %v312_v16  ;;  %v319_v13 = vld [vmem:[%s5986_s26 + $0x488] sm:$0xff]  ;;  %v512_v18 = vld [vmem:[%s5986_s26 + $0xa90] sm:$0xff] }
 0x124   : > { %4316 = vst.msk [vmem:[%s6434_s4 + $0x6e0] sm:$0xff] %vm4095_vm4, %v3931_v19  ;;  %v2903_v27 = vadd.f32 %v6417_v28, %v2902_v25  ;;  %5822 = vmatprep.mubr.msk.f32.mxu1 %vm569_vm3, %v504_v17  ;;  %v3742_v31 = vmax.f32 %v1948_v22, 0.0  ;;  %v320_v17 = vld [vmem:[%s5986_s26 + $0x490] sm:$0xff] }
 0x125   : > { %v3934_v32 = vmax.f32 %v2908_v23, 0.0  ;;  %v3741_v35 = vmax.f32 %v1943_v26, 0.0  ;;  %v5377_v37 = vpop.f32.mrb[32].mxu0 }
 0x126   : > { %v3933_v36 = vmax.f32 %v2903_v27, 0.0  ;;  %v5665_v38 = vpop.f32.mrb[32].mxu1  ;;  %4127 = vst.msk [vmem:[%s6434_s4 + $0xf8] sm:$0xff] %vm4095_vm4, %v3742_v31  ;;  %v1958_v39 = vadd.f32 %v5377_v37, %v6417_v28  ;;  %v1952_v41 = vpop.f32.mrb[33].mxu0  ;;  %5535 = vmatmul.mubr.msk.f32.gmra.mrb[138].mxu0 %vm569_vm3, %v313_v29  ;;  %v513_v31 = vld [vmem:[%s5986_s26 + $0xa98] sm:$0xff] }
 0x127   : > { %4319 = vst.msk [vmem:[%s6434_s4 + $0x6f8] sm:$0xff] %vm4095_vm4, %v3934_v32  ;;  %v2918_v40 = vadd.f32 %v5665_v38, %v6417_v28  ;;  %v2912_v42 = vpop.f32.mrb[33].mxu1  ;;  %5823 = vmatmul.mubr.msk.f32.gmra.mrb[138].mxu1 %vm569_vm3, %v505_v30  ;;  %4126 = vst.msk [vmem:[%s6434_s4 + $0xf0] sm:$0xff] %vm4095_vm4, %v3741_v35  ;;  %v1953_v43 = vadd.f32 %v6417_v28, %v1952_v41  ;;  %5537 = vmatprep.mubr.msk.f32.mxu0 %vm569_vm3, %v314_v33  ;;  %v321_v30 = vld [vmem:[%s5986_s26 + $0x498] sm:$0xff]  ;;  %v514_v35 = vld [vmem:[%s5986_s26 + $0xaa0] sm:$0xff] }
 0x128   : > { %4318 = vst.msk [vmem:[%s6434_s4 + $0x6f0] sm:$0xff] %vm4095_vm4, %v3933_v36  ;;  %v2913_v44 = vadd.f32 %v6417_v28, %v2912_v42  ;;  %5825 = vmatprep.mubr.msk.f32.mxu1 %vm569_vm3, %v506_v34  ;;  %v3744_v47 = vmax.f32 %v1958_v39, 0.0  ;;  %v322_v34 = vld [vmem:[%s5986_s26 + $0x4a0] sm:$0xff] }
 0x129   : > { %v3936_v48 = vmax.f32 %v2918_v40, 0.0  ;;  %v3743_v51 = vmax.f32 %v1953_v43, 0.0  ;;  %v5380_v53 = vpop.f32.mrb[34].mxu0 }
 0x12a   : > { %v3935_v52 = vmax.f32 %v2913_v44, 0.0  ;;  %v5668_v54 = vpop.f32.mrb[34].mxu1  ;;  %4129 = vst.msk [vmem:[%s6434_s4 + $0x108] sm:$0xff] %vm4095_vm4, %v3744_v47  ;;  %v1968_v55 = vadd.f32 %v5380_v53, %v6417_v28  ;;  %v1962_v57 = vpop.f32.mrb[35].mxu0  ;;  %5538 = vmatmul.mubr.msk.f32.gmra.mrb[140].mxu0 %vm569_vm3, %v315_v45  ;;  %v515_v47 = vld [vmem:[%s5986_s26 + $0xaa8] sm:$0xff] }
 0x12b   : > { %4321 = vst.msk [vmem:[%s6434_s4 + $0x708] sm:$0xff] %vm4095_vm4, %v3936_v48  ;;  %v2928_v56 = vadd.f32 %v5668_v54, %v6417_v28  ;;  %v2922_v58 = vpop.f32.mrb[35].mxu1  ;;  %5826 = vmatmul.mubr.msk.f32.gmra.mrb[140].mxu1 %vm569_vm3, %v507_v46  ;;  %4128 = vst.msk [vmem:[%s6434_s4 + $0x100] sm:$0xff] %vm4095_vm4, %v3743_v51  ;;  %v1963_v59 = vadd.f32 %v6417_v28, %v1962_v57  ;;  %5540 = vmatprep.mubr.msk.f32.mxu0 %vm569_vm3, %v316_v49  ;;  %v323_v46 = vld [vmem:[%s5986_s26 + $0x4a8] sm:$0xff]  ;;  %v516_v51 = vld [vmem:[%s5986_s26 + $0xab0] sm:$0xff] }
 0x12c   : > { %4320 = vst.msk [vmem:[%s6434_s4 + $0x700] sm:$0xff] %vm4095_vm4, %v3935_v52  ;;  %v2923_v60 = vadd.f32 %v6417_v28, %v2922_v58  ;;  %5828 = vmatprep.mubr.msk.f32.mxu1 %vm569_vm3, %v508_v50  ;;  %v3746_v63 = vmax.f32 %v1968_v55, 0.0  ;;  %v324_v50 = vld [vmem:[%s5986_s26 + $0x4b0] sm:$0xff] }
 0x12d   : > { %v3938_v0 = vmax.f32 %v2928_v56, 0.0  ;;  %v3745_v3 = vmax.f32 %v1963_v59, 0.0  ;;  %v5383_v5 = vpop.f32.mrb[36].mxu0 }
 0x12e   : > { %v3937_v4 = vmax.f32 %v2923_v60, 0.0  ;;  %v5671_v6 = vpop.f32.mrb[36].mxu1  ;;  %4131 = vst.msk [vmem:[%s6434_s4 + $0x118] sm:$0xff] %vm4095_vm4, %v3746_v63  ;;  %v1978_v7 = vadd.f32 %v5383_v5, %v6417_v28  ;;  %v1972_v9 = vpop.f32.mrb[37].mxu0  ;;  %5541 = vmatmul.mubr.msk.f32.gmra.mrb[142].mxu0 %vm569_vm3, %v317_v61  ;;  %v517_v63 = vld [vmem:[%s5986_s26 + $0xab8] sm:$0xff] }
 0x12f   : > { %4323 = vst.msk [vmem:[%s6434_s4 + $0x718] sm:$0xff] %vm4095_vm4, %v3938_v0  ;;  %v2938_v8 = vadd.f32 %v5671_v6, %v6417_v28  ;;  %v2932_v10 = vpop.f32.mrb[37].mxu1  ;;  %5829 = vmatmul.mubr.msk.f32.gmra.mrb[142].mxu1 %vm569_vm3, %v509_v62  ;;  %4130 = vst.msk [vmem:[%s6434_s4 + $0x110] sm:$0xff] %vm4095_vm4, %v3745_v3  ;;  %v1973_v11 = vadd.f32 %v6417_v28, %v1972_v9  ;;  %5543 = vmatprep.mubr.msk.f32.mxu0 %vm569_vm3, %v318_v1  ;;  %v325_v62 = vld [vmem:[%s5986_s26 + $0x4b8] sm:$0xff]  ;;  %v518_v3 = vld [vmem:[%s5986_s26 + $0xac0] sm:$0xff] }
 0x130   : > { %4322 = vst.msk [vmem:[%s6434_s4 + $0x710] sm:$0xff] %vm4095_vm4, %v3937_v4  ;;  %v2933_v12 = vadd.f32 %v6417_v28, %v2932_v10  ;;  %5831 = vmatprep.mubr.msk.f32.mxu1 %vm569_vm3, %v510_v2  ;;  %v3748_v15 = vmax.f32 %v1978_v7, 0.0  ;;  %v326_v2 = vld [vmem:[%s5986_s26 + $0x4c0] sm:$0xff] }
 0x131   : > { %v3940_v16 = vmax.f32 %v2938_v8, 0.0  ;;  %v3747_v19 = vmax.f32 %v1973_v11, 0.0  ;;  %v5386_v21 = vpop.f32.mrb[38].mxu0 }
 0x132   : > { %v3939_v20 = vmax.f32 %v2933_v12, 0.0  ;;  %v5674_v22 = vpop.f32.mrb[38].mxu1  ;;  %4133 = vst.msk [vmem:[%s6434_s4 + $0x128] sm:$0xff] %vm4095_vm4, %v3748_v15  ;;  %v1988_v23 = vadd.f32 %v5386_v21, %v6417_v28  ;;  %v1982_v25 = vpop.f32.mrb[39].mxu0  ;;  %5544 = vmatmul.mubr.msk.f32.gmra.mrb[144].mxu0 %vm569_vm3, %v319_v13  ;;  %v519_v15 = vld [vmem:[%s5986_s26 + $0xac8] sm:$0xff] }
 0x133   : > { %4325 = vst.msk [vmem:[%s6434_s4 + $0x728] sm:$0xff] %vm4095_vm4, %v3940_v16  ;;  %v2948_v24 = vadd.f32 %v5674_v22, %v6417_v28  ;;  %v2942_v26 = vpop.f32.mrb[39].mxu1  ;;  %5832 = vmatmul.mubr.msk.f32.gmra.mrb[144].mxu1 %vm569_vm3, %v511_v14  ;;  %4132 = vst.msk [vmem:[%s6434_s4 + $0x120] sm:$0xff] %vm4095_vm4, %v3747_v19  ;;  %v1983_v27 = vadd.f32 %v6417_v28, %v1982_v25  ;;  %5546 = vmatprep.mubr.msk.f32.mxu0 %vm569_vm3, %v320_v17  ;;  %v327_v14 = vld [vmem:[%s5986_s26 + $0x4c8] sm:$0xff]  ;;  %v520_v19 = vld [vmem:[%s5986_s26 + $0xad0] sm:$0xff] }
 0x134   : > { %4324 = vst.msk [vmem:[%s6434_s4 + $0x720] sm:$0xff] %vm4095_vm4, %v3939_v20  ;;  %v2943_v29 = vadd.f32 %v6417_v28, %v2942_v26  ;;  %5834 = vmatprep.mubr.msk.f32.mxu1 %vm569_vm3, %v512_v18  ;;  %v3750_v32 = vmax.f32 %v1988_v23, 0.0  ;;  %v328_v18 = vld [vmem:[%s5986_s26 + $0x4d0] sm:$0xff] }
 0x135   : > { %v3942_v33 = vmax.f32 %v2948_v24, 0.0  ;;  %v3749_v36 = vmax.f32 %v1983_v27, 0.0  ;;  %v5389_v38 = vpop.f32.mrb[40].mxu0 }
 0x136   : > { %v3941_v37 = vmax.f32 %v2943_v29, 0.0  ;;  %v5677_v39 = vpop.f32.mrb[40].mxu1  ;;  %4135 = vst.msk [vmem:[%s6434_s4 + $0x138] sm:$0xff] %vm4095_vm4, %v3750_v32  ;;  %v1998_v40 = vadd.f32 %v5389_v38, %v6417_v28  ;;  %v1992_v42 = vpop.f32.mrb[41].mxu0  ;;  %5547 = vmatmul.mubr.msk.f32.gmra.mrb[146].mxu0 %vm569_vm3, %v321_v30  ;;  %v521_v32 = vld [vmem:[%s5986_s26 + $0xad8] sm:$0xff] }
 0x137   : > { %4327 = vst.msk [vmem:[%s6434_s4 + $0x738] sm:$0xff] %vm4095_vm4, %v3942_v33  ;;  %v2958_v41 = vadd.f32 %v5677_v39, %v6417_v28  ;;  %v2952_v43 = vpop.f32.mrb[41].mxu1  ;;  %5835 = vmatmul.mubr.msk.f32.gmra.mrb[146].mxu1 %vm569_vm3, %v513_v31  ;;  %4134 = vst.msk [vmem:[%s6434_s4 + $0x130] sm:$0xff] %vm4095_vm4, %v3749_v36  ;;  %v1993_v44 = vadd.f32 %v6417_v28, %v1992_v42  ;;  %5549 = vmatprep.mubr.msk.f32.mxu0 %vm569_vm3, %v322_v34  ;;  %v329_v31 = vld [vmem:[%s5986_s26 + $0x4d8] sm:$0xff]  ;;  %v522_v36 = vld [vmem:[%s5986_s26 + $0xae0] sm:$0xff] }
 0x138   : > { %4326 = vst.msk [vmem:[%s6434_s4 + $0x730] sm:$0xff] %vm4095_vm4, %v3941_v37  ;;  %v2953_v45 = vadd.f32 %v6417_v28, %v2952_v43  ;;  %5837 = vmatprep.mubr.msk.f32.mxu1 %vm569_vm3, %v514_v35  ;;  %v3752_v48 = vmax.f32 %v1998_v40, 0.0  ;;  %v6851_v28 = vld [vmem:[%s7940_s2] ss:$0 sm:$0xff] }
 0x139   : > { %v3944_v49 = vmax.f32 %v2958_v41, 0.0  ;;  %v3751_v52 = vmax.f32 %v1993_v44, 0.0  ;;  %v5392_v54 = vpop.f32.mrb[42].mxu0  ;;  %v330_v35 = vld [vmem:[%s5986_s26 + $0x4e0] sm:$0xff] }
 0x13a   : > { %v3943_v53 = vmax.f32 %v2953_v45, 0.0  ;;  %v5680_v55 = vpop.f32.mrb[42].mxu1  ;;  %4137 = vst.msk [vmem:[%s6434_s4 + $0x148] sm:$0xff] %vm4095_vm4, %v3752_v48  ;;  %v2008_v56 = vadd.f32 %v6851_v28, %v5392_v54  ;;  %v2002_v58 = vpop.f32.mrb[43].mxu0  ;;  %5550 = vmatmul.mubr.msk.f32.gmra.mrb[148].mxu0 %vm569_vm3, %v323_v46  ;;  %v523_v48 = vld [vmem:[%s5986_s26 + $0xae8] sm:$0xff] }
 0x13b   : > { %4329 = vst.msk [vmem:[%s6434_s4 + $0x748] sm:$0xff] %vm4095_vm4, %v3944_v49  ;;  %v2968_v57 = vadd.f32 %v6851_v28, %v5680_v55  ;;  %v2962_v59 = vpop.f32.mrb[43].mxu1  ;;  %5838 = vmatmul.mubr.msk.f32.gmra.mrb[148].mxu1 %vm569_vm3, %v515_v47  ;;  %4136 = vst.msk [vmem:[%s6434_s4 + $0x140] sm:$0xff] %vm4095_vm4, %v3751_v52  ;;  %v2003_v60 = vadd.f32 %v6851_v28, %v2002_v58  ;;  %5552 = vmatprep.mubr.msk.f32.mxu0 %vm569_vm3, %v324_v50  ;;  %v331_v47 = vld [vmem:[%s5986_s26 + $0x4e8] sm:$0xff]  ;;  %v524_v52 = vld [vmem:[%s5986_s26 + $0xaf0] sm:$0xff] }
 0x13c   : > { %4328 = vst.msk [vmem:[%s6434_s4 + $0x740] sm:$0xff] %vm4095_vm4, %v3943_v53  ;;  %v2963_v61 = vadd.f32 %v6851_v28, %v2962_v59  ;;  %5840 = vmatprep.mubr.msk.f32.mxu1 %vm569_vm3, %v516_v51  ;;  %v3754_v0 = vmax.f32 %v2008_v56, 0.0  ;;  %v332_v51 = vld [vmem:[%s5986_s26 + $0x4f0] sm:$0xff] }
 0x13d   : > { %v3946_v1 = vmax.f32 %v2968_v57, 0.0  ;;  %v3753_v4 = vmax.f32 %v2003_v60, 0.0  ;;  %v5395_v6 = vpop.f32.mrb[44].mxu0 }
 0x13e   : > { %v3945_v5 = vmax.f32 %v2963_v61, 0.0  ;;  %v5683_v7 = vpop.f32.mrb[44].mxu1  ;;  %4139 = vst.msk [vmem:[%s6434_s4 + $0x158] sm:$0xff] %vm4095_vm4, %v3754_v0  ;;  %v2018_v8 = vadd.f32 %v6851_v28, %v5395_v6  ;;  %v2012_v10 = vpop.f32.mrb[45].mxu0  ;;  %5553 = vmatmul.mubr.msk.f32.gmra.mrb[150].mxu0 %vm569_vm3, %v325_v62  ;;  %v525_v0 = vld [vmem:[%s5986_s26 + $0xaf8] sm:$0xff] }
 0x13f   : > { %4331 = vst.msk [vmem:[%s6434_s4 + $0x758] sm:$0xff] %vm4095_vm4, %v3946_v1  ;;  %v2978_v9 = vadd.f32 %v6851_v28, %v5683_v7  ;;  %v2972_v11 = vpop.f32.mrb[45].mxu1  ;;  %5841 = vmatmul.mubr.msk.f32.gmra.mrb[150].mxu1 %vm569_vm3, %v517_v63  ;;  %4138 = vst.msk [vmem:[%s6434_s4 + $0x150] sm:$0xff] %vm4095_vm4, %v3753_v4  ;;  %v2013_v12 = vadd.f32 %v6851_v28, %v2012_v10  ;;  %5555 = vmatprep.mubr.msk.f32.mxu0 %vm569_vm3, %v326_v2  ;;  %v333_v63 = vld [vmem:[%s5986_s26 + $0x4f8] sm:$0xff]  ;;  %v526_v4 = vld [vmem:[%s5986_s26 + $0xb00] sm:$0xff] }
 0x140   : > { %4330 = vst.msk [vmem:[%s6434_s4 + $0x750] sm:$0xff] %vm4095_vm4, %v3945_v5  ;;  %v2973_v13 = vadd.f32 %v6851_v28, %v2972_v11  ;;  %5843 = vmatprep.mubr.msk.f32.mxu1 %vm569_vm3, %v518_v3  ;;  %v3756_v16 = vmax.f32 %v2018_v8, 0.0  ;;  %v334_v3 = vld [vmem:[%s5986_s26 + $0x500] sm:$0xff] }
 0x141   : > { %v3948_v17 = vmax.f32 %v2978_v9, 0.0  ;;  %v3755_v20 = vmax.f32 %v2013_v12, 0.0  ;;  %v5398_v22 = vpop.f32.mrb[46].mxu0 }
 0x142   : > { %v3947_v21 = vmax.f32 %v2973_v13, 0.0  ;;  %v5686_v23 = vpop.f32.mrb[46].mxu1  ;;  %4141 = vst.msk [vmem:[%s6434_s4 + $0x168] sm:$0xff] %vm4095_vm4, %v3756_v16  ;;  %v2028_v24 = vadd.f32 %v6851_v28, %v5398_v22  ;;  %v2022_v26 = vpop.f32.mrb[47].mxu0  ;;  %5556 = vmatmul.mubr.msk.f32.gmra.mrb[152].mxu0 %vm569_vm3, %v327_v14  ;;  %v527_v16 = vld [vmem:[%s5986_s26 + $0xb08] sm:$0xff] }
 0x143   : > { %4333 = vst.msk [vmem:[%s6434_s4 + $0x768] sm:$0xff] %vm4095_vm4, %v3948_v17  ;;  %v2988_v25 = vadd.f32 %v6851_v28, %v5686_v23  ;;  %v2982_v27 = vpop.f32.mrb[47].mxu1  ;;  %5844 = vmatmul.mubr.msk.f32.gmra.mrb[152].mxu1 %vm569_vm3, %v519_v15  ;;  %4140 = vst.msk [vmem:[%s6434_s4 + $0x160] sm:$0xff] %vm4095_vm4, %v3755_v20  ;;  %v2023_v29 = vadd.f32 %v6851_v28, %v2022_v26  ;;  %5558 = vmatprep.mubr.msk.f32.mxu0 %vm569_vm3, %v328_v18  ;;  %v335_v15 = vld [vmem:[%s5986_s26 + $0x508] sm:$0xff]  ;;  %v528_v20 = vld [vmem:[%s5986_s26 + $0xb10] sm:$0xff] }
 0x144   : > { %4332 = vst.msk [vmem:[%s6434_s4 + $0x760] sm:$0xff] %vm4095_vm4, %v3947_v21  ;;  %v2983_v30 = vadd.f32 %v6851_v28, %v2982_v27  ;;  %5846 = vmatprep.mubr.msk.f32.mxu1 %vm569_vm3, %v520_v19  ;;  %v3758_v33 = vmax.f32 %v2028_v24, 0.0  ;;  %v336_v19 = vld [vmem:[%s5986_s26 + $0x510] sm:$0xff] }
 0x145   : > { %v3950_v34 = vmax.f32 %v2988_v25, 0.0  ;;  %v3757_v37 = vmax.f32 %v2023_v29, 0.0  ;;  %v5401_v39 = vpop.f32.mrb[48].mxu0 }
 0x146   : > { %v3949_v38 = vmax.f32 %v2983_v30, 0.0  ;;  %v5689_v40 = vpop.f32.mrb[48].mxu1  ;;  %4143 = vst.msk [vmem:[%s6434_s4 + $0x178] sm:$0xff] %vm4095_vm4, %v3758_v33  ;;  %v2038_v41 = vadd.f32 %v6851_v28, %v5401_v39  ;;  %v2032_v43 = vpop.f32.mrb[49].mxu0  ;;  %5559 = vmatmul.mubr.msk.f32.gmra.mrb[154].mxu0 %vm569_vm3, %v329_v31  ;;  %v529_v33 = vld [vmem:[%s5986_s26 + $0xb18] sm:$0xff] }
 0x147   : > { %4335 = vst.msk [vmem:[%s6434_s4 + $0x778] sm:$0xff] %vm4095_vm4, %v3950_v34  ;;  %v2998_v42 = vadd.f32 %v6851_v28, %v5689_v40  ;;  %v2992_v44 = vpop.f32.mrb[49].mxu1  ;;  %5847 = vmatmul.mubr.msk.f32.gmra.mrb[154].mxu1 %vm569_vm3, %v521_v32  ;;  %4142 = vst.msk [vmem:[%s6434_s4 + $0x170] sm:$0xff] %vm4095_vm4, %v3757_v37  ;;  %v2033_v45 = vadd.f32 %v6851_v28, %v2032_v43  ;;  %5561 = vmatprep.mubr.msk.f32.mxu0 %vm569_vm3, %v330_v35  ;;  %v337_v32 = vld [vmem:[%s5986_s26 + $0x518] sm:$0xff]  ;;  %v530_v37 = vld [vmem:[%s5986_s26 + $0xb20] sm:$0xff] }
 0x148   : > { %4334 = vst.msk [vmem:[%s6434_s4 + $0x770] sm:$0xff] %vm4095_vm4, %v3949_v38  ;;  %v2993_v46 = vadd.f32 %v6851_v28, %v2992_v44  ;;  %5849 = vmatprep.mubr.msk.f32.mxu1 %vm569_vm3, %v522_v36  ;;  %v3760_v49 = vmax.f32 %v2038_v41, 0.0  ;;  %v338_v36 = vld [vmem:[%s5986_s26 + $0x520] sm:$0xff] }
 0x149   : > { %v3952_v50 = vmax.f32 %v2998_v42, 0.0  ;;  %v3759_v53 = vmax.f32 %v2033_v45, 0.0  ;;  %v5404_v55 = vpop.f32.mrb[50].mxu0 }
 0x14a   : > { %v3951_v54 = vmax.f32 %v2993_v46, 0.0  ;;  %v5692_v56 = vpop.f32.mrb[50].mxu1  ;;  %4145 = vst.msk [vmem:[%s6434_s4 + $0x188] sm:$0xff] %vm4095_vm4, %v3760_v49  ;;  %v2048_v57 = vadd.f32 %v6851_v28, %v5404_v55  ;;  %v2042_v59 = vpop.f32.mrb[51].mxu0  ;;  %5562 = vmatmul.mubr.msk.f32.gmra.mrb[156].mxu0 %vm569_vm3, %v331_v47  ;;  %v531_v49 = vld [vmem:[%s5986_s26 + $0xb28] sm:$0xff] }
 0x14b   : > { %4337 = vst.msk [vmem:[%s6434_s4 + $0x788] sm:$0xff] %vm4095_vm4, %v3952_v50  ;;  %v3008_v58 = vadd.f32 %v6851_v28, %v5692_v56  ;;  %v3002_v60 = vpop.f32.mrb[51].mxu1  ;;  %5850 = vmatmul.mubr.msk.f32.gmra.mrb[156].mxu1 %vm569_vm3, %v523_v48  ;;  %4144 = vst.msk [vmem:[%s6434_s4 + $0x180] sm:$0xff] %vm4095_vm4, %v3759_v53  ;;  %v2043_v61 = vadd.f32 %v6851_v28, %v2042_v59  ;;  %5564 = vmatprep.mubr.msk.f32.mxu0 %vm569_vm3, %v332_v51  ;;  %v339_v48 = vld [vmem:[%s5986_s26 + $0x528] sm:$0xff]  ;;  %v532_v53 = vld [vmem:[%s5986_s26 + $0xb30] sm:$0xff] }
 0x14c   : > { %4336 = vst.msk [vmem:[%s6434_s4 + $0x780] sm:$0xff] %vm4095_vm4, %v3951_v54  ;;  %v3003_v62 = vadd.f32 %v6851_v28, %v3002_v60  ;;  %5852 = vmatprep.mubr.msk.f32.mxu1 %vm569_vm3, %v524_v52  ;;  %v3762_v1 = vmax.f32 %v2048_v57, 0.0  ;;  %v340_v52 = vld [vmem:[%s5986_s26 + $0x530] sm:$0xff] }
 0x14d   : > { %v3954_v2 = vmax.f32 %v3008_v58, 0.0  ;;  %v3761_v5 = vmax.f32 %v2043_v61, 0.0  ;;  %v5407_v7 = vpop.f32.mrb[52].mxu0 }
 0x14e   : > { %v3953_v6 = vmax.f32 %v3003_v62, 0.0  ;;  %v5695_v8 = vpop.f32.mrb[52].mxu1  ;;  %4147 = vst.msk [vmem:[%s6434_s4 + $0x198] sm:$0xff] %vm4095_vm4, %v3762_v1  ;;  %v2058_v9 = vadd.f32 %v6851_v28, %v5407_v7  ;;  %v2052_v11 = vpop.f32.mrb[53].mxu0  ;;  %5565 = vmatmul.mubr.msk.f32.gmra.mrb[158].mxu0 %vm569_vm3, %v333_v63  ;;  %v533_v1 = vld [vmem:[%s5986_s26 + $0xb38] sm:$0xff] }
 0x14f   : > { %4339 = vst.msk [vmem:[%s6434_s4 + $0x798] sm:$0xff] %vm4095_vm4, %v3954_v2  ;;  %v3018_v10 = vadd.f32 %v6851_v28, %v5695_v8  ;;  %v3012_v12 = vpop.f32.mrb[53].mxu1  ;;  %5853 = vmatmul.mubr.msk.f32.gmra.mrb[158].mxu1 %vm569_vm3, %v525_v0  ;;  %4146 = vst.msk [vmem:[%s6434_s4 + $0x190] sm:$0xff] %vm4095_vm4, %v3761_v5  ;;  %v2053_v13 = vadd.f32 %v6851_v28, %v2052_v11  ;;  %5567 = vmatprep.mubr.msk.f32.mxu0 %vm569_vm3, %v334_v3  ;;  %v341_v0 = vld [vmem:[%s5986_s26 + $0x538] sm:$0xff]  ;;  %v534_v5 = vld [vmem:[%s5986_s26 + $0xb40] sm:$0xff] }
 0x150   : > { %4338 = vst.msk [vmem:[%s6434_s4 + $0x790] sm:$0xff] %vm4095_vm4, %v3953_v6  ;;  %v3013_v14 = vadd.f32 %v6851_v28, %v3012_v12  ;;  %5855 = vmatprep.mubr.msk.f32.mxu1 %vm569_vm3, %v526_v4  ;;  %v3764_v17 = vmax.f32 %v2058_v9, 0.0  ;;  %v342_v4 = vld [vmem:[%s5986_s26 + $0x540] sm:$0xff] }
 0x151   : > { %v3956_v18 = vmax.f32 %v3018_v10, 0.0  ;;  %v3763_v21 = vmax.f32 %v2053_v13, 0.0  ;;  %v5410_v23 = vpop.f32.mrb[54].mxu0 }
 0x152   : > { %v3955_v22 = vmax.f32 %v3013_v14, 0.0  ;;  %v5698_v24 = vpop.f32.mrb[54].mxu1  ;;  %4149 = vst.msk [vmem:[%s6434_s4 + $0x1a8] sm:$0xff] %vm4095_vm4, %v3764_v17  ;;  %v2068_v25 = vadd.f32 %v6851_v28, %v5410_v23  ;;  %v2062_v27 = vpop.f32.mrb[55].mxu0  ;;  %5568 = vmatmul.mubr.msk.f32.gmra.mrb[160].mxu0 %vm569_vm3, %v335_v15  ;;  %v535_v17 = vld [vmem:[%s5986_s26 + $0xb48] sm:$0xff] }
 0x153   : > { %4341 = vst.msk [vmem:[%s6434_s4 + $0x7a8] sm:$0xff] %vm4095_vm4, %v3956_v18  ;;  %v3028_v26 = vadd.f32 %v6851_v28, %v5698_v24  ;;  %v3022_v29 = vpop.f32.mrb[55].mxu1  ;;  %5856 = vmatmul.mubr.msk.f32.gmra.mrb[160].mxu1 %vm569_vm3, %v527_v16  ;;  %4148 = vst.msk [vmem:[%s6434_s4 + $0x1a0] sm:$0xff] %vm4095_vm4, %v3763_v21  ;;  %v2063_v30 = vadd.f32 %v6851_v28, %v2062_v27  ;;  %5570 = vmatprep.mubr.msk.f32.mxu0 %vm569_vm3, %v336_v19  ;;  %v343_v16 = vld [vmem:[%s5986_s26 + $0x548] sm:$0xff]  ;;  %v536_v21 = vld [vmem:[%s5986_s26 + $0xb50] sm:$0xff] }
 0x154   : > { %4340 = vst.msk [vmem:[%s6434_s4 + $0x7a0] sm:$0xff] %vm4095_vm4, %v3955_v22  ;;  %v3023_v31 = vadd.f32 %v6851_v28, %v3022_v29  ;;  %5858 = vmatprep.mubr.msk.f32.mxu1 %vm569_vm3, %v528_v20  ;;  %v3766_v34 = vmax.f32 %v2068_v25, 0.0  ;;  %v344_v20 = vld [vmem:[%s5986_s26 + $0x550] sm:$0xff] }
 0x155   : > { %v3958_v35 = vmax.f32 %v3028_v26, 0.0  ;;  %v3765_v38 = vmax.f32 %v2063_v30, 0.0  ;;  %v5413_v40 = vpop.f32.mrb[56].mxu0 }
 0x156   : > { %v3957_v39 = vmax.f32 %v3023_v31, 0.0  ;;  %v5701_v41 = vpop.f32.mrb[56].mxu1  ;;  %4151 = vst.msk [vmem:[%s6434_s4 + $0x1b8] sm:$0xff] %vm4095_vm4, %v3766_v34  ;;  %v2078_v42 = vadd.f32 %v6851_v28, %v5413_v40  ;;  %v2072_v44 = vpop.f32.mrb[57].mxu0  ;;  %5571 = vmatmul.mubr.msk.f32.gmra.mrb[162].mxu0 %vm569_vm3, %v337_v32  ;;  %v537_v34 = vld [vmem:[%s5986_s26 + $0xb58] sm:$0xff] }
 0x157   : > { %4343 = vst.msk [vmem:[%s6434_s4 + $0x7b8] sm:$0xff] %vm4095_vm4, %v3958_v35  ;;  %v3038_v43 = vadd.f32 %v6851_v28, %v5701_v41  ;;  %v3032_v45 = vpop.f32.mrb[57].mxu1  ;;  %5859 = vmatmul.mubr.msk.f32.gmra.mrb[162].mxu1 %vm569_vm3, %v529_v33  ;;  %4150 = vst.msk [vmem:[%s6434_s4 + $0x1b0] sm:$0xff] %vm4095_vm4, %v3765_v38  ;;  %v2073_v46 = vadd.f32 %v6851_v28, %v2072_v44  ;;  %5573 = vmatprep.mubr.msk.f32.mxu0 %vm569_vm3, %v338_v36  ;;  %v345_v33 = vld [vmem:[%s5986_s26 + $0x558] sm:$0xff]  ;;  %v538_v38 = vld [vmem:[%s5986_s26 + $0xb60] sm:$0xff] }
 0x158   : > { %4342 = vst.msk [vmem:[%s6434_s4 + $0x7b0] sm:$0xff] %vm4095_vm4, %v3957_v39  ;;  %v3033_v47 = vadd.f32 %v6851_v28, %v3032_v45  ;;  %5861 = vmatprep.mubr.msk.f32.mxu1 %vm569_vm3, %v530_v37  ;;  %v3768_v50 = vmax.f32 %v2078_v42, 0.0  ;;  %v346_v37 = vld [vmem:[%s5986_s26 + $0x560] sm:$0xff] }
 0x159   : > { %v3960_v51 = vmax.f32 %v3038_v43, 0.0  ;;  %v3767_v54 = vmax.f32 %v2073_v46, 0.0  ;;  %v5416_v56 = vpop.f32.mrb[58].mxu0 }
 0x15a   : > { %v3959_v55 = vmax.f32 %v3033_v47, 0.0  ;;  %v5704_v57 = vpop.f32.mrb[58].mxu1  ;;  %4153 = vst.msk [vmem:[%s6434_s4 + $0x1c8] sm:$0xff] %vm4095_vm4, %v3768_v50  ;;  %v2088_v58 = vadd.f32 %v6851_v28, %v5416_v56  ;;  %v2082_v60 = vpop.f32.mrb[59].mxu0  ;;  %5574 = vmatmul.mubr.msk.f32.gmra.mrb[164].mxu0 %vm569_vm3, %v339_v48  ;;  %v539_v50 = vld [vmem:[%s5986_s26 + $0xb68] sm:$0xff] }
 0x15b   : > { %4345 = vst.msk [vmem:[%s6434_s4 + $0x7c8] sm:$0xff] %vm4095_vm4, %v3960_v51  ;;  %v3048_v59 = vadd.f32 %v6851_v28, %v5704_v57  ;;  %v3042_v61 = vpop.f32.mrb[59].mxu1  ;;  %5862 = vmatmul.mubr.msk.f32.gmra.mrb[164].mxu1 %vm569_vm3, %v531_v49  ;;  %4152 = vst.msk [vmem:[%s6434_s4 + $0x1c0] sm:$0xff] %vm4095_vm4, %v3767_v54  ;;  %v2083_v62 = vadd.f32 %v6851_v28, %v2082_v60  ;;  %5576 = vmatprep.mubr.msk.f32.mxu0 %vm569_vm3, %v340_v52  ;;  %v347_v49 = vld [vmem:[%s5986_s26 + $0x568] sm:$0xff]  ;;  %v540_v54 = vld [vmem:[%s5986_s26 + $0xb70] sm:$0xff] }
 0x15c   : > { %4344 = vst.msk [vmem:[%s6434_s4 + $0x7c0] sm:$0xff] %vm4095_vm4, %v3959_v55  ;;  %v3043_v63 = vadd.f32 %v6851_v28, %v3042_v61  ;;  %5864 = vmatprep.mubr.msk.f32.mxu1 %vm569_vm3, %v532_v53  ;;  %v3770_v2 = vmax.f32 %v2088_v58, 0.0  ;;  %v348_v53 = vld [vmem:[%s5986_s26 + $0x570] sm:$0xff] }
 0x15d   : > { %v3962_v3 = vmax.f32 %v3048_v59, 0.0  ;;  %v3769_v6 = vmax.f32 %v2083_v62, 0.0  ;;  %v5419_v8 = vpop.f32.mrb[60].mxu0 }
 0x15e   : > { %v3961_v7 = vmax.f32 %v3043_v63, 0.0  ;;  %v5707_v9 = vpop.f32.mrb[60].mxu1  ;;  %4155 = vst.msk [vmem:[%s6434_s4 + $0x1d8] sm:$0xff] %vm4095_vm4, %v3770_v2  ;;  %v2098_v10 = vadd.f32 %v6851_v28, %v5419_v8  ;;  %v2092_v12 = vpop.f32.mrb[61].mxu0  ;;  %5577 = vmatmul.mubr.msk.f32.gmra.mrb[166].mxu0 %vm569_vm3, %v341_v0  ;;  %v541_v2 = vld [vmem:[%s5986_s26 + $0xb78] sm:$0xff] }
 0x15f   : > { %4347 = vst.msk [vmem:[%s6434_s4 + $0x7d8] sm:$0xff] %vm4095_vm4, %v3962_v3  ;;  %v3058_v11 = vadd.f32 %v6851_v28, %v5707_v9  ;;  %v3052_v13 = vpop.f32.mrb[61].mxu1  ;;  %5865 = vmatmul.mubr.msk.f32.gmra.mrb[166].mxu1 %vm569_vm3, %v533_v1  ;;  %4154 = vst.msk [vmem:[%s6434_s4 + $0x1d0] sm:$0xff] %vm4095_vm4, %v3769_v6  ;;  %v2093_v14 = vadd.f32 %v6851_v28, %v2092_v12  ;;  %5579 = vmatprep.mubr.msk.f32.mxu0 %vm569_vm3, %v342_v4  ;;  %v349_v1 = vld [vmem:[%s5986_s26 + $0x578] sm:$0xff]  ;;  %v542_v6 = vld [vmem:[%s5986_s26 + $0xb80] sm:$0xff] }
 0x160   : > { %4346 = vst.msk [vmem:[%s6434_s4 + $0x7d0] sm:$0xff] %vm4095_vm4, %v3961_v7  ;;  %v3053_v15 = vadd.f32 %v6851_v28, %v3052_v13  ;;  %5867 = vmatprep.mubr.msk.f32.mxu1 %vm569_vm3, %v534_v5  ;;  %v3772_v18 = vmax.f32 %v2098_v10, 0.0  ;;  %v350_v5 = vld [vmem:[%s5986_s26 + $0x580] sm:$0xff] }
 0x161   : > { %v3964_v19 = vmax.f32 %v3058_v11, 0.0  ;;  %v3771_v22 = vmax.f32 %v2093_v14, 0.0  ;;  %v5422_v24 = vpop.f32.mrb[62].mxu0 }
 0x162   : > { %v3963_v23 = vmax.f32 %v3053_v15, 0.0  ;;  %v5710_v25 = vpop.f32.mrb[62].mxu1  ;;  %4157 = vst.msk [vmem:[%s6434_s4 + $0x1e8] sm:$0xff] %vm4095_vm4, %v3772_v18  ;;  %v2108_v26 = vadd.f32 %v6851_v28, %v5422_v24  ;;  %v2102_v29 = vpop.f32.mrb[63].mxu0  ;;  %5580 = vmatmul.mubr.msk.f32.gmra.mrb[168].mxu0 %vm569_vm3, %v343_v16  ;;  %v543_v18 = vld [vmem:[%s5986_s26 + $0xb88] sm:$0xff] }
 0x163   : > { %4349 = vst.msk [vmem:[%s6434_s4 + $0x7e8] sm:$0xff] %vm4095_vm4, %v3964_v19  ;;  %v3068_v27 = vadd.f32 %v6851_v28, %v5710_v25  ;;  %v3062_v30 = vpop.f32.mrb[63].mxu1  ;;  %5868 = vmatmul.mubr.msk.f32.gmra.mrb[168].mxu1 %vm569_vm3, %v535_v17  ;;  %4156 = vst.msk [vmem:[%s6434_s4 + $0x1e0] sm:$0xff] %vm4095_vm4, %v3771_v22  ;;  %v2103_v31 = vadd.f32 %v6851_v28, %v2102_v29  ;;  %5582 = vmatprep.mubr.msk.f32.mxu0 %vm569_vm3, %v344_v20  ;;  %v351_v17 = vld [vmem:[%s5986_s26 + $0x588] sm:$0xff]  ;;  %v544_v22 = vld [vmem:[%s5986_s26 + $0xb90] sm:$0xff] }
 0x164   : > { %4348 = vst.msk [vmem:[%s6434_s4 + $0x7e0] sm:$0xff] %vm4095_vm4, %v3963_v23  ;;  %v3063_v32 = vadd.f32 %v6851_v28, %v3062_v30  ;;  %5870 = vmatprep.mubr.msk.f32.mxu1 %vm569_vm3, %v536_v21  ;;  %v3774_v35 = vmax.f32 %v2108_v26, 0.0  ;;  %v352_v21 = vld [vmem:[%s5986_s26 + $0x590] sm:$0xff] }
 0x165   : > { %v3966_v36 = vmax.f32 %v3068_v27, 0.0  ;;  %v3773_v39 = vmax.f32 %v2103_v31, 0.0  ;;  %v5425_v41 = vpop.f32.mrb[64].mxu0 }
 0x166   : > { %v3965_v40 = vmax.f32 %v3063_v32, 0.0  ;;  %v5713_v42 = vpop.f32.mrb[64].mxu1  ;;  %4159 = vst.msk [vmem:[%s6434_s4 + $0x1f8] sm:$0xff] %vm4095_vm4, %v3774_v35  ;;  %v2118_v43 = vadd.f32 %v6851_v28, %v5425_v41  ;;  %v2112_v45 = vpop.f32.mrb[65].mxu0  ;;  %5583 = vmatmul.mubr.msk.f32.gmra.mrb[170].mxu0 %vm569_vm3, %v345_v33  ;;  %v545_v35 = vld [vmem:[%s5986_s26 + $0xb98] sm:$0xff] }
 0x167   : > { %4351 = vst.msk [vmem:[%s6434_s4 + $0x7f8] sm:$0xff] %vm4095_vm4, %v3966_v36  ;;  %v3078_v44 = vadd.f32 %v6851_v28, %v5713_v42  ;;  %v3072_v46 = vpop.f32.mrb[65].mxu1  ;;  %5871 = vmatmul.mubr.msk.f32.gmra.mrb[170].mxu1 %vm569_vm3, %v537_v34  ;;  %4158 = vst.msk [vmem:[%s6434_s4 + $0x1f0] sm:$0xff] %vm4095_vm4, %v3773_v39  ;;  %v2113_v47 = vadd.f32 %v6851_v28, %v2112_v45  ;;  %5585 = vmatprep.mubr.msk.f32.mxu0 %vm569_vm3, %v346_v37  ;;  %v353_v34 = vld [vmem:[%s5986_s26 + $0x598] sm:$0xff]  ;;  %v546_v39 = vld [vmem:[%s5986_s26 + $0xba0] sm:$0xff] }
 0x168   : > { %4350 = vst.msk [vmem:[%s6434_s4 + $0x7f0] sm:$0xff] %vm4095_vm4, %v3965_v40  ;;  %v3073_v48 = vadd.f32 %v6851_v28, %v3072_v46  ;;  %5873 = vmatprep.mubr.msk.f32.mxu1 %vm569_vm3, %v538_v38  ;;  %v3776_v51 = vmax.f32 %v2118_v43, 0.0  ;;  %v354_v38 = vld [vmem:[%s5986_s26 + $0x5a0] sm:$0xff] }
 0x169   : > { %v3968_v52 = vmax.f32 %v3078_v44, 0.0  ;;  %v3775_v55 = vmax.f32 %v2113_v47, 0.0  ;;  %v5428_v57 = vpop.f32.mrb[66].mxu0 }
 0x16a   : > { %v3967_v56 = vmax.f32 %v3073_v48, 0.0  ;;  %v5716_v58 = vpop.f32.mrb[66].mxu1  ;;  %4161 = vst.msk [vmem:[%s6434_s4 + $0x208] sm:$0xff] %vm4095_vm4, %v3776_v51  ;;  %v2128_v59 = vadd.f32 %v6851_v28, %v5428_v57  ;;  %v2122_v61 = vpop.f32.mrb[67].mxu0  ;;  %5586 = vmatmul.mubr.msk.f32.gmra.mrb[172].mxu0 %vm569_vm3, %v347_v49  ;;  %v547_v51 = vld [vmem:[%s5986_s26 + $0xba8] sm:$0xff] }
 0x16b   : > { %4353 = vst.msk [vmem:[%s6434_s4 + $0x808] sm:$0xff] %vm4095_vm4, %v3968_v52  ;;  %v3088_v60 = vadd.f32 %v6851_v28, %v5716_v58  ;;  %v3082_v62 = vpop.f32.mrb[67].mxu1  ;;  %5874 = vmatmul.mubr.msk.f32.gmra.mrb[172].mxu1 %vm569_vm3, %v539_v50  ;;  %4160 = vst.msk [vmem:[%s6434_s4 + $0x200] sm:$0xff] %vm4095_vm4, %v3775_v55  ;;  %v2123_v63 = vadd.f32 %v6851_v28, %v2122_v61  ;;  %5588 = vmatprep.mubr.msk.f32.mxu0 %vm569_vm3, %v348_v53  ;;  %v355_v50 = vld [vmem:[%s5986_s26 + $0x5a8] sm:$0xff]  ;;  %v548_v55 = vld [vmem:[%s5986_s26 + $0xbb0] sm:$0xff] }
 0x16c   : > { %4352 = vst.msk [vmem:[%s6434_s4 + $0x800] sm:$0xff] %vm4095_vm4, %v3967_v56  ;;  %v3083_v0 = vadd.f32 %v6851_v28, %v3082_v62  ;;  %5876 = vmatprep.mubr.msk.f32.mxu1 %vm569_vm3, %v540_v54  ;;  %v3778_v3 = vmax.f32 %v2128_v59, 0.0  ;;  %v356_v54 = vld [vmem:[%s5986_s26 + $0x5b0] sm:$0xff] }
 0x16d   : > { %v3970_v4 = vmax.f32 %v3088_v60, 0.0  ;;  %v3777_v7 = vmax.f32 %v2123_v63, 0.0  ;;  %v5431_v9 = vpop.f32.mrb[68].mxu0 }
 0x16e   : > { %v3969_v8 = vmax.f32 %v3083_v0, 0.0  ;;  %v5719_v10 = vpop.f32.mrb[68].mxu1  ;;  %4163 = vst.msk [vmem:[%s6434_s4 + $0x218] sm:$0xff] %vm4095_vm4, %v3778_v3  ;;  %v2138_v11 = vadd.f32 %v6851_v28, %v5431_v9  ;;  %v2132_v13 = vpop.f32.mrb[69].mxu0  ;;  %5589 = vmatmul.mubr.msk.f32.gmra.mrb[174].mxu0 %vm569_vm3, %v349_v1  ;;  %v549_v3 = vld [vmem:[%s5986_s26 + $0xbb8] sm:$0xff] }
 0x16f   : > { %4355 = vst.msk [vmem:[%s6434_s4 + $0x818] sm:$0xff] %vm4095_vm4, %v3970_v4  ;;  %v3098_v12 = vadd.f32 %v6851_v28, %v5719_v10  ;;  %v3092_v14 = vpop.f32.mrb[69].mxu1  ;;  %5877 = vmatmul.mubr.msk.f32.gmra.mrb[174].mxu1 %vm569_vm3, %v541_v2  ;;  %4162 = vst.msk [vmem:[%s6434_s4 + $0x210] sm:$0xff] %vm4095_vm4, %v3777_v7  ;;  %v2133_v15 = vadd.f32 %v6851_v28, %v2132_v13  ;;  %5591 = vmatprep.mubr.msk.f32.mxu0 %vm569_vm3, %v350_v5  ;;  %v357_v2 = vld [vmem:[%s5986_s26 + $0x5b8] sm:$0xff]  ;;  %v550_v7 = vld [vmem:[%s5986_s26 + $0xbc0] sm:$0xff] }
 0x170   : > { %4354 = vst.msk [vmem:[%s6434_s4 + $0x810] sm:$0xff] %vm4095_vm4, %v3969_v8  ;;  %v3093_v16 = vadd.f32 %v6851_v28, %v3092_v14  ;;  %5879 = vmatprep.mubr.msk.f32.mxu1 %vm569_vm3, %v542_v6  ;;  %v3780_v19 = vmax.f32 %v2138_v11, 0.0  ;;  %v358_v6 = vld [vmem:[%s5986_s26 + $0x5c0] sm:$0xff] }
 0x171   : > { %v3972_v20 = vmax.f32 %v3098_v12, 0.0  ;;  %v3779_v23 = vmax.f32 %v2133_v15, 0.0  ;;  %v5434_v25 = vpop.f32.mrb[70].mxu0 }
 0x172   : > { %v3971_v24 = vmax.f32 %v3093_v16, 0.0  ;;  %v5722_v26 = vpop.f32.mrb[70].mxu1  ;;  %4165 = vst.msk [vmem:[%s6434_s4 + $0x228] sm:$0xff] %vm4095_vm4, %v3780_v19  ;;  %v2148_v27 = vadd.f32 %v6851_v28, %v5434_v25  ;;  %v2142_v30 = vpop.f32.mrb[71].mxu0  ;;  %5592 = vmatmul.mubr.msk.f32.gmra.mrb[176].mxu0 %vm569_vm3, %v351_v17  ;;  %v551_v19 = vld [vmem:[%s5986_s26 + $0xbc8] sm:$0xff] }
 0x173   : > { %4357 = vst.msk [vmem:[%s6434_s4 + $0x828] sm:$0xff] %vm4095_vm4, %v3972_v20  ;;  %v3108_v29 = vadd.f32 %v6851_v28, %v5722_v26  ;;  %v3102_v31 = vpop.f32.mrb[71].mxu1  ;;  %5880 = vmatmul.mubr.msk.f32.gmra.mrb[176].mxu1 %vm569_vm3, %v543_v18  ;;  %4164 = vst.msk [vmem:[%s6434_s4 + $0x220] sm:$0xff] %vm4095_vm4, %v3779_v23  ;;  %v2143_v32 = vadd.f32 %v6851_v28, %v2142_v30  ;;  %5594 = vmatprep.mubr.msk.f32.mxu0 %vm569_vm3, %v352_v21  ;;  %v359_v18 = vld [vmem:[%s5986_s26 + $0x5c8] sm:$0xff]  ;;  %v552_v23 = vld [vmem:[%s5986_s26 + $0xbd0] sm:$0xff] }
 0x174   : > { %4356 = vst.msk [vmem:[%s6434_s4 + $0x820] sm:$0xff] %vm4095_vm4, %v3971_v24  ;;  %v3103_v33 = vadd.f32 %v6851_v28, %v3102_v31  ;;  %5882 = vmatprep.mubr.msk.f32.mxu1 %vm569_vm3, %v544_v22  ;;  %v3782_v36 = vmax.f32 %v2148_v27, 0.0  ;;  %v360_v22 = vld [vmem:[%s5986_s26 + $0x5d0] sm:$0xff] }
 0x175   : > { %v3974_v37 = vmax.f32 %v3108_v29, 0.0  ;;  %v3781_v40 = vmax.f32 %v2143_v32, 0.0  ;;  %v5437_v42 = vpop.f32.mrb[72].mxu0 }
 0x176   : > { %v3973_v41 = vmax.f32 %v3103_v33, 0.0  ;;  %v5725_v43 = vpop.f32.mrb[72].mxu1  ;;  %4167 = vst.msk [vmem:[%s6434_s4 + $0x238] sm:$0xff] %vm4095_vm4, %v3782_v36  ;;  %v2158_v44 = vadd.f32 %v6851_v28, %v5437_v42  ;;  %v2152_v46 = vpop.f32.mrb[73].mxu0  ;;  %5595 = vmatmul.mubr.msk.f32.gmra.mrb[178].mxu0 %vm569_vm3, %v353_v34  ;;  %v553_v36 = vld [vmem:[%s5986_s26 + $0xbd8] sm:$0xff] }
 0x177   : > { %4359 = vst.msk [vmem:[%s6434_s4 + $0x838] sm:$0xff] %vm4095_vm4, %v3974_v37  ;;  %v3118_v45 = vadd.f32 %v6851_v28, %v5725_v43  ;;  %v3112_v47 = vpop.f32.mrb[73].mxu1  ;;  %5883 = vmatmul.mubr.msk.f32.gmra.mrb[178].mxu1 %vm569_vm3, %v545_v35  ;;  %4166 = vst.msk [vmem:[%s6434_s4 + $0x230] sm:$0xff] %vm4095_vm4, %v3781_v40  ;;  %v2153_v48 = vadd.f32 %v6851_v28, %v2152_v46  ;;  %5597 = vmatprep.mubr.msk.f32.mxu0 %vm569_vm3, %v354_v38  ;;  %v361_v35 = vld [vmem:[%s5986_s26 + $0x5d8] sm:$0xff]  ;;  %v554_v40 = vld [vmem:[%s5986_s26 + $0xbe0] sm:$0xff] }
 0x178   : > { %4358 = vst.msk [vmem:[%s6434_s4 + $0x830] sm:$0xff] %vm4095_vm4, %v3973_v41  ;;  %v3113_v49 = vadd.f32 %v6851_v28, %v3112_v47  ;;  %5885 = vmatprep.mubr.msk.f32.mxu1 %vm569_vm3, %v546_v39  ;;  %v3784_v52 = vmax.f32 %v2158_v44, 0.0  ;;  %v362_v39 = vld [vmem:[%s5986_s26 + $0x5e0] sm:$0xff] }
 0x179   : > { %v3976_v53 = vmax.f32 %v3118_v45, 0.0  ;;  %v3783_v56 = vmax.f32 %v2153_v48, 0.0  ;;  %v5440_v58 = vpop.f32.mrb[74].mxu0 }
 0x17a   : > { %v3975_v57 = vmax.f32 %v3113_v49, 0.0  ;;  %v5728_v59 = vpop.f32.mrb[74].mxu1  ;;  %4169 = vst.msk [vmem:[%s6434_s4 + $0x248] sm:$0xff] %vm4095_vm4, %v3784_v52  ;;  %v2168_v60 = vadd.f32 %v6851_v28, %v5440_v58  ;;  %v2162_v62 = vpop.f32.mrb[75].mxu0  ;;  %5598 = vmatmul.mubr.msk.f32.gmra.mrb[180].mxu0 %vm569_vm3, %v355_v50  ;;  %v555_v52 = vld [vmem:[%s5986_s26 + $0xbe8] sm:$0xff] }
 0x17b   : > { %4361 = vst.msk [vmem:[%s6434_s4 + $0x848] sm:$0xff] %vm4095_vm4, %v3976_v53  ;;  %v3128_v61 = vadd.f32 %v6851_v28, %v5728_v59  ;;  %v3122_v63 = vpop.f32.mrb[75].mxu1  ;;  %5886 = vmatmul.mubr.msk.f32.gmra.mrb[180].mxu1 %vm569_vm3, %v547_v51  ;;  %4168 = vst.msk [vmem:[%s6434_s4 + $0x240] sm:$0xff] %vm4095_vm4, %v3783_v56  ;;  %v2163_v0 = vadd.f32 %v6851_v28, %v2162_v62  ;;  %5600 = vmatprep.mubr.msk.f32.mxu0 %vm569_vm3, %v356_v54  ;;  %v363_v51 = vld [vmem:[%s5986_s26 + $0x5e8] sm:$0xff]  ;;  %v556_v56 = vld [vmem:[%s5986_s26 + $0xbf0] sm:$0xff] }
 0x17c   : > { %4360 = vst.msk [vmem:[%s6434_s4 + $0x840] sm:$0xff] %vm4095_vm4, %v3975_v57  ;;  %v3123_v1 = vadd.f32 %v6851_v28, %v3122_v63  ;;  %5888 = vmatprep.mubr.msk.f32.mxu1 %vm569_vm3, %v548_v55  ;;  %v3786_v4 = vmax.f32 %v2168_v60, 0.0  ;;  %v364_v55 = vld [vmem:[%s5986_s26 + $0x5f0] sm:$0xff] }
 0x17d   : > { %v3978_v5 = vmax.f32 %v3128_v61, 0.0  ;;  %v3785_v8 = vmax.f32 %v2163_v0, 0.0  ;;  %v5443_v10 = vpop.f32.mrb[76].mxu0 }
 0x17e   : > { %v3977_v9 = vmax.f32 %v3123_v1, 0.0  ;;  %v5731_v11 = vpop.f32.mrb[76].mxu1  ;;  %4171 = vst.msk [vmem:[%s6434_s4 + $0x258] sm:$0xff] %vm4095_vm4, %v3786_v4  ;;  %v2178_v12 = vadd.f32 %v6851_v28, %v5443_v10  ;;  %v2172_v14 = vpop.f32.mrb[77].mxu0  ;;  %5601 = vmatmul.mubr.msk.f32.gmra.mrb[182].mxu0 %vm569_vm3, %v357_v2  ;;  %v557_v4 = vld [vmem:[%s5986_s26 + $0xbf8] sm:$0xff] }
 0x17f   : > { %4363 = vst.msk [vmem:[%s6434_s4 + $0x858] sm:$0xff] %vm4095_vm4, %v3978_v5  ;;  %v3138_v13 = vadd.f32 %v6851_v28, %v5731_v11  ;;  %v3132_v15 = vpop.f32.mrb[77].mxu1  ;;  %5889 = vmatmul.mubr.msk.f32.gmra.mrb[182].mxu1 %vm569_vm3, %v549_v3  ;;  %4170 = vst.msk [vmem:[%s6434_s4 + $0x250] sm:$0xff] %vm4095_vm4, %v3785_v8  ;;  %v2173_v16 = vadd.f32 %v6851_v28, %v2172_v14  ;;  %5603 = vmatprep.mubr.msk.f32.mxu0 %vm569_vm3, %v358_v6  ;;  %v365_v3 = vld [vmem:[%s5986_s26 + $0x5f8] sm:$0xff] }
 0x180   : > { %4362 = vst.msk [vmem:[%s6434_s4 + $0x850] sm:$0xff] %vm4095_vm4, %v3977_v9  ;;  %v3133_v17 = vadd.f32 %v6851_v28, %v3132_v15  ;;  %5891 = vmatprep.mubr.msk.f32.mxu1 %vm569_vm3, %v550_v7  ;;  %v3788_v20 = vmax.f32 %v2178_v12, 0.0 }
 0x181   : > { %v3980_v21 = vmax.f32 %v3138_v13, 0.0  ;;  %v3787_v24 = vmax.f32 %v2173_v16, 0.0  ;;  %v5446_v26 = vpop.f32.mrb[78].mxu0 }
 0x182   : > { %v3979_v25 = vmax.f32 %v3133_v17, 0.0  ;;  %v5734_v27 = vpop.f32.mrb[78].mxu1  ;;  %4173 = vst.msk [vmem:[%s6434_s4 + $0x268] sm:$0xff] %vm4095_vm4, %v3788_v20  ;;  %v2188_v29 = vadd.f32 %v6851_v28, %v5446_v26  ;;  %v2182_v31 = vpop.f32.mrb[79].mxu0  ;;  %5604 = vmatmul.mubr.msk.f32.gmra.mrb[184].mxu0 %vm569_vm3, %v359_v18 }
 0x183   : > { %4365 = vst.msk [vmem:[%s6434_s4 + $0x868] sm:$0xff] %vm4095_vm4, %v3980_v21  ;;  %v3148_v30 = vadd.f32 %v6851_v28, %v5734_v27  ;;  %v3142_v32 = vpop.f32.mrb[79].mxu1  ;;  %5892 = vmatmul.mubr.msk.f32.gmra.mrb[184].mxu1 %vm569_vm3, %v551_v19  ;;  %4172 = vst.msk [vmem:[%s6434_s4 + $0x260] sm:$0xff] %vm4095_vm4, %v3787_v24  ;;  %v2183_v33 = vadd.f32 %v6851_v28, %v2182_v31  ;;  %5606 = vmatprep.mubr.msk.f32.mxu0 %vm569_vm3, %v360_v22 }
 0x184   : > { %4364 = vst.msk [vmem:[%s6434_s4 + $0x860] sm:$0xff] %vm4095_vm4, %v3979_v25  ;;  %v3143_v34 = vadd.f32 %v6851_v28, %v3142_v32  ;;  %5894 = vmatprep.mubr.msk.f32.mxu1 %vm569_vm3, %v552_v23  ;;  %v3790_v37 = vmax.f32 %v2188_v29, 0.0  ;;  %v7288_v23 = vld [vmem:[%s7940_s2] ss:$0 sm:$0xff] }
 0x185   : > { %v3982_v38 = vmax.f32 %v3148_v30, 0.0  ;;  %v3789_v41 = vmax.f32 %v2183_v33, 0.0  ;;  %v5449_v43 = vpop.f32.mrb[80].mxu0 }
 0x186   : > { %v3981_v42 = vmax.f32 %v3143_v34, 0.0  ;;  %v5737_v44 = vpop.f32.mrb[80].mxu1  ;;  %4175 = vst.msk [vmem:[%s6434_s4 + $0x278] sm:$0xff] %vm4095_vm4, %v3790_v37  ;;  %v2198_v45 = vadd.f32 %v6851_v28, %v5449_v43  ;;  %v2192_v47 = vpop.f32.mrb[81].mxu0  ;;  %5607 = vmatmul.mubr.msk.f32.gmra.mrb[186].mxu0 %vm569_vm3, %v361_v35 }
 0x187   : > { %4367 = vst.msk [vmem:[%s6434_s4 + $0x878] sm:$0xff] %vm4095_vm4, %v3982_v38  ;;  %v3158_v46 = vadd.f32 %v6851_v28, %v5737_v44  ;;  %v3152_v48 = vpop.f32.mrb[81].mxu1  ;;  %5895 = vmatmul.mubr.msk.f32.gmra.mrb[186].mxu1 %vm569_vm3, %v553_v36  ;;  %4174 = vst.msk [vmem:[%s6434_s4 + $0x270] sm:$0xff] %vm4095_vm4, %v3789_v41  ;;  %v2193_v49 = vadd.f32 %v6851_v28, %v2192_v47  ;;  %5609 = vmatprep.mubr.msk.f32.mxu0 %vm569_vm3, %v362_v39 }
 0x188   : > { %4366 = vst.msk [vmem:[%s6434_s4 + $0x870] sm:$0xff] %vm4095_vm4, %v3981_v42  ;;  %v3153_v50 = vadd.f32 %v6851_v28, %v3152_v48  ;;  %5897 = vmatprep.mubr.msk.f32.mxu1 %vm569_vm3, %v554_v40  ;;  %v3792_v53 = vmax.f32 %v2198_v45, 0.0 }
 0x189   : > { %v3984_v54 = vmax.f32 %v3158_v46, 0.0  ;;  %v3791_v57 = vmax.f32 %v2193_v49, 0.0  ;;  %v5452_v59 = vpop.f32.mrb[82].mxu0 }
 0x18a   : > { %v3983_v58 = vmax.f32 %v3153_v50, 0.0  ;;  %v5740_v60 = vpop.f32.mrb[82].mxu1  ;;  %4177 = vst.msk [vmem:[%s6434_s4 + $0x288] sm:$0xff] %vm4095_vm4, %v3792_v53  ;;  %v2208_v61 = vadd.f32 %v6851_v28, %v5452_v59  ;;  %v2202_v63 = vpop.f32.mrb[83].mxu0  ;;  %5610 = vmatmul.mubr.msk.f32.gmra.mrb[188].mxu0 %vm569_vm3, %v363_v51 }
 0x18b   : > { %4369 = vst.msk [vmem:[%s6434_s4 + $0x888] sm:$0xff] %vm4095_vm4, %v3984_v54  ;;  %v3168_v62 = vadd.f32 %v6851_v28, %v5740_v60  ;;  %v3162_v0 = vpop.f32.mrb[83].mxu1  ;;  %5898 = vmatmul.mubr.msk.f32.gmra.mrb[188].mxu1 %vm569_vm3, %v555_v52  ;;  %4176 = vst.msk [vmem:[%s6434_s4 + $0x280] sm:$0xff] %vm4095_vm4, %v3791_v57  ;;  %v2203_v1 = vadd.f32 %v6851_v28, %v2202_v63  ;;  %5612 = vmatprep.mubr.msk.f32.mxu0 %vm569_vm3, %v364_v55 }
 0x18c   : > { %4368 = vst.msk [vmem:[%s6434_s4 + $0x880] sm:$0xff] %vm4095_vm4, %v3983_v58  ;;  %v3163_v2 = vadd.f32 %v6851_v28, %v3162_v0  ;;  %5900 = vmatprep.mubr.msk.f32.mxu1 %vm569_vm3, %v556_v56  ;;  %v3794_v5 = vmax.f32 %v2208_v61, 0.0 }
 0x18d   : > { %v3986_v6 = vmax.f32 %v3168_v62, 0.0  ;;  %v3793_v7 = vmax.f32 %v2203_v1, 0.0  ;;  %v5455_v9 = vpop.f32.mrb[84].mxu0 }
 0x18e   : > { %v3985_v8 = vmax.f32 %v3163_v2, 0.0  ;;  %v5743_v10 = vpop.f32.mrb[84].mxu1  ;;  %4179 = vst.msk [vmem:[%s6434_s4 + $0x298] sm:$0xff] %vm4095_vm4, %v3794_v5  ;;  %v2218_v11 = vadd.f32 %v6851_v28, %v5455_v9  ;;  %v2212_v13 = vpop.f32.mrb[85].mxu0  ;;  %5613 = vmatmul.mubr.msk.f32.gmra.mrb[190].mxu0 %vm569_vm3, %v365_v3 }
 0x18f   : > { %4371 = vst.msk [vmem:[%s6434_s4 + $0x898] sm:$0xff] %vm4095_vm4, %v3986_v6  ;;  %v3178_v12 = vadd.f32 %v6851_v28, %v5743_v10  ;;  %v3172_v14 = vpop.f32.mrb[85].mxu1  ;;  %5901 = vmatmul.mubr.msk.f32.gmra.mrb[190].mxu1 %vm569_vm3, %v557_v4  ;;  %4178 = vst.msk [vmem:[%s6434_s4 + $0x290] sm:$0xff] %vm4095_vm4, %v3793_v7  ;;  %v2213_v15 = vadd.f32 %v6851_v28, %v2212_v13 }
 0x190   : > { %4370 = vst.msk [vmem:[%s6434_s4 + $0x890] sm:$0xff] %vm4095_vm4, %v3985_v8  ;;  %v3173_v16 = vadd.f32 %v6851_v28, %v3172_v14  ;;  %v3796_v17 = vmax.f32 %v2218_v11, 0.0 }
 0x191   : > { %v3988_v18 = vmax.f32 %v3178_v12, 0.0  ;;  %v3795_v19 = vmax.f32 %v2213_v15, 0.0  ;;  %v5458_v21 = vpop.f32.mrb[86].mxu0 }
 0x192   : > { %v3987_v20 = vmax.f32 %v3173_v16, 0.0  ;;  %v5746_v22 = vpop.f32.mrb[86].mxu1  ;;  %4181 = vst.msk [vmem:[%s6434_s4 + $0x2a8] sm:$0xff] %vm4095_vm4, %v3796_v17  ;;  %v2228_v24 = vadd.f32 %v7288_v23, %v5458_v21  ;;  %v2222_v25 = vpop.f32.mrb[87].mxu0 }
 0x193   : > { %4373 = vst.msk [vmem:[%s6434_s4 + $0x8a8] sm:$0xff] %vm4095_vm4, %v3988_v18  ;;  %v3188_v28 = vadd.f32 %v7288_v23, %v5746_v22  ;;  %v3182_v26 = vpop.f32.mrb[87].mxu1  ;;  %4180 = vst.msk [vmem:[%s6434_s4 + $0x2a0] sm:$0xff] %vm4095_vm4, %v3795_v19  ;;  %v2223_v27 = vadd.f32 %v7288_v23, %v2222_v25 }
 0x194   : > { %4372 = vst.msk [vmem:[%s6434_s4 + $0x8a0] sm:$0xff] %vm4095_vm4, %v3987_v20  ;;  %v3183_v29 = vadd.f32 %v7288_v23, %v3182_v26  ;;  %v3798_v30 = vmax.f32 %v2228_v24, 0.0 }
 0x195   : > { %v3990_v31 = vmax.f32 %v3188_v28, 0.0  ;;  %v3797_v32 = vmax.f32 %v2223_v27, 0.0  ;;  %v5461_v34 = vpop.f32.mrb[88].mxu0 }
 0x196   : > { %v3989_v33 = vmax.f32 %v3183_v29, 0.0  ;;  %v5749_v35 = vpop.f32.mrb[88].mxu1  ;;  %4183 = vst.msk [vmem:[%s6434_s4 + $0x2b8] sm:$0xff] %vm4095_vm4, %v3798_v30  ;;  %v2238_v36 = vadd.f32 %v7288_v23, %v5461_v34  ;;  %v2232_v38 = vpop.f32.mrb[89].mxu0 }
 0x197   : > { %4375 = vst.msk [vmem:[%s6434_s4 + $0x8b8] sm:$0xff] %vm4095_vm4, %v3990_v31  ;;  %v3198_v37 = vadd.f32 %v7288_v23, %v5749_v35  ;;  %v3192_v39 = vpop.f32.mrb[89].mxu1  ;;  %4182 = vst.msk [vmem:[%s6434_s4 + $0x2b0] sm:$0xff] %vm4095_vm4, %v3797_v32  ;;  %v2233_v40 = vadd.f32 %v7288_v23, %v2232_v38 }
 0x198   : > { %4374 = vst.msk [vmem:[%s6434_s4 + $0x8b0] sm:$0xff] %vm4095_vm4, %v3989_v33  ;;  %v3193_v41 = vadd.f32 %v7288_v23, %v3192_v39  ;;  %v3800_v42 = vmax.f32 %v2238_v36, 0.0 }
 0x199   : > { %v3992_v43 = vmax.f32 %v3198_v37, 0.0  ;;  %v3799_v44 = vmax.f32 %v2233_v40, 0.0  ;;  %v5464_v46 = vpop.f32.mrb[90].mxu0 }
 0x19a   : > { %v3991_v45 = vmax.f32 %v3193_v41, 0.0  ;;  %v5752_v47 = vpop.f32.mrb[90].mxu1  ;;  %4185 = vst.msk [vmem:[%s6434_s4 + $0x2c8] sm:$0xff] %vm4095_vm4, %v3800_v42  ;;  %v2248_v48 = vadd.f32 %v7288_v23, %v5464_v46  ;;  %v2242_v50 = vpop.f32.mrb[91].mxu0 }
 0x19b   : > { %4377 = vst.msk [vmem:[%s6434_s4 + $0x8c8] sm:$0xff] %vm4095_vm4, %v3992_v43  ;;  %v3208_v49 = vadd.f32 %v7288_v23, %v5752_v47  ;;  %v3202_v51 = vpop.f32.mrb[91].mxu1  ;;  %4184 = vst.msk [vmem:[%s6434_s4 + $0x2c0] sm:$0xff] %vm4095_vm4, %v3799_v44  ;;  %v2243_v52 = vadd.f32 %v7288_v23, %v2242_v50 }
 0x19c   : > { %4376 = vst.msk [vmem:[%s6434_s4 + $0x8c0] sm:$0xff] %vm4095_vm4, %v3991_v45  ;;  %v3203_v53 = vadd.f32 %v7288_v23, %v3202_v51  ;;  %v3802_v54 = vmax.f32 %v2248_v48, 0.0 }
 0x19d   : > { %v3994_v55 = vmax.f32 %v3208_v49, 0.0  ;;  %v3801_v56 = vmax.f32 %v2243_v52, 0.0  ;;  %v5467_v58 = vpop.f32.mrb[92].mxu0 }
 0x19e   : > { %v3993_v57 = vmax.f32 %v3203_v53, 0.0  ;;  %v5755_v59 = vpop.f32.mrb[92].mxu1  ;;  %4187 = vst.msk [vmem:[%s6434_s4 + $0x2d8] sm:$0xff] %vm4095_vm4, %v3802_v54  ;;  %v2258_v60 = vadd.f32 %v7288_v23, %v5467_v58  ;;  %v2252_v62 = vpop.f32.mrb[93].mxu0 }
 0x19f   : > { %4379 = vst.msk [vmem:[%s6434_s4 + $0x8d8] sm:$0xff] %vm4095_vm4, %v3994_v55  ;;  %v3218_v61 = vadd.f32 %v7288_v23, %v5755_v59  ;;  %v3212_v63 = vpop.f32.mrb[93].mxu1  ;;  %4186 = vst.msk [vmem:[%s6434_s4 + $0x2d0] sm:$0xff] %vm4095_vm4, %v3801_v56  ;;  %v2253_v0 = vadd.f32 %v7288_v23, %v2252_v62 }
 0x1a0   : > { %4378 = vst.msk [vmem:[%s6434_s4 + $0x8d0] sm:$0xff] %vm4095_vm4, %v3993_v57  ;;  %v3213_v1 = vadd.f32 %v7288_v23, %v3212_v63  ;;  %v3804_v2 = vmax.f32 %v2258_v60, 0.0 }
 0x1a1   : > { %v3996_v3 = vmax.f32 %v3218_v61, 0.0  ;;  %v3803_v4 = vmax.f32 %v2253_v0, 0.0  ;;  %v5470_v6 = vpop.f32.mrb[94].mxu0 }
 0x1a2   : > { %v3995_v5 = vmax.f32 %v3213_v1, 0.0  ;;  %v5758_v7 = vpop.f32.mrb[94].mxu1  ;;  %4189 = vst.msk [vmem:[%s6434_s4 + $0x2e8] sm:$0xff] %vm4095_vm4, %v3804_v2  ;;  %v2268_v8 = vadd.f32 %v7288_v23, %v5470_v6  ;;  %v2262_v10 = vpop.f32.mrb[95].mxu0 }
 0x1a3   : > { %4381 = vst.msk [vmem:[%s6434_s4 + $0x8e8] sm:$0xff] %vm4095_vm4, %v3996_v3  ;;  %v3228_v9 = vadd.f32 %v7288_v23, %v5758_v7  ;;  %v3222_v11 = vpop.f32.mrb[95].mxu1  ;;  %4188 = vst.msk [vmem:[%s6434_s4 + $0x2e0] sm:$0xff] %vm4095_vm4, %v3803_v4  ;;  %v2263_v12 = vadd.f32 %v7288_v23, %v2262_v10 }
 0x1a4   : > { %4380 = vst.msk [vmem:[%s6434_s4 + $0x8e0] sm:$0xff] %vm4095_vm4, %v3995_v5  ;;  %v3223_v13 = vadd.f32 %v7288_v23, %v3222_v11  ;;  %v3806_v14 = vmax.f32 %v2268_v8, 0.0 }
 0x1a5   : > { %v3998_v15 = vmax.f32 %v3228_v9, 0.0  ;;  %v3805_v16 = vmax.f32 %v2263_v12, 0.0  ;;  %v5473_v18 = vpop.f32.mrb[96].mxu0 }
 0x1a6   : > { %v3997_v17 = vmax.f32 %v3223_v13, 0.0  ;;  %v5761_v19 = vpop.f32.mrb[96].mxu1  ;;  %4191 = vst.msk [vmem:[%s6434_s4 + $0x2f8] sm:$0xff] %vm4095_vm4, %v3806_v14  ;;  %v2278_v20 = vadd.f32 %v7288_v23, %v5473_v18  ;;  %v2272_v22 = vpop.f32.mrb[97].mxu0 }
 0x1a7   : > { %4383 = vst.msk [vmem:[%s6434_s4 + $0x8f8] sm:$0xff] %vm4095_vm4, %v3998_v15  ;;  %v3238_v21 = vadd.f32 %v7288_v23, %v5761_v19  ;;  %v3232_v24 = vpop.f32.mrb[97].mxu1  ;;  %4190 = vst.msk [vmem:[%s6434_s4 + $0x2f0] sm:$0xff] %vm4095_vm4, %v3805_v16  ;;  %v2273_v28 = vadd.f32 %v7288_v23, %v2272_v22 }
 0x1a8   : > { %4382 = vst.msk [vmem:[%s6434_s4 + $0x8f0] sm:$0xff] %vm4095_vm4, %v3997_v17  ;;  %v3233_v25 = vadd.f32 %v7288_v23, %v3232_v24  ;;  %v3808_v26 = vmax.f32 %v2278_v20, 0.0 }
 0x1a9   : > { %v4000_v27 = vmax.f32 %v3238_v21, 0.0  ;;  %v3807_v29 = vmax.f32 %v2273_v28, 0.0  ;;  %v5476_v31 = vpop.f32.mrb[98].mxu0 }
 0x1aa   : > { %v3999_v30 = vmax.f32 %v3233_v25, 0.0  ;;  %v5764_v32 = vpop.f32.mrb[98].mxu1  ;;  %4193 = vst.msk [vmem:[%s6434_s4 + $0x308] sm:$0xff] %vm4095_vm4, %v3808_v26  ;;  %v2288_v33 = vadd.f32 %v7288_v23, %v5476_v31  ;;  %v2282_v35 = vpop.f32.mrb[99].mxu0 }
 0x1ab   : > { %4385 = vst.msk [vmem:[%s6434_s4 + $0x908] sm:$0xff] %vm4095_vm4, %v4000_v27  ;;  %v3248_v34 = vadd.f32 %v7288_v23, %v5764_v32  ;;  %v3242_v36 = vpop.f32.mrb[99].mxu1  ;;  %4192 = vst.msk [vmem:[%s6434_s4 + $0x300] sm:$0xff] %vm4095_vm4, %v3807_v29  ;;  %v2283_v37 = vadd.f32 %v7288_v23, %v2282_v35 }
 0x1ac   : > { %4384 = vst.msk [vmem:[%s6434_s4 + $0x900] sm:$0xff] %vm4095_vm4, %v3999_v30  ;;  %v3243_v38 = vadd.f32 %v7288_v23, %v3242_v36  ;;  %v3810_v39 = vmax.f32 %v2288_v33, 0.0 }
 0x1ad   : > { %v4002_v40 = vmax.f32 %v3248_v34, 0.0  ;;  %v3809_v41 = vmax.f32 %v2283_v37, 0.0  ;;  %v5479_v43 = vpop.f32.mrb[100].mxu0 }
 0x1ae   : > { %v4001_v42 = vmax.f32 %v3243_v38, 0.0  ;;  %v5767_v44 = vpop.f32.mrb[100].mxu1  ;;  %4195 = vst.msk [vmem:[%s6434_s4 + $0x318] sm:$0xff] %vm4095_vm4, %v3810_v39  ;;  %v2298_v45 = vadd.f32 %v7288_v23, %v5479_v43  ;;  %v2292_v47 = vpop.f32.mrb[101].mxu0 }
 0x1af   : > { %4387 = vst.msk [vmem:[%s6434_s4 + $0x918] sm:$0xff] %vm4095_vm4, %v4002_v40  ;;  %v3258_v46 = vadd.f32 %v7288_v23, %v5767_v44  ;;  %v3252_v48 = vpop.f32.mrb[101].mxu1  ;;  %4194 = vst.msk [vmem:[%s6434_s4 + $0x310] sm:$0xff] %vm4095_vm4, %v3809_v41  ;;  %v2293_v49 = vadd.f32 %v7288_v23, %v2292_v47 }
 0x1b0   : > { %4386 = vst.msk [vmem:[%s6434_s4 + $0x910] sm:$0xff] %vm4095_vm4, %v4001_v42  ;;  %v3253_v50 = vadd.f32 %v7288_v23, %v3252_v48  ;;  %v3812_v51 = vmax.f32 %v2298_v45, 0.0 }
 0x1b1   : > { %v4004_v52 = vmax.f32 %v3258_v46, 0.0  ;;  %v3811_v53 = vmax.f32 %v2293_v49, 0.0  ;;  %v5482_v55 = vpop.f32.mrb[102].mxu0 }
 0x1b2   : > { %v4003_v54 = vmax.f32 %v3253_v50, 0.0  ;;  %v5770_v56 = vpop.f32.mrb[102].mxu1  ;;  %4197 = vst.msk [vmem:[%s6434_s4 + $0x328] sm:$0xff] %vm4095_vm4, %v3812_v51  ;;  %v2308_v57 = vadd.f32 %v7288_v23, %v5482_v55  ;;  %v2302_v59 = vpop.f32.mrb[103].mxu0 }
 0x1b3   : > { %4389 = vst.msk [vmem:[%s6434_s4 + $0x928] sm:$0xff] %vm4095_vm4, %v4004_v52  ;;  %v3268_v58 = vadd.f32 %v7288_v23, %v5770_v56  ;;  %v3262_v60 = vpop.f32.mrb[103].mxu1  ;;  %4196 = vst.msk [vmem:[%s6434_s4 + $0x320] sm:$0xff] %vm4095_vm4, %v3811_v53  ;;  %v2303_v61 = vadd.f32 %v7288_v23, %v2302_v59 }
 0x1b4   : > { %4388 = vst.msk [vmem:[%s6434_s4 + $0x920] sm:$0xff] %vm4095_vm4, %v4003_v54  ;;  %v3263_v62 = vadd.f32 %v7288_v23, %v3262_v60  ;;  %v3814_v63 = vmax.f32 %v2308_v57, 0.0 }
 0x1b5   : > { %v4006_v0 = vmax.f32 %v3268_v58, 0.0  ;;  %v3813_v1 = vmax.f32 %v2303_v61, 0.0  ;;  %v5485_v3 = vpop.f32.mrb[104].mxu0 }
 0x1b6   : > { %v4005_v2 = vmax.f32 %v3263_v62, 0.0  ;;  %v5773_v4 = vpop.f32.mrb[104].mxu1  ;;  %4199 = vst.msk [vmem:[%s6434_s4 + $0x338] sm:$0xff] %vm4095_vm4, %v3814_v63  ;;  %v2318_v5 = vadd.f32 %v7288_v23, %v5485_v3  ;;  %v2312_v7 = vpop.f32.mrb[105].mxu0 }
 0x1b7   : > { %4391 = vst.msk [vmem:[%s6434_s4 + $0x938] sm:$0xff] %vm4095_vm4, %v4006_v0  ;;  %v3278_v6 = vadd.f32 %v7288_v23, %v5773_v4  ;;  %v3272_v8 = vpop.f32.mrb[105].mxu1  ;;  %4198 = vst.msk [vmem:[%s6434_s4 + $0x330] sm:$0xff] %vm4095_vm4, %v3813_v1  ;;  %v2313_v9 = vadd.f32 %v7288_v23, %v2312_v7 }
 0x1b8   : > { %4390 = vst.msk [vmem:[%s6434_s4 + $0x930] sm:$0xff] %vm4095_vm4, %v4005_v2  ;;  %v3273_v10 = vadd.f32 %v7288_v23, %v3272_v8  ;;  %v3816_v11 = vmax.f32 %v2318_v5, 0.0 }
 0x1b9   : > { %v4008_v12 = vmax.f32 %v3278_v6, 0.0  ;;  %v3815_v13 = vmax.f32 %v2313_v9, 0.0  ;;  %v5488_v15 = vpop.f32.mrb[106].mxu0 }
 0x1ba   : > { %v4007_v14 = vmax.f32 %v3273_v10, 0.0  ;;  %v5776_v16 = vpop.f32.mrb[106].mxu1  ;;  %4201 = vst.msk [vmem:[%s6434_s4 + $0x348] sm:$0xff] %vm4095_vm4, %v3816_v11  ;;  %v2328_v17 = vadd.f32 %v7288_v23, %v5488_v15  ;;  %v2322_v19 = vpop.f32.mrb[107].mxu0 }
 0x1bb   : > { %4393 = vst.msk [vmem:[%s6434_s4 + $0x948] sm:$0xff] %vm4095_vm4, %v4008_v12  ;;  %v3288_v18 = vadd.f32 %v7288_v23, %v5776_v16  ;;  %v3282_v20 = vpop.f32.mrb[107].mxu1  ;;  %4200 = vst.msk [vmem:[%s6434_s4 + $0x340] sm:$0xff] %vm4095_vm4, %v3815_v13  ;;  %v2323_v21 = vadd.f32 %v7288_v23, %v2322_v19 }
 0x1bc   : > { %4392 = vst.msk [vmem:[%s6434_s4 + $0x940] sm:$0xff] %vm4095_vm4, %v4007_v14  ;;  %v3283_v22 = vadd.f32 %v7288_v23, %v3282_v20  ;;  %v3818_v24 = vmax.f32 %v2328_v17, 0.0 }
 0x1bd   : > { %v4010_v28 = vmax.f32 %v3288_v18, 0.0  ;;  %v3817_v25 = vmax.f32 %v2323_v21, 0.0  ;;  %v5491_v27 = vpop.f32.mrb[108].mxu0 }
 0x1be   : > { %v4009_v26 = vmax.f32 %v3283_v22, 0.0  ;;  %v5779_v29 = vpop.f32.mrb[108].mxu1  ;;  %4203 = vst.msk [vmem:[%s6434_s4 + $0x358] sm:$0xff] %vm4095_vm4, %v3818_v24  ;;  %v2338_v30 = vadd.f32 %v7288_v23, %v5491_v27  ;;  %v2332_v32 = vpop.f32.mrb[109].mxu0 }
 0x1bf   : > { %4395 = vst.msk [vmem:[%s6434_s4 + $0x958] sm:$0xff] %vm4095_vm4, %v4010_v28  ;;  %v3298_v31 = vadd.f32 %v7288_v23, %v5779_v29  ;;  %v3292_v33 = vpop.f32.mrb[109].mxu1  ;;  %4202 = vst.msk [vmem:[%s6434_s4 + $0x350] sm:$0xff] %vm4095_vm4, %v3817_v25  ;;  %v2333_v34 = vadd.f32 %v7288_v23, %v2332_v32 }
 0x1c0   : > { %4394 = vst.msk [vmem:[%s6434_s4 + $0x950] sm:$0xff] %vm4095_vm4, %v4009_v26  ;;  %v3293_v35 = vadd.f32 %v7288_v23, %v3292_v33  ;;  %v3820_v36 = vmax.f32 %v2338_v30, 0.0 }
 0x1c1   : > { %v4012_v37 = vmax.f32 %v3298_v31, 0.0  ;;  %v3819_v38 = vmax.f32 %v2333_v34, 0.0  ;;  %v5494_v40 = vpop.f32.mrb[110].mxu0 }
 0x1c2   : > { %v4011_v39 = vmax.f32 %v3293_v35, 0.0  ;;  %v5782_v41 = vpop.f32.mrb[110].mxu1  ;;  %4205 = vst.msk [vmem:[%s6434_s4 + $0x368] sm:$0xff] %vm4095_vm4, %v3820_v36  ;;  %v2348_v42 = vadd.f32 %v7288_v23, %v5494_v40  ;;  %v2342_v44 = vpop.f32.mrb[111].mxu0 }
 0x1c3   : > { %4397 = vst.msk [vmem:[%s6434_s4 + $0x968] sm:$0xff] %vm4095_vm4, %v4012_v37  ;;  %v3308_v43 = vadd.f32 %v7288_v23, %v5782_v41  ;;  %v3302_v45 = vpop.f32.mrb[111].mxu1  ;;  %4204 = vst.msk [vmem:[%s6434_s4 + $0x360] sm:$0xff] %vm4095_vm4, %v3819_v38  ;;  %v2343_v46 = vadd.f32 %v7288_v23, %v2342_v44 }
 0x1c4   : > { %4396 = vst.msk [vmem:[%s6434_s4 + $0x960] sm:$0xff] %vm4095_vm4, %v4011_v39  ;;  %v3303_v47 = vadd.f32 %v7288_v23, %v3302_v45  ;;  %v3822_v48 = vmax.f32 %v2348_v42, 0.0 }
 0x1c5   : > { %v4014_v49 = vmax.f32 %v3308_v43, 0.0  ;;  %v3821_v50 = vmax.f32 %v2343_v46, 0.0  ;;  %v5497_v52 = vpop.f32.mrb[112].mxu0 }
 0x1c6   : > { %v4013_v51 = vmax.f32 %v3303_v47, 0.0  ;;  %v5785_v53 = vpop.f32.mrb[112].mxu1  ;;  %4207 = vst.msk [vmem:[%s6434_s4 + $0x378] sm:$0xff] %vm4095_vm4, %v3822_v48  ;;  %v2358_v54 = vadd.f32 %v7288_v23, %v5497_v52  ;;  %v2352_v56 = vpop.f32.mrb[113].mxu0 }
 0x1c7   : > { %4399 = vst.msk [vmem:[%s6434_s4 + $0x978] sm:$0xff] %vm4095_vm4, %v4014_v49  ;;  %v3318_v55 = vadd.f32 %v7288_v23, %v5785_v53  ;;  %v3312_v57 = vpop.f32.mrb[113].mxu1  ;;  %4206 = vst.msk [vmem:[%s6434_s4 + $0x370] sm:$0xff] %vm4095_vm4, %v3821_v50  ;;  %v2353_v58 = vadd.f32 %v7288_v23, %v2352_v56 }
 0x1c8   : > { %4398 = vst.msk [vmem:[%s6434_s4 + $0x970] sm:$0xff] %vm4095_vm4, %v4013_v51  ;;  %v3313_v59 = vadd.f32 %v7288_v23, %v3312_v57  ;;  %v3824_v60 = vmax.f32 %v2358_v54, 0.0 }
 0x1c9   : > { %v4016_v61 = vmax.f32 %v3318_v55, 0.0  ;;  %v3823_v62 = vmax.f32 %v2353_v58, 0.0  ;;  %v5500_v0 = vpop.f32.mrb[114].mxu0 }
 0x1ca   : > { %v4015_v63 = vmax.f32 %v3313_v59, 0.0  ;;  %v5788_v1 = vpop.f32.mrb[114].mxu1  ;;  %4209 = vst.msk [vmem:[%s6434_s4 + $0x388] sm:$0xff] %vm4095_vm4, %v3824_v60  ;;  %v2368_v2 = vadd.f32 %v7288_v23, %v5500_v0  ;;  %v2362_v4 = vpop.f32.mrb[115].mxu0 }
 0x1cb   : > { %4401 = vst.msk [vmem:[%s6434_s4 + $0x988] sm:$0xff] %vm4095_vm4, %v4016_v61  ;;  %v3328_v3 = vadd.f32 %v7288_v23, %v5788_v1  ;;  %v3322_v5 = vpop.f32.mrb[115].mxu1  ;;  %4208 = vst.msk [vmem:[%s6434_s4 + $0x380] sm:$0xff] %vm4095_vm4, %v3823_v62  ;;  %v2363_v6 = vadd.f32 %v7288_v23, %v2362_v4 }
 0x1cc   : > { %4400 = vst.msk [vmem:[%s6434_s4 + $0x980] sm:$0xff] %vm4095_vm4, %v4015_v63  ;;  %v3323_v7 = vadd.f32 %v7288_v23, %v3322_v5  ;;  %v3826_v8 = vmax.f32 %v2368_v2, 0.0 }
 0x1cd   : > { %v4018_v9 = vmax.f32 %v3328_v3, 0.0  ;;  %v3825_v10 = vmax.f32 %v2363_v6, 0.0  ;;  %v5503_v12 = vpop.f32.mrb[116].mxu0 }
 0x1ce   : > { %v4017_v11 = vmax.f32 %v3323_v7, 0.0  ;;  %v5791_v13 = vpop.f32.mrb[116].mxu1  ;;  %4211 = vst.msk [vmem:[%s6434_s4 + $0x398] sm:$0xff] %vm4095_vm4, %v3826_v8  ;;  %v2378_v14 = vadd.f32 %v7288_v23, %v5503_v12  ;;  %v2372_v16 = vpop.f32.mrb[117].mxu0 }
 0x1cf   : > { %4403 = vst.msk [vmem:[%s6434_s4 + $0x998] sm:$0xff] %vm4095_vm4, %v4018_v9  ;;  %v3338_v15 = vadd.f32 %v7288_v23, %v5791_v13  ;;  %v3332_v17 = vpop.f32.mrb[117].mxu1  ;;  %4210 = vst.msk [vmem:[%s6434_s4 + $0x390] sm:$0xff] %vm4095_vm4, %v3825_v10  ;;  %v2373_v18 = vadd.f32 %v7288_v23, %v2372_v16 }
 0x1d0   : > { %4402 = vst.msk [vmem:[%s6434_s4 + $0x990] sm:$0xff] %vm4095_vm4, %v4017_v11  ;;  %v3333_v19 = vadd.f32 %v7288_v23, %v3332_v17  ;;  %v3828_v20 = vmax.f32 %v2378_v14, 0.0 }
 0x1d1   : > { %v4020_v21 = vmax.f32 %v3338_v15, 0.0  ;;  %v3827_v22 = vmax.f32 %v2373_v18, 0.0  ;;  %v5506_v28 = vpop.f32.mrb[118].mxu0 }
 0x1d2   : > { %v4019_v24 = vmax.f32 %v3333_v19, 0.0  ;;  %v5794_v25 = vpop.f32.mrb[118].mxu1  ;;  %4213 = vst.msk [vmem:[%s6434_s4 + $0x3a8] sm:$0xff] %vm4095_vm4, %v3828_v20  ;;  %v2388_v26 = vadd.f32 %v7288_v23, %v5506_v28  ;;  %v2382_v29 = vpop.f32.mrb[119].mxu0 }
 0x1d3   : > { %4405 = vst.msk [vmem:[%s6434_s4 + $0x9a8] sm:$0xff] %vm4095_vm4, %v4020_v21  ;;  %v3348_v27 = vadd.f32 %v7288_v23, %v5794_v25  ;;  %v3342_v30 = vpop.f32.mrb[119].mxu1  ;;  %4212 = vst.msk [vmem:[%s6434_s4 + $0x3a0] sm:$0xff] %vm4095_vm4, %v3827_v22  ;;  %v2383_v31 = vadd.f32 %v7288_v23, %v2382_v29 }
 0x1d4   : > { %4404 = vst.msk [vmem:[%s6434_s4 + $0x9a0] sm:$0xff] %vm4095_vm4, %v4019_v24  ;;  %v3343_v32 = vadd.f32 %v7288_v23, %v3342_v30  ;;  %v3830_v33 = vmax.f32 %v2388_v26, 0.0 }
 0x1d5   : > { %v4022_v34 = vmax.f32 %v3348_v27, 0.0  ;;  %v3829_v35 = vmax.f32 %v2383_v31, 0.0  ;;  %v5509_v37 = vpop.f32.mrb[120].mxu0 }
 0x1d6   : > { %v4021_v36 = vmax.f32 %v3343_v32, 0.0  ;;  %v5797_v38 = vpop.f32.mrb[120].mxu1  ;;  %4215 = vst.msk [vmem:[%s6434_s4 + $0x3b8] sm:$0xff] %vm4095_vm4, %v3830_v33  ;;  %v2398_v39 = vadd.f32 %v7288_v23, %v5509_v37  ;;  %v2392_v41 = vpop.f32.mrb[121].mxu0 }
 0x1d7   : > { %4407 = vst.msk [vmem:[%s6434_s4 + $0x9b8] sm:$0xff] %vm4095_vm4, %v4022_v34  ;;  %v3358_v40 = vadd.f32 %v7288_v23, %v5797_v38  ;;  %v3352_v42 = vpop.f32.mrb[121].mxu1  ;;  %4214 = vst.msk [vmem:[%s6434_s4 + $0x3b0] sm:$0xff] %vm4095_vm4, %v3829_v35  ;;  %v2393_v43 = vadd.f32 %v7288_v23, %v2392_v41 }
 0x1d8   : > { %4406 = vst.msk [vmem:[%s6434_s4 + $0x9b0] sm:$0xff] %vm4095_vm4, %v4021_v36  ;;  %v3353_v44 = vadd.f32 %v7288_v23, %v3352_v42  ;;  %v3832_v45 = vmax.f32 %v2398_v39, 0.0 }
 0x1d9   : > { %v4024_v46 = vmax.f32 %v3358_v40, 0.0  ;;  %v3831_v47 = vmax.f32 %v2393_v43, 0.0  ;;  %v5512_v49 = vpop.f32.mrb[122].mxu0 }
 0x1da   : > { %v4023_v48 = vmax.f32 %v3353_v44, 0.0  ;;  %v5800_v50 = vpop.f32.mrb[122].mxu1  ;;  %4217 = vst.msk [vmem:[%s6434_s4 + $0x3c8] sm:$0xff] %vm4095_vm4, %v3832_v45  ;;  %v2408_v51 = vadd.f32 %v7288_v23, %v5512_v49  ;;  %v2402_v53 = vpop.f32.mrb[123].mxu0 }
 0x1db   : > { %4409 = vst.msk [vmem:[%s6434_s4 + $0x9c8] sm:$0xff] %vm4095_vm4, %v4024_v46  ;;  %v3368_v52 = vadd.f32 %v7288_v23, %v5800_v50  ;;  %v3362_v54 = vpop.f32.mrb[123].mxu1  ;;  %4216 = vst.msk [vmem:[%s6434_s4 + $0x3c0] sm:$0xff] %vm4095_vm4, %v3831_v47  ;;  %v2403_v55 = vadd.f32 %v7288_v23, %v2402_v53 }
 0x1dc   : > { %4408 = vst.msk [vmem:[%s6434_s4 + $0x9c0] sm:$0xff] %vm4095_vm4, %v4023_v48  ;;  %v3363_v56 = vadd.f32 %v7288_v23, %v3362_v54  ;;  %v3834_v57 = vmax.f32 %v2408_v51, 0.0 }
 0x1dd   : > { %v4026_v58 = vmax.f32 %v3368_v52, 0.0  ;;  %v3833_v59 = vmax.f32 %v2403_v55, 0.0  ;;  %v5515_v61 = vpop.f32.mrb[124].mxu0 }
 0x1de   : > { %v4025_v60 = vmax.f32 %v3363_v56, 0.0  ;;  %v5803_v62 = vpop.f32.mrb[124].mxu1  ;;  %4219 = vst.msk [vmem:[%s6434_s4 + $0x3d8] sm:$0xff] %vm4095_vm4, %v3834_v57  ;;  %v2418_v63 = vadd.f32 %v7288_v23, %v5515_v61  ;;  %v2412_v1 = vpop.f32.mrb[125].mxu0 }
 0x1df   : > { %4411 = vst.msk [vmem:[%s6434_s4 + $0x9d8] sm:$0xff] %vm4095_vm4, %v4026_v58  ;;  %v3378_v0 = vadd.f32 %v7288_v23, %v5803_v62  ;;  %v3372_v2 = vpop.f32.mrb[125].mxu1  ;;  %4218 = vst.msk [vmem:[%s6434_s4 + $0x3d0] sm:$0xff] %vm4095_vm4, %v3833_v59  ;;  %v2413_v3 = vadd.f32 %v7288_v23, %v2412_v1 }
 0x1e0   : > { %4410 = vst.msk [vmem:[%s6434_s4 + $0x9d0] sm:$0xff] %vm4095_vm4, %v4025_v60  ;;  %v3373_v4 = vadd.f32 %v7288_v23, %v3372_v2  ;;  %v3836_v5 = vmax.f32 %v2418_v63, 0.0 }
 0x1e1   : > { %v4028_v6 = vmax.f32 %v3378_v0, 0.0  ;;  %v3835_v7 = vmax.f32 %v2413_v3, 0.0  ;;  %v5518_v9 = vpop.f32.mrb[126].mxu0 }
 0x1e2   : > { %v4027_v8 = vmax.f32 %v3373_v4, 0.0  ;;  %v5806_v10 = vpop.f32.mrb[126].mxu1  ;;  %4221 = vst.msk [vmem:[%s6434_s4 + $0x3e8] sm:$0xff] %vm4095_vm4, %v3836_v5  ;;  %v2428_v11 = vadd.f32 %v7288_v23, %v5518_v9  ;;  %v2422_v13 = vpop.f32.mrb[127].mxu0 }
 0x1e3   : > { %4413 = vst.msk [vmem:[%s6434_s4 + $0x9e8] sm:$0xff] %vm4095_vm4, %v4028_v6  ;;  %v3388_v12 = vadd.f32 %v7288_v23, %v5806_v10  ;;  %v3382_v14 = vpop.f32.mrb[127].mxu1  ;;  %4220 = vst.msk [vmem:[%s6434_s4 + $0x3e0] sm:$0xff] %vm4095_vm4, %v3835_v7  ;;  %v2423_v15 = vadd.f32 %v7288_v23, %v2422_v13 }
 0x1e4   : > { %4412 = vst.msk [vmem:[%s6434_s4 + $0x9e0] sm:$0xff] %vm4095_vm4, %v4027_v8  ;;  %v3383_v16 = vadd.f32 %v7288_v23, %v3382_v14  ;;  %v3838_v17 = vmax.f32 %v2428_v11, 0.0 }
 0x1e5   : > { %v4030_v18 = vmax.f32 %v3388_v12, 0.0  ;;  %v3837_v19 = vmax.f32 %v2423_v15, 0.0  ;;  %v5521_v21 = vpop.f32.mrb[128].mxu0 }
 0x1e6   : > { %v4029_v20 = vmax.f32 %v3383_v16, 0.0  ;;  %v5809_v22 = vpop.f32.mrb[128].mxu1  ;;  %4223 = vst.msk [vmem:[%s6434_s4 + $0x3f8] sm:$0xff] %vm4095_vm4, %v3838_v17  ;;  %v2438_v24 = vadd.f32 %v7288_v23, %v5521_v21  ;;  %v2432_v25 = vpop.f32.mrb[129].mxu0 }
 0x1e7   : > { %4415 = vst.msk [vmem:[%s6434_s4 + $0x9f8] sm:$0xff] %vm4095_vm4, %v4030_v18  ;;  %v3398_v28 = vadd.f32 %v7288_v23, %v5809_v22  ;;  %v3392_v26 = vpop.f32.mrb[129].mxu1  ;;  %4222 = vst.msk [vmem:[%s6434_s4 + $0x3f0] sm:$0xff] %vm4095_vm4, %v3837_v19  ;;  %v2433_v27 = vadd.f32 %v7288_v23, %v2432_v25 }
 0x1e8   : > { %4414 = vst.msk [vmem:[%s6434_s4 + $0x9f0] sm:$0xff] %vm4095_vm4, %v4029_v20  ;;  %v3393_v29 = vadd.f32 %v7288_v23, %v3392_v26  ;;  %v3840_v30 = vmax.f32 %v2438_v24, 0.0 }
 0x1e9   : > { %v4032_v31 = vmax.f32 %v3398_v28, 0.0  ;;  %v3839_v32 = vmax.f32 %v2433_v27, 0.0  ;;  %v5524_v34 = vpop.f32.mrb[130].mxu0 }
 0x1ea   : > { %v4031_v33 = vmax.f32 %v3393_v29, 0.0  ;;  %v5812_v35 = vpop.f32.mrb[130].mxu1  ;;  %4225 = vst.msk [vmem:[%s6434_s4 + $0x408] sm:$0xff] %vm4095_vm4, %v3840_v30  ;;  %v2448_v36 = vadd.f32 %v7288_v23, %v5524_v34  ;;  %v2442_v38 = vpop.f32.mrb[131].mxu0 }
 0x1eb   : > { %4417 = vst.msk [vmem:[%s6434_s4 + $0xa08] sm:$0xff] %vm4095_vm4, %v4032_v31  ;;  %v3408_v37 = vadd.f32 %v7288_v23, %v5812_v35  ;;  %v3402_v39 = vpop.f32.mrb[131].mxu1  ;;  %4224 = vst.msk [vmem:[%s6434_s4 + $0x400] sm:$0xff] %vm4095_vm4, %v3839_v32  ;;  %v2443_v40 = vadd.f32 %v7288_v23, %v2442_v38 }
 0x1ec   : > { %4416 = vst.msk [vmem:[%s6434_s4 + $0xa00] sm:$0xff] %vm4095_vm4, %v4031_v33  ;;  %v3403_v41 = vadd.f32 %v7288_v23, %v3402_v39  ;;  %v3842_v42 = vmax.f32 %v2448_v36, 0.0 }
 0x1ed   : > { %v4034_v43 = vmax.f32 %v3408_v37, 0.0  ;;  %v3841_v44 = vmax.f32 %v2443_v40, 0.0  ;;  %v5527_v46 = vpop.f32.mrb[132].mxu0 }
 0x1ee   : > { %v4033_v45 = vmax.f32 %v3403_v41, 0.0  ;;  %v5815_v47 = vpop.f32.mrb[132].mxu1  ;;  %4227 = vst.msk [vmem:[%s6434_s4 + $0x418] sm:$0xff] %vm4095_vm4, %v3842_v42  ;;  %v2458_v48 = vadd.f32 %v7288_v23, %v5527_v46  ;;  %v2452_v50 = vpop.f32.mrb[133].mxu0 }
 0x1ef   : > { %4419 = vst.msk [vmem:[%s6434_s4 + $0xa18] sm:$0xff] %vm4095_vm4, %v4034_v43  ;;  %v3418_v49 = vadd.f32 %v7288_v23, %v5815_v47  ;;  %v3412_v51 = vpop.f32.mrb[133].mxu1  ;;  %4226 = vst.msk [vmem:[%s6434_s4 + $0x410] sm:$0xff] %vm4095_vm4, %v3841_v44  ;;  %v2453_v52 = vadd.f32 %v7288_v23, %v2452_v50 }
 0x1f0   : > { %4418 = vst.msk [vmem:[%s6434_s4 + $0xa10] sm:$0xff] %vm4095_vm4, %v4033_v45  ;;  %v3413_v53 = vadd.f32 %v7288_v23, %v3412_v51  ;;  %v3844_v54 = vmax.f32 %v2458_v48, 0.0 }
 0x1f1   : > { %v4036_v55 = vmax.f32 %v3418_v49, 0.0  ;;  %v3843_v56 = vmax.f32 %v2453_v52, 0.0  ;;  %v5530_v58 = vpop.f32.mrb[134].mxu0 }
 0x1f2   : > { %v4035_v57 = vmax.f32 %v3413_v53, 0.0  ;;  %v5818_v59 = vpop.f32.mrb[134].mxu1  ;;  %4229 = vst.msk [vmem:[%s6434_s4 + $0x428] sm:$0xff] %vm4095_vm4, %v3844_v54  ;;  %v2468_v60 = vadd.f32 %v7288_v23, %v5530_v58  ;;  %v2462_v62 = vpop.f32.mrb[135].mxu0 }
 0x1f3   : > { %4421 = vst.msk [vmem:[%s6434_s4 + $0xa28] sm:$0xff] %vm4095_vm4, %v4036_v55  ;;  %v3428_v61 = vadd.f32 %v7288_v23, %v5818_v59  ;;  %v3422_v63 = vpop.f32.mrb[135].mxu1  ;;  %4228 = vst.msk [vmem:[%s6434_s4 + $0x420] sm:$0xff] %vm4095_vm4, %v3843_v56  ;;  %v2463_v0 = vadd.f32 %v7288_v23, %v2462_v62 }
 0x1f4   : > { %4420 = vst.msk [vmem:[%s6434_s4 + $0xa20] sm:$0xff] %vm4095_vm4, %v4035_v57  ;;  %v3423_v1 = vadd.f32 %v7288_v23, %v3422_v63  ;;  %v3846_v2 = vmax.f32 %v2468_v60, 0.0 }
 0x1f5   : > { %v4038_v3 = vmax.f32 %v3428_v61, 0.0  ;;  %v3845_v4 = vmax.f32 %v2463_v0, 0.0  ;;  %v5533_v6 = vpop.f32.mrb[136].mxu0 }
 0x1f6   : > { %v4037_v5 = vmax.f32 %v3423_v1, 0.0  ;;  %v5821_v7 = vpop.f32.mrb[136].mxu1  ;;  %4231 = vst.msk [vmem:[%s6434_s4 + $0x438] sm:$0xff] %vm4095_vm4, %v3846_v2  ;;  %v2478_v8 = vadd.f32 %v7288_v23, %v5533_v6  ;;  %v2472_v10 = vpop.f32.mrb[137].mxu0 }
 0x1f7   : > { %4423 = vst.msk [vmem:[%s6434_s4 + $0xa38] sm:$0xff] %vm4095_vm4, %v4038_v3  ;;  %v3438_v9 = vadd.f32 %v7288_v23, %v5821_v7  ;;  %v3432_v11 = vpop.f32.mrb[137].mxu1  ;;  %4230 = vst.msk [vmem:[%s6434_s4 + $0x430] sm:$0xff] %vm4095_vm4, %v3845_v4  ;;  %v2473_v12 = vadd.f32 %v7288_v23, %v2472_v10 }
 0x1f8   : > { %4422 = vst.msk [vmem:[%s6434_s4 + $0xa30] sm:$0xff] %vm4095_vm4, %v4037_v5  ;;  %v3433_v13 = vadd.f32 %v7288_v23, %v3432_v11  ;;  %v3848_v14 = vmax.f32 %v2478_v8, 0.0 }
 0x1f9   : > { %v4040_v15 = vmax.f32 %v3438_v9, 0.0  ;;  %v3847_v16 = vmax.f32 %v2473_v12, 0.0  ;;  %v5536_v18 = vpop.f32.mrb[138].mxu0 }
 0x1fa   : > { %v4039_v17 = vmax.f32 %v3433_v13, 0.0  ;;  %v5824_v19 = vpop.f32.mrb[138].mxu1  ;;  %4233 = vst.msk [vmem:[%s6434_s4 + $0x448] sm:$0xff] %vm4095_vm4, %v3848_v14  ;;  %v2488_v20 = vadd.f32 %v7288_v23, %v5536_v18  ;;  %v2482_v22 = vpop.f32.mrb[139].mxu0 }
 0x1fb   : > { %4425 = vst.msk [vmem:[%s6434_s4 + $0xa48] sm:$0xff] %vm4095_vm4, %v4040_v15  ;;  %v3448_v21 = vadd.f32 %v7288_v23, %v5824_v19  ;;  %v3442_v24 = vpop.f32.mrb[139].mxu1  ;;  %4232 = vst.msk [vmem:[%s6434_s4 + $0x440] sm:$0xff] %vm4095_vm4, %v3847_v16  ;;  %v2483_v28 = vadd.f32 %v7288_v23, %v2482_v22 }
 0x1fc   : > { %4424 = vst.msk [vmem:[%s6434_s4 + $0xa40] sm:$0xff] %vm4095_vm4, %v4039_v17  ;;  %v3443_v25 = vadd.f32 %v7288_v23, %v3442_v24  ;;  %v3850_v26 = vmax.f32 %v2488_v20, 0.0 }
 0x1fd   : > { %v4042_v27 = vmax.f32 %v3448_v21, 0.0  ;;  %v3849_v29 = vmax.f32 %v2483_v28, 0.0  ;;  %v5539_v31 = vpop.f32.mrb[140].mxu0 }
 0x1fe   : > { %v4041_v30 = vmax.f32 %v3443_v25, 0.0  ;;  %v5827_v32 = vpop.f32.mrb[140].mxu1  ;;  %4235 = vst.msk [vmem:[%s6434_s4 + $0x458] sm:$0xff] %vm4095_vm4, %v3850_v26  ;;  %v2498_v33 = vadd.f32 %v7288_v23, %v5539_v31  ;;  %v2492_v35 = vpop.f32.mrb[141].mxu0 }
 0x1ff   : > { %4427 = vst.msk [vmem:[%s6434_s4 + $0xa58] sm:$0xff] %vm4095_vm4, %v4042_v27  ;;  %v3458_v34 = vadd.f32 %v7288_v23, %v5827_v32  ;;  %v3452_v36 = vpop.f32.mrb[141].mxu1  ;;  %4234 = vst.msk [vmem:[%s6434_s4 + $0x450] sm:$0xff] %vm4095_vm4, %v3849_v29  ;;  %v2493_v37 = vadd.f32 %v7288_v23, %v2492_v35 }
 0x200   : > { %4426 = vst.msk [vmem:[%s6434_s4 + $0xa50] sm:$0xff] %vm4095_vm4, %v4041_v30  ;;  %v3453_v38 = vadd.f32 %v7288_v23, %v3452_v36  ;;  %v3852_v39 = vmax.f32 %v2498_v33, 0.0  ;;  %v7677_v30 = vld [vmem:[%s7940_s2] ss:$0 sm:$0xff] }
 0x201   : > { %v4044_v40 = vmax.f32 %v3458_v34, 0.0  ;;  %v3851_v41 = vmax.f32 %v2493_v37, 0.0  ;;  %v5542_v43 = vpop.f32.mrb[142].mxu0 }
 0x202   : > { %v4043_v42 = vmax.f32 %v3453_v38, 0.0  ;;  %v5830_v44 = vpop.f32.mrb[142].mxu1  ;;  %4237 = vst.msk [vmem:[%s6434_s4 + $0x468] sm:$0xff] %vm4095_vm4, %v3852_v39  ;;  %v2508_v45 = vadd.f32 %v7288_v23, %v5542_v43  ;;  %v2502_v47 = vpop.f32.mrb[143].mxu0 }
 0x203   : > { %4429 = vst.msk [vmem:[%s6434_s4 + $0xa68] sm:$0xff] %vm4095_vm4, %v4044_v40  ;;  %v3468_v46 = vadd.f32 %v7288_v23, %v5830_v44  ;;  %v3462_v48 = vpop.f32.mrb[143].mxu1  ;;  %4236 = vst.msk [vmem:[%s6434_s4 + $0x460] sm:$0xff] %vm4095_vm4, %v3851_v41  ;;  %v2503_v49 = vadd.f32 %v7288_v23, %v2502_v47 }
 0x204   : > { %4428 = vst.msk [vmem:[%s6434_s4 + $0xa60] sm:$0xff] %vm4095_vm4, %v4043_v42  ;;  %v3463_v50 = vadd.f32 %v7288_v23, %v3462_v48  ;;  %v3854_v51 = vmax.f32 %v2508_v45, 0.0 }
 0x205   : > { %v4046_v52 = vmax.f32 %v3468_v46, 0.0  ;;  %v3853_v53 = vmax.f32 %v2503_v49, 0.0  ;;  %v5545_v55 = vpop.f32.mrb[144].mxu0 }
 0x206   : > { %v4045_v54 = vmax.f32 %v3463_v50, 0.0  ;;  %v5833_v56 = vpop.f32.mrb[144].mxu1  ;;  %4239 = vst.msk [vmem:[%s6434_s4 + $0x478] sm:$0xff] %vm4095_vm4, %v3854_v51  ;;  %v2518_v57 = vadd.f32 %v7288_v23, %v5545_v55  ;;  %v2512_v59 = vpop.f32.mrb[145].mxu0 }
 0x207   : > { %4431 = vst.msk [vmem:[%s6434_s4 + $0xa78] sm:$0xff] %vm4095_vm4, %v4046_v52  ;;  %v3478_v58 = vadd.f32 %v7288_v23, %v5833_v56  ;;  %v3472_v60 = vpop.f32.mrb[145].mxu1  ;;  %4238 = vst.msk [vmem:[%s6434_s4 + $0x470] sm:$0xff] %vm4095_vm4, %v3853_v53  ;;  %v2513_v61 = vadd.f32 %v7288_v23, %v2512_v59 }
 0x208   : > { %4430 = vst.msk [vmem:[%s6434_s4 + $0xa70] sm:$0xff] %vm4095_vm4, %v4045_v54  ;;  %v3473_v62 = vadd.f32 %v7288_v23, %v3472_v60  ;;  %v3856_v63 = vmax.f32 %v2518_v57, 0.0 }
 0x209   : > { %v4048_v0 = vmax.f32 %v3478_v58, 0.0  ;;  %v3855_v1 = vmax.f32 %v2513_v61, 0.0  ;;  %v5548_v3 = vpop.f32.mrb[146].mxu0 }
 0x20a   : > { %v4047_v2 = vmax.f32 %v3473_v62, 0.0  ;;  %v5836_v4 = vpop.f32.mrb[146].mxu1  ;;  %4241 = vst.msk [vmem:[%s6434_s4 + $0x488] sm:$0xff] %vm4095_vm4, %v3856_v63  ;;  %v2528_v5 = vadd.f32 %v7288_v23, %v5548_v3  ;;  %v2522_v7 = vpop.f32.mrb[147].mxu0 }
 0x20b   : > { %4433 = vst.msk [vmem:[%s6434_s4 + $0xa88] sm:$0xff] %vm4095_vm4, %v4048_v0  ;;  %v3488_v6 = vadd.f32 %v7288_v23, %v5836_v4  ;;  %v3482_v8 = vpop.f32.mrb[147].mxu1  ;;  %4240 = vst.msk [vmem:[%s6434_s4 + $0x480] sm:$0xff] %vm4095_vm4, %v3855_v1  ;;  %v2523_v9 = vadd.f32 %v7288_v23, %v2522_v7 }
 0x20c   : > { %4432 = vst.msk [vmem:[%s6434_s4 + $0xa80] sm:$0xff] %vm4095_vm4, %v4047_v2  ;;  %v3483_v10 = vadd.f32 %v7288_v23, %v3482_v8  ;;  %v3858_v11 = vmax.f32 %v2528_v5, 0.0 }
 0x20d   : > { %v4050_v12 = vmax.f32 %v3488_v6, 0.0  ;;  %v3857_v13 = vmax.f32 %v2523_v9, 0.0  ;;  %v5551_v15 = vpop.f32.mrb[148].mxu0 }
 0x20e   : > { %v4049_v14 = vmax.f32 %v3483_v10, 0.0  ;;  %v5839_v16 = vpop.f32.mrb[148].mxu1  ;;  %4243 = vst.msk [vmem:[%s6434_s4 + $0x498] sm:$0xff] %vm4095_vm4, %v3858_v11  ;;  %v2538_v17 = vadd.f32 %v7288_v23, %v5551_v15  ;;  %v2532_v19 = vpop.f32.mrb[149].mxu0 }
 0x20f   : > { %4435 = vst.msk [vmem:[%s6434_s4 + $0xa98] sm:$0xff] %vm4095_vm4, %v4050_v12  ;;  %v3498_v18 = vadd.f32 %v7288_v23, %v5839_v16  ;;  %v3492_v20 = vpop.f32.mrb[149].mxu1  ;;  %4242 = vst.msk [vmem:[%s6434_s4 + $0x490] sm:$0xff] %vm4095_vm4, %v3857_v13  ;;  %v2533_v21 = vadd.f32 %v7288_v23, %v2532_v19 }
 0x210   : > { %4434 = vst.msk [vmem:[%s6434_s4 + $0xa90] sm:$0xff] %vm4095_vm4, %v4049_v14  ;;  %v3493_v22 = vadd.f32 %v7288_v23, %v3492_v20  ;;  %v3860_v24 = vmax.f32 %v2538_v17, 0.0 }
 0x211   : > { %v4052_v28 = vmax.f32 %v3498_v18, 0.0  ;;  %v3859_v25 = vmax.f32 %v2533_v21, 0.0  ;;  %v5554_v27 = vpop.f32.mrb[150].mxu0 }
 0x212   : > { %v4051_v26 = vmax.f32 %v3493_v22, 0.0  ;;  %v5842_v29 = vpop.f32.mrb[150].mxu1  ;;  %4245 = vst.msk [vmem:[%s6434_s4 + $0x4a8] sm:$0xff] %vm4095_vm4, %v3860_v24  ;;  %v2548_v31 = vadd.f32 %v7677_v30, %v5554_v27  ;;  %v2542_v32 = vpop.f32.mrb[151].mxu0 }
 0x213   : > { %4437 = vst.msk [vmem:[%s6434_s4 + $0xaa8] sm:$0xff] %vm4095_vm4, %v4052_v28  ;;  %v3508_v23 = vadd.f32 %v7677_v30, %v5842_v29  ;;  %v3502_v33 = vpop.f32.mrb[151].mxu1  ;;  %4244 = vst.msk [vmem:[%s6434_s4 + $0x4a0] sm:$0xff] %vm4095_vm4, %v3859_v25  ;;  %v2543_v34 = vadd.f32 %v7677_v30, %v2542_v32 }
 0x214   : > { %4436 = vst.msk [vmem:[%s6434_s4 + $0xaa0] sm:$0xff] %vm4095_vm4, %v4051_v26  ;;  %v3503_v35 = vadd.f32 %v7677_v30, %v3502_v33  ;;  %v3862_v36 = vmax.f32 %v2548_v31, 0.0 }
 0x215   : > { %v4054_v37 = vmax.f32 %v3508_v23, 0.0  ;;  %v3861_v38 = vmax.f32 %v2543_v34, 0.0  ;;  %v5557_v40 = vpop.f32.mrb[152].mxu0 }
 0x216   : > { %v4053_v39 = vmax.f32 %v3503_v35, 0.0  ;;  %v5845_v41 = vpop.f32.mrb[152].mxu1  ;;  %4247 = vst.msk [vmem:[%s6434_s4 + $0x4b8] sm:$0xff] %vm4095_vm4, %v3862_v36  ;;  %v2558_v42 = vadd.f32 %v7677_v30, %v5557_v40  ;;  %v2552_v44 = vpop.f32.mrb[153].mxu0 }
 0x217   : > { %4439 = vst.msk [vmem:[%s6434_s4 + $0xab8] sm:$0xff] %vm4095_vm4, %v4054_v37  ;;  %v3518_v43 = vadd.f32 %v7677_v30, %v5845_v41  ;;  %v3512_v45 = vpop.f32.mrb[153].mxu1  ;;  %4246 = vst.msk [vmem:[%s6434_s4 + $0x4b0] sm:$0xff] %vm4095_vm4, %v3861_v38  ;;  %v2553_v46 = vadd.f32 %v7677_v30, %v2552_v44 }
 0x218   : > { %4438 = vst.msk [vmem:[%s6434_s4 + $0xab0] sm:$0xff] %vm4095_vm4, %v4053_v39  ;;  %v3513_v47 = vadd.f32 %v7677_v30, %v3512_v45  ;;  %v3864_v48 = vmax.f32 %v2558_v42, 0.0 }
 0x219   : > { %v4056_v49 = vmax.f32 %v3518_v43, 0.0  ;;  %v3863_v50 = vmax.f32 %v2553_v46, 0.0  ;;  %v5560_v52 = vpop.f32.mrb[154].mxu0 }
 0x21a   : > { %v4055_v51 = vmax.f32 %v3513_v47, 0.0  ;;  %v5848_v53 = vpop.f32.mrb[154].mxu1  ;;  %4249 = vst.msk [vmem:[%s6434_s4 + $0x4c8] sm:$0xff] %vm4095_vm4, %v3864_v48  ;;  %v2568_v54 = vadd.f32 %v7677_v30, %v5560_v52  ;;  %v2562_v56 = vpop.f32.mrb[155].mxu0 }
 0x21b   : > { %4441 = vst.msk [vmem:[%s6434_s4 + $0xac8] sm:$0xff] %vm4095_vm4, %v4056_v49  ;;  %v3528_v55 = vadd.f32 %v7677_v30, %v5848_v53  ;;  %v3522_v57 = vpop.f32.mrb[155].mxu1  ;;  %4248 = vst.msk [vmem:[%s6434_s4 + $0x4c0] sm:$0xff] %vm4095_vm4, %v3863_v50  ;;  %v2563_v58 = vadd.f32 %v7677_v30, %v2562_v56 }
 0x21c   : > { %4440 = vst.msk [vmem:[%s6434_s4 + $0xac0] sm:$0xff] %vm4095_vm4, %v4055_v51  ;;  %v3523_v59 = vadd.f32 %v7677_v30, %v3522_v57  ;;  %v3866_v60 = vmax.f32 %v2568_v54, 0.0 }
 0x21d   : > { %v4058_v61 = vmax.f32 %v3528_v55, 0.0  ;;  %v3865_v62 = vmax.f32 %v2563_v58, 0.0  ;;  %v5563_v0 = vpop.f32.mrb[156].mxu0 }
 0x21e   : > { %v4057_v63 = vmax.f32 %v3523_v59, 0.0  ;;  %v5851_v1 = vpop.f32.mrb[156].mxu1  ;;  %4251 = vst.msk [vmem:[%s6434_s4 + $0x4d8] sm:$0xff] %vm4095_vm4, %v3866_v60  ;;  %v2578_v2 = vadd.f32 %v7677_v30, %v5563_v0  ;;  %v2572_v4 = vpop.f32.mrb[157].mxu0 }
 0x21f   : > { %4443 = vst.msk [vmem:[%s6434_s4 + $0xad8] sm:$0xff] %vm4095_vm4, %v4058_v61  ;;  %v3538_v3 = vadd.f32 %v7677_v30, %v5851_v1  ;;  %v3532_v5 = vpop.f32.mrb[157].mxu1  ;;  %4250 = vst.msk [vmem:[%s6434_s4 + $0x4d0] sm:$0xff] %vm4095_vm4, %v3865_v62  ;;  %v2573_v6 = vadd.f32 %v7677_v30, %v2572_v4 }
 0x220   : > { %4442 = vst.msk [vmem:[%s6434_s4 + $0xad0] sm:$0xff] %vm4095_vm4, %v4057_v63  ;;  %v3533_v7 = vadd.f32 %v7677_v30, %v3532_v5  ;;  %v3868_v8 = vmax.f32 %v2578_v2, 0.0 }
 0x221   : > { %v4060_v9 = vmax.f32 %v3538_v3, 0.0  ;;  %v3867_v10 = vmax.f32 %v2573_v6, 0.0  ;;  %v5566_v12 = vpop.f32.mrb[158].mxu0 }
 0x222   : > { %v4059_v11 = vmax.f32 %v3533_v7, 0.0  ;;  %v5854_v13 = vpop.f32.mrb[158].mxu1  ;;  %4253 = vst.msk [vmem:[%s6434_s4 + $0x4e8] sm:$0xff] %vm4095_vm4, %v3868_v8  ;;  %v2588_v14 = vadd.f32 %v7677_v30, %v5566_v12  ;;  %v2582_v16 = vpop.f32.mrb[159].mxu0 }
 0x223   : > { %4445 = vst.msk [vmem:[%s6434_s4 + $0xae8] sm:$0xff] %vm4095_vm4, %v4060_v9  ;;  %v3548_v15 = vadd.f32 %v7677_v30, %v5854_v13  ;;  %v3542_v17 = vpop.f32.mrb[159].mxu1  ;;  %4252 = vst.msk [vmem:[%s6434_s4 + $0x4e0] sm:$0xff] %vm4095_vm4, %v3867_v10  ;;  %v2583_v18 = vadd.f32 %v7677_v30, %v2582_v16 }
 0x224   : > { %4444 = vst.msk [vmem:[%s6434_s4 + $0xae0] sm:$0xff] %vm4095_vm4, %v4059_v11  ;;  %v3543_v19 = vadd.f32 %v7677_v30, %v3542_v17  ;;  %v3870_v20 = vmax.f32 %v2588_v14, 0.0 }
 0x225   : > { %v4062_v21 = vmax.f32 %v3548_v15, 0.0  ;;  %v3869_v22 = vmax.f32 %v2583_v18, 0.0  ;;  %v5569_v28 = vpop.f32.mrb[160].mxu0 }
 0x226   : > { %v4061_v24 = vmax.f32 %v3543_v19, 0.0  ;;  %v5857_v25 = vpop.f32.mrb[160].mxu1  ;;  %4255 = vst.msk [vmem:[%s6434_s4 + $0x4f8] sm:$0xff] %vm4095_vm4, %v3870_v20  ;;  %v2598_v26 = vadd.f32 %v7677_v30, %v5569_v28  ;;  %v2592_v29 = vpop.f32.mrb[161].mxu0 }
 0x227   : > { %4447 = vst.msk [vmem:[%s6434_s4 + $0xaf8] sm:$0xff] %vm4095_vm4, %v4062_v21  ;;  %v3558_v27 = vadd.f32 %v7677_v30, %v5857_v25  ;;  %v3552_v31 = vpop.f32.mrb[161].mxu1  ;;  %4254 = vst.msk [vmem:[%s6434_s4 + $0x4f0] sm:$0xff] %vm4095_vm4, %v3869_v22  ;;  %v2593_v23 = vadd.f32 %v7677_v30, %v2592_v29 }
 0x228   : > { %4446 = vst.msk [vmem:[%s6434_s4 + $0xaf0] sm:$0xff] %vm4095_vm4, %v4061_v24  ;;  %v3553_v32 = vadd.f32 %v7677_v30, %v3552_v31  ;;  %v3872_v33 = vmax.f32 %v2598_v26, 0.0 }
 0x229   : > { %v4064_v34 = vmax.f32 %v3558_v27, 0.0  ;;  %v3871_v35 = vmax.f32 %v2593_v23, 0.0  ;;  %v5572_v37 = vpop.f32.mrb[162].mxu0 }
 0x22a   : > { %v4063_v36 = vmax.f32 %v3553_v32, 0.0  ;;  %v5860_v38 = vpop.f32.mrb[162].mxu1  ;;  %4257 = vst.msk [vmem:[%s6434_s4 + $0x508] sm:$0xff] %vm4095_vm4, %v3872_v33  ;;  %v2608_v39 = vadd.f32 %v7677_v30, %v5572_v37  ;;  %v2602_v41 = vpop.f32.mrb[163].mxu0 }
 0x22b   : > { %4449 = vst.msk [vmem:[%s6434_s4 + $0xb08] sm:$0xff] %vm4095_vm4, %v4064_v34  ;;  %v3568_v40 = vadd.f32 %v7677_v30, %v5860_v38  ;;  %v3562_v42 = vpop.f32.mrb[163].mxu1  ;;  %4256 = vst.msk [vmem:[%s6434_s4 + $0x500] sm:$0xff] %vm4095_vm4, %v3871_v35  ;;  %v2603_v43 = vadd.f32 %v7677_v30, %v2602_v41 }
 0x22c   : > { %4448 = vst.msk [vmem:[%s6434_s4 + $0xb00] sm:$0xff] %vm4095_vm4, %v4063_v36  ;;  %v3563_v44 = vadd.f32 %v7677_v30, %v3562_v42  ;;  %v3874_v45 = vmax.f32 %v2608_v39, 0.0 }
 0x22d   : > { %v4066_v46 = vmax.f32 %v3568_v40, 0.0  ;;  %v3873_v47 = vmax.f32 %v2603_v43, 0.0  ;;  %v5575_v49 = vpop.f32.mrb[164].mxu0 }
 0x22e   : > { %v4065_v48 = vmax.f32 %v3563_v44, 0.0  ;;  %v5863_v50 = vpop.f32.mrb[164].mxu1  ;;  %4259 = vst.msk [vmem:[%s6434_s4 + $0x518] sm:$0xff] %vm4095_vm4, %v3874_v45  ;;  %v2618_v51 = vadd.f32 %v7677_v30, %v5575_v49  ;;  %v2612_v53 = vpop.f32.mrb[165].mxu0 }
 0x22f   : > { %4451 = vst.msk [vmem:[%s6434_s4 + $0xb18] sm:$0xff] %vm4095_vm4, %v4066_v46  ;;  %v3578_v52 = vadd.f32 %v7677_v30, %v5863_v50  ;;  %v3572_v54 = vpop.f32.mrb[165].mxu1  ;;  %4258 = vst.msk [vmem:[%s6434_s4 + $0x510] sm:$0xff] %vm4095_vm4, %v3873_v47  ;;  %v2613_v55 = vadd.f32 %v7677_v30, %v2612_v53 }
 0x230   : > { %4450 = vst.msk [vmem:[%s6434_s4 + $0xb10] sm:$0xff] %vm4095_vm4, %v4065_v48  ;;  %v3573_v56 = vadd.f32 %v7677_v30, %v3572_v54  ;;  %v3876_v57 = vmax.f32 %v2618_v51, 0.0 }
 0x231   : > { %v4068_v58 = vmax.f32 %v3578_v52, 0.0  ;;  %v3875_v59 = vmax.f32 %v2613_v55, 0.0  ;;  %v5578_v61 = vpop.f32.mrb[166].mxu0 }
 0x232   : > { %v4067_v60 = vmax.f32 %v3573_v56, 0.0  ;;  %v5866_v62 = vpop.f32.mrb[166].mxu1  ;;  %4261 = vst.msk [vmem:[%s6434_s4 + $0x528] sm:$0xff] %vm4095_vm4, %v3876_v57  ;;  %v2628_v63 = vadd.f32 %v7677_v30, %v5578_v61  ;;  %v2622_v1 = vpop.f32.mrb[167].mxu0 }
 0x233   : > { %4453 = vst.msk [vmem:[%s6434_s4 + $0xb28] sm:$0xff] %vm4095_vm4, %v4068_v58  ;;  %v3588_v0 = vadd.f32 %v7677_v30, %v5866_v62  ;;  %v3582_v2 = vpop.f32.mrb[167].mxu1  ;;  %4260 = vst.msk [vmem:[%s6434_s4 + $0x520] sm:$0xff] %vm4095_vm4, %v3875_v59  ;;  %v2623_v3 = vadd.f32 %v7677_v30, %v2622_v1 }
 0x234   : > { %4452 = vst.msk [vmem:[%s6434_s4 + $0xb20] sm:$0xff] %vm4095_vm4, %v4067_v60  ;;  %v3583_v4 = vadd.f32 %v7677_v30, %v3582_v2  ;;  %v3878_v5 = vmax.f32 %v2628_v63, 0.0 }
 0x235   : > { %v4070_v6 = vmax.f32 %v3588_v0, 0.0  ;;  %v3877_v7 = vmax.f32 %v2623_v3, 0.0  ;;  %v5581_v9 = vpop.f32.mrb[168].mxu0 }
 0x236   : > { %v4069_v8 = vmax.f32 %v3583_v4, 0.0  ;;  %v5869_v10 = vpop.f32.mrb[168].mxu1  ;;  %4263 = vst.msk [vmem:[%s6434_s4 + $0x538] sm:$0xff] %vm4095_vm4, %v3878_v5  ;;  %v2638_v11 = vadd.f32 %v7677_v30, %v5581_v9  ;;  %v2632_v13 = vpop.f32.mrb[169].mxu0 }
 0x237   : > { %4455 = vst.msk [vmem:[%s6434_s4 + $0xb38] sm:$0xff] %vm4095_vm4, %v4070_v6  ;;  %v3598_v12 = vadd.f32 %v7677_v30, %v5869_v10  ;;  %v3592_v14 = vpop.f32.mrb[169].mxu1  ;;  %4262 = vst.msk [vmem:[%s6434_s4 + $0x530] sm:$0xff] %vm4095_vm4, %v3877_v7  ;;  %v2633_v15 = vadd.f32 %v7677_v30, %v2632_v13 }
 0x238   : > { %4454 = vst.msk [vmem:[%s6434_s4 + $0xb30] sm:$0xff] %vm4095_vm4, %v4069_v8  ;;  %v3593_v16 = vadd.f32 %v7677_v30, %v3592_v14  ;;  %v3880_v17 = vmax.f32 %v2638_v11, 0.0 }
 0x239   : > { %v4072_v18 = vmax.f32 %v3598_v12, 0.0  ;;  %v3879_v19 = vmax.f32 %v2633_v15, 0.0  ;;  %v5584_v21 = vpop.f32.mrb[170].mxu0 }
 0x23a   : > { %v4071_v20 = vmax.f32 %v3593_v16, 0.0  ;;  %v5872_v22 = vpop.f32.mrb[170].mxu1  ;;  %4265 = vst.msk [vmem:[%s6434_s4 + $0x548] sm:$0xff] %vm4095_vm4, %v3880_v17  ;;  %v2648_v24 = vadd.f32 %v7677_v30, %v5584_v21  ;;  %v2642_v25 = vpop.f32.mrb[171].mxu0 }
 0x23b   : > { %4457 = vst.msk [vmem:[%s6434_s4 + $0xb48] sm:$0xff] %vm4095_vm4, %v4072_v18  ;;  %v3608_v28 = vadd.f32 %v7677_v30, %v5872_v22  ;;  %v3602_v26 = vpop.f32.mrb[171].mxu1  ;;  %4264 = vst.msk [vmem:[%s6434_s4 + $0x540] sm:$0xff] %vm4095_vm4, %v3879_v19  ;;  %v2643_v27 = vadd.f32 %v7677_v30, %v2642_v25 }
 0x23c   : > { %4456 = vst.msk [vmem:[%s6434_s4 + $0xb40] sm:$0xff] %vm4095_vm4, %v4071_v20  ;;  %v3603_v29 = vadd.f32 %v7677_v30, %v3602_v26  ;;  %v3882_v31 = vmax.f32 %v2648_v24, 0.0 }
 0x23d   : > { %v4074_v23 = vmax.f32 %v3608_v28, 0.0  ;;  %v3881_v32 = vmax.f32 %v2643_v27, 0.0  ;;  %v5587_v34 = vpop.f32.mrb[172].mxu0 }
 0x23e   : > { %v4073_v33 = vmax.f32 %v3603_v29, 0.0  ;;  %v5875_v35 = vpop.f32.mrb[172].mxu1  ;;  %4267 = vst.msk [vmem:[%s6434_s4 + $0x558] sm:$0xff] %vm4095_vm4, %v3882_v31  ;;  %v2658_v36 = vadd.f32 %v7677_v30, %v5587_v34  ;;  %v2652_v38 = vpop.f32.mrb[173].mxu0 }
 0x23f   : > { %4459 = vst.msk [vmem:[%s6434_s4 + $0xb58] sm:$0xff] %vm4095_vm4, %v4074_v23  ;;  %v3618_v37 = vadd.f32 %v7677_v30, %v5875_v35  ;;  %v3612_v39 = vpop.f32.mrb[173].mxu1  ;;  %4266 = vst.msk [vmem:[%s6434_s4 + $0x550] sm:$0xff] %vm4095_vm4, %v3881_v32  ;;  %v2653_v40 = vadd.f32 %v7677_v30, %v2652_v38 }
 0x240   : > { %4458 = vst.msk [vmem:[%s6434_s4 + $0xb50] sm:$0xff] %vm4095_vm4, %v4073_v33  ;;  %v3613_v41 = vadd.f32 %v7677_v30, %v3612_v39  ;;  %v3884_v42 = vmax.f32 %v2658_v36, 0.0 }
 0x241   : > { %v4076_v43 = vmax.f32 %v3618_v37, 0.0  ;;  %v3883_v44 = vmax.f32 %v2653_v40, 0.0  ;;  %v5590_v46 = vpop.f32.mrb[174].mxu0 }
 0x242   : > { %v4075_v45 = vmax.f32 %v3613_v41, 0.0  ;;  %v5878_v47 = vpop.f32.mrb[174].mxu1  ;;  %4269 = vst.msk [vmem:[%s6434_s4 + $0x568] sm:$0xff] %vm4095_vm4, %v3884_v42  ;;  %v2668_v48 = vadd.f32 %v7677_v30, %v5590_v46  ;;  %v2662_v50 = vpop.f32.mrb[175].mxu0 }
 0x243   : > { %4461 = vst.msk [vmem:[%s6434_s4 + $0xb68] sm:$0xff] %vm4095_vm4, %v4076_v43  ;;  %v3628_v49 = vadd.f32 %v7677_v30, %v5878_v47  ;;  %v3622_v51 = vpop.f32.mrb[175].mxu1  ;;  %4268 = vst.msk [vmem:[%s6434_s4 + $0x560] sm:$0xff] %vm4095_vm4, %v3883_v44  ;;  %v2663_v52 = vadd.f32 %v7677_v30, %v2662_v50 }
 0x244   : > { %4460 = vst.msk [vmem:[%s6434_s4 + $0xb60] sm:$0xff] %vm4095_vm4, %v4075_v45  ;;  %v3623_v53 = vadd.f32 %v7677_v30, %v3622_v51  ;;  %v3886_v54 = vmax.f32 %v2668_v48, 0.0 }
 0x245   : > { %v4078_v55 = vmax.f32 %v3628_v49, 0.0  ;;  %v3885_v56 = vmax.f32 %v2663_v52, 0.0  ;;  %v5593_v58 = vpop.f32.mrb[176].mxu0 }
 0x246   : > { %v4077_v57 = vmax.f32 %v3623_v53, 0.0  ;;  %v5881_v59 = vpop.f32.mrb[176].mxu1  ;;  %4271 = vst.msk [vmem:[%s6434_s4 + $0x578] sm:$0xff] %vm4095_vm4, %v3886_v54  ;;  %v2678_v60 = vadd.f32 %v7677_v30, %v5593_v58  ;;  %v2672_v62 = vpop.f32.mrb[177].mxu0 }
 0x247   : > { %4463 = vst.msk [vmem:[%s6434_s4 + $0xb78] sm:$0xff] %vm4095_vm4, %v4078_v55  ;;  %v3638_v61 = vadd.f32 %v7677_v30, %v5881_v59  ;;  %v3632_v63 = vpop.f32.mrb[177].mxu1  ;;  %4270 = vst.msk [vmem:[%s6434_s4 + $0x570] sm:$0xff] %vm4095_vm4, %v3885_v56  ;;  %v2673_v0 = vadd.f32 %v7677_v30, %v2672_v62 }
 0x248   : > { %4462 = vst.msk [vmem:[%s6434_s4 + $0xb70] sm:$0xff] %vm4095_vm4, %v4077_v57  ;;  %v3633_v1 = vadd.f32 %v7677_v30, %v3632_v63  ;;  %v3888_v2 = vmax.f32 %v2678_v60, 0.0 }
 0x249   : > { %v4080_v3 = vmax.f32 %v3638_v61, 0.0  ;;  %v3887_v4 = vmax.f32 %v2673_v0, 0.0  ;;  %v5596_v6 = vpop.f32.mrb[178].mxu0 }
 0x24a   : > { %v4079_v5 = vmax.f32 %v3633_v1, 0.0  ;;  %v5884_v7 = vpop.f32.mrb[178].mxu1  ;;  %4273 = vst.msk [vmem:[%s6434_s4 + $0x588] sm:$0xff] %vm4095_vm4, %v3888_v2  ;;  %v2688_v8 = vadd.f32 %v7677_v30, %v5596_v6  ;;  %v2682_v10 = vpop.f32.mrb[179].mxu0 }
 0x24b   : > { %4465 = vst.msk [vmem:[%s6434_s4 + $0xb88] sm:$0xff] %vm4095_vm4, %v4080_v3  ;;  %v3648_v9 = vadd.f32 %v7677_v30, %v5884_v7  ;;  %v3642_v11 = vpop.f32.mrb[179].mxu1  ;;  %4272 = vst.msk [vmem:[%s6434_s4 + $0x580] sm:$0xff] %vm4095_vm4, %v3887_v4  ;;  %v2683_v12 = vadd.f32 %v7677_v30, %v2682_v10 }
 0x24c   : > { %4464 = vst.msk [vmem:[%s6434_s4 + $0xb80] sm:$0xff] %vm4095_vm4, %v4079_v5  ;;  %v3643_v13 = vadd.f32 %v7677_v30, %v3642_v11  ;;  %v3890_v14 = vmax.f32 %v2688_v8, 0.0 }
 0x24d   : > { %v4082_v15 = vmax.f32 %v3648_v9, 0.0  ;;  %v3889_v16 = vmax.f32 %v2683_v12, 0.0  ;;  %v5599_v18 = vpop.f32.mrb[180].mxu0 }
 0x24e   : > { %v4081_v17 = vmax.f32 %v3643_v13, 0.0  ;;  %v5887_v19 = vpop.f32.mrb[180].mxu1  ;;  %4275 = vst.msk [vmem:[%s6434_s4 + $0x598] sm:$0xff] %vm4095_vm4, %v3890_v14  ;;  %v2698_v20 = vadd.f32 %v7677_v30, %v5599_v18  ;;  %v2692_v22 = vpop.f32.mrb[181].mxu0 }
 0x24f   : > { %4467 = vst.msk [vmem:[%s6434_s4 + $0xb98] sm:$0xff] %vm4095_vm4, %v4082_v15  ;;  %v3658_v21 = vadd.f32 %v7677_v30, %v5887_v19  ;;  %v3652_v24 = vpop.f32.mrb[181].mxu1  ;;  %4274 = vst.msk [vmem:[%s6434_s4 + $0x590] sm:$0xff] %vm4095_vm4, %v3889_v16  ;;  %v2693_v28 = vadd.f32 %v7677_v30, %v2692_v22 }
 0x250   : > { %4466 = vst.msk [vmem:[%s6434_s4 + $0xb90] sm:$0xff] %vm4095_vm4, %v4081_v17  ;;  %v3653_v25 = vadd.f32 %v7677_v30, %v3652_v24  ;;  %v3892_v26 = vmax.f32 %v2698_v20, 0.0 }
 0x251   : > { %v4084_v27 = vmax.f32 %v3658_v21, 0.0  ;;  %v3891_v29 = vmax.f32 %v2693_v28, 0.0  ;;  %v5602_v23 = vpop.f32.mrb[182].mxu0 }
 0x252   : > { %v4083_v31 = vmax.f32 %v3653_v25, 0.0  ;;  %v5890_v32 = vpop.f32.mrb[182].mxu1  ;;  %4277 = vst.msk [vmem:[%s6434_s4 + $0x5a8] sm:$0xff] %vm4095_vm4, %v3892_v26  ;;  %v2708_v33 = vadd.f32 %v7677_v30, %v5602_v23  ;;  %v2702_v35 = vpop.f32.mrb[183].mxu0 }
 0x253   : > { %4469 = vst.msk [vmem:[%s6434_s4 + $0xba8] sm:$0xff] %vm4095_vm4, %v4084_v27  ;;  %v3668_v34 = vadd.f32 %v7677_v30, %v5890_v32  ;;  %v3662_v36 = vpop.f32.mrb[183].mxu1  ;;  %4276 = vst.msk [vmem:[%s6434_s4 + $0x5a0] sm:$0xff] %vm4095_vm4, %v3891_v29  ;;  %v2703_v37 = vadd.f32 %v7677_v30, %v2702_v35 }
 0x254   : > { %4468 = vst.msk [vmem:[%s6434_s4 + $0xba0] sm:$0xff] %vm4095_vm4, %v4083_v31  ;;  %v3663_v38 = vadd.f32 %v7677_v30, %v3662_v36  ;;  %v3894_v39 = vmax.f32 %v2708_v33, 0.0 }
 0x255   : > { %v4086_v40 = vmax.f32 %v3668_v34, 0.0  ;;  %v3893_v41 = vmax.f32 %v2703_v37, 0.0  ;;  %v5605_v43 = vpop.f32.mrb[184].mxu0 }
 0x256   : > { %v4085_v42 = vmax.f32 %v3663_v38, 0.0  ;;  %v5893_v44 = vpop.f32.mrb[184].mxu1  ;;  %4279 = vst.msk [vmem:[%s6434_s4 + $0x5b8] sm:$0xff] %vm4095_vm4, %v3894_v39  ;;  %v2718_v45 = vadd.f32 %v7677_v30, %v5605_v43  ;;  %v2712_v47 = vpop.f32.mrb[185].mxu0 }
 0x257   : > { %4471 = vst.msk [vmem:[%s6434_s4 + $0xbb8] sm:$0xff] %vm4095_vm4, %v4086_v40  ;;  %v3678_v46 = vadd.f32 %v7677_v30, %v5893_v44  ;;  %v3672_v48 = vpop.f32.mrb[185].mxu1  ;;  %4278 = vst.msk [vmem:[%s6434_s4 + $0x5b0] sm:$0xff] %vm4095_vm4, %v3893_v41  ;;  %v2713_v49 = vadd.f32 %v7677_v30, %v2712_v47 }
 0x258   : > { %4470 = vst.msk [vmem:[%s6434_s4 + $0xbb0] sm:$0xff] %vm4095_vm4, %v4085_v42  ;;  %v3673_v50 = vadd.f32 %v7677_v30, %v3672_v48  ;;  %v3896_v51 = vmax.f32 %v2718_v45, 0.0 }
 0x259   : > { %v4088_v52 = vmax.f32 %v3678_v46, 0.0  ;;  %v3895_v53 = vmax.f32 %v2713_v49, 0.0  ;;  %v5608_v55 = vpop.f32.mrb[186].mxu0 }
 0x25a   : > { %v4087_v54 = vmax.f32 %v3673_v50, 0.0  ;;  %v5896_v56 = vpop.f32.mrb[186].mxu1  ;;  %4281 = vst.msk [vmem:[%s6434_s4 + $0x5c8] sm:$0xff] %vm4095_vm4, %v3896_v51  ;;  %v2728_v57 = vadd.f32 %v7677_v30, %v5608_v55  ;;  %v2722_v59 = vpop.f32.mrb[187].mxu0 }
 0x25b   : > { %4473 = vst.msk [vmem:[%s6434_s4 + $0xbc8] sm:$0xff] %vm4095_vm4, %v4088_v52  ;;  %v3688_v58 = vadd.f32 %v7677_v30, %v5896_v56  ;;  %v3682_v60 = vpop.f32.mrb[187].mxu1  ;;  %4280 = vst.msk [vmem:[%s6434_s4 + $0x5c0] sm:$0xff] %vm4095_vm4, %v3895_v53  ;;  %v2723_v61 = vadd.f32 %v7677_v30, %v2722_v59 }
 0x25c   : > { %4472 = vst.msk [vmem:[%s6434_s4 + $0xbc0] sm:$0xff] %vm4095_vm4, %v4087_v54  ;;  %v3683_v62 = vadd.f32 %v7677_v30, %v3682_v60  ;;  %v3898_v63 = vmax.f32 %v2728_v57, 0.0 }
 0x25d   : > { %v4090_v0 = vmax.f32 %v3688_v58, 0.0  ;;  %v3897_v1 = vmax.f32 %v2723_v61, 0.0  ;;  %v5611_v3 = vpop.f32.mrb[188].mxu0 }
 0x25e   : > { %v4089_v2 = vmax.f32 %v3683_v62, 0.0  ;;  %v5899_v4 = vpop.f32.mrb[188].mxu1  ;;  %4283 = vst.msk [vmem:[%s6434_s4 + $0x5d8] sm:$0xff] %vm4095_vm4, %v3898_v63  ;;  %v2738_v5 = vadd.f32 %v7677_v30, %v5611_v3  ;;  %v2732_v7 = vpop.f32.mrb[189].mxu0 }
 0x25f   : > { %4475 = vst.msk [vmem:[%s6434_s4 + $0xbd8] sm:$0xff] %vm4095_vm4, %v4090_v0  ;;  %v3698_v6 = vadd.f32 %v7677_v30, %v5899_v4  ;;  %v3692_v8 = vpop.f32.mrb[189].mxu1  ;;  %4282 = vst.msk [vmem:[%s6434_s4 + $0x5d0] sm:$0xff] %vm4095_vm4, %v3897_v1  ;;  %v2733_v9 = vadd.f32 %v7677_v30, %v2732_v7 }
 0x260   : > { %4474 = vst.msk [vmem:[%s6434_s4 + $0xbd0] sm:$0xff] %vm4095_vm4, %v4089_v2  ;;  %v3693_v10 = vadd.f32 %v7677_v30, %v3692_v8  ;;  %v3900_v11 = vmax.f32 %v2738_v5, 0.0 }
 0x261   : > { %v4092_v12 = vmax.f32 %v3698_v6, 0.0  ;;  %v3899_v13 = vmax.f32 %v2733_v9, 0.0  ;;  %v5614_v15 = vpop.f32.mrb[190].mxu0 }
 0x262   : > { %v4091_v14 = vmax.f32 %v3693_v10, 0.0  ;;  %v5902_v16 = vpop.f32.mrb[190].mxu1  ;;  %4285 = vst.msk [vmem:[%s6434_s4 + $0x5e8] sm:$0xff] %vm4095_vm4, %v3900_v11  ;;  %v2748_v17 = vadd.f32 %v7677_v30, %v5614_v15  ;;  %v2742_v19 = vpop.f32.mrb[191].mxu0 }
 0x263   : > { %4477 = vst.msk [vmem:[%s6434_s4 + $0xbe8] sm:$0xff] %vm4095_vm4, %v4092_v12  ;;  %v3708_v18 = vadd.f32 %v7677_v30, %v5902_v16  ;;  %v3702_v20 = vpop.f32.mrb[191].mxu1  ;;  %4284 = vst.msk [vmem:[%s6434_s4 + $0x5e0] sm:$0xff] %vm4095_vm4, %v3899_v13  ;;  %v2743_v21 = vadd.f32 %v7677_v30, %v2742_v19 }
 0x264   : > { %4476 = vst.msk [vmem:[%s6434_s4 + $0xbe0] sm:$0xff] %vm4095_vm4, %v4091_v14  ;;  %v3703_v22 = vadd.f32 %v7677_v30, %v3702_v20  ;;  %v3902_v24 = vmax.f32 %v2748_v17, 0.0 }
 0x265   : > { %v4094_v28 = vmax.f32 %v3708_v18, 0.0  ;;  %v3901_v25 = vmax.f32 %v2743_v21, 0.0 }
 0x266   : > { %v4093_v26 = vmax.f32 %v3703_v22, 0.0  ;;  %4287 = vst.msk [vmem:[%s6434_s4 + $0x5f8] sm:$0xff] %vm4095_vm4, %v3902_v24 }
 0x267   : > { %4479 = vst.msk [vmem:[%s6434_s4 + $0xbf8] sm:$0xff] %vm4095_vm4, %v4094_v28  ;;  %4286 = vst.msk [vmem:[%s6434_s4 + $0x5f0] sm:$0xff] %vm4095_vm4, %v3901_v25 }
 0x268   : > { %4478 = vst.msk [vmem:[%s6434_s4 + $0xbf0] sm:$0xff] %vm4095_vm4, %v4093_v26 }
 0x269 PF: > { %s13_s12 = sadd.s32 1, %s5935_s12  }
 0x26a   : > { %p10_p4 = scmp.ge.s32.totalorder %s13_s12, 8  }
 0x26c   :  { %12 = sbr.rel (!%p10_p4) target bundleno = 1 (0x1), region = 62 }

// kernel: forward.5
= control target key start
LH: loop header
LB: loop body
LE: loop exit
PB: predicated region body
PF: predicated region fallthrough
CT: control target
= control target key end

     0   :  { %s2087_s12 = smov 0   ;;  %s2962_s0 = inlined_call_operand.vmem [shape: f32[2048,144], index: 0, kind: input, shape index: {}]   ;;  %s2963_s1 = inlined_call_operand.vmem [shape: f32[144,32], index: 1, kind: input, shape index: {}]   ;;  %s2964_s2 = inlined_call_operand.vmem [shape: f32[1,32], index: 2, kind: input, shape index: {}]   ;;  %s2965_s3 = inlined_call_operand.vmem [shape: f32[2048,32], index: 3, kind: output, shape index: {}]  }
   0x1 LB: > { %s1861_s13 = sadd.s32 4294967295, %s2064_s12   ;;  %p1865_p0 = scmp.ge.s32.totalorder %s2064_s12, 1  ;;  %s2064_s12 = sphi %s2087_s12, %s13_s12  }
   0x2   : > { %p139_p1 = scmp.lt.s32.totalorder %s2064_s12, 3 }
   0x4   : > { %p140_p2 = pnand %p1865_p0, %p139_p1 }
   0x5   : > { %v433_v0 = vld [vmem:[%s2963_s1] sm:$0xff] (!%p140_p2)  ;;  %v434_v1 = vld [vmem:[%s2963_s1 + $0x8] sm:$0xff] (!%p140_p2)  ;;  %v435_v2 = vld [vmem:[%s2963_s1 + $0x10] sm:$0xff] (!%p140_p2)  ;;  %s1866_s20 = sshll.u32 (!%p140_p2), %s1861_s13, 7  ;;  %v2066_v3 = vmov (!%p140_p2), 0.0|0.0   ;;  %vm458_vm0 = vcmask (!%p140_p2), 130048  }
   0x6   : > { %143 = sbr.rel (%p140_p2) target bundleno = 512 (0x200), region = 32  ;;  %2003 = vmatprep.subr.bf16.mxu0 (!%p140_p2), %v2066_v3  ;;  %2030 = vmatprep.subr.bf16.mxu1 (!%p140_p2), %v2066_v3  ;;  %v2004_v4 = vpack.c.bf16 (!%p140_p2), %v434_v1, %v433_v0  ;;  %v436_v5 = vld [vmem:[%s2963_s1 + $0x18] sm:$0xff] (!%p140_p2)  ;;  %p165_p3 = scmp.lt.s32.totalorder (!%p140_p2), %s1866_s20, 255  ;;  %v437_v7 = vld [vmem:[%s2963_s1 + $0x20] sm:$0xff] (!%p140_p2)  ;;  %v438_v8 = vld [vmem:[%s2963_s1 + $0x28] sm:$0xff] (!%p140_p2)  ;;  %vm1676_vm1 = vcmask (!%p140_p2), 261120  }
   0x7   : > { %v2007_v6 = vpack.c.bf16 (!%p140_p2), %v436_v5, %v435_v2  ;;  %v2010_v9 = vpack.c.bf16 (!%p140_p2), %v438_v8, %v437_v7  ;;  %v439_v12 = vld [vmem:[%s2963_s1 + $0x30] sm:$0xff] (!%p140_p2)  ;;  %v440_v13 = vld [vmem:[%s2963_s1 + $0x38] sm:$0xff] (!%p140_p2)  ;;  %v441_v15 = vld [vmem:[%s2963_s1 + $0x40] sm:$0xff] (!%p140_p2) }
   0x8   : > { %2005 = vmatpush1.bf16.msra.mxu0 (!%p140_p2), %v2004_v4  ;;  %2039 = vmatpush1.bf16.msra.mxu1 (!%p140_p2), %v2004_v4  ;;  %v2013_v14 = vpack.c.bf16 (!%p140_p2), %v440_v13, %v439_v12  ;;  %v442_v16 = vld [vmem:[%s2963_s1 + $0x48] sm:$0xff] (!%p140_p2)  ;;  %v443_v18 = vld [vmem:[%s2963_s1 + $0x50] sm:$0xff] (!%p140_p2)  ;;  %v444_v19 = vld [vmem:[%s2963_s1 + $0x58] sm:$0xff] (!%p140_p2) }
   0x9   : > { %2006 = vmatprep.subr.bf16.mxu0 (!%p140_p2), %v2066_v3  ;;  %2031 = vmatprep.subr.bf16.mxu1 (!%p140_p2), %v2066_v3  ;;  %v2016_v17 = vpack.c.bf16 (!%p140_p2), %v442_v16, %v441_v15  ;;  %v2019_v20 = vpack.c.bf16 (!%p140_p2), %v444_v19, %v443_v18  ;;  %v445_v21 = vld [vmem:[%s2963_s1 + $0x60] sm:$0xff] (!%p140_p2)  ;;  %v446_v22 = vld [vmem:[%s2963_s1 + $0x68] sm:$0xff] (!%p140_p2)  ;;  %v447_v24 = vld [vmem:[%s2963_s1 + $0x70] sm:$0xff] (!%p140_p2) }
   0xa   : > { %v2022_v23 = vpack.c.bf16 (!%p140_p2), %v446_v22, %v445_v21  ;;  %v448_v25 = vld [vmem:[%s2963_s1 + $0x78] sm:$0xff] (!%p140_p2)  ;;  %v449_v27 = vld [vmem:[%s2963_s1 + $0x80] sm:$0xff] (!%p140_p2)  ;;  %v450_v28 = vld [vmem:[%s2963_s1 + $0x88] sm:$0xff] (!%p140_p2) }
   0xb   : > { %v2025_v26 = vpack.c.bf16 (!%p140_p2), %v448_v25, %v447_v24  ;;  %v2028_v29 = vpack.c.bf16 (!%p140_p2), %v450_v28, %v449_v27 }
   0xc   : > { %2008 = vmatpush1.bf16.msra.mxu0 (!%p140_p2), %v2007_v6  ;;  %2040 = vmatpush1.bf16.msra.mxu1 (!%p140_p2), %v2007_v6 }
   0xd   : > { %s2967_s20 = smov (!%p165_p3, %s1866_s20), 255  ;;  %2009 = vmatprep.subr.bf16.mxu0 %v2066_v3  ;;  %2032 = vmatprep.subr.bf16.mxu1 %v2066_v3 }
   0xe   : > { %s2002_s27 = sshll.u32 %s2967_s20, 4  ;;  %s1870_s6 = sshll.u32 %s2967_s20, 3 }
   0xf   : > { %s2123_s30 = scalar_lea.vmem %s2962_s0, %s2002_s27  ;;  %s2512_s9 = scalar_lea.vmem %s2965_s3, %s1870_s6 }
  0x10   : > { %v178_v10 = vld [vmem:[%s2123_s30 + $0x8] sm:$0xff]  ;;  %2011 = vmatpush1.bf16.msra.mxu0 %v2010_v9  ;;  %2041 = vmatpush1.bf16.msra.mxu1 %v2010_v9  ;;  %v177_v30 = vld [vmem:[%s2123_s30] sm:$0xff]  ;;  %v180_v32 = vld [vmem:[%s2123_s30 + $0x18] sm:$0xff] }
  0x11   : > { %v306_v11 = vld [vmem:[%s2123_s30 + $0x408] sm:$0xff]  ;;  %1872 = vmatprep.mubr.msk.f32.mxu0 %vm458_vm0, %v178_v10  ;;  %2012 = vmatprep.subr.bf16.mxu0 %v2066_v3  ;;  %v305_v31 = vld [vmem:[%s2123_s30 + $0x400] sm:$0xff]  ;;  %v308_v33 = vld [vmem:[%s2123_s30 + $0x418] sm:$0xff] }
  0x12   : > { %1936 = vmatprep.mubr.msk.f32.mxu1 %vm458_vm0, %v306_v11  ;;  %2033 = vmatprep.subr.bf16.mxu1 %v2066_v3  ;;  %v179_v34 = vld [vmem:[%s2123_s30 + $0x10] sm:$0xff]  ;;  %v182_v36 = vld [vmem:[%s2123_s30 + $0x28] sm:$0xff]  ;;  %v181_v38 = vld [vmem:[%s2123_s30 + $0x20] sm:$0xff] }
  0x13   : > { %v307_v35 = vld [vmem:[%s2123_s30 + $0x410] sm:$0xff]  ;;  %v310_v37 = vld [vmem:[%s2123_s30 + $0x428] sm:$0xff]  ;;  %v309_v39 = vld [vmem:[%s2123_s30 + $0x420] sm:$0xff] }
  0x14   : > { %2014 = vmatpush1.bf16.msra.mxu0 %v2013_v14  ;;  %2042 = vmatpush1.bf16.msra.mxu1 %v2013_v14  ;;  %v184_v40 = vld [vmem:[%s2123_s30 + $0x38] sm:$0xff]  ;;  %v183_v42 = vld [vmem:[%s2123_s30 + $0x30] sm:$0xff]  ;;  %v186_v44 = vld [vmem:[%s2123_s30 + $0x48] sm:$0xff] }
  0x15   : > { %2015 = vmatprep.subr.bf16.mxu0 %v2066_v3  ;;  %2034 = vmatprep.subr.bf16.mxu1 %v2066_v3  ;;  %v312_v41 = vld [vmem:[%s2123_s30 + $0x438] sm:$0xff]  ;;  %v311_v43 = vld [vmem:[%s2123_s30 + $0x430] sm:$0xff]  ;;  %v314_v45 = vld [vmem:[%s2123_s30 + $0x448] sm:$0xff] }
  0x16   : > { %v185_v46 = vld [vmem:[%s2123_s30 + $0x40] sm:$0xff]  ;;  %v188_v48 = vld [vmem:[%s2123_s30 + $0x58] sm:$0xff]  ;;  %v187_v50 = vld [vmem:[%s2123_s30 + $0x50] sm:$0xff] }
  0x17   : > { %v313_v47 = vld [vmem:[%s2123_s30 + $0x440] sm:$0xff]  ;;  %v316_v49 = vld [vmem:[%s2123_s30 + $0x458] sm:$0xff]  ;;  %v315_v51 = vld [vmem:[%s2123_s30 + $0x450] sm:$0xff] }
  0x18   : > { %2017 = vmatpush1.bf16.msra.mxu0 %v2016_v17  ;;  %2043 = vmatpush1.bf16.msra.mxu1 %v2016_v17  ;;  %v190_v52 = vld [vmem:[%s2123_s30 + $0x68] sm:$0xff]  ;;  %v189_v54 = vld [vmem:[%s2123_s30 + $0x60] sm:$0xff]  ;;  %v192_v56 = vld [vmem:[%s2123_s30 + $0x78] sm:$0xff] }
  0x19   : > { %2018 = vmatprep.subr.bf16.mxu0 %v2066_v3  ;;  %2035 = vmatprep.subr.bf16.mxu1 %v2066_v3  ;;  %v318_v53 = vld [vmem:[%s2123_s30 + $0x468] sm:$0xff]  ;;  %v317_v55 = vld [vmem:[%s2123_s30 + $0x460] sm:$0xff]  ;;  %v320_v57 = vld [vmem:[%s2123_s30 + $0x478] sm:$0xff] }
  0x1a   : > { %v191_v58 = vld [vmem:[%s2123_s30 + $0x70] sm:$0xff]  ;;  %v194_v60 = vld [vmem:[%s2123_s30 + $0x88] sm:$0xff]  ;;  %v193_v62 = vld [vmem:[%s2123_s30 + $0x80] sm:$0xff] }
  0x1b   : > { %v319_v59 = vld [vmem:[%s2123_s30 + $0x470] sm:$0xff]  ;;  %v322_v61 = vld [vmem:[%s2123_s30 + $0x488] sm:$0xff]  ;;  %v321_v63 = vld [vmem:[%s2123_s30 + $0x480] sm:$0xff] }
  0x1c   : > { %2020 = vmatpush1.bf16.msra.mxu0 %v2019_v20  ;;  %2044 = vmatpush1.bf16.msra.mxu1 %v2019_v20  ;;  %v196_v0 = vld [vmem:[%s2123_s30 + $0x98] sm:$0xff]  ;;  %v195_v2 = vld [vmem:[%s2123_s30 + $0x90] sm:$0xff]  ;;  %v198_v4 = vld [vmem:[%s2123_s30 + $0xa8] sm:$0xff] }
  0x1d   : > { %2021 = vmatprep.subr.bf16.mxu0 %v2066_v3  ;;  %2036 = vmatprep.subr.bf16.mxu1 %v2066_v3  ;;  %v324_v1 = vld [vmem:[%s2123_s30 + $0x498] sm:$0xff]  ;;  %v326_v5 = vld [vmem:[%s2123_s30 + $0x4a8] sm:$0xff]  ;;  %v197_v6 = vld [vmem:[%s2123_s30 + $0xa0] sm:$0xff] }
  0x1e   : > { %v325_v7 = vld [vmem:[%s2123_s30 + $0x4a0] sm:$0xff]  ;;  %v200_v8 = vld [vmem:[%s2123_s30 + $0xb8] sm:$0xff]  ;;  %v199_v10 = vld [vmem:[%s2123_s30 + $0xb0] sm:$0xff] }
  0x1f   : > { %v328_v9 = vld [vmem:[%s2123_s30 + $0x4b8] sm:$0xff]  ;;  %v327_v11 = vld [vmem:[%s2123_s30 + $0x4b0] sm:$0xff]  ;;  %v202_v12 = vld [vmem:[%s2123_s30 + $0xc8] sm:$0xff] }
  0x20   : > { %2023 = vmatpush1.bf16.msra.mxu0 %v2022_v23  ;;  %2045 = vmatpush1.bf16.msra.mxu1 %v2022_v23  ;;  %v330_v13 = vld [vmem:[%s2123_s30 + $0x4c8] sm:$0xff]  ;;  %v201_v14 = vld [vmem:[%s2123_s30 + $0xc0] sm:$0xff]  ;;  %v204_v16 = vld [vmem:[%s2123_s30 + $0xd8] sm:$0xff] }
  0x21   : > { %2024 = vmatprep.subr.bf16.mxu0 %v2066_v3  ;;  %2037 = vmatprep.subr.bf16.mxu1 %v2066_v3  ;;  %v329_v15 = vld [vmem:[%s2123_s30 + $0x4c0] sm:$0xff]  ;;  %v332_v17 = vld [vmem:[%s2123_s30 + $0x4d8] sm:$0xff]  ;;  %v203_v18 = vld [vmem:[%s2123_s30 + $0xd0] sm:$0xff] }
  0x22   : > { %v331_v19 = vld [vmem:[%s2123_s30 + $0x4d0] sm:$0xff]  ;;  %v206_v20 = vld [vmem:[%s2123_s30 + $0xe8] sm:$0xff]  ;;  %v205_v22 = vld [vmem:[%s2123_s30 + $0xe0] sm:$0xff] }
  0x23   : > { %v334_v21 = vld [vmem:[%s2123_s30 + $0x4e8] sm:$0xff]  ;;  %v333_v23 = vld [vmem:[%s2123_s30 + $0x4e0] sm:$0xff]  ;;  %v208_v24 = vld [vmem:[%s2123_s30 + $0xf8] sm:$0xff] }
  0x24   : > { %2026 = vmatpush1.bf16.msra.mxu0 %v2025_v26  ;;  %2046 = vmatpush1.bf16.msra.mxu1 %v2025_v26  ;;  %v336_v25 = vld [vmem:[%s2123_s30 + $0x4f8] sm:$0xff]  ;;  %v207_v26 = vld [vmem:[%s2123_s30 + $0xf0] sm:$0xff]  ;;  %v210_v28 = vld [vmem:[%s2123_s30 + $0x108] sm:$0xff] }
  0x25   : > { %2027 = vmatprep.subr.bf16.mxu0 %v2066_v3  ;;  %2038 = vmatprep.subr.bf16.mxu1 %v2066_v3  ;;  %v323_v3 = vld [vmem:[%s2123_s30 + $0x490] sm:$0xff] }
  0x26   : > { %v335_v27 = vld [vmem:[%s2123_s30 + $0x4f0] sm:$0xff] }
  0x28   : > { %2029 = vmatpush1.bf16.msra.mxu0 %v2028_v29  ;;  %2047 = vmatpush1.bf16.msra.mxu1 %v2028_v29  ;;  %v338_v29 = vld [vmem:[%s2123_s30 + $0x508] sm:$0xff] }
  0x2b   : > { %908 = vmatmul.mubr.f32.vlgmr.msra.gmra.mrb[0].mxu0 %v177_v30  ;;  %1228 = vmatmul.mubr.f32.vlgmr.msra.gmra.mrb[0].mxu1 %v305_v31  ;;  %v209_v30 = vld [vmem:[%s2123_s30 + $0x100] sm:$0xff] }
  0x2c   : > { %1873 = vmatprep.mubr.msk.f32.mxu0 %vm458_vm0, %v180_v32  ;;  %1937 = vmatprep.mubr.msk.f32.mxu1 %vm458_vm0, %v308_v33  ;;  %v337_v31 = vld [vmem:[%s2123_s30 + $0x500] sm:$0xff]  ;;  %v212_v32 = vld [vmem:[%s2123_s30 + $0x118] sm:$0xff] }
  0x2d   : > { %v340_v33 = vld [vmem:[%s2123_s30 + $0x518] sm:$0xff] }
  0x2f   : > { %913 = vmatmul.mubr.f32.gmra.mrb[2].mxu0 %v179_v34  ;;  %1233 = vmatmul.mubr.f32.gmra.mrb[2].mxu1 %v307_v35  ;;  %v211_v34 = vld [vmem:[%s2123_s30 + $0x110] sm:$0xff] }
  0x30   : > { %1874 = vmatprep.mubr.msk.f32.mxu0 %vm458_vm0, %v182_v36  ;;  %1938 = vmatprep.mubr.msk.f32.mxu1 %vm458_vm0, %v310_v37  ;;  %v339_v35 = vld [vmem:[%s2123_s30 + $0x510] sm:$0xff]  ;;  %v214_v36 = vld [vmem:[%s2123_s30 + $0x128] sm:$0xff] }
  0x31   : > { %v342_v37 = vld [vmem:[%s2123_s30 + $0x528] sm:$0xff] }
  0x33   : > { %918 = vmatmul.mubr.f32.gmra.mrb[4].mxu0 %v181_v38  ;;  %1238 = vmatmul.mubr.f32.gmra.mrb[4].mxu1 %v309_v39  ;;  %v213_v38 = vld [vmem:[%s2123_s30 + $0x120] sm:$0xff] }
  0x34   : > { %1875 = vmatprep.mubr.msk.f32.mxu0 %vm458_vm0, %v184_v40  ;;  %1939 = vmatprep.mubr.msk.f32.mxu1 %vm458_vm0, %v312_v41  ;;  %v341_v39 = vld [vmem:[%s2123_s30 + $0x520] sm:$0xff]  ;;  %v216_v40 = vld [vmem:[%s2123_s30 + $0x138] sm:$0xff] }
  0x35   : > { %v344_v41 = vld [vmem:[%s2123_s30 + $0x538] sm:$0xff] }
  0x37   : > { %923 = vmatmul.mubr.f32.gmra.mrb[6].mxu0 %v183_v42  ;;  %1243 = vmatmul.mubr.f32.gmra.mrb[6].mxu1 %v311_v43  ;;  %v215_v42 = vld [vmem:[%s2123_s30 + $0x130] sm:$0xff] }
  0x38   : > { %1876 = vmatprep.mubr.msk.f32.mxu0 %vm458_vm0, %v186_v44  ;;  %1940 = vmatprep.mubr.msk.f32.mxu1 %vm458_vm0, %v314_v45  ;;  %v343_v43 = vld [vmem:[%s2123_s30 + $0x530] sm:$0xff]  ;;  %v218_v44 = vld [vmem:[%s2123_s30 + $0x148] sm:$0xff] }
  0x39   : > { %v346_v45 = vld [vmem:[%s2123_s30 + $0x548] sm:$0xff] }
  0x3b   : > { %928 = vmatmul.mubr.f32.gmra.mrb[8].mxu0 %v185_v46  ;;  %1248 = vmatmul.mubr.f32.gmra.mrb[8].mxu1 %v313_v47  ;;  %v217_v46 = vld [vmem:[%s2123_s30 + $0x140] sm:$0xff] }
  0x3c   : > { %1877 = vmatprep.mubr.msk.f32.mxu0 %vm458_vm0, %v188_v48  ;;  %1941 = vmatprep.mubr.msk.f32.mxu1 %vm458_vm0, %v316_v49  ;;  %v345_v47 = vld [vmem:[%s2123_s30 + $0x540] sm:$0xff]  ;;  %v220_v48 = vld [vmem:[%s2123_s30 + $0x158] sm:$0xff] }
  0x3d   : > { %v348_v49 = vld [vmem:[%s2123_s30 + $0x558] sm:$0xff] }
  0x3f   : > { %933 = vmatmul.mubr.f32.gmra.mrb[10].mxu0 %v187_v50  ;;  %1253 = vmatmul.mubr.f32.gmra.mrb[10].mxu1 %v315_v51  ;;  %v219_v50 = vld [vmem:[%s2123_s30 + $0x150] sm:$0xff] }
  0x40   : > { %1878 = vmatprep.mubr.msk.f32.mxu0 %vm458_vm0, %v190_v52  ;;  %1942 = vmatprep.mubr.msk.f32.mxu1 %vm458_vm0, %v318_v53  ;;  %v347_v51 = vld [vmem:[%s2123_s30 + $0x550] sm:$0xff]  ;;  %v222_v52 = vld [vmem:[%s2123_s30 + $0x168] sm:$0xff] }
  0x41   : > { %v350_v53 = vld [vmem:[%s2123_s30 + $0x568] sm:$0xff] }
  0x43   : > { %938 = vmatmul.mubr.f32.gmra.mrb[12].mxu0 %v189_v54  ;;  %1258 = vmatmul.mubr.f32.gmra.mrb[12].mxu1 %v317_v55  ;;  %v221_v54 = vld [vmem:[%s2123_s30 + $0x160] sm:$0xff] }
  0x44   : > { %1879 = vmatprep.mubr.msk.f32.mxu0 %vm458_vm0, %v192_v56  ;;  %1943 = vmatprep.mubr.msk.f32.mxu1 %vm458_vm0, %v320_v57  ;;  %v349_v55 = vld [vmem:[%s2123_s30 + $0x560] sm:$0xff]  ;;  %v224_v56 = vld [vmem:[%s2123_s30 + $0x178] sm:$0xff] }
  0x45   : > { %v352_v57 = vld [vmem:[%s2123_s30 + $0x578] sm:$0xff] }
  0x47   : > { %943 = vmatmul.mubr.f32.gmra.mrb[14].mxu0 %v191_v58  ;;  %1263 = vmatmul.mubr.f32.gmra.mrb[14].mxu1 %v319_v59  ;;  %v223_v58 = vld [vmem:[%s2123_s30 + $0x170] sm:$0xff] }
  0x48   : > { %1880 = vmatprep.mubr.msk.f32.mxu0 %vm458_vm0, %v194_v60  ;;  %1944 = vmatprep.mubr.msk.f32.mxu1 %vm458_vm0, %v322_v61  ;;  %v351_v59 = vld [vmem:[%s2123_s30 + $0x570] sm:$0xff]  ;;  %v226_v60 = vld [vmem:[%s2123_s30 + $0x188] sm:$0xff] }
  0x49   : > { %v354_v61 = vld [vmem:[%s2123_s30 + $0x588] sm:$0xff] }
  0x4b   : > { %948 = vmatmul.mubr.f32.gmra.mrb[16].mxu0 %v193_v62  ;;  %1268 = vmatmul.mubr.f32.gmra.mrb[16].mxu1 %v321_v63  ;;  %v225_v62 = vld [vmem:[%s2123_s30 + $0x180] sm:$0xff] }
  0x4c   : > { %1881 = vmatprep.mubr.msk.f32.mxu0 %vm458_vm0, %v196_v0  ;;  %1945 = vmatprep.mubr.msk.f32.mxu1 %vm458_vm0, %v324_v1  ;;  %v353_v63 = vld [vmem:[%s2123_s30 + $0x580] sm:$0xff]  ;;  %v228_v0 = vld [vmem:[%s2123_s30 + $0x198] sm:$0xff] }
  0x4d   : > { %v356_v1 = vld [vmem:[%s2123_s30 + $0x598] sm:$0xff] }
  0x4f   : > { %953 = vmatmul.mubr.f32.gmra.mrb[18].mxu0 %v195_v2  ;;  %1273 = vmatmul.mubr.f32.gmra.mrb[18].mxu1 %v323_v3  ;;  %v227_v2 = vld [vmem:[%s2123_s30 + $0x190] sm:$0xff] }
  0x50   : > { %1882 = vmatprep.mubr.msk.f32.mxu0 %vm458_vm0, %v198_v4  ;;  %1946 = vmatprep.mubr.msk.f32.mxu1 %vm458_vm0, %v326_v5  ;;  %v355_v3 = vld [vmem:[%s2123_s30 + $0x590] sm:$0xff]  ;;  %v230_v4 = vld [vmem:[%s2123_s30 + $0x1a8] sm:$0xff] }
  0x51   : > { %v358_v5 = vld [vmem:[%s2123_s30 + $0x5a8] sm:$0xff] }
  0x53   : > { %958 = vmatmul.mubr.f32.gmra.mrb[20].mxu0 %v197_v6  ;;  %1278 = vmatmul.mubr.f32.gmra.mrb[20].mxu1 %v325_v7  ;;  %v229_v6 = vld [vmem:[%s2123_s30 + $0x1a0] sm:$0xff] }
  0x54   : > { %1883 = vmatprep.mubr.msk.f32.mxu0 %vm458_vm0, %v200_v8  ;;  %1947 = vmatprep.mubr.msk.f32.mxu1 %vm458_vm0, %v328_v9  ;;  %v357_v7 = vld [vmem:[%s2123_s30 + $0x5a0] sm:$0xff]  ;;  %v232_v8 = vld [vmem:[%s2123_s30 + $0x1b8] sm:$0xff] }
  0x55   : > { %v360_v9 = vld [vmem:[%s2123_s30 + $0x5b8] sm:$0xff] }
  0x57   : > { %963 = vmatmul.mubr.f32.gmra.mrb[22].mxu0 %v199_v10  ;;  %1283 = vmatmul.mubr.f32.gmra.mrb[22].mxu1 %v327_v11  ;;  %v231_v10 = vld [vmem:[%s2123_s30 + $0x1b0] sm:$0xff] }
  0x58   : > { %1884 = vmatprep.mubr.msk.f32.mxu0 %vm458_vm0, %v202_v12  ;;  %1948 = vmatprep.mubr.msk.f32.mxu1 %vm458_vm0, %v330_v13  ;;  %v359_v11 = vld [vmem:[%s2123_s30 + $0x5b0] sm:$0xff]  ;;  %v234_v12 = vld [vmem:[%s2123_s30 + $0x1c8] sm:$0xff] }
  0x59   : > { %v362_v13 = vld [vmem:[%s2123_s30 + $0x5c8] sm:$0xff] }
  0x5b   : > { %968 = vmatmul.mubr.f32.gmra.mrb[24].mxu0 %v201_v14  ;;  %1288 = vmatmul.mubr.f32.gmra.mrb[24].mxu1 %v329_v15  ;;  %v233_v14 = vld [vmem:[%s2123_s30 + $0x1c0] sm:$0xff] }
  0x5c   : > { %1885 = vmatprep.mubr.msk.f32.mxu0 %vm458_vm0, %v204_v16  ;;  %1949 = vmatprep.mubr.msk.f32.mxu1 %vm458_vm0, %v332_v17  ;;  %v361_v15 = vld [vmem:[%s2123_s30 + $0x5c0] sm:$0xff]  ;;  %v236_v16 = vld [vmem:[%s2123_s30 + $0x1d8] sm:$0xff] }
  0x5d   : > { %v364_v17 = vld [vmem:[%s2123_s30 + $0x5d8] sm:$0xff] }
  0x5f   : > { %973 = vmatmul.mubr.f32.gmra.mrb[26].mxu0 %v203_v18  ;;  %1293 = vmatmul.mubr.f32.gmra.mrb[26].mxu1 %v331_v19  ;;  %v235_v18 = vld [vmem:[%s2123_s30 + $0x1d0] sm:$0xff] }
  0x60   : > { %1886 = vmatprep.mubr.msk.f32.mxu0 %vm458_vm0, %v206_v20  ;;  %1950 = vmatprep.mubr.msk.f32.mxu1 %vm458_vm0, %v334_v21  ;;  %v363_v19 = vld [vmem:[%s2123_s30 + $0x5d0] sm:$0xff]  ;;  %v238_v20 = vld [vmem:[%s2123_s30 + $0x1e8] sm:$0xff] }
  0x61   : > { %v366_v21 = vld [vmem:[%s2123_s30 + $0x5e8] sm:$0xff] }
  0x63   : > { %978 = vmatmul.mubr.f32.gmra.mrb[28].mxu0 %v205_v22  ;;  %1298 = vmatmul.mubr.f32.gmra.mrb[28].mxu1 %v333_v23  ;;  %v237_v22 = vld [vmem:[%s2123_s30 + $0x1e0] sm:$0xff] }
  0x64   : > { %1887 = vmatprep.mubr.msk.f32.mxu0 %vm458_vm0, %v208_v24  ;;  %1951 = vmatprep.mubr.msk.f32.mxu1 %vm458_vm0, %v336_v25  ;;  %v365_v23 = vld [vmem:[%s2123_s30 + $0x5e0] sm:$0xff]  ;;  %v240_v24 = vld [vmem:[%s2123_s30 + $0x1f8] sm:$0xff] }
  0x65   : > { %v368_v25 = vld [vmem:[%s2123_s30 + $0x5f8] sm:$0xff] }
  0x67   : > { %983 = vmatmul.mubr.f32.gmra.mrb[30].mxu0 %v207_v26  ;;  %1303 = vmatmul.mubr.f32.gmra.mrb[30].mxu1 %v335_v27  ;;  %v239_v26 = vld [vmem:[%s2123_s30 + $0x1f0] sm:$0xff] }
  0x68   : > { %1888 = vmatprep.mubr.msk.f32.mxu0 %vm458_vm0, %v210_v28  ;;  %1952 = vmatprep.mubr.msk.f32.mxu1 %vm458_vm0, %v338_v29  ;;  %v367_v27 = vld [vmem:[%s2123_s30 + $0x5f0] sm:$0xff]  ;;  %v242_v28 = vld [vmem:[%s2123_s30 + $0x208] sm:$0xff] }
  0x69   : > { %v370_v29 = vld [vmem:[%s2123_s30 + $0x608] sm:$0xff] }
  0x6b   : > { %988 = vmatmul.mubr.f32.gmra.mrb[32].mxu0 %v209_v30  ;;  %1308 = vmatmul.mubr.f32.gmra.mrb[32].mxu1 %v337_v31  ;;  %v241_v30 = vld [vmem:[%s2123_s30 + $0x200] sm:$0xff] }
  0x6c   : > { %1889 = vmatprep.mubr.msk.f32.mxu0 %vm458_vm0, %v212_v32  ;;  %1953 = vmatprep.mubr.msk.f32.mxu1 %vm458_vm0, %v340_v33  ;;  %v369_v31 = vld [vmem:[%s2123_s30 + $0x600] sm:$0xff]  ;;  %v244_v32 = vld [vmem:[%s2123_s30 + $0x218] sm:$0xff] }
  0x6d   : > { %v372_v33 = vld [vmem:[%s2123_s30 + $0x618] sm:$0xff] }
  0x6f   : > { %993 = vmatmul.mubr.f32.gmra.mrb[34].mxu0 %v211_v34  ;;  %1313 = vmatmul.mubr.f32.gmra.mrb[34].mxu1 %v339_v35  ;;  %v243_v34 = vld [vmem:[%s2123_s30 + $0x210] sm:$0xff] }
  0x70   : > { %1890 = vmatprep.mubr.msk.f32.mxu0 %vm458_vm0, %v214_v36  ;;  %1954 = vmatprep.mubr.msk.f32.mxu1 %vm458_vm0, %v342_v37  ;;  %v371_v35 = vld [vmem:[%s2123_s30 + $0x610] sm:$0xff]  ;;  %v246_v36 = vld [vmem:[%s2123_s30 + $0x228] sm:$0xff] }
  0x71   : > { %v374_v37 = vld [vmem:[%s2123_s30 + $0x628] sm:$0xff] }
  0x73   : > { %998 = vmatmul.mubr.f32.gmra.mrb[36].mxu0 %v213_v38  ;;  %1318 = vmatmul.mubr.f32.gmra.mrb[36].mxu1 %v341_v39  ;;  %v245_v38 = vld [vmem:[%s2123_s30 + $0x220] sm:$0xff] }
  0x74   : > { %1891 = vmatprep.mubr.msk.f32.mxu0 %vm458_vm0, %v216_v40  ;;  %1955 = vmatprep.mubr.msk.f32.mxu1 %vm458_vm0, %v344_v41  ;;  %v373_v39 = vld [vmem:[%s2123_s30 + $0x620] sm:$0xff]  ;;  %v248_v40 = vld [vmem:[%s2123_s30 + $0x238] sm:$0xff] }
  0x75   : > { %v376_v41 = vld [vmem:[%s2123_s30 + $0x638] sm:$0xff] }
  0x77   : > { %1003 = vmatmul.mubr.f32.gmra.mrb[38].mxu0 %v215_v42  ;;  %1323 = vmatmul.mubr.f32.gmra.mrb[38].mxu1 %v343_v43  ;;  %v247_v42 = vld [vmem:[%s2123_s30 + $0x230] sm:$0xff] }
  0x78   : > { %1892 = vmatprep.mubr.msk.f32.mxu0 %vm458_vm0, %v218_v44  ;;  %1956 = vmatprep.mubr.msk.f32.mxu1 %vm458_vm0, %v346_v45  ;;  %v375_v43 = vld [vmem:[%s2123_s30 + $0x630] sm:$0xff]  ;;  %v250_v44 = vld [vmem:[%s2123_s30 + $0x248] sm:$0xff] }
  0x79   : > { %v378_v45 = vld [vmem:[%s2123_s30 + $0x648] sm:$0xff] }
  0x7b   : > { %1008 = vmatmul.mubr.f32.gmra.mrb[40].mxu0 %v217_v46  ;;  %1328 = vmatmul.mubr.f32.gmra.mrb[40].mxu1 %v345_v47  ;;  %v249_v46 = vld [vmem:[%s2123_s30 + $0x240] sm:$0xff] }
  0x7c   : > { %1893 = vmatprep.mubr.msk.f32.mxu0 %vm458_vm0, %v220_v48  ;;  %1957 = vmatprep.mubr.msk.f32.mxu1 %vm458_vm0, %v348_v49  ;;  %v377_v47 = vld [vmem:[%s2123_s30 + $0x640] sm:$0xff]  ;;  %v252_v48 = vld [vmem:[%s2123_s30 + $0x258] sm:$0xff] }
  0x7d   : > { %v380_v49 = vld [vmem:[%s2123_s30 + $0x658] sm:$0xff] }
  0x7f   : > { %1013 = vmatmul.mubr.f32.gmra.mrb[42].mxu0 %v219_v50  ;;  %1333 = vmatmul.mubr.f32.gmra.mrb[42].mxu1 %v347_v51  ;;  %v251_v50 = vld [vmem:[%s2123_s30 + $0x250] sm:$0xff] }
  0x80   : > { %1894 = vmatprep.mubr.msk.f32.mxu0 %vm458_vm0, %v222_v52  ;;  %1958 = vmatprep.mubr.msk.f32.mxu1 %vm458_vm0, %v350_v53  ;;  %v379_v51 = vld [vmem:[%s2123_s30 + $0x650] sm:$0xff]  ;;  %v254_v52 = vld [vmem:[%s2123_s30 + $0x268] sm:$0xff] }
  0x81   : > { %v382_v53 = vld [vmem:[%s2123_s30 + $0x668] sm:$0xff] }
  0x83   : > { %1018 = vmatmul.mubr.f32.gmra.mrb[44].mxu0 %v221_v54  ;;  %1338 = vmatmul.mubr.f32.gmra.mrb[44].mxu1 %v349_v55  ;;  %v253_v54 = vld [vmem:[%s2123_s30 + $0x260] sm:$0xff] }
  0x84   : > { %1895 = vmatprep.mubr.msk.f32.mxu0 %vm458_vm0, %v224_v56  ;;  %1959 = vmatprep.mubr.msk.f32.mxu1 %vm458_vm0, %v352_v57  ;;  %v381_v55 = vld [vmem:[%s2123_s30 + $0x660] sm:$0xff]  ;;  %v256_v56 = vld [vmem:[%s2123_s30 + $0x278] sm:$0xff] }
  0x85   : > { %v384_v57 = vld [vmem:[%s2123_s30 + $0x678] sm:$0xff] }
  0x87   : > { %1023 = vmatmul.mubr.f32.gmra.mrb[46].mxu0 %v223_v58  ;;  %1343 = vmatmul.mubr.f32.gmra.mrb[46].mxu1 %v351_v59  ;;  %v255_v58 = vld [vmem:[%s2123_s30 + $0x270] sm:$0xff] }
  0x88   : > { %1896 = vmatprep.mubr.msk.f32.mxu0 %vm458_vm0, %v226_v60  ;;  %1960 = vmatprep.mubr.msk.f32.mxu1 %vm458_vm0, %v354_v61  ;;  %v383_v59 = vld [vmem:[%s2123_s30 + $0x670] sm:$0xff]  ;;  %v258_v60 = vld [vmem:[%s2123_s30 + $0x288] sm:$0xff] }
  0x89   : > { %v386_v61 = vld [vmem:[%s2123_s30 + $0x688] sm:$0xff] }
  0x8b   : > { %1028 = vmatmul.mubr.f32.gmra.mrb[48].mxu0 %v225_v62  ;;  %1348 = vmatmul.mubr.f32.gmra.mrb[48].mxu1 %v353_v63  ;;  %v257_v62 = vld [vmem:[%s2123_s30 + $0x280] sm:$0xff] }
  0x8c   : > { %1897 = vmatprep.mubr.msk.f32.mxu0 %vm458_vm0, %v228_v0  ;;  %1961 = vmatprep.mubr.msk.f32.mxu1 %vm458_vm0, %v356_v1  ;;  %v385_v63 = vld [vmem:[%s2123_s30 + $0x680] sm:$0xff]  ;;  %v260_v0 = vld [vmem:[%s2123_s30 + $0x298] sm:$0xff] }
  0x8d   : > { %v388_v1 = vld [vmem:[%s2123_s30 + $0x698] sm:$0xff] }
  0x8f   : > { %1033 = vmatmul.mubr.f32.gmra.mrb[50].mxu0 %v227_v2  ;;  %1353 = vmatmul.mubr.f32.gmra.mrb[50].mxu1 %v355_v3  ;;  %v259_v2 = vld [vmem:[%s2123_s30 + $0x290] sm:$0xff] }
  0x90   : > { %1898 = vmatprep.mubr.msk.f32.mxu0 %vm458_vm0, %v230_v4  ;;  %1962 = vmatprep.mubr.msk.f32.mxu1 %vm458_vm0, %v358_v5  ;;  %v387_v3 = vld [vmem:[%s2123_s30 + $0x690] sm:$0xff]  ;;  %v262_v4 = vld [vmem:[%s2123_s30 + $0x2a8] sm:$0xff] }
  0x91   : > { %v390_v5 = vld [vmem:[%s2123_s30 + $0x6a8] sm:$0xff] }
  0x93   : > { %1038 = vmatmul.mubr.f32.gmra.mrb[52].mxu0 %v229_v6  ;;  %1358 = vmatmul.mubr.f32.gmra.mrb[52].mxu1 %v357_v7  ;;  %v261_v6 = vld [vmem:[%s2123_s30 + $0x2a0] sm:$0xff] }
  0x94   : > { %1899 = vmatprep.mubr.msk.f32.mxu0 %vm458_vm0, %v232_v8  ;;  %1963 = vmatprep.mubr.msk.f32.mxu1 %vm458_vm0, %v360_v9  ;;  %v389_v7 = vld [vmem:[%s2123_s30 + $0x6a0] sm:$0xff]  ;;  %v264_v8 = vld [vmem:[%s2123_s30 + $0x2b8] sm:$0xff] }
  0x95   : > { %v392_v9 = vld [vmem:[%s2123_s30 + $0x6b8] sm:$0xff] }
  0x97   : > { %1043 = vmatmul.mubr.f32.gmra.mrb[54].mxu0 %v231_v10  ;;  %1363 = vmatmul.mubr.f32.gmra.mrb[54].mxu1 %v359_v11  ;;  %v263_v10 = vld [vmem:[%s2123_s30 + $0x2b0] sm:$0xff] }
  0x98   : > { %1900 = vmatprep.mubr.msk.f32.mxu0 %vm458_vm0, %v234_v12  ;;  %1964 = vmatprep.mubr.msk.f32.mxu1 %vm458_vm0, %v362_v13  ;;  %v391_v11 = vld [vmem:[%s2123_s30 + $0x6b0] sm:$0xff]  ;;  %v266_v12 = vld [vmem:[%s2123_s30 + $0x2c8] sm:$0xff] }
  0x99   : > { %v394_v13 = vld [vmem:[%s2123_s30 + $0x6c8] sm:$0xff] }
  0x9b   : > { %1048 = vmatmul.mubr.f32.gmra.mrb[56].mxu0 %v233_v14  ;;  %1368 = vmatmul.mubr.f32.gmra.mrb[56].mxu1 %v361_v15  ;;  %v265_v14 = vld [vmem:[%s2123_s30 + $0x2c0] sm:$0xff] }
  0x9c   : > { %1901 = vmatprep.mubr.msk.f32.mxu0 %vm458_vm0, %v236_v16  ;;  %1965 = vmatprep.mubr.msk.f32.mxu1 %vm458_vm0, %v364_v17  ;;  %v393_v15 = vld [vmem:[%s2123_s30 + $0x6c0] sm:$0xff]  ;;  %v268_v16 = vld [vmem:[%s2123_s30 + $0x2d8] sm:$0xff] }
  0x9d   : > { %v396_v17 = vld [vmem:[%s2123_s30 + $0x6d8] sm:$0xff] }
  0x9f   : > { %1053 = vmatmul.mubr.f32.gmra.mrb[58].mxu0 %v235_v18  ;;  %1373 = vmatmul.mubr.f32.gmra.mrb[58].mxu1 %v363_v19  ;;  %v267_v18 = vld [vmem:[%s2123_s30 + $0x2d0] sm:$0xff] }
  0xa0   : > { %1902 = vmatprep.mubr.msk.f32.mxu0 %vm458_vm0, %v238_v20  ;;  %1966 = vmatprep.mubr.msk.f32.mxu1 %vm458_vm0, %v366_v21  ;;  %v395_v19 = vld [vmem:[%s2123_s30 + $0x6d0] sm:$0xff]  ;;  %v270_v20 = vld [vmem:[%s2123_s30 + $0x2e8] sm:$0xff] }
  0xa1   : > { %v398_v21 = vld [vmem:[%s2123_s30 + $0x6e8] sm:$0xff] }
  0xa3   : > { %1058 = vmatmul.mubr.f32.gmra.mrb[60].mxu0 %v237_v22  ;;  %1378 = vmatmul.mubr.f32.gmra.mrb[60].mxu1 %v365_v23  ;;  %v269_v22 = vld [vmem:[%s2123_s30 + $0x2e0] sm:$0xff] }
  0xa4   : > { %1903 = vmatprep.mubr.msk.f32.mxu0 %vm458_vm0, %v240_v24  ;;  %1967 = vmatprep.mubr.msk.f32.mxu1 %vm458_vm0, %v368_v25  ;;  %v397_v23 = vld [vmem:[%s2123_s30 + $0x6e0] sm:$0xff]  ;;  %v272_v24 = vld [vmem:[%s2123_s30 + $0x2f8] sm:$0xff] }
  0xa5   : > { %v400_v25 = vld [vmem:[%s2123_s30 + $0x6f8] sm:$0xff] }
  0xa7   : > { %1063 = vmatmul.mubr.f32.gmra.mrb[62].mxu0 %v239_v26  ;;  %1383 = vmatmul.mubr.f32.gmra.mrb[62].mxu1 %v367_v27  ;;  %v271_v26 = vld [vmem:[%s2123_s30 + $0x2f0] sm:$0xff] }
  0xa8   : > { %1904 = vmatprep.mubr.msk.f32.mxu0 %vm458_vm0, %v242_v28  ;;  %1968 = vmatprep.mubr.msk.f32.mxu1 %vm458_vm0, %v370_v29  ;;  %v399_v27 = vld [vmem:[%s2123_s30 + $0x6f0] sm:$0xff]  ;;  %v274_v28 = vld [vmem:[%s2123_s30 + $0x308] sm:$0xff] }
  0xa9   : > { %v402_v29 = vld [vmem:[%s2123_s30 + $0x708] sm:$0xff] }
  0xab   : > { %1068 = vmatmul.mubr.f32.gmra.mrb[64].mxu0 %v241_v30  ;;  %1388 = vmatmul.mubr.f32.gmra.mrb[64].mxu1 %v369_v31  ;;  %v273_v30 = vld [vmem:[%s2123_s30 + $0x300] sm:$0xff] }
  0xac   : > { %1905 = vmatprep.mubr.msk.f32.mxu0 %vm458_vm0, %v244_v32  ;;  %1969 = vmatprep.mubr.msk.f32.mxu1 %vm458_vm0, %v372_v33  ;;  %v401_v31 = vld [vmem:[%s2123_s30 + $0x700] sm:$0xff]  ;;  %v276_v32 = vld [vmem:[%s2123_s30 + $0x318] sm:$0xff] }
  0xad   : > { %v404_v33 = vld [vmem:[%s2123_s30 + $0x718] sm:$0xff] }
  0xaf   : > { %1073 = vmatmul.mubr.f32.gmra.mrb[66].mxu0 %v243_v34  ;;  %1393 = vmatmul.mubr.f32.gmra.mrb[66].mxu1 %v371_v35  ;;  %v275_v34 = vld [vmem:[%s2123_s30 + $0x310] sm:$0xff] }
  0xb0   : > { %1906 = vmatprep.mubr.msk.f32.mxu0 %vm458_vm0, %v246_v36  ;;  %1970 = vmatprep.mubr.msk.f32.mxu1 %vm458_vm0, %v374_v37  ;;  %v403_v35 = vld [vmem:[%s2123_s30 + $0x710] sm:$0xff]  ;;  %v278_v36 = vld [vmem:[%s2123_s30 + $0x328] sm:$0xff] }
  0xb1   : > { %v406_v37 = vld [vmem:[%s2123_s30 + $0x728] sm:$0xff] }
  0xb3   : > { %1078 = vmatmul.mubr.f32.gmra.mrb[68].mxu0 %v245_v38  ;;  %1398 = vmatmul.mubr.f32.gmra.mrb[68].mxu1 %v373_v39  ;;  %v277_v38 = vld [vmem:[%s2123_s30 + $0x320] sm:$0xff] }
  0xb4   : > { %1907 = vmatprep.mubr.msk.f32.mxu0 %vm458_vm0, %v248_v40  ;;  %1971 = vmatprep.mubr.msk.f32.mxu1 %vm458_vm0, %v376_v41  ;;  %v405_v39 = vld [vmem:[%s2123_s30 + $0x720] sm:$0xff]  ;;  %v280_v40 = vld [vmem:[%s2123_s30 + $0x338] sm:$0xff] }
  0xb5   : > { %v408_v41 = vld [vmem:[%s2123_s30 + $0x738] sm:$0xff] }
  0xb7   : > { %1083 = vmatmul.mubr.f32.gmra.mrb[70].mxu0 %v247_v42  ;;  %1403 = vmatmul.mubr.f32.gmra.mrb[70].mxu1 %v375_v43  ;;  %v279_v42 = vld [vmem:[%s2123_s30 + $0x330] sm:$0xff] }
  0xb8   : > { %1908 = vmatprep.mubr.msk.f32.mxu0 %vm458_vm0, %v250_v44  ;;  %1972 = vmatprep.mubr.msk.f32.mxu1 %vm458_vm0, %v378_v45  ;;  %v407_v43 = vld [vmem:[%s2123_s30 + $0x730] sm:$0xff]  ;;  %v282_v44 = vld [vmem:[%s2123_s30 + $0x348] sm:$0xff] }
  0xb9   : > { %v410_v45 = vld [vmem:[%s2123_s30 + $0x748] sm:$0xff] }
  0xbb   : > { %1088 = vmatmul.mubr.f32.gmra.mrb[72].mxu0 %v249_v46  ;;  %1408 = vmatmul.mubr.f32.gmra.mrb[72].mxu1 %v377_v47  ;;  %v281_v46 = vld [vmem:[%s2123_s30 + $0x340] sm:$0xff] }
  0xbc   : > { %1909 = vmatprep.mubr.msk.f32.mxu0 %vm458_vm0, %v252_v48  ;;  %1973 = vmatprep.mubr.msk.f32.mxu1 %vm458_vm0, %v380_v49  ;;  %v409_v47 = vld [vmem:[%s2123_s30 + $0x740] sm:$0xff]  ;;  %v284_v48 = vld [vmem:[%s2123_s30 + $0x358] sm:$0xff] }
  0xbd   : > { %v412_v49 = vld [vmem:[%s2123_s30 + $0x758] sm:$0xff] }
  0xbf   : > { %1093 = vmatmul.mubr.f32.gmra.mrb[74].mxu0 %v251_v50  ;;  %1413 = vmatmul.mubr.f32.gmra.mrb[74].mxu1 %v379_v51  ;;  %v2498_v50 = vld [vmem:[%s2964_s2] ss:$0 sm:$0xff]  ;;  %v283_v51 = vld [vmem:[%s2123_s30 + $0x350] sm:$0xff] }
  0xc0   : > { %1910 = vmatprep.mubr.msk.f32.mxu0 %vm458_vm0, %v254_v52  ;;  %1974 = vmatprep.mubr.msk.f32.mxu1 %vm458_vm0, %v382_v53  ;;  %v411_v52 = vld [vmem:[%s2123_s30 + $0x750] sm:$0xff]  ;;  %v286_v53 = vld [vmem:[%s2123_s30 + $0x368] sm:$0xff] }
  0xc3   : > { %1098 = vmatmul.mubr.f32.gmra.mrb[76].mxu0 %v253_v54  ;;  %1418 = vmatmul.mubr.f32.gmra.mrb[76].mxu1 %v381_v55  ;;  %v414_v54 = vld [vmem:[%s2123_s30 + $0x768] sm:$0xff] }
  0xc4   : > { %1911 = vmatprep.mubr.msk.f32.mxu0 %vm458_vm0, %v256_v56  ;;  %1975 = vmatprep.mubr.msk.f32.mxu1 %vm458_vm0, %v384_v57 }
  0xc7   : > { %1103 = vmatmul.mubr.f32.gmra.mrb[78].mxu0 %v255_v58  ;;  %1423 = vmatmul.mubr.f32.gmra.mrb[78].mxu1 %v383_v59 }
  0xc8   : > { %1912 = vmatprep.mubr.msk.f32.mxu0 %vm458_vm0, %v258_v60  ;;  %1976 = vmatprep.mubr.msk.f32.mxu1 %vm458_vm0, %v386_v61  ;;  %v285_v61 = vld [vmem:[%s2123_s30 + $0x360] sm:$0xff] }
  0xcb   : > { %1108 = vmatmul.mubr.f32.gmra.mrb[80].mxu0 %v257_v62  ;;  %1428 = vmatmul.mubr.f32.gmra.mrb[80].mxu1 %v385_v63  ;;  %v413_v62 = vld [vmem:[%s2123_s30 + $0x760] sm:$0xff] }
  0xcc   : > { %1913 = vmatprep.mubr.msk.f32.mxu0 %vm458_vm0, %v260_v0  ;;  %1977 = vmatprep.mubr.msk.f32.mxu1 %vm458_vm0, %v388_v1  ;;  %v288_v1 = vld [vmem:[%s2123_s30 + $0x378] sm:$0xff] }
  0xcf   : > { %1113 = vmatmul.mubr.f32.gmra.mrb[82].mxu0 %v259_v2  ;;  %1433 = vmatmul.mubr.f32.gmra.mrb[82].mxu1 %v387_v3  ;;  %v416_v2 = vld [vmem:[%s2123_s30 + $0x778] sm:$0xff] }
  0xd0   : > { %1914 = vmatprep.mubr.msk.f32.mxu0 %vm458_vm0, %v262_v4  ;;  %1978 = vmatprep.mubr.msk.f32.mxu1 %vm458_vm0, %v390_v5 }
  0xd3   : > { %1118 = vmatmul.mubr.f32.gmra.mrb[84].mxu0 %v261_v6  ;;  %1438 = vmatmul.mubr.f32.gmra.mrb[84].mxu1 %v389_v7 }
  0xd4   : > { %1915 = vmatprep.mubr.msk.f32.mxu0 %vm458_vm0, %v264_v8  ;;  %1979 = vmatprep.mubr.msk.f32.mxu1 %vm458_vm0, %v392_v9  ;;  %v287_v9 = vld [vmem:[%s2123_s30 + $0x370] sm:$0xff] }
  0xd7   : > { %1123 = vmatmul.mubr.f32.gmra.mrb[86].mxu0 %v263_v10  ;;  %1443 = vmatmul.mubr.f32.gmra.mrb[86].mxu1 %v391_v11  ;;  %v415_v10 = vld [vmem:[%s2123_s30 + $0x770] sm:$0xff] }
  0xd8   : > { %1916 = vmatprep.mubr.msk.f32.mxu0 %vm458_vm0, %v266_v12  ;;  %1980 = vmatprep.mubr.msk.f32.mxu1 %vm458_vm0, %v394_v13  ;;  %v290_v13 = vld [vmem:[%s2123_s30 + $0x388] sm:$0xff] }
  0xdb   : > { %1128 = vmatmul.mubr.f32.gmra.mrb[88].mxu0 %v265_v14  ;;  %1448 = vmatmul.mubr.f32.gmra.mrb[88].mxu1 %v393_v15  ;;  %v418_v14 = vld [vmem:[%s2123_s30 + $0x788] sm:$0xff] }
  0xdc   : > { %1917 = vmatprep.mubr.msk.f32.mxu0 %vm458_vm0, %v268_v16  ;;  %1981 = vmatprep.mubr.msk.f32.mxu1 %vm458_vm0, %v396_v17 }
  0xdf   : > { %1133 = vmatmul.mubr.f32.gmra.mrb[90].mxu0 %v267_v18  ;;  %1453 = vmatmul.mubr.f32.gmra.mrb[90].mxu1 %v395_v19 }
  0xe0   : > { %1918 = vmatprep.mubr.msk.f32.mxu0 %vm458_vm0, %v270_v20  ;;  %1982 = vmatprep.mubr.msk.f32.mxu1 %vm458_vm0, %v398_v21  ;;  %v289_v21 = vld [vmem:[%s2123_s30 + $0x380] sm:$0xff] }
  0xe3   : > { %1138 = vmatmul.mubr.f32.gmra.mrb[92].mxu0 %v269_v22  ;;  %1458 = vmatmul.mubr.f32.gmra.mrb[92].mxu1 %v397_v23  ;;  %v417_v22 = vld [vmem:[%s2123_s30 + $0x780] sm:$0xff] }
  0xe4   : > { %1919 = vmatprep.mubr.msk.f32.mxu0 %vm458_vm0, %v272_v24  ;;  %1983 = vmatprep.mubr.msk.f32.mxu1 %vm458_vm0, %v400_v25  ;;  %v292_v25 = vld [vmem:[%s2123_s30 + $0x398] sm:$0xff] }
  0xe7   : > { %1143 = vmatmul.mubr.f32.gmra.mrb[94].mxu0 %v271_v26  ;;  %1463 = vmatmul.mubr.f32.gmra.mrb[94].mxu1 %v399_v27  ;;  %v420_v26 = vld [vmem:[%s2123_s30 + $0x798] sm:$0xff] }
  0xe8   : > { %1920 = vmatprep.mubr.msk.f32.mxu0 %vm458_vm0, %v274_v28  ;;  %1984 = vmatprep.mubr.msk.f32.mxu1 %vm458_vm0, %v402_v29 }
  0xeb   : > { %1148 = vmatmul.mubr.f32.gmra.mrb[96].mxu0 %v273_v30  ;;  %1468 = vmatmul.mubr.f32.gmra.mrb[96].mxu1 %v401_v31 }
  0xec   : > { %1921 = vmatprep.mubr.msk.f32.mxu0 %vm458_vm0, %v276_v32  ;;  %1985 = vmatprep.mubr.msk.f32.mxu1 %vm458_vm0, %v404_v33  ;;  %v291_v33 = vld [vmem:[%s2123_s30 + $0x390] sm:$0xff] }
  0xef   : > { %1153 = vmatmul.mubr.f32.gmra.mrb[98].mxu0 %v275_v34  ;;  %1473 = vmatmul.mubr.f32.gmra.mrb[98].mxu1 %v403_v35  ;;  %v419_v34 = vld [vmem:[%s2123_s30 + $0x790] sm:$0xff] }
  0xf0   : > { %1922 = vmatprep.mubr.msk.f32.mxu0 %vm458_vm0, %v278_v36  ;;  %1986 = vmatprep.mubr.msk.f32.mxu1 %vm458_vm0, %v406_v37  ;;  %v294_v37 = vld [vmem:[%s2123_s30 + $0x3a8] sm:$0xff] }
  0xf3   : > { %1158 = vmatmul.mubr.f32.gmra.mrb[100].mxu0 %v277_v38  ;;  %1478 = vmatmul.mubr.f32.gmra.mrb[100].mxu1 %v405_v39  ;;  %v422_v38 = vld [vmem:[%s2123_s30 + $0x7a8] sm:$0xff] }
  0xf4   : > { %1923 = vmatprep.mubr.msk.f32.mxu0 %vm458_vm0, %v280_v40  ;;  %1987 = vmatprep.mubr.msk.f32.mxu1 %vm458_vm0, %v408_v41 }
  0xf7   : > { %1163 = vmatmul.mubr.f32.gmra.mrb[102].mxu0 %v279_v42  ;;  %1483 = vmatmul.mubr.f32.gmra.mrb[102].mxu1 %v407_v43 }
  0xf8   : > { %1924 = vmatprep.mubr.msk.f32.mxu0 %vm458_vm0, %v282_v44  ;;  %1988 = vmatprep.mubr.msk.f32.mxu1 %vm458_vm0, %v410_v45  ;;  %v293_v45 = vld [vmem:[%s2123_s30 + $0x3a0] sm:$0xff] }
  0xfb   : > { %1168 = vmatmul.mubr.f32.gmra.mrb[104].mxu0 %v281_v46  ;;  %1488 = vmatmul.mubr.f32.gmra.mrb[104].mxu1 %v409_v47  ;;  %v421_v46 = vld [vmem:[%s2123_s30 + $0x7a0] sm:$0xff] }
  0xfc   : > { %1925 = vmatprep.mubr.msk.f32.mxu0 %vm458_vm0, %v284_v48  ;;  %1989 = vmatprep.mubr.msk.f32.mxu1 %vm458_vm0, %v412_v49  ;;  %v296_v49 = vld [vmem:[%s2123_s30 + $0x3b8] sm:$0xff] }
  0xfe   : > { %v909_v55 = vpop.f32.mrb[0].mxu0  ;;  %v1229_v56 = vpop.f32.mrb[0].mxu1 }
  0xff   : > { %v910_v57 = vadd.f32 %v2498_v50, %v909_v55  ;;  %v1230_v58 = vadd.f32 %v2498_v50, %v1229_v56  ;;  %v911_v59 = vpop.f32.mrb[1].mxu0  ;;  %1173 = vmatmul.mubr.f32.gmra.mrb[106].mxu0 %v283_v51  ;;  %v1231_v60 = vpop.f32.mrb[1].mxu1  ;;  %1493 = vmatmul.mubr.f32.gmra.mrb[106].mxu1 %v411_v52  ;;  %v424_v51 = vld [vmem:[%s2123_s30 + $0x7b8] sm:$0xff] }
 0x100   : > { %1926 = vmatprep.mubr.msk.f32.mxu0 %vm458_vm0, %v286_v53  ;;  %1990 = vmatprep.mubr.msk.f32.mxu1 %vm458_vm0, %v414_v54  ;;  %v423_v59 = vld [vmem:[%s2123_s30 + $0x7b0] sm:$0xff] }
 0x101   : > { %v1548_v63 = vmax.f32 %v910_v57, 0.0  ;;  %v1612_v0 = vmax.f32 %v1230_v58, 0.0  ;;  %v295_v58 = vld [vmem:[%s2123_s30 + $0x3b0] sm:$0xff] }
 0x102   : > { %v914_v3 = vpop.f32.mrb[2].mxu0  ;;  %v1234_v4 = vpop.f32.mrb[2].mxu1 }
 0x103   : > { %1677 = vst.msk [vmem:[%s2512_s9] sm:$0xff] %vm1676_vm1, %v1548_v63  ;;  %1741 = vst.msk [vmem:[%s2512_s9 + $0x200] sm:$0xff] %vm1676_vm1, %v1612_v0  ;;  %v915_v5 = vadd.f32 %v2498_v50, %v914_v3  ;;  %v1235_v6 = vadd.f32 %v2498_v50, %v1234_v4  ;;  %v916_v7 = vpop.f32.mrb[3].mxu0  ;;  %1178 = vmatmul.mubr.f32.gmra.mrb[108].mxu0 %v285_v61  ;;  %v1236_v8 = vpop.f32.mrb[3].mxu1  ;;  %1498 = vmatmul.mubr.f32.gmra.mrb[108].mxu1 %v413_v62  ;;  %v298_v62 = vld [vmem:[%s2123_s30 + $0x3c8] sm:$0xff] }
 0x104   : > { %1927 = vmatprep.mubr.msk.f32.mxu0 %vm458_vm0, %v288_v1  ;;  %1991 = vmatprep.mubr.msk.f32.mxu1 %vm458_vm0, %v416_v2  ;;  %v426_v63 = vld [vmem:[%s2123_s30 + $0x7c8] sm:$0xff]  ;;  %v425_v7 = vld [vmem:[%s2123_s30 + $0x7c0] sm:$0xff] }
 0x105   : > { %v1549_v11 = vmax.f32 %v915_v5, 0.0  ;;  %v1613_v12 = vmax.f32 %v1235_v6, 0.0  ;;  %v297_v6 = vld [vmem:[%s2123_s30 + $0x3c0] sm:$0xff] }
 0x106   : > { %v919_v15 = vpop.f32.mrb[4].mxu0  ;;  %v1239_v16 = vpop.f32.mrb[4].mxu1 }
 0x107   : > { %1678 = vst.msk [vmem:[%s2512_s9 + $0x8] sm:$0xff] %vm1676_vm1, %v1549_v11  ;;  %1742 = vst.msk [vmem:[%s2512_s9 + $0x208] sm:$0xff] %vm1676_vm1, %v1613_v12  ;;  %v920_v17 = vadd.f32 %v2498_v50, %v919_v15  ;;  %v1240_v18 = vadd.f32 %v2498_v50, %v1239_v16  ;;  %v921_v19 = vpop.f32.mrb[5].mxu0  ;;  %1183 = vmatmul.mubr.f32.gmra.mrb[110].mxu0 %v287_v9  ;;  %v1241_v20 = vpop.f32.mrb[5].mxu1  ;;  %1503 = vmatmul.mubr.f32.gmra.mrb[110].mxu1 %v415_v10  ;;  %v300_v10 = vld [vmem:[%s2123_s30 + $0x3d8] sm:$0xff] }
 0x108   : > { %1928 = vmatprep.mubr.msk.f32.mxu0 %vm458_vm0, %v290_v13  ;;  %1992 = vmatprep.mubr.msk.f32.mxu1 %vm458_vm0, %v418_v14  ;;  %v428_v11 = vld [vmem:[%s2123_s30 + $0x7d8] sm:$0xff]  ;;  %v427_v19 = vld [vmem:[%s2123_s30 + $0x7d0] sm:$0xff] }
 0x109   : > { %v1550_v23 = vmax.f32 %v920_v17, 0.0  ;;  %v1614_v24 = vmax.f32 %v1240_v18, 0.0  ;;  %v299_v18 = vld [vmem:[%s2123_s30 + $0x3d0] sm:$0xff] }
 0x10a   : > { %v924_v27 = vpop.f32.mrb[6].mxu0  ;;  %v1244_v28 = vpop.f32.mrb[6].mxu1 }
 0x10b   : > { %1679 = vst.msk [vmem:[%s2512_s9 + $0x10] sm:$0xff] %vm1676_vm1, %v1550_v23  ;;  %1743 = vst.msk [vmem:[%s2512_s9 + $0x210] sm:$0xff] %vm1676_vm1, %v1614_v24  ;;  %v925_v29 = vadd.f32 %v2498_v50, %v924_v27  ;;  %v1245_v30 = vadd.f32 %v2498_v50, %v1244_v28  ;;  %v926_v31 = vpop.f32.mrb[7].mxu0  ;;  %1188 = vmatmul.mubr.f32.gmra.mrb[112].mxu0 %v289_v21  ;;  %v1246_v32 = vpop.f32.mrb[7].mxu1  ;;  %1508 = vmatmul.mubr.f32.gmra.mrb[112].mxu1 %v417_v22  ;;  %v302_v22 = vld [vmem:[%s2123_s30 + $0x3e8] sm:$0xff] }
 0x10c   : > { %1929 = vmatprep.mubr.msk.f32.mxu0 %vm458_vm0, %v292_v25  ;;  %1993 = vmatprep.mubr.msk.f32.mxu1 %vm458_vm0, %v420_v26  ;;  %v430_v23 = vld [vmem:[%s2123_s30 + $0x7e8] sm:$0xff]  ;;  %v429_v31 = vld [vmem:[%s2123_s30 + $0x7e0] sm:$0xff] }
 0x10d   : > { %v1551_v35 = vmax.f32 %v925_v29, 0.0  ;;  %v1615_v36 = vmax.f32 %v1245_v30, 0.0  ;;  %v301_v30 = vld [vmem:[%s2123_s30 + $0x3e0] sm:$0xff] }
 0x10e   : > { %v929_v39 = vpop.f32.mrb[8].mxu0  ;;  %v1249_v40 = vpop.f32.mrb[8].mxu1 }
 0x10f   : > { %1680 = vst.msk [vmem:[%s2512_s9 + $0x18] sm:$0xff] %vm1676_vm1, %v1551_v35  ;;  %1744 = vst.msk [vmem:[%s2512_s9 + $0x218] sm:$0xff] %vm1676_vm1, %v1615_v36  ;;  %v930_v41 = vadd.f32 %v2498_v50, %v929_v39  ;;  %v1250_v42 = vadd.f32 %v2498_v50, %v1249_v40  ;;  %v931_v43 = vpop.f32.mrb[9].mxu0  ;;  %1193 = vmatmul.mubr.f32.gmra.mrb[114].mxu0 %v291_v33  ;;  %v1251_v44 = vpop.f32.mrb[9].mxu1  ;;  %1513 = vmatmul.mubr.f32.gmra.mrb[114].mxu1 %v419_v34  ;;  %v304_v34 = vld [vmem:[%s2123_s30 + $0x3f8] sm:$0xff] }
 0x110   : > { %1930 = vmatprep.mubr.msk.f32.mxu0 %vm458_vm0, %v294_v37  ;;  %1994 = vmatprep.mubr.msk.f32.mxu1 %vm458_vm0, %v422_v38  ;;  %v432_v35 = vld [vmem:[%s2123_s30 + $0x7f8] sm:$0xff]  ;;  %v431_v43 = vld [vmem:[%s2123_s30 + $0x7f0] sm:$0xff] }
 0x111   : > { %v1552_v47 = vmax.f32 %v930_v41, 0.0  ;;  %v1616_v48 = vmax.f32 %v1250_v42, 0.0  ;;  %v303_v42 = vld [vmem:[%s2123_s30 + $0x3f0] sm:$0xff] }
 0x112   : > { %v934_v52 = vpop.f32.mrb[10].mxu0  ;;  %v1254_v53 = vpop.f32.mrb[10].mxu1 }
 0x113   : > { %1681 = vst.msk [vmem:[%s2512_s9 + $0x20] sm:$0xff] %vm1676_vm1, %v1552_v47  ;;  %1745 = vst.msk [vmem:[%s2512_s9 + $0x220] sm:$0xff] %vm1676_vm1, %v1616_v48  ;;  %v935_v54 = vadd.f32 %v2498_v50, %v934_v52  ;;  %v1255_v55 = vadd.f32 %v2498_v50, %v1254_v53  ;;  %v936_v56 = vpop.f32.mrb[11].mxu0  ;;  %1198 = vmatmul.mubr.f32.gmra.mrb[116].mxu0 %v293_v45  ;;  %v1256_v57 = vpop.f32.mrb[11].mxu1  ;;  %1518 = vmatmul.mubr.f32.gmra.mrb[116].mxu1 %v421_v46 }
 0x114   : > { %1931 = vmatprep.mubr.msk.f32.mxu0 %vm458_vm0, %v296_v49  ;;  %1995 = vmatprep.mubr.msk.f32.mxu1 %vm458_vm0, %v424_v51 }
 0x115   : > { %v1553_v60 = vmax.f32 %v935_v54, 0.0  ;;  %v1617_v61 = vmax.f32 %v1255_v55, 0.0 }
 0x116   : > { %v939_v0 = vpop.f32.mrb[12].mxu0  ;;  %v1259_v1 = vpop.f32.mrb[12].mxu1 }
 0x117   : > { %1682 = vst.msk [vmem:[%s2512_s9 + $0x28] sm:$0xff] %vm1676_vm1, %v1553_v60  ;;  %1746 = vst.msk [vmem:[%s2512_s9 + $0x228] sm:$0xff] %vm1676_vm1, %v1617_v61  ;;  %v940_v2 = vadd.f32 %v2498_v50, %v939_v0  ;;  %v1260_v3 = vadd.f32 %v2498_v50, %v1259_v1  ;;  %v941_v4 = vpop.f32.mrb[13].mxu0  ;;  %1203 = vmatmul.mubr.f32.gmra.mrb[118].mxu0 %v295_v58  ;;  %v1261_v5 = vpop.f32.mrb[13].mxu1  ;;  %1523 = vmatmul.mubr.f32.gmra.mrb[118].mxu1 %v423_v59 }
 0x118   : > { %1932 = vmatprep.mubr.msk.f32.mxu0 %vm458_vm0, %v298_v62  ;;  %1996 = vmatprep.mubr.msk.f32.mxu1 %vm458_vm0, %v426_v63 }
 0x119   : > { %v1554_v8 = vmax.f32 %v940_v2, 0.0  ;;  %v1618_v9 = vmax.f32 %v1260_v3, 0.0 }
 0x11a   : > { %v944_v12 = vpop.f32.mrb[14].mxu0  ;;  %v1264_v13 = vpop.f32.mrb[14].mxu1 }
 0x11b   : > { %1683 = vst.msk [vmem:[%s2512_s9 + $0x30] sm:$0xff] %vm1676_vm1, %v1554_v8  ;;  %1747 = vst.msk [vmem:[%s2512_s9 + $0x230] sm:$0xff] %vm1676_vm1, %v1618_v9  ;;  %v945_v14 = vadd.f32 %v2498_v50, %v944_v12  ;;  %v1265_v15 = vadd.f32 %v2498_v50, %v1264_v13  ;;  %v946_v16 = vpop.f32.mrb[15].mxu0  ;;  %1208 = vmatmul.mubr.f32.gmra.mrb[120].mxu0 %v297_v6  ;;  %v1266_v17 = vpop.f32.mrb[15].mxu1  ;;  %1528 = vmatmul.mubr.f32.gmra.mrb[120].mxu1 %v425_v7 }
 0x11c   : > { %1933 = vmatprep.mubr.msk.f32.mxu0 %vm458_vm0, %v300_v10  ;;  %1997 = vmatprep.mubr.msk.f32.mxu1 %vm458_vm0, %v428_v11 }
 0x11d   : > { %v1555_v20 = vmax.f32 %v945_v14, 0.0  ;;  %v1619_v21 = vmax.f32 %v1265_v15, 0.0 }
 0x11e   : > { %v949_v24 = vpop.f32.mrb[16].mxu0  ;;  %v1269_v25 = vpop.f32.mrb[16].mxu1 }
 0x11f   : > { %1684 = vst.msk [vmem:[%s2512_s9 + $0x38] sm:$0xff] %vm1676_vm1, %v1555_v20  ;;  %1748 = vst.msk [vmem:[%s2512_s9 + $0x238] sm:$0xff] %vm1676_vm1, %v1619_v21  ;;  %v950_v26 = vadd.f32 %v2498_v50, %v949_v24  ;;  %v1270_v27 = vadd.f32 %v2498_v50, %v1269_v25  ;;  %v951_v28 = vpop.f32.mrb[17].mxu0  ;;  %1213 = vmatmul.mubr.f32.gmra.mrb[122].mxu0 %v299_v18  ;;  %v1271_v29 = vpop.f32.mrb[17].mxu1  ;;  %1533 = vmatmul.mubr.f32.gmra.mrb[122].mxu1 %v427_v19 }
 0x120   : > { %1934 = vmatprep.mubr.msk.f32.mxu0 %vm458_vm0, %v302_v22  ;;  %1998 = vmatprep.mubr.msk.f32.mxu1 %vm458_vm0, %v430_v23 }
 0x121   : > { %v1556_v32 = vmax.f32 %v950_v26, 0.0  ;;  %v1620_v33 = vmax.f32 %v1270_v27, 0.0 }
 0x122   : > { %v954_v36 = vpop.f32.mrb[18].mxu0  ;;  %v1274_v37 = vpop.f32.mrb[18].mxu1 }
 0x123   : > { %1685 = vst.msk [vmem:[%s2512_s9 + $0x40] sm:$0xff] %vm1676_vm1, %v1556_v32  ;;  %1749 = vst.msk [vmem:[%s2512_s9 + $0x240] sm:$0xff] %vm1676_vm1, %v1620_v33  ;;  %v955_v38 = vadd.f32 %v2498_v50, %v954_v36  ;;  %v1275_v39 = vadd.f32 %v2498_v50, %v1274_v37  ;;  %v956_v40 = vpop.f32.mrb[19].mxu0  ;;  %1218 = vmatmul.mubr.f32.gmra.mrb[124].mxu0 %v301_v30  ;;  %v1276_v41 = vpop.f32.mrb[19].mxu1  ;;  %1538 = vmatmul.mubr.f32.gmra.mrb[124].mxu1 %v429_v31 }
 0x124   : > { %1935 = vmatprep.mubr.msk.f32.mxu0 %vm458_vm0, %v304_v34  ;;  %1999 = vmatprep.mubr.msk.f32.mxu1 %vm458_vm0, %v432_v35 }
 0x125   : > { %v1557_v44 = vmax.f32 %v955_v38, 0.0  ;;  %v1621_v45 = vmax.f32 %v1275_v39, 0.0 }
 0x126   : > { %v959_v46 = vpop.f32.mrb[20].mxu0  ;;  %v1279_v47 = vpop.f32.mrb[20].mxu1 }
 0x127   : > { %1686 = vst.msk [vmem:[%s2512_s9 + $0x48] sm:$0xff] %vm1676_vm1, %v1557_v44  ;;  %1750 = vst.msk [vmem:[%s2512_s9 + $0x248] sm:$0xff] %vm1676_vm1, %v1621_v45  ;;  %v960_v48 = vadd.f32 %v2498_v50, %v959_v46  ;;  %v1280_v49 = vadd.f32 %v2498_v50, %v1279_v47  ;;  %v961_v51 = vpop.f32.mrb[21].mxu0  ;;  %1223 = vmatmul.mubr.f32.gmra.mrb[126].mxu0 %v303_v42  ;;  %v1281_v52 = vpop.f32.mrb[21].mxu1  ;;  %1543 = vmatmul.mubr.f32.gmra.mrb[126].mxu1 %v431_v43 }
 0x129   : > { %v1558_v53 = vmax.f32 %v960_v48, 0.0  ;;  %v1622_v54 = vmax.f32 %v1280_v49, 0.0 }
 0x12a   : > { %v964_v55 = vpop.f32.mrb[22].mxu0  ;;  %v1284_v56 = vpop.f32.mrb[22].mxu1 }
 0x12b   : > { %1687 = vst.msk [vmem:[%s2512_s9 + $0x50] sm:$0xff] %vm1676_vm1, %v1558_v53  ;;  %1751 = vst.msk [vmem:[%s2512_s9 + $0x250] sm:$0xff] %vm1676_vm1, %v1622_v54  ;;  %v965_v57 = vadd.f32 %v2498_v50, %v964_v55  ;;  %v1285_v58 = vadd.f32 %v2498_v50, %v1284_v56  ;;  %v966_v59 = vpop.f32.mrb[23].mxu0  ;;  %v1286_v60 = vpop.f32.mrb[23].mxu1 }
 0x12d   : > { %v1559_v61 = vmax.f32 %v965_v57, 0.0  ;;  %v1623_v62 = vmax.f32 %v1285_v58, 0.0 }
 0x12e   : > { %v969_v63 = vpop.f32.mrb[24].mxu0  ;;  %v1289_v0 = vpop.f32.mrb[24].mxu1 }
 0x12f   : > { %1688 = vst.msk [vmem:[%s2512_s9 + $0x58] sm:$0xff] %vm1676_vm1, %v1559_v61  ;;  %1752 = vst.msk [vmem:[%s2512_s9 + $0x258] sm:$0xff] %vm1676_vm1, %v1623_v62  ;;  %v970_v1 = vadd.f32 %v2498_v50, %v969_v63  ;;  %v1290_v2 = vadd.f32 %v2498_v50, %v1289_v0  ;;  %v971_v3 = vpop.f32.mrb[25].mxu0  ;;  %v1291_v4 = vpop.f32.mrb[25].mxu1 }
 0x131   : > { %v1560_v5 = vmax.f32 %v970_v1, 0.0  ;;  %v1624_v6 = vmax.f32 %v1290_v2, 0.0 }
 0x132   : > { %v974_v7 = vpop.f32.mrb[26].mxu0  ;;  %v1294_v8 = vpop.f32.mrb[26].mxu1 }
 0x133   : > { %1689 = vst.msk [vmem:[%s2512_s9 + $0x60] sm:$0xff] %vm1676_vm1, %v1560_v5  ;;  %1753 = vst.msk [vmem:[%s2512_s9 + $0x260] sm:$0xff] %vm1676_vm1, %v1624_v6  ;;  %v975_v9 = vadd.f32 %v2498_v50, %v974_v7  ;;  %v1295_v10 = vadd.f32 %v2498_v50, %v1294_v8  ;;  %v976_v11 = vpop.f32.mrb[27].mxu0  ;;  %v1296_v12 = vpop.f32.mrb[27].mxu1 }
 0x135   : > { %v1561_v13 = vmax.f32 %v975_v9, 0.0  ;;  %v1625_v14 = vmax.f32 %v1295_v10, 0.0 }
 0x136   : > { %v979_v15 = vpop.f32.mrb[28].mxu0  ;;  %v1299_v16 = vpop.f32.mrb[28].mxu1 }
 0x137   : > { %1690 = vst.msk [vmem:[%s2512_s9 + $0x68] sm:$0xff] %vm1676_vm1, %v1561_v13  ;;  %1754 = vst.msk [vmem:[%s2512_s9 + $0x268] sm:$0xff] %vm1676_vm1, %v1625_v14  ;;  %v980_v17 = vadd.f32 %v2498_v50, %v979_v15  ;;  %v1300_v18 = vadd.f32 %v2498_v50, %v1299_v16  ;;  %v981_v19 = vpop.f32.mrb[29].mxu0  ;;  %v1301_v20 = vpop.f32.mrb[29].mxu1 }
 0x139   : > { %v1562_v21 = vmax.f32 %v980_v17, 0.0  ;;  %v1626_v22 = vmax.f32 %v1300_v18, 0.0 }
 0x13a   : > { %v984_v23 = vpop.f32.mrb[30].mxu0  ;;  %v1304_v24 = vpop.f32.mrb[30].mxu1 }
 0x13b   : > { %1691 = vst.msk [vmem:[%s2512_s9 + $0x70] sm:$0xff] %vm1676_vm1, %v1562_v21  ;;  %1755 = vst.msk [vmem:[%s2512_s9 + $0x270] sm:$0xff] %vm1676_vm1, %v1626_v22  ;;  %v985_v25 = vadd.f32 %v2498_v50, %v984_v23  ;;  %v1305_v26 = vadd.f32 %v2498_v50, %v1304_v24  ;;  %v986_v27 = vpop.f32.mrb[31].mxu0  ;;  %v1306_v28 = vpop.f32.mrb[31].mxu1 }
 0x13d   : > { %v1563_v29 = vmax.f32 %v985_v25, 0.0  ;;  %v1627_v30 = vmax.f32 %v1305_v26, 0.0 }
 0x13e   : > { %v989_v31 = vpop.f32.mrb[32].mxu0  ;;  %v1309_v32 = vpop.f32.mrb[32].mxu1 }
 0x13f   : > { %1692 = vst.msk [vmem:[%s2512_s9 + $0x78] sm:$0xff] %vm1676_vm1, %v1563_v29  ;;  %1756 = vst.msk [vmem:[%s2512_s9 + $0x278] sm:$0xff] %vm1676_vm1, %v1627_v30  ;;  %v990_v33 = vadd.f32 %v2498_v50, %v989_v31  ;;  %v1310_v34 = vadd.f32 %v2498_v50, %v1309_v32  ;;  %v991_v35 = vpop.f32.mrb[33].mxu0  ;;  %v1311_v36 = vpop.f32.mrb[33].mxu1 }
 0x141   : > { %v1564_v37 = vmax.f32 %v990_v33, 0.0  ;;  %v1628_v38 = vmax.f32 %v1310_v34, 0.0 }
 0x142   : > { %v994_v39 = vpop.f32.mrb[34].mxu0  ;;  %v1314_v40 = vpop.f32.mrb[34].mxu1 }
 0x143   : > { %1693 = vst.msk [vmem:[%s2512_s9 + $0x80] sm:$0xff] %vm1676_vm1, %v1564_v37  ;;  %1757 = vst.msk [vmem:[%s2512_s9 + $0x280] sm:$0xff] %vm1676_vm1, %v1628_v38  ;;  %v995_v41 = vadd.f32 %v2498_v50, %v994_v39  ;;  %v1315_v42 = vadd.f32 %v2498_v50, %v1314_v40  ;;  %v996_v43 = vpop.f32.mrb[35].mxu0  ;;  %v1316_v44 = vpop.f32.mrb[35].mxu1 }
 0x145   : > { %v1565_v45 = vmax.f32 %v995_v41, 0.0  ;;  %v1629_v46 = vmax.f32 %v1315_v42, 0.0 }
 0x146   : > { %v999_v47 = vpop.f32.mrb[36].mxu0  ;;  %v1319_v48 = vpop.f32.mrb[36].mxu1 }
 0x147   : > { %1694 = vst.msk [vmem:[%s2512_s9 + $0x88] sm:$0xff] %vm1676_vm1, %v1565_v45  ;;  %1758 = vst.msk [vmem:[%s2512_s9 + $0x288] sm:$0xff] %vm1676_vm1, %v1629_v46  ;;  %v1000_v49 = vadd.f32 %v2498_v50, %v999_v47  ;;  %v1320_v51 = vadd.f32 %v2498_v50, %v1319_v48  ;;  %v1001_v52 = vpop.f32.mrb[37].mxu0  ;;  %v1321_v53 = vpop.f32.mrb[37].mxu1 }
 0x149   : > { %v1566_v54 = vmax.f32 %v1000_v49, 0.0  ;;  %v1630_v55 = vmax.f32 %v1320_v51, 0.0 }
 0x14a   : > { %v1004_v56 = vpop.f32.mrb[38].mxu0  ;;  %v1324_v57 = vpop.f32.mrb[38].mxu1 }
 0x14b   : > { %1695 = vst.msk [vmem:[%s2512_s9 + $0x90] sm:$0xff] %vm1676_vm1, %v1566_v54  ;;  %1759 = vst.msk [vmem:[%s2512_s9 + $0x290] sm:$0xff] %vm1676_vm1, %v1630_v55  ;;  %v1005_v58 = vadd.f32 %v2498_v50, %v1004_v56  ;;  %v1325_v59 = vadd.f32 %v2498_v50, %v1324_v57  ;;  %v1006_v60 = vpop.f32.mrb[39].mxu0  ;;  %v1326_v61 = vpop.f32.mrb[39].mxu1 }
 0x14d   : > { %v1567_v62 = vmax.f32 %v1005_v58, 0.0  ;;  %v1631_v63 = vmax.f32 %v1325_v59, 0.0 }
 0x14e   : > { %v1009_v0 = vpop.f32.mrb[40].mxu0  ;;  %v1329_v1 = vpop.f32.mrb[40].mxu1 }
 0x14f   : > { %1696 = vst.msk [vmem:[%s2512_s9 + $0x98] sm:$0xff] %vm1676_vm1, %v1567_v62  ;;  %1760 = vst.msk [vmem:[%s2512_s9 + $0x298] sm:$0xff] %vm1676_vm1, %v1631_v63  ;;  %v1010_v2 = vadd.f32 %v2498_v50, %v1009_v0  ;;  %v1330_v3 = vadd.f32 %v2498_v50, %v1329_v1  ;;  %v1011_v4 = vpop.f32.mrb[41].mxu0  ;;  %v1331_v5 = vpop.f32.mrb[41].mxu1 }
 0x151   : > { %v1568_v6 = vmax.f32 %v1010_v2, 0.0  ;;  %v1632_v7 = vmax.f32 %v1330_v3, 0.0 }
 0x152   : > { %v1014_v8 = vpop.f32.mrb[42].mxu0  ;;  %v1334_v9 = vpop.f32.mrb[42].mxu1 }
 0x153   : > { %1697 = vst.msk [vmem:[%s2512_s9 + $0xa0] sm:$0xff] %vm1676_vm1, %v1568_v6  ;;  %1761 = vst.msk [vmem:[%s2512_s9 + $0x2a0] sm:$0xff] %vm1676_vm1, %v1632_v7  ;;  %v1015_v10 = vadd.f32 %v2498_v50, %v1014_v8  ;;  %v1335_v11 = vadd.f32 %v2498_v50, %v1334_v9  ;;  %v1016_v12 = vpop.f32.mrb[43].mxu0  ;;  %v1336_v13 = vpop.f32.mrb[43].mxu1 }
 0x155   : > { %v1569_v14 = vmax.f32 %v1015_v10, 0.0  ;;  %v1633_v15 = vmax.f32 %v1335_v11, 0.0 }
 0x156   : > { %v1019_v16 = vpop.f32.mrb[44].mxu0  ;;  %v1339_v17 = vpop.f32.mrb[44].mxu1 }
 0x157   : > { %1698 = vst.msk [vmem:[%s2512_s9 + $0xa8] sm:$0xff] %vm1676_vm1, %v1569_v14  ;;  %1762 = vst.msk [vmem:[%s2512_s9 + $0x2a8] sm:$0xff] %vm1676_vm1, %v1633_v15  ;;  %v1020_v18 = vadd.f32 %v2498_v50, %v1019_v16  ;;  %v1340_v19 = vadd.f32 %v2498_v50, %v1339_v17  ;;  %v1021_v20 = vpop.f32.mrb[45].mxu0  ;;  %v1341_v21 = vpop.f32.mrb[45].mxu1 }
 0x159   : > { %v1570_v22 = vmax.f32 %v1020_v18, 0.0  ;;  %v1634_v23 = vmax.f32 %v1340_v19, 0.0 }
 0x15a   : > { %v1024_v24 = vpop.f32.mrb[46].mxu0  ;;  %v1344_v25 = vpop.f32.mrb[46].mxu1 }
 0x15b   : > { %1699 = vst.msk [vmem:[%s2512_s9 + $0xb0] sm:$0xff] %vm1676_vm1, %v1570_v22  ;;  %1763 = vst.msk [vmem:[%s2512_s9 + $0x2b0] sm:$0xff] %vm1676_vm1, %v1634_v23  ;;  %v1025_v26 = vadd.f32 %v2498_v50, %v1024_v24  ;;  %v1345_v27 = vadd.f32 %v2498_v50, %v1344_v25  ;;  %v1026_v28 = vpop.f32.mrb[47].mxu0  ;;  %v1346_v29 = vpop.f32.mrb[47].mxu1 }
 0x15d   : > { %v1571_v30 = vmax.f32 %v1025_v26, 0.0  ;;  %v1635_v31 = vmax.f32 %v1345_v27, 0.0 }
 0x15e   : > { %v1029_v32 = vpop.f32.mrb[48].mxu0  ;;  %v1349_v33 = vpop.f32.mrb[48].mxu1 }
 0x15f   : > { %1700 = vst.msk [vmem:[%s2512_s9 + $0xb8] sm:$0xff] %vm1676_vm1, %v1571_v30  ;;  %1764 = vst.msk [vmem:[%s2512_s9 + $0x2b8] sm:$0xff] %vm1676_vm1, %v1635_v31  ;;  %v1030_v34 = vadd.f32 %v2498_v50, %v1029_v32  ;;  %v1350_v35 = vadd.f32 %v2498_v50, %v1349_v33  ;;  %v1031_v36 = vpop.f32.mrb[49].mxu0  ;;  %v1351_v37 = vpop.f32.mrb[49].mxu1 }
 0x161   : > { %v1572_v38 = vmax.f32 %v1030_v34, 0.0  ;;  %v1636_v39 = vmax.f32 %v1350_v35, 0.0 }
 0x162   : > { %v1034_v40 = vpop.f32.mrb[50].mxu0  ;;  %v1354_v41 = vpop.f32.mrb[50].mxu1 }
 0x163   : > { %1701 = vst.msk [vmem:[%s2512_s9 + $0xc0] sm:$0xff] %vm1676_vm1, %v1572_v38  ;;  %1765 = vst.msk [vmem:[%s2512_s9 + $0x2c0] sm:$0xff] %vm1676_vm1, %v1636_v39  ;;  %v1035_v42 = vadd.f32 %v2498_v50, %v1034_v40  ;;  %v1355_v43 = vadd.f32 %v2498_v50, %v1354_v41  ;;  %v1036_v44 = vpop.f32.mrb[51].mxu0  ;;  %v1356_v45 = vpop.f32.mrb[51].mxu1 }
 0x165   : > { %v1573_v46 = vmax.f32 %v1035_v42, 0.0  ;;  %v1637_v47 = vmax.f32 %v1355_v43, 0.0 }
 0x166   : > { %v1039_v48 = vpop.f32.mrb[52].mxu0  ;;  %v1359_v49 = vpop.f32.mrb[52].mxu1 }
 0x167   : > { %1702 = vst.msk [vmem:[%s2512_s9 + $0xc8] sm:$0xff] %vm1676_vm1, %v1573_v46  ;;  %1766 = vst.msk [vmem:[%s2512_s9 + $0x2c8] sm:$0xff] %vm1676_vm1, %v1637_v47  ;;  %v1040_v51 = vadd.f32 %v2498_v50, %v1039_v48  ;;  %v1360_v52 = vadd.f32 %v2498_v50, %v1359_v49  ;;  %v1041_v53 = vpop.f32.mrb[53].mxu0  ;;  %v1361_v54 = vpop.f32.mrb[53].mxu1 }
 0x169   : > { %v1574_v55 = vmax.f32 %v1040_v51, 0.0  ;;  %v1638_v56 = vmax.f32 %v1360_v52, 0.0 }
 0x16a   : > { %v1044_v57 = vpop.f32.mrb[54].mxu0  ;;  %v1364_v58 = vpop.f32.mrb[54].mxu1 }
 0x16b   : > { %1703 = vst.msk [vmem:[%s2512_s9 + $0xd0] sm:$0xff] %vm1676_vm1, %v1574_v55  ;;  %1767 = vst.msk [vmem:[%s2512_s9 + $0x2d0] sm:$0xff] %vm1676_vm1, %v1638_v56  ;;  %v1045_v59 = vadd.f32 %v2498_v50, %v1044_v57  ;;  %v1365_v60 = vadd.f32 %v2498_v50, %v1364_v58  ;;  %v1046_v61 = vpop.f32.mrb[55].mxu0  ;;  %v1366_v62 = vpop.f32.mrb[55].mxu1 }
 0x16d   : > { %v1575_v63 = vmax.f32 %v1045_v59, 0.0  ;;  %v1639_v0 = vmax.f32 %v1365_v60, 0.0 }
 0x16e   : > { %v1049_v1 = vpop.f32.mrb[56].mxu0  ;;  %v1369_v2 = vpop.f32.mrb[56].mxu1 }
 0x16f   : > { %1704 = vst.msk [vmem:[%s2512_s9 + $0xd8] sm:$0xff] %vm1676_vm1, %v1575_v63  ;;  %1768 = vst.msk [vmem:[%s2512_s9 + $0x2d8] sm:$0xff] %vm1676_vm1, %v1639_v0  ;;  %v1050_v3 = vadd.f32 %v2498_v50, %v1049_v1  ;;  %v1370_v4 = vadd.f32 %v2498_v50, %v1369_v2  ;;  %v1051_v5 = vpop.f32.mrb[57].mxu0  ;;  %v1371_v6 = vpop.f32.mrb[57].mxu1 }
 0x171   : > { %v1576_v7 = vmax.f32 %v1050_v3, 0.0  ;;  %v1640_v8 = vmax.f32 %v1370_v4, 0.0 }
 0x172   : > { %v1054_v9 = vpop.f32.mrb[58].mxu0  ;;  %v1374_v10 = vpop.f32.mrb[58].mxu1 }
 0x173   : > { %1705 = vst.msk [vmem:[%s2512_s9 + $0xe0] sm:$0xff] %vm1676_vm1, %v1576_v7  ;;  %1769 = vst.msk [vmem:[%s2512_s9 + $0x2e0] sm:$0xff] %vm1676_vm1, %v1640_v8  ;;  %v1055_v11 = vadd.f32 %v2498_v50, %v1054_v9  ;;  %v1375_v12 = vadd.f32 %v2498_v50, %v1374_v10  ;;  %v1056_v13 = vpop.f32.mrb[59].mxu0  ;;  %v1376_v14 = vpop.f32.mrb[59].mxu1 }
 0x175   : > { %v1577_v15 = vmax.f32 %v1055_v11, 0.0  ;;  %v1641_v16 = vmax.f32 %v1375_v12, 0.0 }
 0x176   : > { %v1059_v17 = vpop.f32.mrb[60].mxu0  ;;  %v1379_v18 = vpop.f32.mrb[60].mxu1 }
 0x177   : > { %1706 = vst.msk [vmem:[%s2512_s9 + $0xe8] sm:$0xff] %vm1676_vm1, %v1577_v15  ;;  %1770 = vst.msk [vmem:[%s2512_s9 + $0x2e8] sm:$0xff] %vm1676_vm1, %v1641_v16  ;;  %v1060_v19 = vadd.f32 %v2498_v50, %v1059_v17  ;;  %v1380_v20 = vadd.f32 %v2498_v50, %v1379_v18  ;;  %v1061_v21 = vpop.f32.mrb[61].mxu0  ;;  %v1381_v22 = vpop.f32.mrb[61].mxu1 }
 0x179   : > { %v1578_v23 = vmax.f32 %v1060_v19, 0.0  ;;  %v1642_v24 = vmax.f32 %v1380_v20, 0.0 }
 0x17a   : > { %v1064_v25 = vpop.f32.mrb[62].mxu0  ;;  %v1384_v26 = vpop.f32.mrb[62].mxu1 }
 0x17b   : > { %1707 = vst.msk [vmem:[%s2512_s9 + $0xf0] sm:$0xff] %vm1676_vm1, %v1578_v23  ;;  %1771 = vst.msk [vmem:[%s2512_s9 + $0x2f0] sm:$0xff] %vm1676_vm1, %v1642_v24  ;;  %v1065_v27 = vadd.f32 %v2498_v50, %v1064_v25  ;;  %v1385_v28 = vadd.f32 %v2498_v50, %v1384_v26  ;;  %v1066_v29 = vpop.f32.mrb[63].mxu0  ;;  %v1386_v30 = vpop.f32.mrb[63].mxu1 }
 0x17d   : > { %v1579_v31 = vmax.f32 %v1065_v27, 0.0  ;;  %v1643_v32 = vmax.f32 %v1385_v28, 0.0 }
 0x17e   : > { %v1069_v33 = vpop.f32.mrb[64].mxu0  ;;  %v1389_v34 = vpop.f32.mrb[64].mxu1 }
 0x17f   : > { %1708 = vst.msk [vmem:[%s2512_s9 + $0xf8] sm:$0xff] %vm1676_vm1, %v1579_v31  ;;  %1772 = vst.msk [vmem:[%s2512_s9 + $0x2f8] sm:$0xff] %vm1676_vm1, %v1643_v32  ;;  %v1070_v35 = vadd.f32 %v2498_v50, %v1069_v33  ;;  %v1390_v36 = vadd.f32 %v2498_v50, %v1389_v34  ;;  %v1071_v37 = vpop.f32.mrb[65].mxu0  ;;  %v1391_v38 = vpop.f32.mrb[65].mxu1 }
 0x181   : > { %v1580_v39 = vmax.f32 %v1070_v35, 0.0  ;;  %v1644_v40 = vmax.f32 %v1390_v36, 0.0 }
 0x182   : > { %v1074_v41 = vpop.f32.mrb[66].mxu0  ;;  %v1394_v42 = vpop.f32.mrb[66].mxu1 }
 0x183   : > { %1709 = vst.msk [vmem:[%s2512_s9 + $0x100] sm:$0xff] %vm1676_vm1, %v1580_v39  ;;  %1773 = vst.msk [vmem:[%s2512_s9 + $0x300] sm:$0xff] %vm1676_vm1, %v1644_v40  ;;  %v1075_v43 = vadd.f32 %v2498_v50, %v1074_v41  ;;  %v1395_v44 = vadd.f32 %v2498_v50, %v1394_v42  ;;  %v1076_v45 = vpop.f32.mrb[67].mxu0  ;;  %v1396_v46 = vpop.f32.mrb[67].mxu1 }
 0x185   : > { %v1581_v47 = vmax.f32 %v1075_v43, 0.0  ;;  %v1645_v48 = vmax.f32 %v1395_v44, 0.0 }
 0x186   : > { %v1079_v49 = vpop.f32.mrb[68].mxu0  ;;  %v1399_v51 = vpop.f32.mrb[68].mxu1 }
 0x187   : > { %1710 = vst.msk [vmem:[%s2512_s9 + $0x108] sm:$0xff] %vm1676_vm1, %v1581_v47  ;;  %1774 = vst.msk [vmem:[%s2512_s9 + $0x308] sm:$0xff] %vm1676_vm1, %v1645_v48  ;;  %v1080_v52 = vadd.f32 %v2498_v50, %v1079_v49  ;;  %v1400_v53 = vadd.f32 %v2498_v50, %v1399_v51  ;;  %v1081_v54 = vpop.f32.mrb[69].mxu0  ;;  %v1401_v55 = vpop.f32.mrb[69].mxu1 }
 0x189   : > { %v1582_v56 = vmax.f32 %v1080_v52, 0.0  ;;  %v1646_v57 = vmax.f32 %v1400_v53, 0.0  ;;  %v2825_v53 = vld [vmem:[%s2964_s2] ss:$0 sm:$0xff] }
 0x18a   : > { %v1084_v58 = vpop.f32.mrb[70].mxu0  ;;  %v1404_v59 = vpop.f32.mrb[70].mxu1 }
 0x18b   : > { %1711 = vst.msk [vmem:[%s2512_s9 + $0x110] sm:$0xff] %vm1676_vm1, %v1582_v56  ;;  %1775 = vst.msk [vmem:[%s2512_s9 + $0x310] sm:$0xff] %vm1676_vm1, %v1646_v57  ;;  %v1085_v60 = vadd.f32 %v2498_v50, %v1084_v58  ;;  %v1405_v61 = vadd.f32 %v2498_v50, %v1404_v59  ;;  %v1086_v62 = vpop.f32.mrb[71].mxu0  ;;  %v1406_v63 = vpop.f32.mrb[71].mxu1 }
 0x18d   : > { %v1583_v0 = vmax.f32 %v1085_v60, 0.0  ;;  %v1647_v1 = vmax.f32 %v1405_v61, 0.0 }
 0x18e   : > { %v1089_v2 = vpop.f32.mrb[72].mxu0  ;;  %v1409_v3 = vpop.f32.mrb[72].mxu1 }
 0x18f   : > { %1712 = vst.msk [vmem:[%s2512_s9 + $0x118] sm:$0xff] %vm1676_vm1, %v1583_v0  ;;  %1776 = vst.msk [vmem:[%s2512_s9 + $0x318] sm:$0xff] %vm1676_vm1, %v1647_v1  ;;  %v1090_v4 = vadd.f32 %v2498_v50, %v1089_v2  ;;  %v1410_v5 = vadd.f32 %v2498_v50, %v1409_v3  ;;  %v1091_v6 = vpop.f32.mrb[73].mxu0  ;;  %v1411_v7 = vpop.f32.mrb[73].mxu1 }
 0x191   : > { %v1584_v8 = vmax.f32 %v1090_v4, 0.0  ;;  %v1648_v9 = vmax.f32 %v1410_v5, 0.0 }
 0x192   : > { %v1094_v10 = vpop.f32.mrb[74].mxu0  ;;  %v1414_v11 = vpop.f32.mrb[74].mxu1 }
 0x193   : > { %1713 = vst.msk [vmem:[%s2512_s9 + $0x120] sm:$0xff] %vm1676_vm1, %v1584_v8  ;;  %1777 = vst.msk [vmem:[%s2512_s9 + $0x320] sm:$0xff] %vm1676_vm1, %v1648_v9  ;;  %v1095_v12 = vadd.f32 %v2498_v50, %v1094_v10  ;;  %v1415_v13 = vadd.f32 %v2498_v50, %v1414_v11  ;;  %v1096_v14 = vpop.f32.mrb[75].mxu0  ;;  %v1416_v15 = vpop.f32.mrb[75].mxu1 }
 0x195   : > { %v1585_v16 = vmax.f32 %v1095_v12, 0.0  ;;  %v1649_v17 = vmax.f32 %v1415_v13, 0.0 }
 0x196   : > { %v1099_v18 = vpop.f32.mrb[76].mxu0  ;;  %v1419_v19 = vpop.f32.mrb[76].mxu1 }
 0x197   : > { %1714 = vst.msk [vmem:[%s2512_s9 + $0x128] sm:$0xff] %vm1676_vm1, %v1585_v16  ;;  %1778 = vst.msk [vmem:[%s2512_s9 + $0x328] sm:$0xff] %vm1676_vm1, %v1649_v17  ;;  %v1100_v20 = vadd.f32 %v2498_v50, %v1099_v18  ;;  %v1420_v21 = vadd.f32 %v2498_v50, %v1419_v19  ;;  %v1101_v22 = vpop.f32.mrb[77].mxu0  ;;  %v1421_v23 = vpop.f32.mrb[77].mxu1 }
 0x199   : > { %v1586_v24 = vmax.f32 %v1100_v20, 0.0  ;;  %v1650_v25 = vmax.f32 %v1420_v21, 0.0 }
 0x19a   : > { %v1104_v26 = vpop.f32.mrb[78].mxu0  ;;  %v1424_v27 = vpop.f32.mrb[78].mxu1 }
 0x19b   : > { %1715 = vst.msk [vmem:[%s2512_s9 + $0x130] sm:$0xff] %vm1676_vm1, %v1586_v24  ;;  %1779 = vst.msk [vmem:[%s2512_s9 + $0x330] sm:$0xff] %vm1676_vm1, %v1650_v25  ;;  %v1105_v28 = vadd.f32 %v2498_v50, %v1104_v26  ;;  %v1425_v29 = vadd.f32 %v2498_v50, %v1424_v27  ;;  %v1106_v30 = vpop.f32.mrb[79].mxu0  ;;  %v1426_v31 = vpop.f32.mrb[79].mxu1 }
 0x19d   : > { %v1587_v32 = vmax.f32 %v1105_v28, 0.0  ;;  %v1651_v33 = vmax.f32 %v1425_v29, 0.0 }
 0x19e   : > { %v1109_v34 = vpop.f32.mrb[80].mxu0  ;;  %v1429_v35 = vpop.f32.mrb[80].mxu1 }
 0x19f   : > { %1716 = vst.msk [vmem:[%s2512_s9 + $0x138] sm:$0xff] %vm1676_vm1, %v1587_v32  ;;  %1780 = vst.msk [vmem:[%s2512_s9 + $0x338] sm:$0xff] %vm1676_vm1, %v1651_v33  ;;  %v1110_v36 = vadd.f32 %v2498_v50, %v1109_v34  ;;  %v1430_v37 = vadd.f32 %v2498_v50, %v1429_v35  ;;  %v1111_v38 = vpop.f32.mrb[81].mxu0  ;;  %v1431_v39 = vpop.f32.mrb[81].mxu1 }
 0x1a1   : > { %v1588_v40 = vmax.f32 %v1110_v36, 0.0  ;;  %v1652_v41 = vmax.f32 %v1430_v37, 0.0 }
 0x1a2   : > { %v1114_v42 = vpop.f32.mrb[82].mxu0  ;;  %v1434_v43 = vpop.f32.mrb[82].mxu1 }
 0x1a3   : > { %1717 = vst.msk [vmem:[%s2512_s9 + $0x140] sm:$0xff] %vm1676_vm1, %v1588_v40  ;;  %1781 = vst.msk [vmem:[%s2512_s9 + $0x340] sm:$0xff] %vm1676_vm1, %v1652_v41  ;;  %v1115_v44 = vadd.f32 %v2498_v50, %v1114_v42  ;;  %v1435_v45 = vadd.f32 %v2498_v50, %v1434_v43  ;;  %v1116_v46 = vpop.f32.mrb[83].mxu0  ;;  %v1436_v47 = vpop.f32.mrb[83].mxu1 }
 0x1a5   : > { %v1589_v48 = vmax.f32 %v1115_v44, 0.0  ;;  %v1653_v49 = vmax.f32 %v1435_v45, 0.0 }
 0x1a6   : > { %v1119_v51 = vpop.f32.mrb[84].mxu0  ;;  %v1439_v52 = vpop.f32.mrb[84].mxu1 }
 0x1a7   : > { %1718 = vst.msk [vmem:[%s2512_s9 + $0x148] sm:$0xff] %vm1676_vm1, %v1589_v48  ;;  %1782 = vst.msk [vmem:[%s2512_s9 + $0x348] sm:$0xff] %vm1676_vm1, %v1653_v49  ;;  %v1120_v54 = vadd.f32 %v2825_v53, %v1119_v51  ;;  %v1440_v50 = vadd.f32 %v2825_v53, %v1439_v52  ;;  %v1121_v55 = vpop.f32.mrb[85].mxu0  ;;  %v1441_v56 = vpop.f32.mrb[85].mxu1 }
 0x1a9   : > { %v1590_v57 = vmax.f32 %v1120_v54, 0.0  ;;  %v1654_v58 = vmax.f32 %v1440_v50, 0.0 }
 0x1aa   : > { %v1124_v59 = vpop.f32.mrb[86].mxu0  ;;  %v1444_v60 = vpop.f32.mrb[86].mxu1 }
 0x1ab   : > { %1719 = vst.msk [vmem:[%s2512_s9 + $0x150] sm:$0xff] %vm1676_vm1, %v1590_v57  ;;  %1783 = vst.msk [vmem:[%s2512_s9 + $0x350] sm:$0xff] %vm1676_vm1, %v1654_v58  ;;  %v1125_v61 = vadd.f32 %v2825_v53, %v1124_v59  ;;  %v1445_v62 = vadd.f32 %v2825_v53, %v1444_v60  ;;  %v1126_v63 = vpop.f32.mrb[87].mxu0  ;;  %v1446_v0 = vpop.f32.mrb[87].mxu1 }
 0x1ad   : > { %v1591_v1 = vmax.f32 %v1125_v61, 0.0  ;;  %v1655_v2 = vmax.f32 %v1445_v62, 0.0 }
 0x1ae   : > { %v1129_v3 = vpop.f32.mrb[88].mxu0  ;;  %v1449_v4 = vpop.f32.mrb[88].mxu1 }
 0x1af   : > { %1720 = vst.msk [vmem:[%s2512_s9 + $0x158] sm:$0xff] %vm1676_vm1, %v1591_v1  ;;  %1784 = vst.msk [vmem:[%s2512_s9 + $0x358] sm:$0xff] %vm1676_vm1, %v1655_v2  ;;  %v1130_v5 = vadd.f32 %v2825_v53, %v1129_v3  ;;  %v1450_v6 = vadd.f32 %v2825_v53, %v1449_v4  ;;  %v1131_v7 = vpop.f32.mrb[89].mxu0  ;;  %v1451_v8 = vpop.f32.mrb[89].mxu1 }
 0x1b1   : > { %v1592_v9 = vmax.f32 %v1130_v5, 0.0  ;;  %v1656_v10 = vmax.f32 %v1450_v6, 0.0 }
 0x1b2   : > { %v1134_v11 = vpop.f32.mrb[90].mxu0  ;;  %v1454_v12 = vpop.f32.mrb[90].mxu1 }
 0x1b3   : > { %1721 = vst.msk [vmem:[%s2512_s9 + $0x160] sm:$0xff] %vm1676_vm1, %v1592_v9  ;;  %1785 = vst.msk [vmem:[%s2512_s9 + $0x360] sm:$0xff] %vm1676_vm1, %v1656_v10  ;;  %v1135_v13 = vadd.f32 %v2825_v53, %v1134_v11  ;;  %v1455_v14 = vadd.f32 %v2825_v53, %v1454_v12  ;;  %v1136_v15 = vpop.f32.mrb[91].mxu0  ;;  %v1456_v16 = vpop.f32.mrb[91].mxu1 }
 0x1b5   : > { %v1593_v17 = vmax.f32 %v1135_v13, 0.0  ;;  %v1657_v18 = vmax.f32 %v1455_v14, 0.0 }
 0x1b6   : > { %v1139_v19 = vpop.f32.mrb[92].mxu0  ;;  %v1459_v20 = vpop.f32.mrb[92].mxu1 }
 0x1b7   : > { %1722 = vst.msk [vmem:[%s2512_s9 + $0x168] sm:$0xff] %vm1676_vm1, %v1593_v17  ;;  %1786 = vst.msk [vmem:[%s2512_s9 + $0x368] sm:$0xff] %vm1676_vm1, %v1657_v18  ;;  %v1140_v21 = vadd.f32 %v2825_v53, %v1139_v19  ;;  %v1460_v22 = vadd.f32 %v2825_v53, %v1459_v20  ;;  %v1141_v23 = vpop.f32.mrb[93].mxu0  ;;  %v1461_v24 = vpop.f32.mrb[93].mxu1 }
 0x1b9   : > { %v1594_v25 = vmax.f32 %v1140_v21, 0.0  ;;  %v1658_v26 = vmax.f32 %v1460_v22, 0.0 }
 0x1ba   : > { %v1144_v27 = vpop.f32.mrb[94].mxu0  ;;  %v1464_v28 = vpop.f32.mrb[94].mxu1 }
 0x1bb   : > { %1723 = vst.msk [vmem:[%s2512_s9 + $0x170] sm:$0xff] %vm1676_vm1, %v1594_v25  ;;  %1787 = vst.msk [vmem:[%s2512_s9 + $0x370] sm:$0xff] %vm1676_vm1, %v1658_v26  ;;  %v1145_v29 = vadd.f32 %v2825_v53, %v1144_v27  ;;  %v1465_v30 = vadd.f32 %v2825_v53, %v1464_v28  ;;  %v1146_v31 = vpop.f32.mrb[95].mxu0  ;;  %v1466_v32 = vpop.f32.mrb[95].mxu1 }
 0x1bd   : > { %v1595_v33 = vmax.f32 %v1145_v29, 0.0  ;;  %v1659_v34 = vmax.f32 %v1465_v30, 0.0 }
 0x1be   : > { %v1149_v35 = vpop.f32.mrb[96].mxu0  ;;  %v1469_v36 = vpop.f32.mrb[96].mxu1 }
 0x1bf   : > { %1724 = vst.msk [vmem:[%s2512_s9 + $0x178] sm:$0xff] %vm1676_vm1, %v1595_v33  ;;  %1788 = vst.msk [vmem:[%s2512_s9 + $0x378] sm:$0xff] %vm1676_vm1, %v1659_v34  ;;  %v1150_v37 = vadd.f32 %v2825_v53, %v1149_v35  ;;  %v1470_v38 = vadd.f32 %v2825_v53, %v1469_v36  ;;  %v1151_v39 = vpop.f32.mrb[97].mxu0  ;;  %v1471_v40 = vpop.f32.mrb[97].mxu1 }
 0x1c1   : > { %v1596_v41 = vmax.f32 %v1150_v37, 0.0  ;;  %v1660_v42 = vmax.f32 %v1470_v38, 0.0 }
 0x1c2   : > { %v1154_v43 = vpop.f32.mrb[98].mxu0  ;;  %v1474_v44 = vpop.f32.mrb[98].mxu1 }
 0x1c3   : > { %1725 = vst.msk [vmem:[%s2512_s9 + $0x180] sm:$0xff] %vm1676_vm1, %v1596_v41  ;;  %1789 = vst.msk [vmem:[%s2512_s9 + $0x380] sm:$0xff] %vm1676_vm1, %v1660_v42  ;;  %v1155_v45 = vadd.f32 %v2825_v53, %v1154_v43  ;;  %v1475_v46 = vadd.f32 %v2825_v53, %v1474_v44  ;;  %v1156_v47 = vpop.f32.mrb[99].mxu0  ;;  %v1476_v48 = vpop.f32.mrb[99].mxu1 }
 0x1c5   : > { %v1597_v49 = vmax.f32 %v1155_v45, 0.0  ;;  %v1661_v51 = vmax.f32 %v1475_v46, 0.0 }
 0x1c6   : > { %v1159_v52 = vpop.f32.mrb[100].mxu0  ;;  %v1479_v54 = vpop.f32.mrb[100].mxu1 }
 0x1c7   : > { %1726 = vst.msk [vmem:[%s2512_s9 + $0x188] sm:$0xff] %vm1676_vm1, %v1597_v49  ;;  %1790 = vst.msk [vmem:[%s2512_s9 + $0x388] sm:$0xff] %vm1676_vm1, %v1661_v51  ;;  %v1160_v50 = vadd.f32 %v2825_v53, %v1159_v52  ;;  %v1480_v55 = vadd.f32 %v2825_v53, %v1479_v54  ;;  %v1161_v56 = vpop.f32.mrb[101].mxu0  ;;  %v1481_v57 = vpop.f32.mrb[101].mxu1 }
 0x1c9   : > { %v1598_v58 = vmax.f32 %v1160_v50, 0.0  ;;  %v1662_v59 = vmax.f32 %v1480_v55, 0.0 }
 0x1ca   : > { %v1164_v60 = vpop.f32.mrb[102].mxu0  ;;  %v1484_v61 = vpop.f32.mrb[102].mxu1 }
 0x1cb   : > { %1727 = vst.msk [vmem:[%s2512_s9 + $0x190] sm:$0xff] %vm1676_vm1, %v1598_v58  ;;  %1791 = vst.msk [vmem:[%s2512_s9 + $0x390] sm:$0xff] %vm1676_vm1, %v1662_v59  ;;  %v1165_v62 = vadd.f32 %v2825_v53, %v1164_v60  ;;  %v1485_v63 = vadd.f32 %v2825_v53, %v1484_v61  ;;  %v1166_v0 = vpop.f32.mrb[103].mxu0  ;;  %v1486_v1 = vpop.f32.mrb[103].mxu1 }
 0x1cd   : > { %v1599_v2 = vmax.f32 %v1165_v62, 0.0  ;;  %v1663_v3 = vmax.f32 %v1485_v63, 0.0 }
 0x1ce   : > { %v1169_v4 = vpop.f32.mrb[104].mxu0  ;;  %v1489_v5 = vpop.f32.mrb[104].mxu1 }
 0x1cf   : > { %1728 = vst.msk [vmem:[%s2512_s9 + $0x198] sm:$0xff] %vm1676_vm1, %v1599_v2  ;;  %1792 = vst.msk [vmem:[%s2512_s9 + $0x398] sm:$0xff] %vm1676_vm1, %v1663_v3  ;;  %v1170_v6 = vadd.f32 %v2825_v53, %v1169_v4  ;;  %v1490_v7 = vadd.f32 %v2825_v53, %v1489_v5  ;;  %v1171_v8 = vpop.f32.mrb[105].mxu0  ;;  %v1491_v9 = vpop.f32.mrb[105].mxu1 }
 0x1d1   : > { %v1600_v10 = vmax.f32 %v1170_v6, 0.0  ;;  %v1664_v11 = vmax.f32 %v1490_v7, 0.0 }
 0x1d2   : > { %v1174_v12 = vpop.f32.mrb[106].mxu0  ;;  %v1494_v13 = vpop.f32.mrb[106].mxu1 }
 0x1d3   : > { %1729 = vst.msk [vmem:[%s2512_s9 + $0x1a0] sm:$0xff] %vm1676_vm1, %v1600_v10  ;;  %1793 = vst.msk [vmem:[%s2512_s9 + $0x3a0] sm:$0xff] %vm1676_vm1, %v1664_v11  ;;  %v1175_v14 = vadd.f32 %v2825_v53, %v1174_v12  ;;  %v1495_v15 = vadd.f32 %v2825_v53, %v1494_v13  ;;  %v1176_v16 = vpop.f32.mrb[107].mxu0  ;;  %v1496_v17 = vpop.f32.mrb[107].mxu1 }
 0x1d5   : > { %v1601_v18 = vmax.f32 %v1175_v14, 0.0  ;;  %v1665_v19 = vmax.f32 %v1495_v15, 0.0 }
 0x1d6   : > { %v1179_v20 = vpop.f32.mrb[108].mxu0  ;;  %v1499_v21 = vpop.f32.mrb[108].mxu1 }
 0x1d7   : > { %1730 = vst.msk [vmem:[%s2512_s9 + $0x1a8] sm:$0xff] %vm1676_vm1, %v1601_v18  ;;  %1794 = vst.msk [vmem:[%s2512_s9 + $0x3a8] sm:$0xff] %vm1676_vm1, %v1665_v19  ;;  %v1180_v22 = vadd.f32 %v2825_v53, %v1179_v20  ;;  %v1500_v23 = vadd.f32 %v2825_v53, %v1499_v21  ;;  %v1181_v24 = vpop.f32.mrb[109].mxu0  ;;  %v1501_v25 = vpop.f32.mrb[109].mxu1 }
 0x1d9   : > { %v1602_v26 = vmax.f32 %v1180_v22, 0.0  ;;  %v1666_v27 = vmax.f32 %v1500_v23, 0.0 }
 0x1da   : > { %v1184_v28 = vpop.f32.mrb[110].mxu0  ;;  %v1504_v29 = vpop.f32.mrb[110].mxu1 }
 0x1db   : > { %1731 = vst.msk [vmem:[%s2512_s9 + $0x1b0] sm:$0xff] %vm1676_vm1, %v1602_v26  ;;  %1795 = vst.msk [vmem:[%s2512_s9 + $0x3b0] sm:$0xff] %vm1676_vm1, %v1666_v27  ;;  %v1185_v30 = vadd.f32 %v2825_v53, %v1184_v28  ;;  %v1505_v31 = vadd.f32 %v2825_v53, %v1504_v29  ;;  %v1186_v32 = vpop.f32.mrb[111].mxu0  ;;  %v1506_v33 = vpop.f32.mrb[111].mxu1 }
 0x1dd   : > { %v1603_v34 = vmax.f32 %v1185_v30, 0.0  ;;  %v1667_v35 = vmax.f32 %v1505_v31, 0.0 }
 0x1de   : > { %v1189_v36 = vpop.f32.mrb[112].mxu0  ;;  %v1509_v37 = vpop.f32.mrb[112].mxu1 }
 0x1df   : > { %1732 = vst.msk [vmem:[%s2512_s9 + $0x1b8] sm:$0xff] %vm1676_vm1, %v1603_v34  ;;  %1796 = vst.msk [vmem:[%s2512_s9 + $0x3b8] sm:$0xff] %vm1676_vm1, %v1667_v35  ;;  %v1190_v38 = vadd.f32 %v2825_v53, %v1189_v36  ;;  %v1510_v39 = vadd.f32 %v2825_v53, %v1509_v37  ;;  %v1191_v40 = vpop.f32.mrb[113].mxu0  ;;  %v1511_v41 = vpop.f32.mrb[113].mxu1 }
 0x1e1   : > { %v1604_v42 = vmax.f32 %v1190_v38, 0.0  ;;  %v1668_v43 = vmax.f32 %v1510_v39, 0.0 }
 0x1e2   : > { %v1194_v44 = vpop.f32.mrb[114].mxu0  ;;  %v1514_v45 = vpop.f32.mrb[114].mxu1 }
 0x1e3   : > { %1733 = vst.msk [vmem:[%s2512_s9 + $0x1c0] sm:$0xff] %vm1676_vm1, %v1604_v42  ;;  %1797 = vst.msk [vmem:[%s2512_s9 + $0x3c0] sm:$0xff] %vm1676_vm1, %v1668_v43  ;;  %v1195_v46 = vadd.f32 %v2825_v53, %v1194_v44  ;;  %v1515_v47 = vadd.f32 %v2825_v53, %v1514_v45  ;;  %v1196_v48 = vpop.f32.mrb[115].mxu0  ;;  %v1516_v49 = vpop.f32.mrb[115].mxu1 }
 0x1e5   : > { %v1605_v51 = vmax.f32 %v1195_v46, 0.0  ;;  %v1669_v52 = vmax.f32 %v1515_v47, 0.0 }
 0x1e6   : > { %v1199_v54 = vpop.f32.mrb[116].mxu0  ;;  %v1519_v50 = vpop.f32.mrb[116].mxu1 }
 0x1e7   : > { %1734 = vst.msk [vmem:[%s2512_s9 + $0x1c8] sm:$0xff] %vm1676_vm1, %v1605_v51  ;;  %1798 = vst.msk [vmem:[%s2512_s9 + $0x3c8] sm:$0xff] %vm1676_vm1, %v1669_v52  ;;  %v1200_v55 = vadd.f32 %v2825_v53, %v1199_v54  ;;  %v1520_v56 = vadd.f32 %v2825_v53, %v1519_v50  ;;  %v1201_v57 = vpop.f32.mrb[117].mxu0  ;;  %v1521_v58 = vpop.f32.mrb[117].mxu1 }
 0x1e9   : > { %v1606_v59 = vmax.f32 %v1200_v55, 0.0  ;;  %v1670_v60 = vmax.f32 %v1520_v56, 0.0 }
 0x1ea   : > { %v1204_v61 = vpop.f32.mrb[118].mxu0  ;;  %v1524_v62 = vpop.f32.mrb[118].mxu1 }
 0x1eb   : > { %1735 = vst.msk [vmem:[%s2512_s9 + $0x1d0] sm:$0xff] %vm1676_vm1, %v1606_v59  ;;  %1799 = vst.msk [vmem:[%s2512_s9 + $0x3d0] sm:$0xff] %vm1676_vm1, %v1670_v60  ;;  %v1205_v63 = vadd.f32 %v2825_v53, %v1204_v61  ;;  %v1525_v0 = vadd.f32 %v2825_v53, %v1524_v62  ;;  %v1206_v1 = vpop.f32.mrb[119].mxu0  ;;  %v1526_v2 = vpop.f32.mrb[119].mxu1 }
 0x1ed   : > { %v1607_v3 = vmax.f32 %v1205_v63, 0.0  ;;  %v1671_v4 = vmax.f32 %v1525_v0, 0.0 }
 0x1ee   : > { %v1209_v5 = vpop.f32.mrb[120].mxu0  ;;  %v1529_v6 = vpop.f32.mrb[120].mxu1 }
 0x1ef   : > { %1736 = vst.msk [vmem:[%s2512_s9 + $0x1d8] sm:$0xff] %vm1676_vm1, %v1607_v3  ;;  %1800 = vst.msk [vmem:[%s2512_s9 + $0x3d8] sm:$0xff] %vm1676_vm1, %v1671_v4  ;;  %v1210_v7 = vadd.f32 %v2825_v53, %v1209_v5  ;;  %v1530_v8 = vadd.f32 %v2825_v53, %v1529_v6  ;;  %v1211_v9 = vpop.f32.mrb[121].mxu0  ;;  %v1531_v10 = vpop.f32.mrb[121].mxu1 }
 0x1f1   : > { %v1608_v11 = vmax.f32 %v1210_v7, 0.0  ;;  %v1672_v12 = vmax.f32 %v1530_v8, 0.0 }
 0x1f2   : > { %v1214_v13 = vpop.f32.mrb[122].mxu0  ;;  %v1534_v14 = vpop.f32.mrb[122].mxu1 }
 0x1f3   : > { %1737 = vst.msk [vmem:[%s2512_s9 + $0x1e0] sm:$0xff] %vm1676_vm1, %v1608_v11  ;;  %1801 = vst.msk [vmem:[%s2512_s9 + $0x3e0] sm:$0xff] %vm1676_vm1, %v1672_v12  ;;  %v1215_v15 = vadd.f32 %v2825_v53, %v1214_v13  ;;  %v1535_v16 = vadd.f32 %v2825_v53, %v1534_v14  ;;  %v1216_v17 = vpop.f32.mrb[123].mxu0  ;;  %v1536_v18 = vpop.f32.mrb[123].mxu1 }
 0x1f5   : > { %v1609_v19 = vmax.f32 %v1215_v15, 0.0  ;;  %v1673_v20 = vmax.f32 %v1535_v16, 0.0 }
 0x1f6   : > { %v1219_v21 = vpop.f32.mrb[124].mxu0  ;;  %v1539_v22 = vpop.f32.mrb[124].mxu1 }
 0x1f7   : > { %1738 = vst.msk [vmem:[%s2512_s9 + $0x1e8] sm:$0xff] %vm1676_vm1, %v1609_v19  ;;  %1802 = vst.msk [vmem:[%s2512_s9 + $0x3e8] sm:$0xff] %vm1676_vm1, %v1673_v20  ;;  %v1220_v23 = vadd.f32 %v2825_v53, %v1219_v21  ;;  %v1540_v24 = vadd.f32 %v2825_v53, %v1539_v22  ;;  %v1221_v25 = vpop.f32.mrb[125].mxu0  ;;  %v1541_v26 = vpop.f32.mrb[125].mxu1 }
 0x1f9   : > { %v1610_v27 = vmax.f32 %v1220_v23, 0.0  ;;  %v1674_v28 = vmax.f32 %v1540_v24, 0.0 }
 0x1fa   : > { %v1224_v29 = vpop.f32.mrb[126].mxu0  ;;  %v1544_v30 = vpop.f32.mrb[126].mxu1 }
 0x1fb   : > { %1739 = vst.msk [vmem:[%s2512_s9 + $0x1f0] sm:$0xff] %vm1676_vm1, %v1610_v27  ;;  %1803 = vst.msk [vmem:[%s2512_s9 + $0x3f0] sm:$0xff] %vm1676_vm1, %v1674_v28  ;;  %v1225_v31 = vadd.f32 %v2825_v53, %v1224_v29  ;;  %v1545_v32 = vadd.f32 %v2825_v53, %v1544_v30  ;;  %v1226_v33 = vpop.f32.mrb[127].mxu0  ;;  %v1546_v34 = vpop.f32.mrb[127].mxu1 }
 0x1fd   : > { %v1611_v35 = vmax.f32 %v1225_v31, 0.0  ;;  %v1675_v36 = vmax.f32 %v1545_v32, 0.0 }
 0x1ff   : > { %1740 = vst.msk [vmem:[%s2512_s9 + $0x1f8] sm:$0xff] %vm1676_vm1, %v1611_v35  ;;  %1804 = vst.msk [vmem:[%s2512_s9 + $0x3f8] sm:$0xff] %vm1676_vm1, %v1675_v36 }
 0x200 PF: > { %s13_s12 = sadd.s32 1, %s2064_s12  }
 0x201   : > { %p10_p4 = scmp.ge.s32.totalorder %s13_s12, 4  }
 0x203   :  { %12 = sbr.rel (!%p10_p4) target bundleno = 1 (0x1), region = 62 }

// kernel: forward.6
= control target key start
LH: loop header
LB: loop body
LE: loop exit
PB: predicated region body
PF: predicated region fallthrough
CT: control target
= control target key end

     0   :  { %s789_s12 = smov 0   ;;  %s1073_s0 = inlined_call_operand.vmem [shape: f32[128,512], index: 0, kind: input, shape index: {}]   ;;  %s1074_s1 = inlined_call_operand.vmem [shape: f32[512,64], index: 1, kind: input, shape index: {}]   ;;  %s1075_s2 = inlined_call_operand.vmem [shape: f32[1,64], index: 2, kind: input, shape index: {}]   ;;  %s1076_s3 = inlined_call_operand.vmem [shape: f32[128,64], index: 3, kind: output, shape index: {}]  }
   0x1 LB: > { %s563_s13 = sadd.s32 4294967295, %s767_s12   ;;  %p567_p0 = scmp.ge.s32.totalorder %s767_s12, 1  ;;  %s767_s12 = sphi %s789_s12, %s13_s12  }
   0x2   : > { %p139_p1 = scmp.lt.s32.totalorder %s767_s12, 3 }
   0x4   : > { %p140_p2 = pnand %p567_p0, %p139_p1 }
   0x5   : > { %v225_v0 = vld [vmem:[%s1074_s1 + $0x80] sm:$0xff] (!%p140_p2)  ;;  %v226_v1 = vld [vmem:[%s1074_s1 + $0x88] sm:$0xff] (!%p140_p2)  ;;  %v227_v11 = vld [vmem:[%s1074_s1 + $0x90] sm:$0xff] (!%p140_p2)  ;;  %s842_s19 = sshll.u32 (!%p140_p2), %s563_s13, 3  ;;  %vm498_vm0 = vcmask (!%p140_p2), 523264  }
   0x6   : > { %143 = sbr.rel (%p140_p2) target bundleno = 290 (0x122), region = 32  ;;  %v209_v2 = vld [vmem:[%s1074_s1] sm:$0xff] (!%p140_p2)  ;;  %v689_v3 = vpack.c.bf16 (!%p140_p2), %v226_v1, %v225_v0  ;;  %v210_v4 = vld [vmem:[%s1074_s1 + $0x8] sm:$0xff] (!%p140_p2)  ;;  %v228_v13 = vld [vmem:[%s1074_s1 + $0x98] sm:$0xff] (!%p140_p2)  ;;  %p165_p3 = scmp.lt.s32.totalorder (!%p140_p2), %s842_s19, 15 }
   0x7   : > { %v257_v5 = vld [vmem:[%s1074_s1 + $0x180] sm:$0xff] (!%p140_p2)  ;;  %v258_v6 = vld [vmem:[%s1074_s1 + $0x188] sm:$0xff] (!%p140_p2)  ;;  %v691_v7 = vpack.c.bf16 (!%p140_p2), %v210_v4, %v209_v2  ;;  %v211_v14 = vld [vmem:[%s1074_s1 + $0x10] sm:$0xff] (!%p140_p2)  ;;  %v693_v16 = vpack.c.bf16 (!%p140_p2), %v228_v13, %v227_v11 }
   0x8   : > { %v721_v8 = vpack.c.bf16 (!%p140_p2), %v258_v6, %v257_v5  ;;  %v241_v9 = vld [vmem:[%s1074_s1 + $0x100] sm:$0xff] (!%p140_p2)  ;;  %v242_v10 = vld [vmem:[%s1074_s1 + $0x108] sm:$0xff] (!%p140_p2)  ;;  %690 = vmatprep.subr.bf16.mxu0 (!%p140_p2), %v689_v3  ;;  %v212_v15 = vld [vmem:[%s1074_s1 + $0x18] sm:$0xff] (!%p140_p2) }
   0x9   : > { %v723_v12 = vpack.c.bf16 (!%p140_p2), %v242_v10, %v241_v9  ;;  %692 = vmatpush3.bf16.msra.mxu0 (!%p140_p2), %v691_v7  ;;  %v695_v17 = vpack.c.bf16 (!%p140_p2), %v212_v15, %v211_v14  ;;  %v259_v18 = vld [vmem:[%s1074_s1 + $0x190] sm:$0xff] (!%p140_p2)  ;;  %v260_v19 = vld [vmem:[%s1074_s1 + $0x198] sm:$0xff] (!%p140_p2)  ;;  %v229_v23 = vld [vmem:[%s1074_s1 + $0xa0] sm:$0xff] (!%p140_p2) }
   0xa   : > { %722 = vmatprep.subr.bf16.mxu1 (!%p140_p2), %v721_v8  ;;  %v243_v20 = vld [vmem:[%s1074_s1 + $0x110] sm:$0xff] (!%p140_p2)  ;;  %v725_v21 = vpack.c.bf16 (!%p140_p2), %v260_v19, %v259_v18  ;;  %v244_v22 = vld [vmem:[%s1074_s1 + $0x118] sm:$0xff] (!%p140_p2)  ;;  %v230_v24 = vld [vmem:[%s1074_s1 + $0xa8] sm:$0xff] (!%p140_p2)  ;;  %694 = vmatprep.subr.bf16.mxu0 (!%p140_p2), %v693_v16 }
   0xb   : > { %724 = vmatpush3.bf16.msra.mxu1 (!%p140_p2), %v723_v12  ;;  %v727_v25 = vpack.c.bf16 (!%p140_p2), %v244_v22, %v243_v20  ;;  %v697_v26 = vpack.c.bf16 (!%p140_p2), %v230_v24, %v229_v23  ;;  %v213_v27 = vld [vmem:[%s1074_s1 + $0x20] sm:$0xff] (!%p140_p2)  ;;  %v214_v28 = vld [vmem:[%s1074_s1 + $0x28] sm:$0xff] (!%p140_p2)  ;;  %v231_v35 = vld [vmem:[%s1074_s1 + $0xb0] sm:$0xff] (!%p140_p2) }
   0xc   : > { %v261_v29 = vld [vmem:[%s1074_s1 + $0x1a0] sm:$0xff] (!%p140_p2)  ;;  %726 = vmatprep.subr.bf16.mxu1 (!%p140_p2), %v725_v21  ;;  %v262_v30 = vld [vmem:[%s1074_s1 + $0x1a8] sm:$0xff] (!%p140_p2)  ;;  %v699_v33 = vpack.c.bf16 (!%p140_p2), %v214_v28, %v213_v27  ;;  %v232_v36 = vld [vmem:[%s1074_s1 + $0xb8] sm:$0xff] (!%p140_p2) }
   0xd   : > { %v245_v31 = vld [vmem:[%s1074_s1 + $0x120] sm:$0xff]  ;;  %v246_v32 = vld [vmem:[%s1074_s1 + $0x128] sm:$0xff]  ;;  %696 = vmatpush3.bf16.msra.mxu0 %v695_v17  ;;  %v729_v34 = vpack.c.bf16 %v262_v30, %v261_v29  ;;  %v215_v37 = vld [vmem:[%s1074_s1 + $0x30] sm:$0xff]  ;;  %v701_v39 = vpack.c.bf16 %v232_v36, %v231_v35  ;;  %s1078_s19 = smov (!%p165_p3, %s842_s19), 15 }
   0xe   : > { %698 = vmatprep.subr.bf16.mxu0 %v697_v26  ;;  %v731_v38 = vpack.c.bf16 %v246_v32, %v245_v31  ;;  %v216_v40 = vld [vmem:[%s1074_s1 + $0x38] sm:$0xff]  ;;  %v263_v41 = vld [vmem:[%s1074_s1 + $0x1b0] sm:$0xff]  ;;  %v233_v46 = vld [vmem:[%s1074_s1 + $0xc0] sm:$0xff]  ;;  %s576_s27 = sshll.u32 %s1078_s19, 5  ;;  %s572_s25 = sshll.u32 %s1078_s19, 3 }
   0xf   : > { %728 = vmatpush3.bf16.msra.mxu1 %v727_v25  ;;  %v264_v42 = vld [vmem:[%s1074_s1 + $0x1b8] sm:$0xff]  ;;  %v247_v44 = vld [vmem:[%s1074_s1 + $0x130] sm:$0xff]  ;;  %v234_v47 = vld [vmem:[%s1074_s1 + $0xc8] sm:$0xff]  ;;  %v703_v48 = vpack.c.bf16 %v216_v40, %v215_v37  ;;  %s959_s17 = scalar_lea.vmem %s1073_s0, %s576_s27  ;;  %s1045_s26 = scalar_lea.vmem %s1076_s3, %s572_s25 }
  0x10   : > { %730 = vmatprep.subr.bf16.mxu1 %v729_v34  ;;  %v733_v43 = vpack.c.bf16 %v264_v42, %v263_v41  ;;  %v248_v45 = vld [vmem:[%s1074_s1 + $0x138] sm:$0xff]  ;;  %v265_v49 = vld [vmem:[%s1074_s1 + $0x1c0] sm:$0xff]  ;;  %v266_v50 = vld [vmem:[%s1074_s1 + $0x1c8] sm:$0xff]  ;;  %v705_v52 = vpack.c.bf16 %v234_v47, %v233_v46 }
  0x11   : > { %700 = vmatpush3.bf16.msra.mxu0 %v699_v33  ;;  %v735_v51 = vpack.c.bf16 %v248_v45, %v247_v44  ;;  %v217_v53 = vld [vmem:[%s1074_s1 + $0x40] sm:$0xff]  ;;  %v218_v54 = vld [vmem:[%s1074_s1 + $0x48] sm:$0xff]  ;;  %v737_v56 = vpack.c.bf16 %v266_v50, %v265_v49  ;;  %v235_v58 = vld [vmem:[%s1074_s1 + $0xd0] sm:$0xff] }
  0x12   : > { %702 = vmatprep.subr.bf16.mxu0 %v701_v39  ;;  %v249_v55 = vld [vmem:[%s1074_s1 + $0x140] sm:$0xff]  ;;  %v250_v57 = vld [vmem:[%s1074_s1 + $0x148] sm:$0xff]  ;;  %v236_v59 = vld [vmem:[%s1074_s1 + $0xd8] sm:$0xff]  ;;  %v707_v62 = vpack.c.bf16 %v218_v54, %v217_v53 }
  0x13   : > { %732 = vmatpush3.bf16.msra.mxu1 %v731_v38  ;;  %v267_v60 = vld [vmem:[%s1074_s1 + $0x1d0] sm:$0xff]  ;;  %v268_v61 = vld [vmem:[%s1074_s1 + $0x1d8] sm:$0xff]  ;;  %v739_v63 = vpack.c.bf16 %v250_v57, %v249_v55  ;;  %v709_v0 = vpack.c.bf16 %v236_v59, %v235_v58  ;;  %v237_v6 = vld [vmem:[%s1074_s1 + $0xe0] sm:$0xff] }
  0x14   : > { %734 = vmatprep.subr.bf16.mxu1 %v733_v43  ;;  %v219_v1 = vld [vmem:[%s1074_s1 + $0x50] sm:$0xff]  ;;  %v220_v2 = vld [vmem:[%s1074_s1 + $0x58] sm:$0xff]  ;;  %v741_v4 = vpack.c.bf16 %v268_v61, %v267_v60  ;;  %v238_v7 = vld [vmem:[%s1074_s1 + $0xe8] sm:$0xff] }
  0x15   : > { %704 = vmatpush3.bf16.msra.mxu0 %v703_v48  ;;  %v251_v3 = vld [vmem:[%s1074_s1 + $0x150] sm:$0xff]  ;;  %v252_v5 = vld [vmem:[%s1074_s1 + $0x158] sm:$0xff]  ;;  %v269_v8 = vld [vmem:[%s1074_s1 + $0x1e0] sm:$0xff]  ;;  %v711_v10 = vpack.c.bf16 %v220_v2, %v219_v1  ;;  %v713_v14 = vpack.c.bf16 %v238_v7, %v237_v6 }
  0x16   : > { %706 = vmatprep.subr.bf16.mxu0 %v705_v52  ;;  %v270_v9 = vld [vmem:[%s1074_s1 + $0x1e8] sm:$0xff]  ;;  %v221_v11 = vld [vmem:[%s1074_s1 + $0x60] sm:$0xff]  ;;  %v743_v13 = vpack.c.bf16 %v252_v5, %v251_v3  ;;  %v239_v19 = vld [vmem:[%s1074_s1 + $0xf0] sm:$0xff] }
  0x17   : > { %736 = vmatpush3.bf16.msra.mxu1 %v735_v51  ;;  %v222_v12 = vld [vmem:[%s1074_s1 + $0x68] sm:$0xff]  ;;  %v253_v15 = vld [vmem:[%s1074_s1 + $0x160] sm:$0xff]  ;;  %v745_v18 = vpack.c.bf16 %v270_v9, %v269_v8  ;;  %v240_v20 = vld [vmem:[%s1074_s1 + $0xf8] sm:$0xff] }
  0x18   : > { %738 = vmatprep.subr.bf16.mxu1 %v737_v56  ;;  %v254_v16 = vld [vmem:[%s1074_s1 + $0x168] sm:$0xff]  ;;  %v180_v21 = vld [vmem:[%s959_s17 + $0x18] sm:$0xff]  ;;  %v271_v22 = vld [vmem:[%s1074_s1 + $0x1f0] sm:$0xff]  ;;  %v715_v24 = vpack.c.bf16 %v222_v12, %v221_v11  ;;  %v717_v26 = vpack.c.bf16 %v240_v20, %v239_v19 }
  0x19   : > { %708 = vmatpush3.bf16.msra.mxu0 %v707_v62  ;;  %v178_v17 = vld [vmem:[%s959_s17 + $0x8] sm:$0xff]  ;;  %v272_v23 = vld [vmem:[%s1074_s1 + $0x1f8] sm:$0xff]  ;;  %449 = vmatprep.mubr.f32.mxu1 %v180_v21  ;;  %v747_v25 = vpack.c.bf16 %v254_v16, %v253_v15  ;;  %v223_v27 = vld [vmem:[%s1074_s1 + $0x70] sm:$0xff] }
  0x1a   : > { %710 = vmatprep.subr.bf16.mxu0 %v709_v0  ;;  %344 = vmatprep.mubr.f32.mxu0 %v178_v17  ;;  %v224_v28 = vld [vmem:[%s1074_s1 + $0x78] sm:$0xff]  ;;  %v749_v29 = vpack.c.bf16 %v272_v23, %v271_v22  ;;  %v255_v30 = vld [vmem:[%s1074_s1 + $0x170] sm:$0xff]  ;;  %v177_v34 = vld [vmem:[%s959_s17] sm:$0xff] }
  0x1b   : > { %740 = vmatpush3.bf16.msra.mxu1 %v739_v63  ;;  %v256_v31 = vld [vmem:[%s1074_s1 + $0x178] sm:$0xff]  ;;  %v719_v32 = vpack.c.bf16 %v224_v28, %v223_v27  ;;  %v179_v35 = vld [vmem:[%s959_s17 + $0x10] sm:$0xff]  ;;  %v182_v36 = vld [vmem:[%s959_s17 + $0x28] sm:$0xff] }
  0x1c   : > { %742 = vmatprep.subr.bf16.mxu1 %v741_v4  ;;  %v751_v33 = vpack.c.bf16 %v256_v31, %v255_v30  ;;  %v184_v37 = vld [vmem:[%s959_s17 + $0x38] sm:$0xff]  ;;  %v181_v38 = vld [vmem:[%s959_s17 + $0x20] sm:$0xff]  ;;  %v183_v39 = vld [vmem:[%s959_s17 + $0x30] sm:$0xff] }
  0x1d   : > { %712 = vmatpush3.bf16.msra.mxu0 %v711_v10  ;;  %v186_v40 = vld [vmem:[%s959_s17 + $0x48] sm:$0xff]  ;;  %v188_v41 = vld [vmem:[%s959_s17 + $0x58] sm:$0xff]  ;;  %v185_v42 = vld [vmem:[%s959_s17 + $0x40] sm:$0xff] }
  0x1e   : > { %714 = vmatprep.subr.bf16.mxu0 %v713_v14  ;;  %v187_v43 = vld [vmem:[%s959_s17 + $0x50] sm:$0xff]  ;;  %v190_v44 = vld [vmem:[%s959_s17 + $0x68] sm:$0xff]  ;;  %v192_v45 = vld [vmem:[%s959_s17 + $0x78] sm:$0xff] }
  0x1f   : > { %744 = vmatpush3.bf16.msra.mxu1 %v743_v13  ;;  %v189_v46 = vld [vmem:[%s959_s17 + $0x60] sm:$0xff]  ;;  %v191_v47 = vld [vmem:[%s959_s17 + $0x70] sm:$0xff]  ;;  %v194_v48 = vld [vmem:[%s959_s17 + $0x88] sm:$0xff] }
  0x20   : > { %746 = vmatprep.subr.bf16.mxu1 %v745_v18  ;;  %v196_v49 = vld [vmem:[%s959_s17 + $0x98] sm:$0xff]  ;;  %v193_v50 = vld [vmem:[%s959_s17 + $0x80] sm:$0xff]  ;;  %v195_v51 = vld [vmem:[%s959_s17 + $0x90] sm:$0xff] }
  0x21   : > { %716 = vmatpush3.bf16.msra.mxu0 %v715_v24  ;;  %v198_v52 = vld [vmem:[%s959_s17 + $0xa8] sm:$0xff]  ;;  %v200_v53 = vld [vmem:[%s959_s17 + $0xb8] sm:$0xff]  ;;  %v197_v54 = vld [vmem:[%s959_s17 + $0xa0] sm:$0xff] }
  0x22   : > { %718 = vmatprep.subr.bf16.mxu0 %v717_v26  ;;  %v199_v55 = vld [vmem:[%s959_s17 + $0xb0] sm:$0xff]  ;;  %v202_v56 = vld [vmem:[%s959_s17 + $0xc8] sm:$0xff]  ;;  %v204_v57 = vld [vmem:[%s959_s17 + $0xd8] sm:$0xff] }
  0x23   : > { %748 = vmatpush3.bf16.msra.mxu1 %v747_v25  ;;  %v201_v58 = vld [vmem:[%s959_s17 + $0xc0] sm:$0xff]  ;;  %v203_v59 = vld [vmem:[%s959_s17 + $0xd0] sm:$0xff]  ;;  %v206_v60 = vld [vmem:[%s959_s17 + $0xe8] sm:$0xff] }
  0x24   : > { %750 = vmatprep.subr.bf16.mxu1 %v749_v29  ;;  %v208_v61 = vld [vmem:[%s959_s17 + $0xf8] sm:$0xff]  ;;  %v205_v62 = vld [vmem:[%s959_s17 + $0xe0] sm:$0xff]  ;;  %v207_v63 = vld [vmem:[%s959_s17 + $0xf0] sm:$0xff] }
  0x25   : > { %720 = vmatpush3.bf16.msra.mxu0 %v719_v32  ;;  %v1038_v1 = vld [vmem:[%s1075_s2] ss:$0 sm:$0xff] }
  0x27   : > { %752 = vmatpush3.bf16.msra.mxu1 %v751_v33 }
  0x28   : > { %345 = vmatmul.mubr.f32.vlgmr.msra.gmra.mrb[0].mxu0 %v177_v34 }
  0x29   : > { %349 = vmatprep.mubr.f32.mxu0 %v182_v36 }
  0x2a   : > { %450 = vmatmul.mubr.f32.vlgmr.msra.gmra.mrb[0].mxu1 %v179_v35 }
  0x2b   : > { %454 = vmatprep.mubr.f32.mxu1 %v184_v37 }
  0x2c   : > { %350 = vmatmul.mubr.f32.gmra.mrb[2].mxu0 %v181_v38 }
  0x2d   : > { %354 = vmatprep.mubr.f32.mxu0 %v186_v40 }
  0x2e   : > { %455 = vmatmul.mubr.f32.gmra.mrb[2].mxu1 %v183_v39 }
  0x2f   : > { %459 = vmatprep.mubr.f32.mxu1 %v188_v41 }
  0x30   : > { %355 = vmatmul.mubr.f32.gmra.mrb[4].mxu0 %v185_v42 }
  0x31   : > { %359 = vmatprep.mubr.f32.mxu0 %v190_v44 }
  0x32   : > { %460 = vmatmul.mubr.f32.gmra.mrb[4].mxu1 %v187_v43 }
  0x33   : > { %464 = vmatprep.mubr.f32.mxu1 %v192_v45 }
  0x34   : > { %360 = vmatmul.mubr.f32.gmra.mrb[6].mxu0 %v189_v46 }
  0x35   : > { %364 = vmatprep.mubr.f32.mxu0 %v194_v48 }
  0x36   : > { %465 = vmatmul.mubr.f32.gmra.mrb[6].mxu1 %v191_v47 }
  0x37   : > { %469 = vmatprep.mubr.f32.mxu1 %v196_v49 }
  0x38   : > { %365 = vmatmul.mubr.f32.gmra.mrb[8].mxu0 %v193_v50 }
  0x39   : > { %369 = vmatprep.mubr.f32.mxu0 %v198_v52 }
  0x3a   : > { %470 = vmatmul.mubr.f32.gmra.mrb[8].mxu1 %v195_v51 }
  0x3b   : > { %474 = vmatprep.mubr.f32.mxu1 %v200_v53 }
  0x3c   : > { %370 = vmatmul.mubr.f32.gmra.mrb[10].mxu0 %v197_v54 }
  0x3d   : > { %374 = vmatprep.mubr.f32.mxu0 %v202_v56 }
  0x3e   : > { %475 = vmatmul.mubr.f32.gmra.mrb[10].mxu1 %v199_v55 }
  0x3f   : > { %479 = vmatprep.mubr.f32.mxu1 %v204_v57 }
  0x40   : > { %375 = vmatmul.mubr.f32.gmra.mrb[12].mxu0 %v201_v58 }
  0x41   : > { %379 = vmatprep.mubr.f32.mxu0 %v206_v60 }
  0x42   : > { %480 = vmatmul.mubr.f32.gmra.mrb[12].mxu1 %v203_v59 }
  0x43   : > { %484 = vmatprep.mubr.f32.mxu1 %v208_v61 }
  0x44   : > { %380 = vmatmul.mubr.f32.gmra.mrb[14].mxu0 %v205_v62 }
  0x46   : > { %485 = vmatmul.mubr.f32.gmra.mrb[14].mxu1 %v207_v63 }
  0xfb   : > { %v609_v0 = vpop.f32.mrb[0].mxu0 }
  0xfc   : > { %v610_v2 = vpop.f32.mrb[1].mxu0 }
  0xfd   : > { %v665_v3 = vpop.f32.mrb[0].mxu1  ;;  %v611_v4 = vadd.f32 %v610_v2, %v609_v0 }
  0xfe   : > { %v666_v5 = vpop.f32.mrb[1].mxu1 }
  0xff   : > { %v667_v6 = vadd.f32 %v666_v5, %v665_v3  ;;  %v347_v7 = vadd.f32 %v611_v4, %v1038_v1  ;;  %v612_v8 = vpop.f32.mrb[2].mxu0 }
 0x100   : > { %v613_v9 = vpop.f32.mrb[3].mxu0 }
 0x101   : > { %v668_v10 = vpop.f32.mrb[2].mxu1  ;;  %v452_v11 = vadd.f32 %v667_v6, %v347_v7  ;;  %v614_v12 = vadd.f32 %v613_v9, %v612_v8 }
 0x102   : > { %v669_v13 = vpop.f32.mrb[3].mxu1 }
 0x103   : > { %v670_v14 = vadd.f32 %v669_v13, %v668_v10  ;;  %v490_v15 = vmax.f32 %v452_v11, 0.0  ;;  %v352_v16 = vadd.f32 %v614_v12, %v1038_v1  ;;  %v615_v17 = vpop.f32.mrb[4].mxu0 }
 0x104   : > { %v616_v18 = vpop.f32.mrb[5].mxu0 }
 0x105   : > { %v671_v19 = vpop.f32.mrb[4].mxu1  ;;  %499 = vst.msk [vmem:[%s1045_s26] sm:$0xff] %vm498_vm0, %v490_v15  ;;  %v457_v20 = vadd.f32 %v670_v14, %v352_v16  ;;  %v617_v21 = vadd.f32 %v616_v18, %v615_v17 }
 0x106   : > { %v672_v22 = vpop.f32.mrb[5].mxu1 }
 0x107   : > { %v673_v23 = vadd.f32 %v672_v22, %v671_v19  ;;  %v491_v24 = vmax.f32 %v457_v20, 0.0  ;;  %v357_v25 = vadd.f32 %v617_v21, %v1038_v1  ;;  %v618_v26 = vpop.f32.mrb[6].mxu0 }
 0x108   : > { %v619_v27 = vpop.f32.mrb[7].mxu0 }
 0x109   : > { %v674_v28 = vpop.f32.mrb[6].mxu1  ;;  %500 = vst.msk [vmem:[%s1045_s26 + $0x8] sm:$0xff] %vm498_vm0, %v491_v24  ;;  %v462_v29 = vadd.f32 %v673_v23, %v357_v25  ;;  %v620_v30 = vadd.f32 %v619_v27, %v618_v26 }
 0x10a   : > { %v675_v31 = vpop.f32.mrb[7].mxu1 }
 0x10b   : > { %v676_v32 = vadd.f32 %v675_v31, %v674_v28  ;;  %v492_v33 = vmax.f32 %v462_v29, 0.0  ;;  %v362_v34 = vadd.f32 %v620_v30, %v1038_v1  ;;  %v621_v35 = vpop.f32.mrb[8].mxu0 }
 0x10c   : > { %v622_v36 = vpop.f32.mrb[9].mxu0 }
 0x10d   : > { %v677_v37 = vpop.f32.mrb[8].mxu1  ;;  %501 = vst.msk [vmem:[%s1045_s26 + $0x10] sm:$0xff] %vm498_vm0, %v492_v33  ;;  %v467_v38 = vadd.f32 %v676_v32, %v362_v34  ;;  %v623_v39 = vadd.f32 %v622_v36, %v621_v35 }
 0x10e   : > { %v678_v40 = vpop.f32.mrb[9].mxu1 }
 0x10f   : > { %v679_v41 = vadd.f32 %v678_v40, %v677_v37  ;;  %v493_v42 = vmax.f32 %v467_v38, 0.0  ;;  %v367_v43 = vadd.f32 %v623_v39, %v1038_v1  ;;  %v624_v44 = vpop.f32.mrb[10].mxu0 }
 0x110   : > { %v625_v45 = vpop.f32.mrb[11].mxu0 }
 0x111   : > { %v680_v46 = vpop.f32.mrb[10].mxu1  ;;  %502 = vst.msk [vmem:[%s1045_s26 + $0x18] sm:$0xff] %vm498_vm0, %v493_v42  ;;  %v472_v47 = vadd.f32 %v679_v41, %v367_v43  ;;  %v626_v48 = vadd.f32 %v625_v45, %v624_v44 }
 0x112   : > { %v681_v49 = vpop.f32.mrb[11].mxu1 }
 0x113   : > { %v682_v50 = vadd.f32 %v681_v49, %v680_v46  ;;  %v494_v51 = vmax.f32 %v472_v47, 0.0  ;;  %v372_v52 = vadd.f32 %v626_v48, %v1038_v1  ;;  %v627_v53 = vpop.f32.mrb[12].mxu0 }
 0x114   : > { %v628_v54 = vpop.f32.mrb[13].mxu0 }
 0x115   : > { %v683_v55 = vpop.f32.mrb[12].mxu1  ;;  %503 = vst.msk [vmem:[%s1045_s26 + $0x20] sm:$0xff] %vm498_vm0, %v494_v51  ;;  %v477_v56 = vadd.f32 %v682_v50, %v372_v52  ;;  %v629_v57 = vadd.f32 %v628_v54, %v627_v53 }
 0x116   : > { %v684_v58 = vpop.f32.mrb[13].mxu1 }
 0x117   : > { %v685_v59 = vadd.f32 %v684_v58, %v683_v55  ;;  %v495_v60 = vmax.f32 %v477_v56, 0.0  ;;  %v377_v61 = vadd.f32 %v629_v57, %v1038_v1  ;;  %v630_v62 = vpop.f32.mrb[14].mxu0 }
 0x118   : > { %v631_v63 = vpop.f32.mrb[15].mxu0 }
 0x119   : > { %v686_v0 = vpop.f32.mrb[14].mxu1  ;;  %504 = vst.msk [vmem:[%s1045_s26 + $0x28] sm:$0xff] %vm498_vm0, %v495_v60  ;;  %v482_v2 = vadd.f32 %v685_v59, %v377_v61  ;;  %v632_v3 = vadd.f32 %v631_v63, %v630_v62 }
 0x11a   : > { %v687_v4 = vpop.f32.mrb[15].mxu1 }
 0x11b   : > { %v688_v5 = vadd.f32 %v687_v4, %v686_v0  ;;  %v496_v6 = vmax.f32 %v482_v2, 0.0  ;;  %v382_v7 = vadd.f32 %v632_v3, %v1038_v1 }
 0x11d   : > { %505 = vst.msk [vmem:[%s1045_s26 + $0x30] sm:$0xff] %vm498_vm0, %v496_v6  ;;  %v487_v8 = vadd.f32 %v688_v5, %v382_v7 }
 0x11f   : > { %v497_v9 = vmax.f32 %v487_v8, 0.0 }
 0x121   : > { %506 = vst.msk [vmem:[%s1045_s26 + $0x38] sm:$0xff] %vm498_vm0, %v497_v9 }
 0x122 PF: > { %s13_s12 = sadd.s32 1, %s767_s12  }
 0x123   : > { %p10_p4 = scmp.ge.s32.totalorder %s13_s12, 4  }
 0x125   :  { %12 = sbr.rel (!%p10_p4) target bundleno = 1 (0x1), region = 62 }

// kernel: forward.7
= control target key start
LH: loop header
LB: loop body
LE: loop exit
PB: predicated region body
PF: predicated region fallthrough
CT: control target
= control target key end

     0   :  { %20 = vsyncpa [#allocation3], 0  ;;  %v2853_v7 = vmov 0   ;;  %s4711_s0 = inlined_call_operand.vmem [shape: f32[8,1024], index: 0, kind: input, shape index: {}]   ;;  %s4712_s1 = inlined_call_operand.vmem [shape: f32[1024,256], index: 1, kind: input, shape index: {}]   ;;  %s4713_s2 = inlined_call_operand.vmem [shape: f32[1,256], index: 2, kind: input, shape index: {}]   ;;  %s4714_s3 = inlined_call_operand.vmem [shape: s32[8,1], index: 3, kind: input, shape index: {}]   ;;  %s4715_s4 = inlined_call_operand.vmem [shape: f32[41,256], index: 4, kind: input, shape index: {}]   ;;  %s4716_s5 = inlined_call_operand.vmem [shape: f32[8,1], index: 5, kind: input, shape index: {}]   ;;  %s4717_s6 = inlined_call_operand.vmem [shape: f32[1,256], index: 6, kind: input, shape index: {}]   ;;  %s4718_s7 = inlined_call_operand.vmem [shape: f32[1,256], index: 7, kind: input, shape index: {}]   ;;  %s4719_s8 = inlined_call_operand.vmem [shape: f32[256,512], index: 8, kind: input, shape index: {}]   ;;  %s4720_s9 = inlined_call_operand.vmem [shape: f32[128,512], index: 9, kind: input, shape index: {}]   ;;  %s4721_s10 = inlined_call_operand.vmem [shape: f32[1,512], index: 10, kind: input, shape index: {}]   ;;  %s4722_s11 = inlined_call_operand.vmem [shape: f32[128,128], index: 11, kind: input, shape index: {}]   ;;  %s4723_s12 = inlined_call_operand.vmem [shape: f32[8,128], index: 12, kind: output, shape index: {0}]   ;;  %s4724_s13 = inlined_call_operand.hbm [shape: f32[2,128], index: 13, kind: output, shape index: {1}]   ;;  %s4725_s14 = inlined_call_operand.hbm [shape: f32[2,128], index: 14, kind: output, shape index: {2}]  }
   0x1   :  { %v55_v0 = vld [vmem:[%s4712_s1 + $0x8] sm:$0xff]  ;;  %v57_v1 = vld [vmem:[%s4712_s1 + $0x18] sm:$0xff]  ;;  %v54_v2 = vld [vmem:[%s4712_s1] sm:$0xff]  ;;  %2728 = vset.pattern.permute.xlu0 %v2853_v7 }
   0x2   :  { %v2035_v3 = vpack.c.bf16 %v57_v1, %v55_v0  ;;  %v56_v4 = vld [vmem:[%s4712_s1 + $0x10] sm:$0xff]  ;;  %v59_v5 = vld [vmem:[%s4712_s1 + $0x28] sm:$0xff]  ;;  %v61_v6 = vld [vmem:[%s4712_s1 + $0x38] sm:$0xff] }
   0x3   :  { %v2037_v8 = vpack.c.bf16 %v56_v4, %v54_v2  ;;  %v2039_v9 = vpack.c.bf16 %v61_v6, %v59_v5  ;;  %v58_v10 = vld [vmem:[%s4712_s1 + $0x20] sm:$0xff]  ;;  %v60_v11 = vld [vmem:[%s4712_s1 + $0x30] sm:$0xff]  ;;  %v63_v12 = vld [vmem:[%s4712_s1 + $0x48] sm:$0xff] }
   0x4   :  { %2036 = vmatprep.subr.bf16.mxu0 %v2035_v3  ;;  %v65_v13 = vld [vmem:[%s4712_s1 + $0x58] sm:$0xff]  ;;  %v2041_v14 = vpack.c.bf16 %v60_v11, %v58_v10  ;;  %v62_v16 = vld [vmem:[%s4712_s1 + $0x40] sm:$0xff]  ;;  %v64_v17 = vld [vmem:[%s4712_s1 + $0x50] sm:$0xff] }
   0x5   :  { %2038 = vmatpush1.bf16.msra.mxu0 %v2037_v8  ;;  %v2043_v15 = vpack.c.bf16 %v65_v13, %v63_v12  ;;  %v67_v18 = vld [vmem:[%s4712_s1 + $0x68] sm:$0xff]  ;;  %v69_v19 = vld [vmem:[%s4712_s1 + $0x78] sm:$0xff]  ;;  %v2045_v20 = vpack.c.bf16 %v64_v17, %v62_v16  ;;  %v66_v22 = vld [vmem:[%s4712_s1 + $0x60] sm:$0xff] }
   0x6   :  { %2040 = vmatprep.subr.bf16.mxu0 %v2039_v9  ;;  %v2047_v21 = vpack.c.bf16 %v69_v19, %v67_v18  ;;  %v68_v23 = vld [vmem:[%s4712_s1 + $0x70] sm:$0xff]  ;;  %v71_v24 = vld [vmem:[%s4712_s1 + $0x88] sm:$0xff]  ;;  %v73_v25 = vld [vmem:[%s4712_s1 + $0x98] sm:$0xff] }
   0x7   :  { %v2049_v26 = vpack.c.bf16 %v68_v23, %v66_v22  ;;  %v2051_v27 = vpack.c.bf16 %v73_v25, %v71_v24  ;;  %v70_v28 = vld [vmem:[%s4712_s1 + $0x80] sm:$0xff]  ;;  %v72_v29 = vld [vmem:[%s4712_s1 + $0x90] sm:$0xff]  ;;  %v75_v30 = vld [vmem:[%s4712_s1 + $0xa8] sm:$0xff] }
   0x8   :  { %v77_v31 = vld [vmem:[%s4712_s1 + $0xb8] sm:$0xff]  ;;  %v2053_v32 = vpack.c.bf16 %v72_v29, %v70_v28  ;;  %v74_v34 = vld [vmem:[%s4712_s1 + $0xa0] sm:$0xff]  ;;  %v76_v35 = vld [vmem:[%s4712_s1 + $0xb0] sm:$0xff] }
   0x9   :  { %2042 = vmatpush1.bf16.msra.mxu0 %v2041_v14  ;;  %v2055_v33 = vpack.c.bf16 %v77_v31, %v75_v30  ;;  %v79_v36 = vld [vmem:[%s4712_s1 + $0xc8] sm:$0xff]  ;;  %v81_v37 = vld [vmem:[%s4712_s1 + $0xd8] sm:$0xff]  ;;  %v2057_v38 = vpack.c.bf16 %v76_v35, %v74_v34  ;;  %v78_v40 = vld [vmem:[%s4712_s1 + $0xc0] sm:$0xff] }
   0xa   :  { %2044 = vmatprep.subr.bf16.mxu0 %v2043_v15  ;;  %v2059_v39 = vpack.c.bf16 %v81_v37, %v79_v36  ;;  %v80_v41 = vld [vmem:[%s4712_s1 + $0xd0] sm:$0xff]  ;;  %v47_v42 = vld [vmem:[%s4711_s0 + $0x8] sm:$0xff]  ;;  %v85_v44 = vld [vmem:[%s4712_s1 + $0xf8] sm:$0xff] }
   0xb   :  { %v83_v43 = vld [vmem:[%s4712_s1 + $0xe8] sm:$0xff]  ;;  %386 = vmatprep.mubr.f32.mxu0 %v47_v42  ;;  %v2061_v45 = vpack.c.bf16 %v80_v41, %v78_v40  ;;  %v82_v47 = vld [vmem:[%s4712_s1 + $0xe0] sm:$0xff]  ;;  %v84_v48 = vld [vmem:[%s4712_s1 + $0xf0] sm:$0xff] }
   0xc   :  { %v2063_v46 = vpack.c.bf16 %v85_v44, %v83_v43  ;;  %v87_v49 = vld [vmem:[%s4712_s1 + $0x108] sm:$0xff]  ;;  %v89_v50 = vld [vmem:[%s4712_s1 + $0x118] sm:$0xff]  ;;  %v2065_v51 = vpack.c.bf16 %v84_v48, %v82_v47  ;;  %v86_v53 = vld [vmem:[%s4712_s1 + $0x100] sm:$0xff] }
   0xd   :  { %2046 = vmatpush1.bf16.msra.mxu0 %v2045_v20  ;;  %v2067_v52 = vpack.c.bf16 %v89_v50, %v87_v49  ;;  %v88_v54 = vld [vmem:[%s4712_s1 + $0x110] sm:$0xff]  ;;  %v91_v55 = vld [vmem:[%s4712_s1 + $0x128] sm:$0xff]  ;;  %v93_v56 = vld [vmem:[%s4712_s1 + $0x138] sm:$0xff] }
   0xe   :  { %2048 = vmatprep.subr.bf16.mxu0 %v2047_v21  ;;  %v2069_v57 = vpack.c.bf16 %v88_v54, %v86_v53  ;;  %v2071_v58 = vpack.c.bf16 %v93_v56, %v91_v55  ;;  %v90_v59 = vld [vmem:[%s4712_s1 + $0x120] sm:$0xff]  ;;  %v92_v60 = vld [vmem:[%s4712_s1 + $0x130] sm:$0xff]  ;;  %v95_v61 = vld [vmem:[%s4712_s1 + $0x148] sm:$0xff] }
   0xf   :  { %v97_v62 = vld [vmem:[%s4712_s1 + $0x158] sm:$0xff]  ;;  %v2073_v63 = vpack.c.bf16 %v92_v60, %v90_v59  ;;  %v94_v1 = vld [vmem:[%s4712_s1 + $0x140] sm:$0xff]  ;;  %v96_v2 = vld [vmem:[%s4712_s1 + $0x150] sm:$0xff] }
  0x10   :  { %v2075_v0 = vpack.c.bf16 %v97_v62, %v95_v61  ;;  %v99_v3 = vld [vmem:[%s4712_s1 + $0x168] sm:$0xff]  ;;  %v101_v4 = vld [vmem:[%s4712_s1 + $0x178] sm:$0xff]  ;;  %v2077_v5 = vpack.c.bf16 %v96_v2, %v94_v1  ;;  %v98_v7 = vld [vmem:[%s4712_s1 + $0x160] sm:$0xff] }
  0x11   :  { %2050 = vmatpush1.bf16.msra.mxu0 %v2049_v26  ;;  %v2079_v6 = vpack.c.bf16 %v101_v4, %v99_v3  ;;  %v100_v8 = vld [vmem:[%s4712_s1 + $0x170] sm:$0xff]  ;;  %v103_v9 = vld [vmem:[%s4712_s1 + $0x188] sm:$0xff]  ;;  %v105_v10 = vld [vmem:[%s4712_s1 + $0x198] sm:$0xff] }
  0x12   :  { %2052 = vmatprep.subr.bf16.mxu0 %v2051_v27  ;;  %v610_v11 = vld [vmem:[%s4714_s3] sm:$0xff]  ;;  %v2081_v12 = vpack.c.bf16 %v100_v8, %v98_v7  ;;  %v2083_v14 = vpack.c.bf16 %v105_v10, %v103_v9  ;;  %v104_v16 = vld [vmem:[%s4712_s1 + $0x190] sm:$0xff]  ;;  %v107_v17 = vld [vmem:[%s4712_s1 + $0x1a8] sm:$0xff] }
  0x13   :  { %612 = vperm.xlu0 %2728, %v610_v11   ;;  %v713_v13 = vld [vmem:[%s4716_s5] sm:$0xff]  ;;  %v109_v18 = vld [vmem:[%s4712_s1 + $0x1b8] sm:$0xff]  ;;  %v108_v22 = vld [vmem:[%s4712_s1 + $0x1b0] sm:$0xff] }
  0x14   :  { %v102_v15 = vld [vmem:[%s4712_s1 + $0x180] sm:$0xff]  ;;  %v2087_v20 = vpack.c.bf16 %v109_v18, %v107_v17  ;;  %v111_v23 = vld [vmem:[%s4712_s1 + $0x1c8] sm:$0xff]  ;;  %v113_v24 = vld [vmem:[%s4712_s1 + $0x1d8] sm:$0xff] }
  0x15   :  { %2054 = vmatpush1.bf16.msra.mxu0 %v2053_v32  ;;  %v2085_v19 = vpack.c.bf16 %v104_v16, %v102_v15  ;;  %v106_v21 = vld [vmem:[%s4712_s1 + $0x1a0] sm:$0xff]  ;;  %v2091_v26 = vpack.c.bf16 %v113_v24, %v111_v23  ;;  %v112_v28 = vld [vmem:[%s4712_s1 + $0x1d0] sm:$0xff]  ;;  %v115_v29 = vld [vmem:[%s4712_s1 + $0x1e8] sm:$0xff] }
  0x16   :  { %2056 = vmatprep.subr.bf16.mxu0 %v2055_v33  ;;  %v2089_v25 = vpack.c.bf16 %v108_v22, %v106_v21  ;;  %v110_v27 = vld [vmem:[%s4712_s1 + $0x1c0] sm:$0xff]  ;;  %v117_v30 = vld [vmem:[%s4712_s1 + $0x1f8] sm:$0xff]  ;;  %v116_v34 = vld [vmem:[%s4712_s1 + $0x1f0] sm:$0xff] }
  0x17   :  { %717 = vperm.xlu0 %2728, %v713_v13   ;;  %v2093_v31 = vpack.c.bf16 %v112_v28, %v110_v27  ;;  %v2095_v32 = vpack.c.bf16 %v117_v30, %v115_v29  ;;  %v114_v33 = vld [vmem:[%s4712_s1 + $0x1e0] sm:$0xff]  ;;  %v119_v35 = vld [vmem:[%s4712_s1 + $0x208] sm:$0xff]  ;;  %v121_v36 = vld [vmem:[%s4712_s1 + $0x218] sm:$0xff] }
  0x18   :  { %v2097_v37 = vpack.c.bf16 %v116_v34, %v114_v33  ;;  %v120_v40 = vld [vmem:[%s4712_s1 + $0x210] sm:$0xff]  ;;  %v123_v41 = vld [vmem:[%s4712_s1 + $0x228] sm:$0xff]  ;;  %v125_v42 = vld [vmem:[%s4712_s1 + $0x238] sm:$0xff] }
  0x19   :  { %2058 = vmatpush1.bf16.msra.mxu0 %v2057_v38  ;;  %v2099_v38 = vpack.c.bf16 %v121_v36, %v119_v35  ;;  %v46_v43 = vld [vmem:[%s4711_s0] sm:$0xff]  ;;  %v124_v47 = vld [vmem:[%s4712_s1 + $0x230] sm:$0xff]  ;;  %v49_v48 = vld [vmem:[%s4711_s0 + $0x18] sm:$0xff] }
  0x1a   :  { %2060 = vmatprep.subr.bf16.mxu0 %v2059_v39  ;;  %v118_v39 = vld [vmem:[%s4712_s1 + $0x200] sm:$0xff]  ;;  %v127_v49 = vld [vmem:[%s4712_s1 + $0x248] sm:$0xff]  ;;  %v129_v50 = vld [vmem:[%s4712_s1 + $0x258] sm:$0xff] }
  0x1b   :  { %v2101_v44 = vpack.c.bf16 %v120_v40, %v118_v39 }
  0x1d   :  { %2062 = vmatpush1.bf16.msra.mxu0 %v2061_v45  ;;  %v2103_v45 = vpack.c.bf16 %v125_v42, %v123_v41 }
  0x1e   :  { %2064 = vmatprep.subr.bf16.mxu0 %v2063_v46  ;;  %v122_v46 = vld [vmem:[%s4712_s1 + $0x220] sm:$0xff] }
  0x21   :  { %2066 = vmatpush1.bf16.msra.mxu0 %v2065_v51  ;;  %v2105_v51 = vpack.c.bf16 %v124_v47, %v122_v46 }
  0x22   :  { %2068 = vmatprep.subr.bf16.mxu0 %v2067_v52 }
  0x25   :  { %2070 = vmatpush1.bf16.msra.mxu0 %v2069_v57 }
  0x26   :  { %2072 = vmatprep.subr.bf16.mxu0 %v2071_v58 }
  0x29   :  { %2074 = vmatpush1.bf16.msra.mxu0 %v2073_v63 }
  0x2a   :  { %2076 = vmatprep.subr.bf16.mxu0 %v2075_v0 }
  0x2d   :  { %2078 = vmatpush1.bf16.msra.mxu0 %v2077_v5 }
  0x2e   :  { %2080 = vmatprep.subr.bf16.mxu0 %v2079_v6 }
  0x31   :  { %2082 = vmatpush1.bf16.msra.mxu0 %v2081_v12 }
  0x32   :  { %2084 = vmatprep.subr.bf16.mxu0 %v2083_v14 }
  0x35   :  { %2086 = vmatpush1.bf16.msra.mxu0 %v2085_v19 }
  0x36   :  { %2088 = vmatprep.subr.bf16.mxu0 %v2087_v20 }
  0x39   :  { %2090 = vmatpush1.bf16.msra.mxu0 %v2089_v25 }
  0x3a   :  { %2092 = vmatprep.subr.bf16.mxu0 %v2091_v26 }
  0x3d   :  { %2094 = vmatpush1.bf16.msra.mxu0 %v2093_v31 }
  0x3e   :  { %2096 = vmatprep.subr.bf16.mxu0 %v2095_v32 }
  0x41   :  { %2098 = vmatpush1.bf16.msra.mxu0 %v2097_v37 }
  0x42   :  { %2100 = vmatprep.subr.bf16.mxu0 %v2099_v38 }
  0x44   :  { %387 = vmatmul.mubr.f32.vlgmr.msra.gmra.mrb[0].mxu0 %v46_v43 }
  0x45   :  { %2102 = vmatpush1.bf16.msra.mxu0 %v2101_v44  ;;  %457 = vmatprep.mubr.f32.mxu0 %v49_v48 }
  0x46   :  { %21 = vsyncpa [#allocation5], 0  ;;  %2104 = vmatprep.subr.bf16.mxu0 %v2103_v45  ;;  %v2107_v52 = vpack.c.bf16 %v129_v50, %v127_v49  ;;  %v126_v53 = vld [vmem:[%s4712_s1 + $0x240] sm:$0xff]  ;;  %v128_v54 = vld [vmem:[%s4712_s1 + $0x250] sm:$0xff]  ;;  %vm633_vm0 = vcmask 1040384   ;;  %vm2855_vm1 = vmmov 1  }
  0x47   :  { %v131_v55 = vld [vmem:[%s4712_s1 + $0x268] sm:$0xff]  ;;  %v133_v56 = vld [vmem:[%s4712_s1 + $0x278] sm:$0xff]  ;;  %v2109_v57 = vpack.c.bf16 %v128_v54, %v126_v53  ;;  %v130_v59 = vld [vmem:[%s4712_s1 + $0x260] sm:$0xff]  ;;  %vm629_vm3 = vcmask 334848   ;;  %vm1840_vm5 = vcmask 1041408   ;;  %vm1842_vm6 = vcmask 1043456  }
  0x48   :  { %v2111_v58 = vpack.c.bf16 %v133_v56, %v131_v55  ;;  %v132_v60 = vld [vmem:[%s4712_s1 + $0x270] sm:$0xff]  ;;  %v135_v61 = vld [vmem:[%s4712_s1 + $0x288] sm:$0xff]  ;;  %v137_v62 = vld [vmem:[%s4712_s1 + $0x298] sm:$0xff]  ;;  %vm2857_vm7 = vmmov 0   ;;  %vm1844_vm8 = vcmask 1045504  }
  0x49   :  { %2106 = vmatpush1.bf16.msra.mxu0 %v2105_v51  ;;  %v2113_v63 = vpack.c.bf16 %v132_v60, %v130_v59  ;;  %v2115_v0 = vpack.c.bf16 %v137_v62, %v135_v61  ;;  %v134_v1 = vld [vmem:[%s4712_s1 + $0x280] sm:$0xff]  ;;  %v136_v2 = vld [vmem:[%s4712_s1 + $0x290] sm:$0xff]  ;;  %v139_v3 = vld [vmem:[%s4712_s1 + $0x2a8] sm:$0xff] }
  0x4a   :  { %2108 = vmatprep.subr.bf16.mxu0 %v2107_v52  ;;  %v141_v4 = vld [vmem:[%s4712_s1 + $0x2b8] sm:$0xff]  ;;  %v2117_v5 = vpack.c.bf16 %v136_v2, %v134_v1  ;;  %v138_v7 = vld [vmem:[%s4712_s1 + $0x2a0] sm:$0xff]  ;;  %v140_v8 = vld [vmem:[%s4712_s1 + $0x2b0] sm:$0xff] }
  0x4b   :  { %v2119_v6 = vpack.c.bf16 %v141_v4, %v139_v3  ;;  %v143_v9 = vld [vmem:[%s4712_s1 + $0x2c8] sm:$0xff]  ;;  %v145_v10 = vld [vmem:[%s4712_s1 + $0x2d8] sm:$0xff]  ;;  %v2121_v11 = vpack.c.bf16 %v140_v8, %v138_v7  ;;  %v142_v13 = vld [vmem:[%s4712_s1 + $0x2c0] sm:$0xff] }
  0x4c   :  { %v2123_v12 = vpack.c.bf16 %v145_v10, %v143_v9  ;;  %v144_v14 = vld [vmem:[%s4712_s1 + $0x2d0] sm:$0xff]  ;;  %v147_v15 = vld [vmem:[%s4712_s1 + $0x2e8] sm:$0xff]  ;;  %v149_v16 = vld [vmem:[%s4712_s1 + $0x2f8] sm:$0xff] }
  0x4d   :  { %2110 = vmatpush1.bf16.msra.mxu0 %v2109_v57  ;;  %v2125_v17 = vpack.c.bf16 %v144_v14, %v142_v13  ;;  %v2127_v18 = vpack.c.bf16 %v149_v16, %v147_v15  ;;  %v146_v19 = vld [vmem:[%s4712_s1 + $0x2e0] sm:$0xff]  ;;  %v148_v20 = vld [vmem:[%s4712_s1 + $0x2f0] sm:$0xff]  ;;  %v151_v21 = vld [vmem:[%s4712_s1 + $0x308] sm:$0xff] }
  0x4e   :  { %2112 = vmatprep.subr.bf16.mxu0 %v2111_v58  ;;  %v153_v22 = vld [vmem:[%s4712_s1 + $0x318] sm:$0xff]  ;;  %v2129_v23 = vpack.c.bf16 %v148_v20, %v146_v19  ;;  %v150_v25 = vld [vmem:[%s4712_s1 + $0x300] sm:$0xff]  ;;  %v152_v26 = vld [vmem:[%s4712_s1 + $0x310] sm:$0xff] }
  0x4f   :  { %v2131_v24 = vpack.c.bf16 %v153_v22, %v151_v21  ;;  %v155_v27 = vld [vmem:[%s4712_s1 + $0x328] sm:$0xff]  ;;  %v157_v28 = vld [vmem:[%s4712_s1 + $0x338] sm:$0xff]  ;;  %v2133_v29 = vpack.c.bf16 %v152_v26, %v150_v25  ;;  %v154_v31 = vld [vmem:[%s4712_s1 + $0x320] sm:$0xff] }
  0x50   :  { %v2135_v30 = vpack.c.bf16 %v157_v28, %v155_v27  ;;  %v156_v32 = vld [vmem:[%s4712_s1 + $0x330] sm:$0xff]  ;;  %v159_v33 = vld [vmem:[%s4712_s1 + $0x348] sm:$0xff]  ;;  %v161_v34 = vld [vmem:[%s4712_s1 + $0x358] sm:$0xff]  ;;  %v2854_v28 = vmov 0.0  }
  0x51   :  { %2114 = vmatpush1.bf16.msra.mxu0 %v2113_v63  ;;  %v2137_v35 = vpack.c.bf16 %v156_v32, %v154_v31  ;;  %v2139_v36 = vpack.c.bf16 %v161_v34, %v159_v33  ;;  %v158_v37 = vld [vmem:[%s4712_s1 + $0x340] sm:$0xff]  ;;  %v160_v38 = vld [vmem:[%s4712_s1 + $0x350] sm:$0xff]  ;;  %v163_v39 = vld [vmem:[%s4712_s1 + $0x368] sm:$0xff]  ;;  %704 = vmatprep.mubr.f32.mxu1 %v2854_v28 }
  0x52   :  { %2116 = vmatprep.subr.bf16.mxu0 %v2115_v0  ;;  %v165_v40 = vld [vmem:[%s4712_s1 + $0x378] sm:$0xff]  ;;  %v2141_v41 = vpack.c.bf16 %v160_v38, %v158_v37  ;;  %v162_v43 = vld [vmem:[%s4712_s1 + $0x360] sm:$0xff]  ;;  %v164_v44 = vld [vmem:[%s4712_s1 + $0x370] sm:$0xff] }
  0x53   :  { %v2143_v42 = vpack.c.bf16 %v165_v40, %v163_v39  ;;  %v167_v45 = vld [vmem:[%s4712_s1 + $0x388] sm:$0xff]  ;;  %v169_v46 = vld [vmem:[%s4712_s1 + $0x398] sm:$0xff]  ;;  %v2145_v47 = vpack.c.bf16 %v164_v44, %v162_v43  ;;  %v166_v49 = vld [vmem:[%s4712_s1 + $0x380] sm:$0xff] }
  0x54   :  { %v2147_v48 = vpack.c.bf16 %v169_v46, %v167_v45  ;;  %v168_v50 = vld [vmem:[%s4712_s1 + $0x390] sm:$0xff]  ;;  %v171_v51 = vld [vmem:[%s4712_s1 + $0x3a8] sm:$0xff]  ;;  %v173_v52 = vld [vmem:[%s4712_s1 + $0x3b8] sm:$0xff] }
  0x55   :  { %2118 = vmatpush1.bf16.msra.mxu0 %v2117_v5  ;;  %v2149_v53 = vpack.c.bf16 %v168_v50, %v166_v49  ;;  %v2151_v54 = vpack.c.bf16 %v173_v52, %v171_v51  ;;  %v170_v55 = vld [vmem:[%s4712_s1 + $0x3a0] sm:$0xff]  ;;  %v172_v56 = vld [vmem:[%s4712_s1 + $0x3b0] sm:$0xff]  ;;  %v175_v57 = vld [vmem:[%s4712_s1 + $0x3c8] sm:$0xff] }
  0x56   :  { %2120 = vmatprep.subr.bf16.mxu0 %v2119_v6  ;;  %v177_v58 = vld [vmem:[%s4712_s1 + $0x3d8] sm:$0xff]  ;;  %v2153_v59 = vpack.c.bf16 %v172_v56, %v170_v55  ;;  %v174_v60 = vld [vmem:[%s4712_s1 + $0x3c0] sm:$0xff]  ;;  %v176_v61 = vld [vmem:[%s4712_s1 + $0x3d0] sm:$0xff] }
  0x57   :  { %v2155_v62 = vpack.c.bf16 %v177_v58, %v175_v57  ;;  %v179_v63 = vld [vmem:[%s4712_s1 + $0x3e8] sm:$0xff]  ;;  %v181_v0 = vld [vmem:[%s4712_s1 + $0x3f8] sm:$0xff]  ;;  %v617_v3 = vld [vmem:[%s4715_s4] sm:$0xff]  ;;  %v2157_v7 = vpack.c.bf16 %v176_v61, %v174_v60 }
  0x58   :  { %v618_v1 = vld [vmem:[%s4715_s4 + $0x8] sm:$0xff]  ;;  %v620_v2 = vld [vmem:[%s4715_s4 + $0x18] sm:$0xff]  ;;  %v619_v4 = vld [vmem:[%s4715_s4 + $0x10] sm:$0xff]  ;;  %v2159_v10 = vpack.c.bf16 %v181_v0, %v179_v63 }
  0x59   :  { %2122 = vmatpush1.bf16.msra.mxu0 %v2121_v11  ;;  %v2291_v5 = vpack.c.bf16 %v620_v2, %v618_v1  ;;  %v2293_v6 = vpack.c.bf16 %v619_v4, %v617_v3  ;;  %v178_v8 = vld [vmem:[%s4712_s1 + $0x3e0] sm:$0xff]  ;;  %v180_v9 = vld [vmem:[%s4712_s1 + $0x3f0] sm:$0xff]  ;;  %v183_v11 = vld [vmem:[%s4712_s1 + $0x408] sm:$0xff] }
  0x5a   :  { %2124 = vmatprep.subr.bf16.mxu0 %v2123_v12  ;;  %v185_v12 = vld [vmem:[%s4712_s1 + $0x418] sm:$0xff]  ;;  %v622_v13 = vld [vmem:[%s4715_s4 + $0x28] sm:$0xff]  ;;  %v621_v15 = vld [vmem:[%s4715_s4 + $0x20] sm:$0xff]  ;;  %v2161_v19 = vpack.c.bf16 %v180_v9, %v178_v8 }
  0x5b   :  { %2292 = vmatprep.subr.bf16.mxu1 %v2291_v5  ;;  %v624_v14 = vld [vmem:[%s4715_s4 + $0x38] sm:$0xff]  ;;  %v623_v16 = vld [vmem:[%s4715_s4 + $0x30] sm:$0xff]  ;;  %v182_v20 = vld [vmem:[%s4712_s1 + $0x400] sm:$0xff]  ;;  %v2163_v21 = vpack.c.bf16 %v185_v12, %v183_v11 }
  0x5c   :  { %2294 = vmatpush1.bf16.msra.mxu1 %v2293_v6  ;;  %v184_v22 = vld [vmem:[%s4712_s1 + $0x410] sm:$0xff]  ;;  %v189_v25 = vld [vmem:[%s4712_s1 + $0x438] sm:$0xff]  ;;  %v625_v27 = vld [vmem:[%s4715_s4 + $0x40] sm:$0xff] }
  0x5d   :  { %2126 = vmatpush1.bf16.msra.mxu0 %v2125_v17  ;;  %v2295_v17 = vpack.c.bf16 %v624_v14, %v622_v13  ;;  %v628_v26 = vld [vmem:[%s4715_s4 + $0x58] sm:$0x1]  ;;  %vm2300_vm2 = vmpackc.low %vm633_vm0, %vm2855_vm1  ;;  %v48_v31 = vld [vmem:[%s4711_s0 + $0x10] sm:$0xff]  ;;  %v2165_v32 = vpack.c.bf16 %v184_v22, %v182_v20 }
  0x5e   :  { %2128 = vmatprep.subr.bf16.mxu0 %v2127_v18  ;;  %v2297_v18 = vpack.c.bf16 %v623_v16, %v621_v15  ;;  %v51_v37 = vld [vmem:[%s4711_s0 + $0x28] sm:$0xff]  ;;  %v193_v39 = vld [vmem:[%s4712_s1 + $0x458] sm:$0xff]  ;;  %v190_v45 = vld [vmem:[%s4712_s1 + $0x440] sm:$0xff] }
  0x5f   :  { %2296 = vmatprep.subr.bf16.mxu1 %v2295_v17  ;;  %v191_v38 = vld [vmem:[%s4712_s1 + $0x448] sm:$0xff]  ;;  %v192_v46 = vld [vmem:[%s4712_s1 + $0x450] sm:$0xff]  ;;  %v194_v51 = vld [vmem:[%s4712_s1 + $0x460] sm:$0xff] }
  0x60   :  { %2298 = vmatpush1.bf16.msra.mxu1 %v2297_v18  ;;  %v754_v40 = vld [vmem:[%s4719_s8 + $0x8] sm:$0xff]  ;;  %v2171_v44 = vpack.c.bf16 %v193_v39, %v191_v38  ;;  %v2173_v49 = vpack.c.bf16 %v192_v46, %v190_v45  ;;  %v196_v52 = vld [vmem:[%s4712_s1 + $0x470] sm:$0xff]  ;;  %v198_v57 = vld [vmem:[%s4712_s1 + $0x480] sm:$0xff] }
  0x61   :  { %2130 = vmatpush1.bf16.msra.mxu0 %v2129_v23  ;;  %v187_v23 = vld [vmem:[%s4712_s1 + $0x428] sm:$0xff]  ;;  %v2177_v55 = vpack.c.bf16 %v196_v52, %v194_v51  ;;  %v200_v58 = vld [vmem:[%s4712_s1 + $0x490] sm:$0xff]  ;;  %v205_v60 = vld [vmem:[%s4712_s1 + $0x4b8] sm:$0xff] }
  0x62   :  { %2132 = vmatprep.subr.bf16.mxu0 %v2131_v24  ;;  %v626_v24 = vld [vmem:[%s4715_s4 + $0x48] sm:$0xff]  ;;  %v2167_v34 = vpack.c.bf16 %v189_v25, %v187_v23  ;;  %v2181_v61 = vpack.c.bf16 %v200_v58, %v198_v57  ;;  %v202_v63 = vld [vmem:[%s4712_s1 + $0x4a0] sm:$0xff]  ;;  %v204_v0 = vld [vmem:[%s4712_s1 + $0x4b0] sm:$0xff] }
  0x63   :  { %v207_v1 = vld [vmem:[%s4712_s1 + $0x4c8] sm:$0xff]  ;;  %v209_v2 = vld [vmem:[%s4712_s1 + $0x4d8] sm:$0xff]  ;;  %v2185_v3 = vpack.c.bf16 %v204_v0, %v202_v63  ;;  %v206_v5 = vld [vmem:[%s4712_s1 + $0x4c0] sm:$0xff] }
  0x64   :  { %v2187_v4 = vpack.c.bf16 %v209_v2, %v207_v1  ;;  %v208_v6 = vld [vmem:[%s4712_s1 + $0x4d0] sm:$0xff]  ;;  %v213_v8 = vld [vmem:[%s4712_s1 + $0x4f8] sm:$0xff]  ;;  %v210_v11 = vld [vmem:[%s4712_s1 + $0x4e0] sm:$0xff] }
  0x65   :  { %2134 = vmatpush1.bf16.msra.mxu0 %v2133_v29  ;;  %v2299_v29 = vpack.c.bf16 %v628_v26, %v626_v24  ;;  %v2189_v9 = vpack.c.bf16 %v208_v6, %v206_v5  ;;  %v212_v12 = vld [vmem:[%s4712_s1 + $0x4f0] sm:$0xff]  ;;  %v215_v13 = vld [vmem:[%s4712_s1 + $0x508] sm:$0xff]  ;;  %v217_v14 = vld [vmem:[%s4712_s1 + $0x518] sm:$0xff] }
  0x66   :  { %2136 = vmatprep.subr.bf16.mxu0 %v2135_v30  ;;  %v627_v30 = vld [vmem:[%s4715_s4 + $0x50] sm:$0x1]  ;;  %v2193_v15 = vpack.c.bf16 %v212_v12, %v210_v11  ;;  %v2195_v16 = vpack.c.bf16 %v217_v14, %v215_v13  ;;  %v214_v17 = vld [vmem:[%s4712_s1 + $0x500] sm:$0xff]  ;;  %v221_v20 = vld [vmem:[%s4712_s1 + $0x538] sm:$0xff] }
  0x67   :  { %v2302_v33 = vpack.c.bf16 %v627_v30, %v625_v27  ;;  %2301 = vmatprep.subr.msk.bf16.mxu1 %vm2300_vm2, %v2299_v29  ;;  %v216_v18 = vld [vmem:[%s4712_s1 + $0x510] sm:$0xff]  ;;  %v218_v23 = vld [vmem:[%s4712_s1 + $0x520] sm:$0xff]  ;;  %v223_v25 = vld [vmem:[%s4712_s1 + $0x548] sm:$0xff] }
  0x68   :  { %v220_v24 = vld [vmem:[%s4712_s1 + $0x530] sm:$0xff]  ;;  %v225_v26 = vld [vmem:[%s4712_s1 + $0x558] sm:$0xff]  ;;  %v222_v30 = vld [vmem:[%s4712_s1 + $0x540] sm:$0xff] }
  0x69   :  { %2138 = vmatpush1.bf16.msra.mxu0 %v2137_v35  ;;  %v186_v35 = vld [vmem:[%s4712_s1 + $0x420] sm:$0xff]  ;;  %2304 = vmatpush1.bf16.msk.msra.mxu1 %vm2300_vm2, %v2302_v33  ;;  %v2201_v27 = vpack.c.bf16 %v220_v24, %v218_v23  ;;  %v2203_v29 = vpack.c.bf16 %v225_v26, %v223_v25  ;;  %v227_v33 = vld [vmem:[%s4712_s1 + $0x568] sm:$0xff]  ;;  %v233_v45 = vld [vmem:[%s4712_s1 + $0x598] sm:$0xff] }
  0x6a   :  { %2140 = vmatprep.subr.bf16.mxu0 %v2139_v36  ;;  %v188_v36 = vld [vmem:[%s4712_s1 + $0x430] sm:$0xff]  ;;  %v762_v39 = vld [vmem:[%s4719_s8 + $0x48] sm:$0xff]  ;;  %v773_v63 = vld [vmem:[%s4719_s8 + $0xa0] sm:$0xff] }
  0x6b   :  { %v232_v57 = vld [vmem:[%s4712_s1 + $0x590] sm:$0xff]  ;;  %v235_v58 = vld [vmem:[%s4712_s1 + $0x5a8] sm:$0xff]  ;;  %v781_v11 = vld [vmem:[%s4719_s8 + $0xe0] sm:$0xff] }
  0x6c   :  { %v778_v1 = vld [vmem:[%s4719_s8 + $0xc8] sm:$0xff]  ;;  %v236_v5 = vld [vmem:[%s4712_s1 + $0x5b0] sm:$0xff]  ;;  %v789_v23 = vld [vmem:[%s4719_s8 + $0x120] sm:$0xff] }
  0x6d   :  { %2142 = vmatpush1.bf16.msra.mxu0 %v2141_v41  ;;  %v758_v41 = vld [vmem:[%s4719_s8 + $0x28] sm:$0xff] }
  0x6e   :  { %2144 = vmatprep.subr.bf16.mxu0 %v2143_v42  ;;  %v2169_v42 = vpack.c.bf16 %v188_v36, %v186_v35  ;;  %v2305_v43 = vpack.c.bf16 %v758_v41, %v754_v40  ;;  %v753_v36 = vld [vmem:[%s4719_s8] sm:$0xff]  ;;  %v766_v40 = vld [vmem:[%s4719_s8 + $0x68] sm:$0xff] }
  0x6f   :  { %v782_v2 = vld [vmem:[%s4719_s8 + $0xe8] sm:$0xff] }
  0x70   :  { %2306 = vmatprep.subr.bf16.mxu1 %v2305_v43  ;;  %v228_v43 = vld [vmem:[%s4712_s1 + $0x570] sm:$0xff]  ;;  %v239_v6 = vld [vmem:[%s4712_s1 + $0x5c8] sm:$0xff] }
  0x71   :  { %2146 = vmatpush1.bf16.msra.mxu0 %v2145_v47  ;;  %v195_v47 = vld [vmem:[%s4712_s1 + $0x468] sm:$0xff] }
  0x72   :  { %2148 = vmatprep.subr.bf16.mxu0 %v2147_v48  ;;  %v197_v48 = vld [vmem:[%s4712_s1 + $0x478] sm:$0xff]  ;;  %v786_v13 = vld [vmem:[%s4719_s8 + $0x108] sm:$0xff] }
  0x73   :  { %v2175_v50 = vpack.c.bf16 %v197_v48, %v195_v47  ;;  %v2309_v48 = vpack.c.bf16 %v766_v40, %v762_v39  ;;  %v790_v14 = vld [vmem:[%s4719_s8 + $0x128] sm:$0xff] }
  0x74   :  { %v794_v25 = vld [vmem:[%s4719_s8 + $0x148] sm:$0xff] }
  0x75   :  { %2150 = vmatpush1.bf16.msra.mxu0 %v2149_v53  ;;  %v199_v53 = vld [vmem:[%s4712_s1 + $0x488] sm:$0xff] }
  0x76   :  { %2152 = vmatprep.subr.bf16.mxu0 %v2151_v54  ;;  %v201_v54 = vld [vmem:[%s4712_s1 + $0x498] sm:$0xff]  ;;  %v798_v26 = vld [vmem:[%s4719_s8 + $0x168] sm:$0xff] }
  0x77   :  { %v2179_v56 = vpack.c.bf16 %v201_v54, %v199_v53  ;;  %v770_v53 = vld [vmem:[%s4719_s8 + $0x88] sm:$0xff] }
  0x78   :  { %v774_v54 = vld [vmem:[%s4719_s8 + $0xa8] sm:$0xff] }
  0x79   :  { %2154 = vmatpush1.bf16.msra.mxu0 %v2153_v59  ;;  %v203_v59 = vld [vmem:[%s4712_s1 + $0x4a8] sm:$0xff] }
  0x7a   :  { %2156 = vmatprep.subr.bf16.mxu0 %v2155_v62  ;;  %v2183_v62 = vpack.c.bf16 %v205_v60, %v203_v59  ;;  %v237_v59 = vld [vmem:[%s4712_s1 + $0x5b8] sm:$0xff]  ;;  %v802_v39 = vld [vmem:[%s4719_s8 + $0x188] sm:$0xff] }
  0x7b   :  { %v806_v40 = vld [vmem:[%s4719_s8 + $0x1a8] sm:$0xff] }
  0x7d   :  { %2158 = vmatpush1.bf16.msra.mxu0 %v2157_v7  ;;  %v211_v7 = vld [vmem:[%s4712_s1 + $0x4e8] sm:$0xff] }
  0x7e   :  { %2160 = vmatprep.subr.bf16.mxu0 %v2159_v10  ;;  %v2191_v10 = vpack.c.bf16 %v213_v8, %v211_v7  ;;  %v241_v7 = vld [vmem:[%s4712_s1 + $0x5d8] sm:$0xff] }
  0x81   :  { %2162 = vmatpush1.bf16.msra.mxu0 %v2161_v19  ;;  %v219_v19 = vld [vmem:[%s4712_s1 + $0x528] sm:$0xff] }
  0x82   :  { %2164 = vmatprep.subr.bf16.mxu0 %v2163_v21  ;;  %v2197_v21 = vpack.c.bf16 %v216_v18, %v214_v17  ;;  %v2199_v22 = vpack.c.bf16 %v221_v20, %v219_v19  ;;  %v240_v17 = vld [vmem:[%s4712_s1 + $0x5d0] sm:$0xff]  ;;  %v243_v18 = vld [vmem:[%s4712_s1 + $0x5e8] sm:$0xff]  ;;  %v245_v19 = vld [vmem:[%s4712_s1 + $0x5f8] sm:$0xff] }
  0x84   :  { %458 = vmatmul.mubr.f32.vlgmr.msra.gmra.mrb[0].mxu0 %v48_v31  ;;  %v224_v31 = vld [vmem:[%s4712_s1 + $0x550] sm:$0xff] }
  0x85   :  { %2166 = vmatpush1.bf16.msra.mxu0 %v2165_v32  ;;  %528 = vmatprep.mubr.f32.mxu0 %v51_v37  ;;  %v312_v32 = vlaneseq  ;;  %v757_v37 = vld [vmem:[%s4719_s8 + $0x20] sm:$0xff]  ;;  %v2205_v38 = vpack.c.bf16 %v224_v31, %v222_v30  ;;  %v244_v30 = vld [vmem:[%s4712_s1 + $0x5f0] sm:$0xff]  ;;  %v247_v31 = vld [vmem:[%s4712_s1 + $0x608] sm:$0xff] }
  0x86   :  { %2168 = vmatprep.subr.bf16.mxu0 %v2167_v34  ;;  %v229_v34 = vld [vmem:[%s4712_s1 + $0x578] sm:$0xff]  ;;  %v2307_v47 = vpack.c.bf16 %v757_v37, %v753_v36  ;;  %v793_v36 = vld [vmem:[%s4719_s8 + $0x140] sm:$0xff] }
  0x87   :  { %v609_v35 = vand.u32 127, %v312_v32  ;;  %v2207_v41 = vpack.c.bf16 %v229_v34, %v227_v33  ;;  %v249_v33 = vld [vmem:[%s4712_s1 + $0x618] sm:$0xff]  ;;  %v797_v37 = vld [vmem:[%s4719_s8 + $0x160] sm:$0xff] }
  0x89   :  { %2170 = vmatpush1.bf16.msra.mxu0 %v2169_v42  ;;  %v226_v42 = vld [vmem:[%s4712_s1 + $0x560] sm:$0xff] }
  0x8a   :  { %2172 = vmatprep.subr.bf16.mxu0 %v2171_v44  ;;  %v231_v44 = vld [vmem:[%s4712_s1 + $0x588] sm:$0xff]  ;;  %v2209_v51 = vpack.c.bf16 %v228_v43, %v226_v42  ;;  %v246_v42 = vld [vmem:[%s4712_s1 + $0x600] sm:$0xff]  ;;  %v248_v43 = vld [vmem:[%s4712_s1 + $0x610] sm:$0xff] }
  0x8d   :  { %2174 = vmatpush1.bf16.msra.mxu0 %v2173_v49  ;;  %v761_v49 = vld [vmem:[%s4719_s8 + $0x40] sm:$0xff] }
  0x8e   :  { %2176 = vmatprep.subr.bf16.mxu0 %v2175_v50  ;;  %v765_v50 = vld [vmem:[%s4719_s8 + $0x60] sm:$0xff] }
  0x8f   :  { %v2311_v60 = vpack.c.bf16 %v765_v50, %v761_v49  ;;  %v805_v49 = vld [vmem:[%s4719_s8 + $0x1a0] sm:$0xff] }
  0x90   :  { %v50_v50 = vld [vmem:[%s4711_s0 + $0x20] sm:$0xff] }
  0x91   :  { %2178 = vmatpush1.bf16.msra.mxu0 %v2177_v55  ;;  %v2211_v55 = vpack.c.bf16 %v233_v45, %v231_v44  ;;  %v251_v44 = vld [vmem:[%s4712_s1 + $0x628] sm:$0xff]  ;;  %v253_v45 = vld [vmem:[%s4712_s1 + $0x638] sm:$0xff] }
  0x92   :  { %2180 = vmatprep.subr.bf16.mxu0 %v2179_v56  ;;  %v613_v46 = vpop.permute.xlu0 %612  ;;  %v230_v56 = vld [vmem:[%s4712_s1 + $0x580] sm:$0xff] }
  0x93   :  { %vm614_vm4 = vcmp.eq.s32.totalorder %v609_v35, %v613_v46  ;;  %v2213_v0 = vpack.c.bf16 %v232_v57, %v230_v56  ;;  %v2325_v35 = vpack.c.bf16 %v798_v26, %v794_v25  ;;  %v2327_v46 = vpack.c.bf16 %v797_v37, %v793_v36  ;;  %v252_v56 = vld [vmem:[%s4712_s1 + $0x630] sm:$0xff]  ;;  %v53_v57 = vld [vmem:[%s4711_s0 + $0x38] sm:$0xff]  ;;  %v834_v25 = vld [vmem:[%s4719_s8 + $0x288] sm:$0xff] }
  0x94   :  { %v1967_v52 = vsel %vm614_vm4, 1.0, %v2854_v28  ;;  %v838_v26 = vld [vmem:[%s4719_s8 + $0x2a8] sm:$0xff]  ;;  %v833_v36 = vld [vmem:[%s4719_s8 + $0x280] sm:$0xff] }
  0x95   :  { %2182 = vmatpush1.bf16.msra.mxu0 %v2181_v61  ;;  %1970 = vmatmul.mubr.msk.f32.vlgmr.msra.gmra.mrb[0].mxu1 %vm629_vm3, %v1967_v52  ;;  %v2313_v61 = vpack.c.bf16 %v774_v54, %v770_v53  ;;  %v810_v52 = vld [vmem:[%s4719_s8 + $0x1c8] sm:$0xff]  ;;  %v2231_v54 = vpack.c.bf16 %v253_v45, %v251_v44  ;;  %v837_v37 = vld [vmem:[%s4719_s8 + $0x2a0] sm:$0xff]  ;;  %v273_v45 = vld [vmem:[%s4712_s1 + $0x6d8] sm:$0xff] }
  0x96   :  { %2184 = vmatprep.subr.bf16.mxu0 %v2183_v62  ;;  %2308 = vmatpush1.bf16.msra.mxu1 %v2307_v47  ;;  %v769_v62 = vld [vmem:[%s4719_s8 + $0x80] sm:$0xff]  ;;  %v2329_v47 = vpack.c.bf16 %v806_v40, %v802_v39  ;;  %v814_v53 = vld [vmem:[%s4719_s8 + $0x1e8] sm:$0xff] }
  0x97   :  { %2310 = vmatprep.subr.bf16.mxu1 %v2309_v48  ;;  %v2315_v8 = vpack.c.bf16 %v773_v63, %v769_v62  ;;  %v801_v48 = vld [vmem:[%s4719_s8 + $0x180] sm:$0xff]  ;;  %v842_v39 = vld [vmem:[%s4719_s8 + $0x2c8] sm:$0xff] }
  0x98   :  { %v809_v62 = vld [vmem:[%s4719_s8 + $0x1c0] sm:$0xff]  ;;  %v846_v40 = vld [vmem:[%s4719_s8 + $0x2e8] sm:$0xff] }
  0x99   :  { %2186 = vmatpush1.bf16.msra.mxu0 %v2185_v3  ;;  %v2215_v3 = vpack.c.bf16 %v237_v59, %v235_v58  ;;  %v255_v58 = vld [vmem:[%s4712_s1 + $0x648] sm:$0xff]  ;;  %v257_v59 = vld [vmem:[%s4712_s1 + $0x658] sm:$0xff]  ;;  %v813_v63 = vld [vmem:[%s4719_s8 + $0x1e0] sm:$0xff] }
  0x9a   :  { %2188 = vmatprep.subr.bf16.mxu0 %v2187_v4  ;;  %v234_v4 = vld [vmem:[%s4712_s1 + $0x5a0] sm:$0xff]  ;;  %2312 = vmatpush1.bf16.msra.mxu1 %v2311_v60  ;;  %v2331_v60 = vpack.c.bf16 %v805_v49, %v801_v48  ;;  %v271_v44 = vld [vmem:[%s4712_s1 + $0x6c8] sm:$0xff] }
  0x9b   :  { %2314 = vmatprep.subr.bf16.mxu1 %v2313_v61  ;;  %v2217_v12 = vpack.c.bf16 %v236_v5, %v234_v4  ;;  %v2333_v61 = vpack.c.bf16 %v814_v53, %v810_v52  ;;  %v254_v4 = vld [vmem:[%s4712_s1 + $0x640] sm:$0xff]  ;;  %v256_v5 = vld [vmem:[%s4712_s1 + $0x650] sm:$0xff]  ;;  %v2251_v49 = vpack.c.bf16 %v273_v45, %v271_v44  ;;  %v275_v52 = vld [vmem:[%s4712_s1 + $0x6e8] sm:$0xff] }
  0x9c   :  { %v277_v53 = vld [vmem:[%s4712_s1 + $0x6f8] sm:$0xff]  ;;  %v52_v45 = vld [vmem:[%s4711_s0 + $0x30] sm:$0xff] }
  0x9d   :  { %2190 = vmatpush1.bf16.msra.mxu0 %v2189_v9  ;;  %v2317_v9 = vpack.c.bf16 %v782_v2, %v778_v1  ;;  %v818_v1 = vld [vmem:[%s4719_s8 + $0x208] sm:$0xff] }
  0x9e   :  { %2192 = vmatprep.subr.bf16.mxu0 %v2191_v10  ;;  %v777_v10 = vld [vmem:[%s4719_s8 + $0xc0] sm:$0xff]  ;;  %2316 = vmatpush1.bf16.msra.mxu1 %v2315_v8  ;;  %v822_v2 = vld [vmem:[%s4719_s8 + $0x228] sm:$0xff]  ;;  %v2335_v8 = vpack.c.bf16 %v813_v63, %v809_v62  ;;  %v280_v63 = vld [vmem:[%s4712_s1 + $0x710] sm:$0xff] }
  0x9f   :  { %v2319_v20 = vpack.c.bf16 %v781_v11, %v777_v10  ;;  %2318 = vmatprep.subr.bf16.mxu1 %v2317_v9  ;;  %v2337_v9 = vpack.c.bf16 %v822_v2, %v818_v1  ;;  %v817_v10 = vld [vmem:[%s4719_s8 + $0x200] sm:$0xff]  ;;  %v285_v1 = vld [vmem:[%s4712_s1 + $0x738] sm:$0xff] }
  0xa0   :  { %v821_v11 = vld [vmem:[%s4719_s8 + $0x220] sm:$0xff] }
  0xa1   :  { %2194 = vmatpush1.bf16.msra.mxu0 %v2193_v15  ;;  %v2219_v15 = vpack.c.bf16 %v241_v7, %v239_v6  ;;  %v259_v6 = vld [vmem:[%s4712_s1 + $0x668] sm:$0xff]  ;;  %v261_v7 = vld [vmem:[%s4712_s1 + $0x678] sm:$0xff]  ;;  %v278_v62 = vld [vmem:[%s4712_s1 + $0x700] sm:$0xff] }
  0xa2   :  { %2196 = vmatprep.subr.bf16.mxu0 %v2195_v16  ;;  %v238_v16 = vld [vmem:[%s4712_s1 + $0x5c0] sm:$0xff]  ;;  %2320 = vmatpush1.bf16.msra.mxu1 %v2319_v20  ;;  %v2339_v20 = vpack.c.bf16 %v821_v11, %v817_v10  ;;  %v2261_v2 = vpack.c.bf16 %v280_v63, %v278_v62  ;;  %v288_v11 = vld [vmem:[%s4712_s1 + $0x750] sm:$0xff] }
  0xa3   :  { %v2221_v24 = vpack.c.bf16 %v240_v17, %v238_v16  ;;  %v258_v16 = vld [vmem:[%s4712_s1 + $0x660] sm:$0xff]  ;;  %v260_v17 = vld [vmem:[%s4712_s1 + $0x670] sm:$0xff] }
  0xa4   :  { %v286_v10 = vld [vmem:[%s4712_s1 + $0x740] sm:$0xff] }
  0xa5   :  { %2198 = vmatpush1.bf16.msra.mxu0 %v2197_v21  ;;  %v2321_v21 = vpack.c.bf16 %v790_v14, %v786_v13  ;;  %v826_v13 = vld [vmem:[%s4719_s8 + $0x248] sm:$0xff] }
  0xa6   :  { %2200 = vmatprep.subr.bf16.mxu0 %v2199_v22  ;;  %v785_v22 = vld [vmem:[%s4719_s8 + $0x100] sm:$0xff]  ;;  %v830_v14 = vld [vmem:[%s4719_s8 + $0x268] sm:$0xff] }
  0xa7   :  { %v2323_v34 = vpack.c.bf16 %v789_v23, %v785_v22  ;;  %2322 = vmatprep.subr.bf16.mxu1 %v2321_v21  ;;  %v2341_v21 = vpack.c.bf16 %v830_v14, %v826_v13  ;;  %v825_v22 = vld [vmem:[%s4719_s8 + $0x240] sm:$0xff]  ;;  %v293_v13 = vld [vmem:[%s4712_s1 + $0x778] sm:$0xff]  ;;  %v2269_v14 = vpack.c.bf16 %v288_v11, %v286_v10 }
  0xa8   :  { %v829_v23 = vld [vmem:[%s4719_s8 + $0x260] sm:$0xff]  ;;  %v760_v10 = vld [vmem:[%s4719_s8 + $0x38] sm:$0xff] }
  0xa9   :  { %2202 = vmatpush1.bf16.msra.mxu0 %v2201_v27  ;;  %v2223_v27 = vpack.c.bf16 %v245_v19, %v243_v18  ;;  %2324 = vmatpush1.bf16.msra.mxu1 %v2323_v34  ;;  %v263_v18 = vld [vmem:[%s4712_s1 + $0x688] sm:$0xff]  ;;  %v265_v19 = vld [vmem:[%s4712_s1 + $0x698] sm:$0xff]  ;;  %v2343_v34 = vpack.c.bf16 %v829_v23, %v825_v22  ;;  %v294_v22 = vld [vmem:[%s4712_s1 + $0x780] sm:$0xff] }
  0xaa   :  { %2204 = vmatprep.subr.bf16.mxu0 %v2203_v29  ;;  %v242_v29 = vld [vmem:[%s4712_s1 + $0x5e0] sm:$0xff]  ;;  %2326 = vmatprep.subr.bf16.mxu1 %v2325_v35  ;;  %v2345_v35 = vpack.c.bf16 %v838_v26, %v834_v25  ;;  %v296_v23 = vld [vmem:[%s4712_s1 + $0x790] sm:$0xff]  ;;  %v301_v25 = vld [vmem:[%s4712_s1 + $0x7b8] sm:$0xff] }
  0xab   :  { %v2277_v26 = vpack.c.bf16 %v296_v23, %v294_v22  ;;  %v1053_v23 = vld [vmem:[%s4720_s9 + $0x40] sm:$0xff] }
  0xad   :  { %2206 = vmatpush1.bf16.msra.mxu0 %v2205_v38  ;;  %v2225_v38 = vpack.c.bf16 %v244_v30, %v242_v29  ;;  %2328 = vmatpush1.bf16.msra.mxu1 %v2327_v46  ;;  %v262_v29 = vld [vmem:[%s4712_s1 + $0x680] sm:$0xff]  ;;  %v264_v30 = vld [vmem:[%s4712_s1 + $0x690] sm:$0xff]  ;;  %v2347_v46 = vpack.c.bf16 %v837_v37, %v833_v36 }
  0xae   :  { %2208 = vmatprep.subr.bf16.mxu0 %v2207_v41  ;;  %v2227_v41 = vpack.c.bf16 %v249_v33, %v247_v31  ;;  %2330 = vmatprep.subr.bf16.mxu1 %v2329_v47  ;;  %v267_v31 = vld [vmem:[%s4712_s1 + $0x6a8] sm:$0xff]  ;;  %v269_v33 = vld [vmem:[%s4712_s1 + $0x6b8] sm:$0xff]  ;;  %v2349_v47 = vpack.c.bf16 %v846_v40, %v842_v39  ;;  %v302_v36 = vld [vmem:[%s4712_s1 + $0x7c0] sm:$0xff] }
  0xaf   :  { %v304_v37 = vld [vmem:[%s4712_s1 + $0x7d0] sm:$0xff]  ;;  %v309_v39 = vld [vmem:[%s4712_s1 + $0x7f8] sm:$0xff] }
  0xb0   :  { %v2285_v40 = vpack.c.bf16 %v304_v37, %v302_v36  ;;  %v1069_v37 = vld [vmem:[%s4720_s9 + $0xc0] sm:$0xff] }
  0xb1   :  { %2210 = vmatpush1.bf16.msra.mxu0 %v2209_v51  ;;  %v2229_v51 = vpack.c.bf16 %v248_v43, %v246_v42  ;;  %2332 = vmatpush1.bf16.msra.mxu1 %v2331_v60  ;;  %v266_v42 = vld [vmem:[%s4712_s1 + $0x6a0] sm:$0xff]  ;;  %v268_v43 = vld [vmem:[%s4712_s1 + $0x6b0] sm:$0xff] }
  0xb2   :  { %2212 = vmatprep.subr.bf16.mxu0 %v2211_v55  ;;  %v250_v55 = vld [vmem:[%s4712_s1 + $0x620] sm:$0xff]  ;;  %2334 = vmatprep.subr.bf16.mxu1 %v2333_v61  ;;  %v2249_v48 = vpack.c.bf16 %v268_v43, %v266_v42  ;;  %v308_v43 = vld [vmem:[%s4712_s1 + $0x7f0] sm:$0xff] }
  0xb3   :  { %v306_v42 = vld [vmem:[%s4712_s1 + $0x7e0] sm:$0xff] }
  0xb4   :  { %v2289_v44 = vpack.c.bf16 %v308_v43, %v306_v42  ;;  %v1077_v43 = vld [vmem:[%s4720_s9 + $0x100] sm:$0xff] }
  0xb5   :  { %2214 = vmatpush1.bf16.msra.mxu0 %v2213_v0  ;;  %v2233_v0 = vpack.c.bf16 %v252_v56, %v250_v55  ;;  %2336 = vmatpush1.bf16.msra.mxu1 %v2335_v8  ;;  %v2255_v55 = vpack.c.bf16 %v277_v53, %v275_v52  ;;  %v274_v56 = vld [vmem:[%s4712_s1 + $0x6e0] sm:$0xff] }
  0xb6   :  { %2216 = vmatprep.subr.bf16.mxu0 %v2215_v3  ;;  %v2235_v3 = vpack.c.bf16 %v257_v59, %v255_v58  ;;  %2338 = vmatprep.subr.bf16.mxu1 %v2337_v9  ;;  %v279_v58 = vld [vmem:[%s4712_s1 + $0x708] sm:$0xff]  ;;  %v281_v59 = vld [vmem:[%s4712_s1 + $0x718] sm:$0xff]  ;;  %v849_v52 = vld [vmem:[%s4719_s8 + $0x300] sm:$0xff] }
  0xb7   :  { %v2259_v61 = vpack.c.bf16 %v281_v59, %v279_v58  ;;  %v853_v53 = vld [vmem:[%s4719_s8 + $0x320] sm:$0xff] }
  0xb8   :  { %v861_v59 = vld [vmem:[%s4719_s8 + $0x360] sm:$0xff] }
  0xb9   :  { %2218 = vmatpush1.bf16.msra.mxu0 %v2217_v12  ;;  %v2237_v12 = vpack.c.bf16 %v256_v5, %v254_v4  ;;  %2340 = vmatpush1.bf16.msra.mxu1 %v2339_v20  ;;  %v282_v4 = vld [vmem:[%s4712_s1 + $0x720] sm:$0xff]  ;;  %v284_v5 = vld [vmem:[%s4712_s1 + $0x730] sm:$0xff] }
  0xba   :  { %2220 = vmatprep.subr.bf16.mxu0 %v2219_v15  ;;  %v2239_v15 = vpack.c.bf16 %v261_v7, %v259_v6  ;;  %2342 = vmatprep.subr.bf16.mxu1 %v2341_v21  ;;  %v287_v6 = vld [vmem:[%s4712_s1 + $0x748] sm:$0xff]  ;;  %v289_v7 = vld [vmem:[%s4712_s1 + $0x758] sm:$0xff]  ;;  %v2265_v8 = vpack.c.bf16 %v284_v5, %v282_v4 }
  0xbb   :  { %v2267_v9 = vpack.c.bf16 %v289_v7, %v287_v6  ;;  %v873_v6 = vld [vmem:[%s4719_s8 + $0x3c0] sm:$0xff] }
  0xbc   :  { %v877_v7 = vld [vmem:[%s4719_s8 + $0x3e0] sm:$0xff] }
  0xbd   :  { %2222 = vmatpush1.bf16.msra.mxu0 %v2221_v24  ;;  %v2241_v24 = vpack.c.bf16 %v260_v17, %v258_v16  ;;  %2344 = vmatpush1.bf16.msra.mxu1 %v2343_v34  ;;  %v290_v16 = vld [vmem:[%s4712_s1 + $0x760] sm:$0xff]  ;;  %v292_v17 = vld [vmem:[%s4712_s1 + $0x770] sm:$0xff] }
  0xbe   :  { %2224 = vmatprep.subr.bf16.mxu0 %v2223_v27  ;;  %v2243_v27 = vpack.c.bf16 %v265_v19, %v263_v18  ;;  %2346 = vmatprep.subr.bf16.mxu1 %v2345_v35  ;;  %v295_v18 = vld [vmem:[%s4712_s1 + $0x788] sm:$0xff]  ;;  %v297_v19 = vld [vmem:[%s4712_s1 + $0x798] sm:$0xff]  ;;  %v2273_v20 = vpack.c.bf16 %v292_v17, %v290_v16  ;;  %v1045_v17 = vld [vmem:[%s4720_s9] sm:$0xff] }
  0xbf   :  { %v2275_v21 = vpack.c.bf16 %v297_v19, %v295_v18  ;;  %v1049_v18 = vld [vmem:[%s4720_s9 + $0x20] sm:$0xff] }
  0xc0   :  { %v3989_v19 = vpack.c.bf16 %v1049_v18, %v1045_v17 }
  0xc1   :  { %2226 = vmatpush1.bf16.msra.mxu0 %v2225_v38  ;;  %v2245_v38 = vpack.c.bf16 %v264_v30, %v262_v29  ;;  %2348 = vmatpush1.bf16.msra.mxu1 %v2347_v46  ;;  %v298_v29 = vld [vmem:[%s4712_s1 + $0x7a0] sm:$0xff]  ;;  %v300_v30 = vld [vmem:[%s4712_s1 + $0x7b0] sm:$0xff] }
  0xc2   :  { %2228 = vmatprep.subr.bf16.mxu0 %v2227_v41  ;;  %v2247_v41 = vpack.c.bf16 %v269_v33, %v267_v31  ;;  %2350 = vmatprep.subr.bf16.mxu1 %v2349_v47  ;;  %v303_v31 = vld [vmem:[%s4712_s1 + $0x7c8] sm:$0xff]  ;;  %v305_v33 = vld [vmem:[%s4712_s1 + $0x7d8] sm:$0xff]  ;;  %v2281_v34 = vpack.c.bf16 %v300_v30, %v298_v29  ;;  %v841_v46 = vld [vmem:[%s4719_s8 + $0x2c0] sm:$0xff] }
  0xc3   :  { %v2283_v35 = vpack.c.bf16 %v305_v33, %v303_v31  ;;  %v845_v47 = vld [vmem:[%s4719_s8 + $0x2e0] sm:$0xff] }
  0xc4   :  { %529 = vmatmul.mubr.f32.vlgmr.msra.gmra.mrb[0].mxu0 %v50_v50  ;;  %v270_v50 = vld [vmem:[%s4712_s1 + $0x6c0] sm:$0xff] }
  0xc5   :  { %2230 = vmatpush1.bf16.msra.mxu0 %v2229_v51  ;;  %599 = vmatprep.mubr.f32.mxu0 %v53_v57  ;;  %v272_v51 = vld [vmem:[%s4712_s1 + $0x6d0] sm:$0xff]  ;;  %v1061_v30 = vld [vmem:[%s4720_s9 + $0x80] sm:$0xff] }
  0xc6   :  { %2232 = vmatprep.subr.bf16.mxu0 %v2231_v54  ;;  %v2253_v54 = vpack.c.bf16 %v272_v51, %v270_v50  ;;  %v276_v57 = vld [vmem:[%s4712_s1 + $0x6f0] sm:$0xff]  ;;  %v854_v50 = vld [vmem:[%s4719_s8 + $0x328] sm:$0xff]  ;;  %v1065_v31 = vld [vmem:[%s4720_s9 + $0xa0] sm:$0xff] }
  0xc7   :  { %v2257_v60 = vpack.c.bf16 %v276_v57, %v274_v56  ;;  %v862_v56 = vld [vmem:[%s4719_s8 + $0x368] sm:$0xff]  ;;  %v857_v57 = vld [vmem:[%s4719_s8 + $0x340] sm:$0xff]  ;;  %v4025_v33 = vpack.c.bf16 %v1065_v31, %v1061_v30 }
  0xc8   :  { %v2359_v62 = vpack.c.bf16 %v861_v59, %v857_v57  ;;  %v1106_v59 = vld [vmem:[%s4720_s9 + $0x1e8] sm:$0xff] }
  0xc9   :  { %2234 = vmatpush1.bf16.msra.mxu0 %v2233_v0  ;;  %v283_v0 = vld [vmem:[%s4712_s1 + $0x728] sm:$0xff] }
  0xca   :  { %2236 = vmatprep.subr.bf16.mxu0 %v2235_v3  ;;  %v2263_v3 = vpack.c.bf16 %v285_v1, %v283_v0  ;;  %v865_v0 = vld [vmem:[%s4719_s8 + $0x380] sm:$0xff] }
  0xcb   :  { %v869_v1 = vld [vmem:[%s4719_s8 + $0x3a0] sm:$0xff] }
  0xcc   :  { %v2363_v4 = vpack.c.bf16 %v869_v1, %v865_v0  ;;  %v4120_v0 = vshrl.u32 %v312_v32, 7  ;;  %v733_v32 = vld [vmem:[%s4718_s7] sm:$0x3] }
  0xcd   :  { %2238 = vmatpush1.bf16.msra.mxu0 %v2237_v12  ;;  %v291_v12 = vld [vmem:[%s4712_s1 + $0x768] sm:$0xff] }
  0xce   :  { %2240 = vmatprep.subr.bf16.mxu0 %v2239_v15  ;;  %v2271_v15 = vpack.c.bf16 %v293_v13, %v291_v12  ;;  %v4124_v1 = vsub.s32 1, %v4120_v0 }
  0xd1   :  { %2242 = vmatpush1.bf16.msra.mxu0 %v2241_v24  ;;  %v299_v24 = vld [vmem:[%s4712_s1 + $0x7a8] sm:$0xff] }
  0xd2   :  { %2244 = vmatprep.subr.bf16.mxu0 %v2243_v27  ;;  %v2279_v27 = vpack.c.bf16 %v301_v25, %v299_v24  ;;  %v1057_v24 = vld [vmem:[%s4720_s9 + $0x60] sm:$0xff] }
  0xd3   :  { %v4007_v25 = vpack.c.bf16 %v1057_v24, %v1053_v23 }
  0xd5   :  { %2246 = vmatpush1.bf16.msra.mxu0 %v2245_v38  ;;  %v307_v38 = vld [vmem:[%s4712_s1 + $0x7e8] sm:$0xff]  ;;  %s2859_s1 = smov [#allocation4]  }
  0xd6   :  { %2248 = vmatprep.subr.bf16.mxu0 %v2247_v41  ;;  %v2287_v41 = vpack.c.bf16 %v309_v39, %v307_v38  ;;  %v1073_v38 = vld [vmem:[%s4720_s9 + $0xe0] sm:$0xff] }
  0xd7   :  { %v4043_v39 = vpack.c.bf16 %v1073_v38, %v1069_v37  ;;  %v768_v38 = vld [vmem:[%s4719_s8 + $0x78] sm:$0xff] }
  0xd9   :  { %2250 = vmatpush1.bf16.msra.mxu0 %v2249_v48  ;;  %v2351_v48 = vpack.c.bf16 %v845_v47, %v841_v46  ;;  %v1086_v46 = vld [vmem:[%s4720_s9 + $0x148] sm:$0xff] }
  0xda   :  { %2252 = vmatprep.subr.bf16.mxu0 %v2251_v49  ;;  %v850_v49 = vld [vmem:[%s4719_s8 + $0x308] sm:$0xff] }
  0xdb   :  { %2352 = vmatpush1.bf16.msra.mxu1 %v2351_v48  ;;  %v2353_v51 = vpack.c.bf16 %v854_v50, %v850_v49  ;;  %v1090_v47 = vld [vmem:[%s4720_s9 + $0x168] sm:$0xff]  ;;  %v1085_v49 = vld [vmem:[%s4720_s9 + $0x140] sm:$0xff] }
  0xdc   :  { %v4071_v48 = vpack.c.bf16 %v1090_v47, %v1086_v46  ;;  %v1089_v50 = vld [vmem:[%s4720_s9 + $0x160] sm:$0xff] }
  0xdd   :  { %2254 = vmatpush1.bf16.msra.mxu0 %v2253_v54  ;;  %v2355_v54 = vpack.c.bf16 %v853_v53, %v849_v52  ;;  %2354 = vmatprep.subr.bf16.mxu1 %v2353_v51  ;;  %v4079_v51 = vpack.c.bf16 %v1089_v50, %v1085_v49  ;;  %v1094_v52 = vld [vmem:[%s4720_s9 + $0x188] sm:$0xff]  ;;  %v763_v49 = vld [vmem:[%s4719_s8 + $0x50] sm:$0xff] }
  0xde   :  { %2256 = vmatprep.subr.bf16.mxu0 %v2255_v55  ;;  %v858_v55 = vld [vmem:[%s4719_s8 + $0x348] sm:$0xff]  ;;  %v767_v50 = vld [vmem:[%s4719_s8 + $0x70] sm:$0xff] }
  0xdf   :  { %2356 = vmatpush1.bf16.msra.mxu1 %v2355_v54  ;;  %v2357_v58 = vpack.c.bf16 %v862_v56, %v858_v55  ;;  %v1098_v53 = vld [vmem:[%s4720_s9 + $0x1a8] sm:$0xff]  ;;  %v1093_v55 = vld [vmem:[%s4720_s9 + $0x180] sm:$0xff] }
  0xe0   :  { %v4089_v54 = vpack.c.bf16 %v1098_v53, %v1094_v52  ;;  %v1097_v56 = vld [vmem:[%s4720_s9 + $0x1a0] sm:$0xff]  ;;  %v772_v52 = vld [vmem:[%s4719_s8 + $0x98] sm:$0xff] }
  0xe1   :  { %2258 = vmatpush1.bf16.msra.mxu0 %v2257_v60  ;;  %v866_v60 = vld [vmem:[%s4719_s8 + $0x388] sm:$0xff]  ;;  %2358 = vmatprep.subr.bf16.mxu1 %v2357_v58  ;;  %v4097_v57 = vpack.c.bf16 %v1097_v56, %v1093_v55  ;;  %v776_v53 = vld [vmem:[%s4719_s8 + $0xb8] sm:$0xff]  ;;  %v2375_v55 = vpack.c.bf16 %v767_v50, %v763_v49  ;;  %v823_v49 = vld [vmem:[%s4719_s8 + $0x230] sm:$0xff] }
  0xe2   :  { %2260 = vmatprep.subr.bf16.mxu0 %v2259_v61  ;;  %v870_v61 = vld [vmem:[%s4719_s8 + $0x3a8] sm:$0xff]  ;;  %v2377_v56 = vpack.c.bf16 %v776_v53, %v772_v52  ;;  %v828_v50 = vld [vmem:[%s4719_s8 + $0x258] sm:$0xff] }
  0xe3   :  { %v2361_v63 = vpack.c.bf16 %v870_v61, %v866_v60  ;;  %2360 = vmatpush1.bf16.msra.mxu1 %v2359_v62  ;;  %v1102_v58 = vld [vmem:[%s4720_s9 + $0x1c8] sm:$0xff]  ;;  %v1101_v61 = vld [vmem:[%s4720_s9 + $0x1c0] sm:$0xff]  ;;  %v832_v52 = vld [vmem:[%s4719_s8 + $0x278] sm:$0xff] }
  0xe4   :  { %v4107_v60 = vpack.c.bf16 %v1106_v59, %v1102_v58  ;;  %v1105_v62 = vld [vmem:[%s4720_s9 + $0x1e0] sm:$0xff]  ;;  %v771_v58 = vld [vmem:[%s4719_s8 + $0x90] sm:$0xff] }
  0xe5   :  { %2262 = vmatpush1.bf16.msra.mxu0 %v2261_v2  ;;  %v874_v2 = vld [vmem:[%s4719_s8 + $0x3c8] sm:$0xff]  ;;  %2362 = vmatprep.subr.bf16.mxu1 %v2361_v63  ;;  %v4115_v63 = vpack.c.bf16 %v1105_v62, %v1101_v61  ;;  %v775_v59 = vld [vmem:[%s4719_s8 + $0xb0] sm:$0xff]  ;;  %v780_v61 = vld [vmem:[%s4719_s8 + $0xd8] sm:$0xff] }
  0xe6   :  { %2264 = vmatprep.subr.bf16.mxu0 %v2263_v3  ;;  %v878_v3 = vld [vmem:[%s4719_s8 + $0x3e8] sm:$0xff]  ;;  %v784_v62 = vld [vmem:[%s4719_s8 + $0xf8] sm:$0xff] }
  0xe7   :  { %v2365_v5 = vpack.c.bf16 %v878_v3, %v874_v2  ;;  %2364 = vmatpush1.bf16.msra.mxu1 %v2363_v4  ;;  %v714_v2 = vld [vmem:[%s4717_s6] sm:$0x3]  ;;  %v4130_v3 = vsub.s32 0, %v4120_v0 }
  0xe8   :  { %v728_v4 = vrot.slane %v714_v2, %v4124_v1 }
  0xe9   :  { %2266 = vmatpush1.bf16.msra.mxu0 %v2265_v8  ;;  %v2367_v8 = vpack.c.bf16 %v877_v7, %v873_v6  ;;  %2366 = vmatprep.subr.bf16.mxu1 %v2365_v5  ;;  %v310_v5 = vld [vmem:[%s4713_s2] sm:$0x3]  ;;  %v718_v6 = vpop.permute.xlu0 %717  ;;  %v724_v7 = vrot.slane %v714_v2, %v4130_v3  ;;  %v2379_v2 = vpack.c.bf16 %v775_v59, %v771_v58  ;;  %v831_v58 = vld [vmem:[%s4719_s8 + $0x270] sm:$0xff]  ;;  %v836_v59 = vld [vmem:[%s4719_s8 + $0x298] sm:$0xff]  ;;  %s1953_s2 = sshll.u32 %s2859_s1, 4  ;;  %s1954_s2 = int_to_ptr.vmem [resolvable:$true] %s1953_s2 }
  0xea   :  { %2268 = vmatprep.subr.bf16.mxu0 %v2267_v9  ;;  %v756_v9 = vld [vmem:[%s4719_s8 + $0x18] sm:$0xff] }
  0xeb   :  { %2368 = vmatpush1.bf16.msra.mxu1 %v2367_v8  ;;  %v2369_v11 = vpack.c.bf16 %v760_v10, %v756_v9  ;;  %v315_v8 = vrot.slane %v310_v5, %v4130_v3  ;;  %v732_v9 = vmul.f32 %v728_v4, %v718_v6  ;;  %v742_v10 = vrot.slane %v733_v32, %v4124_v1 }
  0xec   :  { %v2381_v4 = vpack.c.bf16 %v784_v62, %v780_v61  ;;  %v840_v61 = vld [vmem:[%s4719_s8 + $0x2b8] sm:$0xff] }
  0xed   :  { %2270 = vmatpush1.bf16.msra.mxu0 %v2269_v14  ;;  %2370 = vmatprep.subr.bf16.mxu1 %v2369_v11  ;;  %v1046_v14 = vld [vmem:[%s4720_s9 + $0x8] sm:$0xff]  ;;  %v319_v11 = vrot.slane %v310_v5, %v4124_v1  ;;  %v779_v5 = vld [vmem:[%s4719_s8 + $0xd0] sm:$0xff] }
  0xee   :  { %2272 = vmatprep.subr.bf16.mxu0 %v2271_v15  ;;  %v1050_v15 = vld [vmem:[%s4720_s9 + $0x28] sm:$0xff] }
  0xef   :  { %v3981_v16 = vpack.c.bf16 %v1050_v15, %v1046_v14  ;;  %v731_v14 = vmul.f32 %v724_v7, %v718_v6  ;;  %v738_v15 = vrot.slane %v733_v32, %v4130_v3  ;;  %v783_v32 = vld [vmem:[%s4719_s8 + $0xf0] sm:$0xff]  ;;  %v788_v6 = vld [vmem:[%s4719_s8 + $0x118] sm:$0xff] }
  0xf0   :  { %v792_v7 = vld [vmem:[%s4719_s8 + $0x138] sm:$0xff] }
  0xf1   :  { %2274 = vmatpush1.bf16.msra.mxu0 %v2273_v20  ;;  %v1054_v20 = vld [vmem:[%s4720_s9 + $0x48] sm:$0xff]  ;;  %v745_v24 = vadd.f32 %v738_v15, %v731_v14  ;;  %v796_v14 = vld [vmem:[%s4719_s8 + $0x158] sm:$0xff] }
  0xf2   :  { %2276 = vmatprep.subr.bf16.mxu0 %v2275_v21  ;;  %v1058_v21 = vld [vmem:[%s4720_s9 + $0x68] sm:$0xff]  ;;  %v800_v15 = vld [vmem:[%s4719_s8 + $0x178] sm:$0xff] }
  0xf3   :  { %v3999_v22 = vpack.c.bf16 %v1058_v21, %v1054_v20  ;;  %v746_v21 = vadd.f32 %v742_v10, %v732_v9  ;;  %v2385_v9 = vpack.c.bf16 %v792_v7, %v788_v6  ;;  %v787_v10 = vld [vmem:[%s4719_s8 + $0x110] sm:$0xff]  ;;  %v848_v6 = vld [vmem:[%s4719_s8 + $0x2f8] sm:$0xff] }
  0xf5   :  { %2278 = vmatpush1.bf16.msra.mxu0 %v2277_v26  ;;  %v1062_v26 = vld [vmem:[%s4720_s9 + $0x88] sm:$0xff] }
  0xf6   :  { %2280 = vmatprep.subr.bf16.mxu0 %v2279_v27  ;;  %v1066_v27 = vld [vmem:[%s4720_s9 + $0xa8] sm:$0xff] }
  0xf7   :  { %v4017_v29 = vpack.c.bf16 %v1066_v27, %v1062_v26 }
  0xf9   :  { %2282 = vmatpush1.bf16.msra.mxu0 %v2281_v34  ;;  %v1070_v34 = vld [vmem:[%s4720_s9 + $0xc8] sm:$0xff] }
  0xfa   :  { %2284 = vmatprep.subr.bf16.mxu0 %v2283_v35  ;;  %v1074_v35 = vld [vmem:[%s4720_s9 + $0xe8] sm:$0xff] }
  0xfb   :  { %v4035_v36 = vpack.c.bf16 %v1074_v35, %v1070_v34  ;;  %v755_v35 = vld [vmem:[%s4719_s8 + $0x10] sm:$0xff] }
  0xfd   :  { %2286 = vmatpush1.bf16.msra.mxu0 %v2285_v40  ;;  %v1078_v40 = vld [vmem:[%s4720_s9 + $0x108] sm:$0xff] }
  0xfe   :  { %2288 = vmatprep.subr.bf16.mxu0 %v2287_v41  ;;  %v1082_v41 = vld [vmem:[%s4720_s9 + $0x128] sm:$0xff] }
  0xff   :  { %v4053_v42 = vpack.c.bf16 %v1082_v41, %v1078_v40 }
 0x101   :  { %2290 = vmatpush1.bf16.msra.mxu0 %v2289_v44  ;;  %v1081_v44 = vld [vmem:[%s4720_s9 + $0x120] sm:$0xff] }
 0x102   :  { %2562 = vmatprep.subr.bf16.mxu0 %v3981_v16 }
 0x104   :  { %600 = vmatmul.mubr.f32.vlgmr.msra.gmra.mrb[0].mxu0 %v52_v45  ;;  %v4061_v45 = vpack.c.bf16 %v1081_v44, %v1077_v43 }
 0x105   :  { %1531 = vmatprep.mubr.f32.mxu0 %v2854_v28  ;;  %2564 = vmatpush1.bf16.msra.mxu0 %v3989_v19 }
 0x106   :  { %2566 = vmatprep.subr.bf16.mxu0 %v3999_v22 }
 0x109   :  { %2568 = vmatpush1.bf16.msra.mxu0 %v4007_v25 }
 0x10a   :  { %2570 = vmatprep.subr.bf16.mxu0 %v4017_v29 }
 0x10d   :  { %2572 = vmatpush1.bf16.msra.mxu0 %v4025_v33 }
 0x10e   :  { %2574 = vmatprep.subr.bf16.mxu0 %v4035_v36 }
 0x111   :  { %2576 = vmatpush1.bf16.msra.mxu0 %v4043_v39 }
 0x112   :  { %2578 = vmatprep.subr.bf16.mxu0 %v4053_v42 }
 0x115   :  { %2580 = vmatpush1.bf16.msra.mxu0 %v4061_v45 }
 0x116   :  { %2582 = vmatprep.subr.bf16.mxu0 %v4071_v48 }
 0x119   :  { %2584 = vmatpush1.bf16.msra.mxu0 %v4079_v51 }
 0x11a   :  { %2586 = vmatprep.subr.bf16.mxu0 %v4089_v54 }
 0x11d   :  { %2588 = vmatpush1.bf16.msra.mxu0 %v4097_v57 }
 0x11e   :  { %2590 = vmatprep.subr.bf16.mxu0 %v4107_v60 }
 0x121   :  { %2592 = vmatpush1.bf16.msra.mxu0 %v4115_v63 }
 0x122   :  { %2626 = vmatprep.subr.bf16.mxu0 %v3981_v16 }
 0x168   :  { %v3971_v12 = vpop.f32.mrb[0].mxu1 }
 0x169   :  { %v3973_v13 = vpop.f32.mrb[1].mxu1  ;;  %2729 = vtanh.f32 %v3971_v12  ;;  %v759_v12 = vld [vmem:[%s4719_s8 + $0x30] sm:$0xff] }
 0x16a   :  { %2731 = vtanh.f32 %v3973_v13  ;;  %v764_v13 = vld [vmem:[%s4719_s8 + $0x58] sm:$0xff]  ;;  %v2371_v44 = vpack.c.bf16 %v759_v12, %v755_v35 }
 0x16b   :  { %v2373_v47 = vpack.c.bf16 %v768_v38, %v764_v13  ;;  %v816_v35 = vld [vmem:[%s4719_s8 + $0x1f8] sm:$0xff]  ;;  %v811_v13 = vld [vmem:[%s4719_s8 + $0x1d0] sm:$0xff] }
 0x16c   :  { %v815_v38 = vld [vmem:[%s4719_s8 + $0x1f0] sm:$0xff] }
 0x173   :  { %v2730_v26 = vpop.eup %2729 }
 0x174   :  { %v2732_v27 = vpop.eup %2731 }
 0x1d7   :  { %v601_v17 = vpop.f32.mrb[0].mxu0 }
 0x1d8   :  { %v2713_v18 = vadd.f32 %v601_v17, %v315_v8  ;;  %v603_v20 = vpop.f32.mrb[1].mxu0  ;;  %v2383_v8 = vpack.c.bf16 %v783_v32, %v779_v5  ;;  %v839_v5 = vld [vmem:[%s4719_s8 + $0x2b0] sm:$0xff]  ;;  %v844_v32 = vld [vmem:[%s4719_s8 + $0x2d8] sm:$0xff] }
 0x1d9   :  { %v2714_v23 = vadd.f32 %v603_v20, %v319_v11  ;;  %v791_v11 = vld [vmem:[%s4719_s8 + $0x130] sm:$0xff] }
 0x1da   :  { %2733 = vtanh.f32 %v2713_v18  ;;  %v2387_v17 = vpack.c.bf16 %v791_v11, %v787_v10  ;;  %v2389_v18 = vpack.c.bf16 %v800_v15, %v796_v14  ;;  %v795_v20 = vld [vmem:[%s4719_s8 + $0x150] sm:$0xff]  ;;  %v852_v11 = vld [vmem:[%s4719_s8 + $0x318] sm:$0xff] }
 0x1db   :  { %2735 = vtanh.f32 %v2714_v23  ;;  %v804_v23 = vld [vmem:[%s4719_s8 + $0x198] sm:$0xff]  ;;  %v847_v10 = vld [vmem:[%s4719_s8 + $0x2f0] sm:$0xff] }
 0x1dc   :  { %2737 = vtanh.f32 %v746_v21  ;;  %v799_v21 = vld [vmem:[%s4719_s8 + $0x170] sm:$0xff]  ;;  %v856_v14 = vld [vmem:[%s4719_s8 + $0x338] sm:$0xff] }
 0x1dd   :  { %2739 = vtanh.f32 %v745_v24  ;;  %v808_v24 = vld [vmem:[%s4719_s8 + $0x1b8] sm:$0xff] }
 0x1e4   :  { %v2734_v30 = vpop.eup %2733 }
 0x1e5   :  { %v2736_v31 = vpop.eup %2735  ;;  %v749_v34 = vadd.f32 %v2734_v30, %v2730_v26  ;;  %v2391_v26 = vpack.c.bf16 %v799_v21, %v795_v20  ;;  %v803_v30 = vld [vmem:[%s4719_s8 + $0x190] sm:$0xff]  ;;  %v860_v21 = vld [vmem:[%s4719_s8 + $0x358] sm:$0xff] }
 0x1e6   :  { %v750_v37 = vadd.f32 %v2736_v31, %v2732_v27  ;;  %v2738_v40 = vpop.eup %2737  ;;  %v2393_v27 = vpack.c.bf16 %v808_v24, %v804_v23  ;;  %v807_v31 = vld [vmem:[%s4719_s8 + $0x1b0] sm:$0xff]  ;;  %v864_v23 = vld [vmem:[%s4719_s8 + $0x378] sm:$0xff] }
 0x1e7   :  { %v2740_v41 = vpop.eup %2739  ;;  %v2395_v12 = vpack.c.bf16 %v807_v31, %v803_v30  ;;  %v855_v20 = vld [vmem:[%s4719_s8 + $0x330] sm:$0xff]  ;;  %v868_v31 = vld [vmem:[%s4719_s8 + $0x398] sm:$0xff] }
 0x1e8   :  { %v752_v43 = vadd.f32 %v2738_v40, %v750_v37  ;;  %v4158_v46 = vadd.f32 %v2740_v41, %v749_v34  ;;  %v812_v34 = vld [vmem:[%s4719_s8 + $0x1d8] sm:$0xff]  ;;  %v863_v30 = vld [vmem:[%s4719_s8 + $0x370] sm:$0xff] }
 0x1e9   :  { %v2397_v37 = vpack.c.bf16 %v816_v35, %v812_v34  ;;  %v820_v40 = vld [vmem:[%s4719_s8 + $0x218] sm:$0xff] }
 0x1ea   :  { %967 = vmatprep.mubr.f32.mxu1 %v752_v43  ;;  %v824_v41 = vld [vmem:[%s4719_s8 + $0x238] sm:$0xff] }
 0x1eb   :  { %968 = vmatmul.mubr.f32.vlgmr.msra.gmra.mrb[2].mxu1 %v4158_v46  ;;  %v872_v34 = vld [vmem:[%s4719_s8 + $0x3b8] sm:$0xff] }
 0x1ec   :  { %2372 = vmatpush1.bf16.msra.mxu1 %v2371_v44  ;;  %1038 = vmatprep.mubr.f32.mxu1 %v752_v43  ;;  %v2399_v43 = vpack.c.bf16 %v815_v38, %v811_v13  ;;  %v2401_v44 = vpack.c.bf16 %v824_v41, %v820_v40  ;;  %v871_v13 = vld [vmem:[%s4719_s8 + $0x3b0] sm:$0xff]  ;;  %v876_v38 = vld [vmem:[%s4719_s8 + $0x3d8] sm:$0xff] }
 0x1ed   :  { %2374 = vmatprep.subr.bf16.mxu1 %v2373_v47  ;;  %v819_v47 = vld [vmem:[%s4719_s8 + $0x210] sm:$0xff]  ;;  %v880_v40 = vld [vmem:[%s4719_s8 + $0x3f8] sm:$0xff] }
 0x1ee   :  { %v2403_v53 = vpack.c.bf16 %v823_v49, %v819_v47  ;;  %v879_v47 = vld [vmem:[%s4719_s8 + $0x3f0] sm:$0xff] }
 0x1f0   :  { %2376 = vmatpush1.bf16.msra.mxu1 %v2375_v55  ;;  %v2405_v55 = vpack.c.bf16 %v832_v52, %v828_v50  ;;  %v1052_v50 = vld [vmem:[%s4720_s9 + $0x38] sm:$0xff] }
 0x1f1   :  { %2378 = vmatprep.subr.bf16.mxu1 %v2377_v56  ;;  %v827_v56 = vld [vmem:[%s4719_s8 + $0x250] sm:$0xff] }
 0x1f2   :  { %v2407_v62 = vpack.c.bf16 %v831_v58, %v827_v56  ;;  %v1056_v56 = vld [vmem:[%s4720_s9 + $0x58] sm:$0xff] }
 0x1f3   :  { %v1060_v58 = vld [vmem:[%s4720_s9 + $0x78] sm:$0xff] }
 0x1f4   :  { %2380 = vmatpush1.bf16.msra.mxu1 %v2379_v2  ;;  %v2409_v2 = vpack.c.bf16 %v840_v61, %v836_v59  ;;  %v4376_v61 = vpack.c.bf16 %v1060_v58, %v1056_v56 }
 0x1f5   :  { %2382 = vmatprep.subr.bf16.mxu1 %v2381_v4  ;;  %v835_v4 = vld [vmem:[%s4719_s8 + $0x290] sm:$0xff] }
 0x1f6   :  { %v2411_v7 = vpack.c.bf16 %v839_v5, %v835_v4  ;;  %v1064_v4 = vld [vmem:[%s4720_s9 + $0x98] sm:$0xff] }
 0x1f7   :  { %v1068_v5 = vld [vmem:[%s4720_s9 + $0xb8] sm:$0xff] }
 0x1f8   :  { %2384 = vmatpush1.bf16.msra.mxu1 %v2383_v8  ;;  %v2413_v8 = vpack.c.bf16 %v848_v6, %v844_v32  ;;  %v4396_v6 = vpack.c.bf16 %v1068_v5, %v1064_v4 }
 0x1f9   :  { %2386 = vmatprep.subr.bf16.mxu1 %v2385_v9  ;;  %v843_v9 = vld [vmem:[%s4719_s8 + $0x2d0] sm:$0xff] }
 0x1fa   :  { %v2415_v15 = vpack.c.bf16 %v847_v10, %v843_v9  ;;  %v1072_v9 = vld [vmem:[%s4720_s9 + $0xd8] sm:$0xff] }
 0x1fb   :  { %v1076_v10 = vld [vmem:[%s4720_s9 + $0xf8] sm:$0xff] }
 0x1fc   :  { %2388 = vmatpush1.bf16.msra.mxu1 %v2387_v17  ;;  %v2417_v17 = vpack.c.bf16 %v856_v14, %v852_v11  ;;  %v4414_v14 = vpack.c.bf16 %v1076_v10, %v1072_v9 }
 0x1fd   :  { %2390 = vmatprep.subr.bf16.mxu1 %v2389_v18  ;;  %v851_v18 = vld [vmem:[%s4719_s8 + $0x310] sm:$0xff] }
 0x1fe   :  { %v2419_v24 = vpack.c.bf16 %v855_v20, %v851_v18  ;;  %v1080_v18 = vld [vmem:[%s4720_s9 + $0x118] sm:$0xff] }
 0x1ff   :  { %v1084_v20 = vld [vmem:[%s4720_s9 + $0x138] sm:$0xff] }
 0x200   :  { %2392 = vmatpush1.bf16.msra.mxu1 %v2391_v26  ;;  %v2421_v26 = vpack.c.bf16 %v864_v23, %v860_v21  ;;  %v4432_v23 = vpack.c.bf16 %v1084_v20, %v1080_v18 }
 0x201   :  { %2394 = vmatprep.subr.bf16.mxu1 %v2393_v27  ;;  %v859_v27 = vld [vmem:[%s4719_s8 + $0x350] sm:$0xff] }
 0x202   :  { %v2423_v35 = vpack.c.bf16 %v863_v30, %v859_v27  ;;  %v1088_v27 = vld [vmem:[%s4720_s9 + $0x158] sm:$0xff] }
 0x203   :  { %v1092_v30 = vld [vmem:[%s4720_s9 + $0x178] sm:$0xff] }
 0x204   :  { %2396 = vmatpush1.bf16.msra.mxu1 %v2395_v12  ;;  %v2425_v12 = vpack.c.bf16 %v872_v34, %v868_v31  ;;  %v4450_v34 = vpack.c.bf16 %v1092_v30, %v1088_v27 }
 0x205   :  { %2398 = vmatprep.subr.bf16.mxu1 %v2397_v37  ;;  %v867_v37 = vld [vmem:[%s4719_s8 + $0x390] sm:$0xff] }
 0x206   :  { %v2427_v41 = vpack.c.bf16 %v871_v13, %v867_v37  ;;  %v1096_v37 = vld [vmem:[%s4720_s9 + $0x198] sm:$0xff] }
 0x207   :  { %v1100_v13 = vld [vmem:[%s4720_s9 + $0x1b8] sm:$0xff] }
 0x208   :  { %2400 = vmatpush1.bf16.msra.mxu1 %v2399_v43  ;;  %v2429_v43 = vpack.c.bf16 %v880_v40, %v876_v38  ;;  %v4468_v40 = vpack.c.bf16 %v1100_v13, %v1096_v37 }
 0x209   :  { %2402 = vmatprep.subr.bf16.mxu1 %v2401_v44  ;;  %v875_v44 = vld [vmem:[%s4719_s8 + $0x3d0] sm:$0xff] }
 0x20a   :  { %v2431_v49 = vpack.c.bf16 %v879_v47, %v875_v44  ;;  %v1104_v44 = vld [vmem:[%s4720_s9 + $0x1d8] sm:$0xff] }
 0x20b   :  { %v1108_v47 = vld [vmem:[%s4720_s9 + $0x1f8] sm:$0xff] }
 0x20c   :  { %2404 = vmatpush1.bf16.msra.mxu1 %v2403_v53  ;;  %v1047_v53 = vld [vmem:[%s4720_s9 + $0x10] sm:$0xff] }
 0x20d   :  { %2406 = vmatprep.subr.bf16.mxu1 %v2405_v55  ;;  %v1051_v55 = vld [vmem:[%s4720_s9 + $0x30] sm:$0xff] }
 0x20e   :  { %v4373_v59 = vpack.c.bf16 %v1051_v55, %v1047_v53  ;;  %v1107_v53 = vld [vmem:[%s4720_s9 + $0x1f0] sm:$0xff] }
 0x210   :  { %2408 = vmatpush1.bf16.msra.mxu1 %v2407_v62  ;;  %v1055_v62 = vld [vmem:[%s4720_s9 + $0x50] sm:$0xff] }
 0x211   :  { %2410 = vmatprep.subr.bf16.mxu1 %v2409_v2  ;;  %v1059_v2 = vld [vmem:[%s4720_s9 + $0x70] sm:$0xff] }
 0x212   :  { %v4392_v32 = vpack.c.bf16 %v1059_v2, %v1055_v62  ;;  %v881_v2 = vld [vmem:[%s4721_s10] sm:$0xf] }
 0x214   :  { %2412 = vmatpush1.bf16.msra.mxu1 %v2411_v7  ;;  %v1063_v7 = vld [vmem:[%s4720_s9 + $0x90] sm:$0xff] }
 0x215   :  { %2414 = vmatprep.subr.bf16.mxu1 %v2413_v8  ;;  %v1067_v8 = vld [vmem:[%s4720_s9 + $0xb0] sm:$0xff] }
 0x216   :  { %v4411_v11 = vpack.c.bf16 %v1067_v8, %v1063_v7  ;;  %v890_v7 = vrot.slane %v881_v2, %v4124_v1  ;;  %v886_v8 = vrot.slane %v881_v2, %v4130_v3 }
 0x218   :  { %2416 = vmatpush1.bf16.msra.mxu1 %v2415_v15  ;;  %v1071_v15 = vld [vmem:[%s4720_s9 + $0xd0] sm:$0xff] }
 0x219   :  { %2418 = vmatprep.subr.bf16.mxu1 %v2417_v17  ;;  %v1075_v17 = vld [vmem:[%s4720_s9 + $0xf0] sm:$0xff] }
 0x21a   :  { %v4429_v21 = vpack.c.bf16 %v1075_v17, %v1071_v15 }
 0x21c   :  { %2420 = vmatpush1.bf16.msra.mxu1 %v2419_v24  ;;  %v1079_v24 = vld [vmem:[%s4720_s9 + $0x110] sm:$0xff] }
 0x21d   :  { %2422 = vmatprep.subr.bf16.mxu1 %v2421_v26  ;;  %v1083_v26 = vld [vmem:[%s4720_s9 + $0x130] sm:$0xff] }
 0x21e   :  { %v4447_v31 = vpack.c.bf16 %v1083_v26, %v1079_v24  ;;  %v893_v24 = vsub.s32 2, %v4120_v0  ;;  %v897_v26 = vsub.s32 3, %v4120_v0 }
 0x220   :  { %2424 = vmatpush1.bf16.msra.mxu1 %v2423_v35  ;;  %v1087_v35 = vld [vmem:[%s4720_s9 + $0x150] sm:$0xff]  ;;  %v894_v30 = vrot.slane %v881_v2, %v893_v24  ;;  %v898_v3 = vrot.slane %v881_v2, %v897_v26 }
 0x221   :  { %2426 = vmatprep.subr.bf16.mxu1 %v2425_v12  ;;  %v1091_v12 = vld [vmem:[%s4720_s9 + $0x170] sm:$0xff] }
 0x222   :  { %v4465_v38 = vpack.c.bf16 %v1091_v12, %v1087_v35 }
 0x224   :  { %2428 = vmatpush1.bf16.msra.mxu1 %v2427_v41  ;;  %v1095_v41 = vld [vmem:[%s4720_s9 + $0x190] sm:$0xff] }
 0x225   :  { %2430 = vmatprep.subr.bf16.mxu1 %v2429_v43  ;;  %v1099_v43 = vld [vmem:[%s4720_s9 + $0x1b0] sm:$0xff] }
 0x228   :  { %2432 = vmatpush1.bf16.msra.mxu1 %v2431_v49  ;;  %v4483_v49 = vpack.c.bf16 %v1099_v43, %v1095_v41 }
 0x229   :  { %2434 = vmatprep.subr.bf16.mxu1 %v3981_v16 }
 0x22b   :  { %1039 = vmatmul.mubr.f32.vlgmr.msra.gmra.mrb[4].mxu1 %v4158_v46  ;;  %v1048_v46 = vld [vmem:[%s4720_s9 + $0x18] sm:$0xff] }
 0x22c   :  { %2436 = vmatpush1.bf16.msra.mxu1 %v3989_v19  ;;  %1173 = vmatprep.mubr.f32.mxu1 %v2854_v28  ;;  %v4358_v52 = vpack.c.bf16 %v1052_v50, %v1048_v46  ;;  %v4486_v46 = vpack.c.bf16 %v1108_v47, %v1104_v44  ;;  %v1103_v50 = vld [vmem:[%s4720_s9 + $0x1d0] sm:$0xff] }
 0x22d   :  { %2438 = vmatprep.subr.bf16.mxu1 %v3999_v22  ;;  %v4495_v55 = vpack.c.bf16 %v1107_v53, %v1103_v50 }
 0x230   :  { %2440 = vmatpush1.bf16.msra.mxu1 %v4007_v25 }
 0x231   :  { %2442 = vmatprep.subr.bf16.mxu1 %v4017_v29 }
 0x234   :  { %2444 = vmatpush1.bf16.msra.mxu1 %v4025_v33 }
 0x235   :  { %2446 = vmatprep.subr.bf16.mxu1 %v4035_v36 }
 0x238   :  { %2448 = vmatpush1.bf16.msra.mxu1 %v4043_v39 }
 0x239   :  { %2450 = vmatprep.subr.bf16.mxu1 %v4053_v42 }
 0x23c   :  { %2452 = vmatpush1.bf16.msra.mxu1 %v4061_v45 }
 0x23d   :  { %2454 = vmatprep.subr.bf16.mxu1 %v4071_v48 }
 0x240   :  { %2456 = vmatpush1.bf16.msra.mxu1 %v4079_v51 }
 0x241   :  { %2458 = vmatprep.subr.bf16.mxu1 %v4089_v54 }
 0x244   :  { %2460 = vmatpush1.bf16.msra.mxu1 %v4097_v57 }
 0x245   :  { %2462 = vmatprep.subr.bf16.mxu1 %v4107_v60 }
 0x248   :  { %2464 = vmatpush1.bf16.msra.mxu1 %v4115_v63 }
 0x249   :  { %2466 = vmatprep.subr.bf16.mxu1 %v4358_v52 }
 0x24b   :  { %1174 = vmatmul.mubr.f32.vlgmr.msra.gmra.mrb[6].mxu1 %v2854_v28 }
 0x24c   :  { %2468 = vmatpush1.bf16.msra.mxu1 %v4373_v59  ;;  %1244 = vmatprep.mubr.f32.mxu1 %v2854_v28 }
 0x24d   :  { %2470 = vmatprep.subr.bf16.mxu1 %v4376_v61 }
 0x250   :  { %2472 = vmatpush1.bf16.msra.mxu1 %v4392_v32 }
 0x251   :  { %2474 = vmatprep.subr.bf16.mxu1 %v4396_v6 }
 0x254   :  { %2476 = vmatpush1.bf16.msra.mxu1 %v4411_v11 }
 0x255   :  { %2478 = vmatprep.subr.bf16.mxu1 %v4414_v14 }
 0x258   :  { %2480 = vmatpush1.bf16.msra.mxu1 %v4429_v21 }
 0x259   :  { %2482 = vmatprep.subr.bf16.mxu1 %v4432_v23 }
 0x25c   :  { %2484 = vmatpush1.bf16.msra.mxu1 %v4447_v31 }
 0x25d   :  { %2486 = vmatprep.subr.bf16.mxu1 %v4450_v34 }
 0x260   :  { %2488 = vmatpush1.bf16.msra.mxu1 %v4465_v38 }
 0x261   :  { %2490 = vmatprep.subr.bf16.mxu1 %v4468_v40 }
 0x264   :  { %2492 = vmatpush1.bf16.msra.mxu1 %v4483_v49 }
 0x265   :  { %2494 = vmatprep.subr.bf16.mxu1 %v4486_v46 }
 0x268   :  { %2496 = vmatpush1.bf16.msra.mxu1 %v4495_v55 }
 0x269   :  { %2498 = vmatprep.subr.bf16.mxu1 %v3981_v16 }
 0x26b   :  { %1245 = vmatmul.mubr.f32.vlgmr.msra.gmra.mrb[8].mxu1 %v2854_v28 }
 0x26c   :  { %2500 = vmatpush1.bf16.msra.mxu1 %v3989_v19  ;;  %1343 = vmatprep.mubr.f32.mxu1 %v2854_v28 }
 0x26d   :  { %2502 = vmatprep.subr.bf16.mxu1 %v3999_v22 }
 0x270   :  { %2504 = vmatpush1.bf16.msra.mxu1 %v4007_v25 }
 0x271   :  { %2506 = vmatprep.subr.bf16.mxu1 %v4017_v29 }
 0x274   :  { %2508 = vmatpush1.bf16.msra.mxu1 %v4025_v33 }
 0x275   :  { %2510 = vmatprep.subr.bf16.mxu1 %v4035_v36 }
 0x278   :  { %2512 = vmatpush1.bf16.msra.mxu1 %v4043_v39 }
 0x279   :  { %2514 = vmatprep.subr.bf16.mxu1 %v4053_v42 }
 0x27c   :  { %2516 = vmatpush1.bf16.msra.mxu1 %v4061_v45 }
 0x27d   :  { %2518 = vmatprep.subr.bf16.mxu1 %v4071_v48 }
 0x280   :  { %2520 = vmatpush1.bf16.msra.mxu1 %v4079_v51 }
 0x281   :  { %2522 = vmatprep.subr.bf16.mxu1 %v4089_v54 }
 0x284   :  { %2524 = vmatpush1.bf16.msra.mxu1 %v4097_v57 }
 0x285   :  { %2526 = vmatprep.subr.bf16.mxu1 %v4107_v60 }
 0x288   :  { %2528 = vmatpush1.bf16.msra.mxu1 %v4115_v63 }
 0x289   :  { %2530 = vmatprep.subr.bf16.mxu1 %v4358_v52 }
 0x2be   :  { %v969_v16 = vpop.f32.mrb[2].mxu1 }
 0x2bf   :  { %v971_v56 = vpop.f32.mrb[3].mxu1  ;;  %v4525_v10 = vadd.f32 %v969_v16, %v886_v8 }
 0x2c0   :  { %v4523_v9 = vadd.f32 %v971_v56, %v890_v7 }
 0x2fe   :  { %v1040_v58 = vpop.f32.mrb[4].mxu1 }
 0x2ff   :  { %v1042_v62 = vpop.f32.mrb[5].mxu1  ;;  %v4531_v37 = vadd.f32 %v1040_v58, %v894_v30 }
 0x300   :  { %v4533_v13 = vadd.f32 %v1042_v62, %v898_v3 }
 0x31e   :  { %v1175_v4 = vpop.f32.mrb[6].mxu1 }
 0x31f   :  { %v1177_v5 = vpop.f32.mrb[7].mxu1  ;;  %v1251_v17 = vadd.f32 %v1175_v4, %v4525_v10 }
 0x320   :  { %v1252_v15 = vadd.f32 %v1177_v5, %v4523_v9 }
 0x321   :  { %v1971_v20 = vmul.f32 -1.442695, %v1251_v17 }
 0x322   :  { %v1972_v18 = vmul.f32 -1.442695, %v1252_v15 }
 0x324   :  { %2741 = vpow2.f32 %v1972_v18 }
 0x325   :  { %2743 = vpow2.f32 %v1971_v20 }
 0x32e   :  { %v2742_v27 = vpop.eup %2741 }
 0x32f   :  { %v2744_v1 = vpop.eup %2743  ;;  %v1264_v35 = vadd.f32 1.0, %v2742_v27 }
 0x330   :  { %v1258_v12 = vadd.f32 1.0, %v2744_v1 }
 0x331   :  { %2745 = vrcp.f32 %v1264_v35 }
 0x332   :  { %2747 = vrcp.f32 %v1258_v12 }
 0x33b   :  { %v2746_v50 = vpop.eup %2745 }
 0x33c   :  { %v2748_v53 = vpop.eup %2747  ;;  %v1274_v56 = vmul.f32 0.0, %v2746_v50 }
 0x33e   :  { %v1246_v41 = vpop.f32.mrb[8].mxu1 }
 0x33f   :  { %v1253_v43 = vadd.f32 %v1246_v41, %v4531_v37  ;;  %v1248_v44 = vpop.f32.mrb[9].mxu1 }
 0x340   :  { %v1254_v47 = vadd.f32 %v1248_v44, %v4533_v13 }
 0x341   :  { %2749 = vtanh.f32 %v1253_v43 }
 0x342   :  { %v1973_v0 = vmul.f32 -1.442695, %v1254_v47 }
 0x344   :  { %2751 = vpow2.f32 %v1973_v0 }
 0x34b   :  { %v2750_v16 = vpop.eup %2749 }
 0x34c   :  { %v1275_v2 = vmul.f32 %v2750_v16, %v2748_v53 }
 0x34e   :  { %v2752_v58 = vpop.eup %2751  ;;  %v1276_v4 = vadd.f32 %v1275_v2, %v1274_v56 }
 0x34f   :  { %v1271_v62 = vadd.f32 1.0, %v2752_v58 }
 0x350   :  { %2753 = vtanh.f32 %v1276_v4  ;;  %v1457_v12 = vrot.slane %v1276_v4, 6 }
 0x351   :  { %2755 = vrcp.f32 %v1271_v62 }
 0x35a   :  { %v2754_v5 = vpop.eup %2753 }
 0x35b   :  { %v2756_v7 = vpop.eup %2755 }
 0x35c   :  { %v4537_v8 = vmul.f32 %v2756_v7, %v2754_v5 }
 0x35e   :  { %1344 = vmatmul.mubr.f32.vlgmr.msra.gmra.mrb[10].mxu1 %v4537_v8 }
 0x35f   :  { %2532 = vmatpush1.bf16.msra.mxu1 %v4373_v59  ;;  %1414 = vmatprep.mubr.f32.mxu1 %v2854_v28 }
 0x360   :  { %2534 = vmatprep.subr.bf16.mxu1 %v4376_v61 }
 0x363   :  { %2536 = vmatpush1.bf16.msra.mxu1 %v4392_v32 }
 0x364   :  { %2538 = vmatprep.subr.bf16.mxu1 %v4396_v6 }
 0x367   :  { %2540 = vmatpush1.bf16.msra.mxu1 %v4411_v11 }
 0x368   :  { %2542 = vmatprep.subr.bf16.mxu1 %v4414_v14 }
 0x36b   :  { %2544 = vmatpush1.bf16.msra.mxu1 %v4429_v21 }
 0x36c   :  { %2546 = vmatprep.subr.bf16.mxu1 %v4432_v23 }
 0x36f   :  { %2548 = vmatpush1.bf16.msra.mxu1 %v4447_v31 }
 0x370   :  { %2550 = vmatprep.subr.bf16.mxu1 %v4450_v34 }
 0x373   :  { %2552 = vmatpush1.bf16.msra.mxu1 %v4465_v38 }
 0x374   :  { %2554 = vmatprep.subr.bf16.mxu1 %v4468_v40 }
 0x377   :  { %2556 = vmatpush1.bf16.msra.mxu1 %v4483_v49 }
 0x378   :  { %2558 = vmatprep.subr.bf16.mxu1 %v4486_v46 }
 0x37b   :  { %2560 = vmatpush1.bf16.msra.mxu1 %v4495_v55 }
 0x37c   :  { %2594 = vmatprep.subr.bf16.mxu1 %v4358_v52 }
 0x37e   :  { %1415 = vmatmul.mubr.f32.vlgmr.msra.gmra.mrb[12].mxu1 %v4537_v8 }
 0x37f   :  { %2596 = vmatpush1.bf16.msra.mxu1 %v4373_v59  ;;  %1602 = vmatprep.mubr.f32.mxu1 %v2854_v28 }
 0x380   :  { %2598 = vmatprep.subr.bf16.mxu1 %v4376_v61 }
 0x383   :  { %2600 = vmatpush1.bf16.msra.mxu1 %v4392_v32 }
 0x384   :  { %2602 = vmatprep.subr.bf16.mxu1 %v4396_v6 }
 0x387   :  { %2604 = vmatpush1.bf16.msra.mxu1 %v4411_v11 }
 0x388   :  { %2606 = vmatprep.subr.bf16.mxu1 %v4414_v14 }
 0x38b   :  { %2608 = vmatpush1.bf16.msra.mxu1 %v4429_v21 }
 0x38c   :  { %2610 = vmatprep.subr.bf16.mxu1 %v4432_v23 }
 0x38f   :  { %2612 = vmatpush1.bf16.msra.mxu1 %v4447_v31 }
 0x390   :  { %2614 = vmatprep.subr.bf16.mxu1 %v4450_v34 }
 0x393   :  { %2616 = vmatpush1.bf16.msra.mxu1 %v4465_v38 }
 0x394   :  { %2618 = vmatprep.subr.bf16.mxu1 %v4468_v40 }
 0x397   :  { %2620 = vmatpush1.bf16.msra.mxu1 %v4483_v49 }
 0x398   :  { %2622 = vmatprep.subr.bf16.mxu1 %v4486_v46 }
 0x39b   :  { %2624 = vmatpush1.bf16.msra.mxu1 %v4495_v55 }
 0x39c   :  { %2658 = vmatprep.subr.bf16.mxu1 %v4358_v52 }
 0x431   :  { %v1345_v15 = vpop.f32.mrb[10].mxu1 }
 0x432   :  { %v1347_v17 = vpop.f32.mrb[11].mxu1  ;;  %v1425_v26 = vrot.slane %v1345_v15, 6 }
 0x433   :  { %v1426_v18 = vrot.slane %v1347_v17, 6 }
 0x434   :  { %v1433_v27 = vadd.f32 %v1425_v26, %v4525_v10 }
 0x435   :  { %v1434_v20 = vadd.f32 %v1426_v18, %v4523_v9 }
 0x436   :  { %v1974_v1 = vmul.f32 -1.442695, %v1433_v27 }
 0x437   :  { %v1975_v24 = vmul.f32 -1.442695, %v1434_v20 }
 0x439   :  { %2757 = vpow2.f32 %v1975_v24 }
 0x43a   :  { %2759 = vpow2.f32 %v1974_v1 }
 0x443   :  { %v2758_v30 = vpop.eup %2757 }
 0x444   :  { %v1446_v3 = vadd.f32 1.0, %v2758_v30  ;;  %v2760_v35 = vpop.eup %2759  ;;  %v1846_v30 = vld [vmem:[%s4722_s11] sm:$0xff] }
 0x445   :  { %v1440_v43 = vadd.f32 1.0, %v2760_v35 }
 0x446   :  { %2761 = vrcp.f32 %v1446_v3  ;;  %v1847_v3 = vld [vmem:[%s4722_s11 + $0x8] sm:$0xff] }
 0x447   :  { %2763 = vrcp.f32 %v1440_v43  ;;  %v2690_v35 = vpack.c.bf16 %v1847_v3, %v1846_v30 }
 0x450   :  { %v2762_v41 = vpop.eup %2761 }
 0x451   :  { %v1459_v52 = vmul.f32 %v2762_v41, %v1457_v12  ;;  %v1416_v44 = vpop.f32.mrb[12].mxu1  ;;  %v2764_v2 = vpop.eup %2763  ;;  %v2856_v12 = vmov 0.0|0.0   ;;  %v1849_v41 = vld [vmem:[%s4722_s11 + $0x18] sm:$0xff] }
 0x452   :  { %v1427_v47 = vrot.slane %v1416_v44, 6  ;;  %v1418_v0 = vpop.f32.mrb[13].mxu1  ;;  %v1851_v44 = vld [vmem:[%s4722_s11 + $0x28] sm:$0xff] }
 0x453   :  { %v1428_v50 = vrot.slane %v1418_v0, 6  ;;  %v1852_v0 = vld [vmem:[%s4722_s11 + $0x30] sm:$0xff] }
 0x454   :  { %v1435_v53 = vadd.f32 %v1427_v47, %v4531_v37 }
 0x455   :  { %v1436_v16 = vadd.f32 %v1428_v50, %v4533_v13  ;;  %v1853_v50 = vld [vmem:[%s4722_s11 + $0x38] sm:$0xff] }
 0x456   :  { %2765 = vtanh.f32 %v1435_v53  ;;  %v2699_v53 = vpack.c.bf16 %v1853_v50, %v1852_v0 }
 0x457   :  { %v1976_v56 = vmul.f32 -1.442695, %v1436_v16  ;;  %v1854_v16 = vld [vmem:[%s4722_s11 + $0x40] sm:$0xff] }
 0x459   :  { %2767 = vpow2.f32 %v1976_v56  ;;  %v1855_v56 = vld [vmem:[%s4722_s11 + $0x48] sm:$0xff] }
 0x460   :  { %v2766_v58 = vpop.eup %2765 }
 0x461   :  { %v1460_v62 = vmul.f32 %v2766_v58, %v2764_v2  ;;  %v2702_v2 = vpack.c.bf16 %v1855_v56, %v1854_v16  ;;  %v1856_v58 = vld [vmem:[%s4722_s11 + $0x50] sm:$0xff] }
 0x463   :  { %v2768_v5 = vpop.eup %2767  ;;  %v4579_v4 = vadd.f32 %v1460_v62, %v1459_v52  ;;  %v1850_v52 = vld [vmem:[%s4722_s11 + $0x20] sm:$0xff]  ;;  %v1857_v62 = vld [vmem:[%s4722_s11 + $0x58] sm:$0xff] }
 0x464   :  { %v1453_v7 = vadd.f32 1.0, %v2768_v5  ;;  %v2696_v47 = vpack.c.bf16 %v1851_v44, %v1850_v52  ;;  %v2705_v5 = vpack.c.bf16 %v1857_v62, %v1856_v58 }
 0x465   :  { %2769 = vtanh.f32 %v4579_v4 }
 0x466   :  { %2771 = vrcp.f32 %v1453_v7  ;;  %v1859_v7 = vld [vmem:[%s4722_s11 + $0x68] sm:$0xff] }
 0x46f   :  { %v2770_v15 = vpop.eup %2769 }
 0x470   :  { %v2772_v17 = vpop.eup %2771 }
 0x471   :  { %v4582_v18 = vmul.f32 %v2772_v17, %v2770_v15  ;;  %v1860_v17 = vld [vmem:[%s4722_s11 + $0x70] sm:$0xff] }
 0x473   :  { %v1465_v20 = vrot.slane %v4582_v18, 2  ;;  %v1841_v26 = vsel %vm1840_vm5, %v4537_v8, %v4582_v18  ;;  %v1848_v8 = vld [vmem:[%s4722_s11 + $0x10] sm:$0xff]  ;;  %v1861_v18 = vld [vmem:[%s4722_s11 + $0x78] sm:$0xff] }
 0x474   :  { %v2693_v43 = vpack.c.bf16 %v1849_v41, %v1848_v8 }
 0x475   :  { %1532 = vmatmul.mubr.f32.vlgmr.msra.gmra.mrb[2].mxu0 %v1465_v20  ;;  %1603 = vmatmul.mubr.f32.vlgmr.msra.gmra.mrb[14].mxu1 %v1465_v20  ;;  %v2711_v20 = vpack.c.bf16 %v1861_v18, %v1860_v17 }
 0x476   :  { %2628 = vmatpush1.bf16.msra.mxu0 %v3989_v19  ;;  %2660 = vmatpush1.bf16.msra.mxu1 %v4373_v59 }
 0x477   :  { %2630 = vmatprep.subr.bf16.mxu0 %v3999_v22  ;;  %2662 = vmatprep.subr.bf16.mxu1 %v4376_v61 }
 0x478   :  { %1719 = vmatprep.mubr.f32.mxu0 %v2854_v28  ;;  %1790 = vmatprep.mubr.f32.mxu1 %v2854_v28 }
 0x47a   :  { %2632 = vmatpush1.bf16.msra.mxu0 %v4007_v25  ;;  %2664 = vmatpush1.bf16.msra.mxu1 %v4392_v32 }
 0x47b   :  { %2634 = vmatprep.subr.bf16.mxu0 %v4017_v29  ;;  %2666 = vmatprep.subr.bf16.mxu1 %v4396_v6 }
 0x47e   :  { %2636 = vmatpush1.bf16.msra.mxu0 %v4025_v33  ;;  %2668 = vmatpush1.bf16.msra.mxu1 %v4411_v11 }
 0x47f   :  { %2638 = vmatprep.subr.bf16.mxu0 %v4035_v36  ;;  %2670 = vmatprep.subr.bf16.mxu1 %v4414_v14 }
 0x482   :  { %2640 = vmatpush1.bf16.msra.mxu0 %v4043_v39  ;;  %2672 = vmatpush1.bf16.msra.mxu1 %v4429_v21 }
 0x483   :  { %2642 = vmatprep.subr.bf16.mxu0 %v4053_v42  ;;  %2674 = vmatprep.subr.bf16.mxu1 %v4432_v23  ;;  %v1645_v23 = vrot.slane %v4579_v4, 6  ;;  %v1858_v4 = vld [vmem:[%s4722_s11 + $0x60] sm:$0xff]  ;;  %s2858_s11 = smov [#allocation2]  }
 0x484   :  { %v2708_v15 = vpack.c.bf16 %v1859_v7, %v1858_v4  ;;  %s1943_s28 = sshll.u32 %s2858_s11, 4  ;;  %s1944_s28 = int_to_ptr.vmem [resolvable:$true] %s1943_s28 }
 0x485   :  { %s2805_s6 = scalar_lea.vmem %s1944_s28, 32  ;;  %p2810_p1 = scmp.lt.s32.totalorder %s1944_s28, %s1944_s28 }
 0x486   :  { %2644 = vmatpush1.bf16.msra.mxu0 %v4061_v45  ;;  %2676 = vmatpush1.bf16.msra.mxu1 %v4447_v31  ;;  %p2806_p0 = scmp.ne.s32.totalorder %s1944_s28, %s2805_s6  ;;  %p2811_p2 = scmp.lt.s32.totalorder %s2805_s6, %s2805_s6 }
 0x487   :  { %2646 = vmatprep.subr.bf16.mxu0 %v4071_v48  ;;  %2678 = vmatprep.subr.bf16.mxu1 %v4450_v34 }
 0x488   :  { %p2812_p3 = por %p2811_p2, %p2810_p1 }
 0x48a   :  { %2648 = vmatpush1.bf16.msra.mxu0 %v4079_v51  ;;  %2680 = vmatpush1.bf16.msra.mxu1 %v4465_v38  ;;  %p2813_p4 = pnand %p2812_p3, %p2806_p0 }
 0x48b   :  { %2650 = vmatprep.subr.bf16.mxu0 %v4089_v54  ;;  %2682 = vmatprep.subr.bf16.mxu1 %v4468_v40 }
 0x48e   :  { %2652 = vmatpush1.bf16.msra.mxu0 %v4097_v57  ;;  %2684 = vmatpush1.bf16.msra.mxu1 %v4483_v49 }
 0x48f   :  { %2654 = vmatprep.subr.bf16.mxu0 %v4107_v60  ;;  %2686 = vmatprep.subr.bf16.mxu1 %v4486_v46 }
 0x492   :  { %2656 = vmatpush1.bf16.msra.mxu0 %v4115_v63  ;;  %2688 = vmatpush1.bf16.msra.mxu1 %v4495_v55 }
 0x493   :  { %2689 = vmatprep.subr.bf16.mxu0 %v2856_v12 }
 0x548   :  { %v1533_v19 = vpop.f32.mrb[2].mxu0  ;;  %v1604_v22 = vpop.f32.mrb[14].mxu1 }
 0x549   :  { %v1613_v25 = vrot.slane %v1533_v19, 4  ;;  %v1535_v29 = vpop.f32.mrb[3].mxu0  ;;  %v1606_v33 = vpop.f32.mrb[15].mxu1  ;;  %v1615_v57 = vrot.slane %v1604_v22, 4 }
 0x54a   :  { %v1614_v36 = vrot.slane %v1535_v29, 4  ;;  %v1616_v51 = vrot.slane %v1606_v33, 4 }
 0x54b   :  { %v1621_v39 = vadd.f32 %v1613_v25, %v4525_v10  ;;  %v1623_v63 = vadd.f32 %v1615_v57, %v4531_v37 }
 0x54c   :  { %v1622_v42 = vadd.f32 %v1614_v36, %v4523_v9  ;;  %v1624_v54 = vadd.f32 %v1616_v51, %v4533_v13 }
 0x54d   :  { %v1977_v45 = vmul.f32 -1.442695, %v1621_v39 }
 0x54e   :  { %v1978_v48 = vmul.f32 -1.442695, %v1622_v42  ;;  %v1979_v60 = vmul.f32 -1.442695, %v1624_v54 }
 0x54f   :  { %2773 = vpow2.f32 %v1977_v45 }
 0x550   :  { %2775 = vpow2.f32 %v1978_v48 }
 0x551   :  { %2777 = vpow2.f32 %v1979_v60 }
 0x552   :  { %2779 = vtanh.f32 %v1623_v63 }
 0x559   :  { %v2774_v59 = vpop.eup %2773 }
 0x55a   :  { %v2776_v61 = vpop.eup %2775  ;;  %v1628_v32 = vadd.f32 1.0, %v2774_v59 }
 0x55b   :  { %v1634_v6 = vadd.f32 1.0, %v2776_v61  ;;  %v2778_v11 = vpop.eup %2777 }
 0x55c   :  { %2781 = vrcp.f32 %v1628_v32  ;;  %v2780_v14 = vpop.eup %2779  ;;  %v1641_v38 = vadd.f32 1.0, %v2778_v11 }
 0x55d   :  { %2783 = vrcp.f32 %v1634_v6 }
 0x55e   :  { %2785 = vrcp.f32 %v1641_v38 }
 0x566   :  { %v2782_v21 = vpop.eup %2781 }
 0x567   :  { %v2784_v31 = vpop.eup %2783  ;;  %v1648_v34 = vmul.f32 %v2782_v21, %v2780_v14 }
 0x568   :  { %v1647_v40 = vmul.f32 %v2784_v31, %v1645_v23  ;;  %v2786_v46 = vpop.eup %2785 }
 0x56a   :  { %v4622_v49 = vadd.f32 %v1648_v34, %v1647_v40 }
 0x56c   :  { %2787 = vtanh.f32 %v4622_v49  ;;  %v1833_v11 = vrot.slane %v4622_v49, 6 }
 0x576   :  { %v2788_v55 = vpop.eup %2787 }
 0x577   :  { %v1651_v24 = vmul.f32 %v2788_v55, %v2786_v46 }
 0x579   :  { %v1653_v27 = vrot.slane %v1651_v24, 4  ;;  %v4627_v1 = vsel %vm1842_vm6, %v1841_v26, %v1651_v24 }
 0x57b   :  { %1720 = vmatmul.mubr.f32.vlgmr.msra.gmra.mrb[4].mxu0 %v1653_v27  ;;  %1791 = vmatmul.mubr.f32.vlgmr.msra.gmra.mrb[16].mxu1 %v1653_v27 }
 0x57c   :  { %2691 = vmatpush3.bf16.msra.mxu0 %v2690_v35  ;;  %2032 = vmatprep.mubr.msk.f32.mxu0 %vm2857_vm7, %v2854_v28 }
 0x57d   :  { %2692 = vmatprep.subr.bf16.mxu0 %v2856_v12 }
 0x580   :  { %2694 = vmatpush3.bf16.msra.mxu0 %v2693_v43 }
 0x581   :  { %2695 = vmatprep.subr.bf16.mxu0 %v2856_v12 }
 0x584   :  { %2697 = vmatpush3.bf16.msra.mxu0 %v2696_v47 }
 0x585   :  { %2698 = vmatprep.subr.bf16.mxu0 %v2856_v12 }
 0x588   :  { %2700 = vmatpush3.bf16.msra.mxu0 %v2699_v53 }
 0x589   :  { %2701 = vmatprep.subr.bf16.mxu0 %v2856_v12 }
 0x58c   :  { %2703 = vmatpush3.bf16.msra.mxu0 %v2702_v2 }
 0x58d   :  { %2704 = vmatprep.subr.bf16.mxu0 %v2856_v12 }
 0x590   :  { %2706 = vmatpush3.bf16.msra.mxu0 %v2705_v5 }
 0x591   :  { %2707 = vmatprep.subr.bf16.mxu0 %v2856_v12 }
 0x594   :  { %2709 = vmatpush3.bf16.msra.mxu0 %v2708_v15 }
 0x595   :  { %2710 = vmatprep.subr.bf16.mxu0 %v2856_v12 }
 0x598   :  { %2712 = vmatpush3.bf16.msra.mxu0 %v2711_v20 }
 0x64e   :  { %v1721_v19 = vpop.f32.mrb[4].mxu0  ;;  %v1792_v22 = vpop.f32.mrb[16].mxu1 }
 0x64f   :  { %v1801_v25 = vrot.slane %v1721_v19, 2  ;;  %v1723_v29 = vpop.f32.mrb[5].mxu0  ;;  %v1794_v28 = vpop.f32.mrb[17].mxu1  ;;  %v1803_v54 = vrot.slane %v1792_v22, 2 }
 0x650   :  { %v1802_v33 = vrot.slane %v1723_v29, 2  ;;  %v1804_v48 = vrot.slane %v1794_v28, 2 }
 0x651   :  { %v1809_v36 = vadd.f32 %v1801_v25, %v4525_v10  ;;  %v1811_v60 = vadd.f32 %v1803_v54, %v4531_v37 }
 0x652   :  { %v1810_v39 = vadd.f32 %v1802_v33, %v4523_v9  ;;  %v1812_v51 = vadd.f32 %v1804_v48, %v4533_v13 }
 0x653   :  { %v1980_v42 = vmul.f32 -1.442695, %v1809_v36 }
 0x654   :  { %v1981_v45 = vmul.f32 -1.442695, %v1810_v39  ;;  %v1982_v57 = vmul.f32 -1.442695, %v1812_v51 }
 0x655   :  { %2789 = vpow2.f32 %v1980_v42 }
 0x656   :  { %2791 = vpow2.f32 %v1981_v45 }
 0x657   :  { %2793 = vpow2.f32 %v1982_v57 }
 0x658   :  { %2795 = vtanh.f32 %v1811_v60 }
 0x65f   :  { %v2790_v63 = vpop.eup %2789 }
 0x660   :  { %v2792_v59 = vpop.eup %2791  ;;  %v1816_v61 = vadd.f32 1.0, %v2790_v63 }
 0x661   :  { %v1822_v32 = vadd.f32 1.0, %v2792_v59  ;;  %v2794_v9 = vpop.eup %2793 }
 0x662   :  { %2797 = vrcp.f32 %v1816_v61  ;;  %v2796_v10 = vpop.eup %2795  ;;  %v1829_v13 = vadd.f32 1.0, %v2794_v9 }
 0x663   :  { %2799 = vrcp.f32 %v1822_v32 }
 0x664   :  { %2801 = vrcp.f32 %v1829_v13 }
 0x66c   :  { %v2798_v6 = vpop.eup %2797 }
 0x66d   :  { %v2800_v14 = vpop.eup %2799  ;;  %v1836_v21 = vmul.f32 %v2798_v6, %v2796_v10 }
 0x66e   :  { %v1835_v23 = vmul.f32 %v2800_v14, %v1833_v11  ;;  %v2802_v37 = vpop.eup %2801 }
 0x670   :  { %v1837_v31 = vadd.f32 %v1836_v21, %v1835_v23 }
 0x672   :  { %1934 = vst [vmem:[#allocation4 - $0x6] sm:$0xc0] %v1837_v31  ;;  %2803 = vtanh.f32 %v1837_v31 }
 0x67c   :  { %v2804_v34 = vpop.eup %2803 }
 0x67d   :  { %v1839_v38 = vmul.f32 %v2804_v34, %v2802_v37 }
 0x67f   :  { %v1845_v40 = vsel %vm1844_vm8, %v4627_v1, %v1839_v38  ;;  %1933 = vst [vmem:[#allocation2 - $0x6] sm:$0xc0] %v1839_v38 }
 0x680   :  { %2033 = vmatmul.mubr.f32.vlgmr.msra.gmra.mrb[6].mxu0 %v1845_v40 }
 0x681   :  { %2816 = shalt.err (!%p2813_p4)
}
 0x682   :  { %s2817_s8 = scalar_lea.hbm %s4724_s13, 32 }
 0x683   :  { %p2818_p5 = scmp.ne.s32.totalorder %s4724_s13, %s2817_s8  ;;  %p2821_p6 = scmp.lt.u32.totalorder %s2817_s8, %s4724_s13 }
 0x685   :  { %p2823_p7 = pnand %p2821_p6, %p2818_p5 }
 0x687   :  { %2826 = shalt.err (!%p2823_p7)
}
 0x688   :  { %1946 = dma.vmem_to_hbm [thread:$0]  %s1944_s28, 32, %s4724_s13, [#allocation3]  }
 0x689   :  { %s2827_s16 = scalar_lea.vmem %s1954_s2, 32  ;;  %p2832_p9 = scmp.lt.s32.totalorder %s1954_s2, %s1954_s2 }
 0x68a   :  { %p2828_p8 = scmp.ne.s32.totalorder %s1954_s2, %s2827_s16  ;;  %p2833_p10 = scmp.lt.s32.totalorder %s2827_s16, %s2827_s16 }
 0x68c   :  { %p2834_p11 = por %p2833_p10, %p2832_p9 }
 0x68e   :  { %p2835_p12 = pnand %p2834_p11, %p2828_p8 }
 0x690   :  { %2838 = shalt.err (!%p2835_p12)
}
 0x691   :  { %s2839_s19 = scalar_lea.hbm %s4725_s14, 32 }
 0x692   :  { %p2840_p13 = scmp.ne.s32.totalorder %s4725_s14, %s2839_s19  ;;  %p2843_p0 = scmp.lt.u32.totalorder %s2839_s19, %s4725_s14 }
 0x694   :  { %p2845_p1 = pnand %p2843_p0, %p2840_p13 }
 0x696   :  { %2848 = shalt.err (!%p2845_p1)
}
 0x697   :  { %1956 = dma.vmem_to_hbm [thread:$0]  %s1954_s2, 32, %s4725_s14, [#allocation5]  }
 0x753   :  { %v1928_v49 = vpop.f32.mrb[6].mxu0 }
 0x754   :  { %1932 = vst [vmem:[%s4723_s12] sm:$0xff] %v1928_v49  ;;  %v2034_v46 = vpop.f32.mrb[7].mxu0 }
 0x755   :  { %2849 = dma.done.wait [#allocation3], 32  }
 0x756   :  { %2850 = vsyncadd [#allocation3], 4294967264 }
 0x757   :  { %2851 = dma.done.wait [#allocation5], 32  }
 0x758   :  { %2852 = vsyncadd [#allocation5], 4294967264 }
 0x759   :  { %1965 = vsyncpa [#allocation3], 1 }
 0x75a   :  { %1966 = vsyncpa [#allocation5], 1 }

</bundles_post_ra>
